<compile_context>
chip_gen: v5e
topology: v5e:2x2
jax: 0.10.0
libtpu: 0.0.40
codegen_flags: <defaults>
</compile_context>

<pallas_src>
import functools

import jax
import jax.numpy as jnp
from jax.experimental import pallas as pl
from jax.experimental.pallas import tpu as pltpu

GROUPS = 32
EPS = 1e-5


def _resblock_kernel(*refs, H, W, has_res_conv):
    if has_res_conv:
        (x_ref,
         g1_ref, bt1_ref, m1cg_ref, m1gc_ref, w1_ref, b1_ref,
         g2_ref, bt2_ref, m2cg_ref, m2gc_ref, w2_ref, b2_ref,
         wr_ref, br_ref,
         o_ref, pad1_ref, pad2_ref) = refs
    else:
        (x_ref,
         g1_ref, bt1_ref, m1cg_ref, m1gc_ref, w1_ref, b1_ref,
         g2_ref, bt2_ref, m2cg_ref, m2gc_ref, w2_ref, b2_ref,
         o_ref, pad1_ref) = refs
        wr_ref = br_ref = None
        pad2_ref = pad1_ref            # Cin == Cout: both convs share one pad scratch

    HW = H * W
    base = W + 1                       # rows of top halo in the padded flat buffer

    x = x_ref[...]                     # (HW, Cin) f32

    # Column-wrap validity masks, generated in-kernel (no input array / DMA).
    col = jax.lax.broadcasted_iota(jnp.int32, (HW, 1), 0) % W
    left_ok = (col >= 1).astype(jnp.float32)        # neighbor at ow = -1 stays in-row
    right_ok = (col <= W - 2).astype(jnp.float32)   # neighbor at ow = +1 stays in-row

    # Zero ONLY the halo rows; the interior is fully overwritten by each conv and the
    # halos are never written again. Unconditional (cheap) so it is safe under megacore
    # sharding of the "parallel" batch axis.
    def zero_halo(pad_ref):
        z = jnp.zeros((base, pad_ref.shape[1]), pad_ref.dtype)
        pad_ref[0:base, :] = z
        pad_ref[base + HW:base + HW + base, :] = z

    zero_halo(pad1_ref)
    if has_res_conv:                   # shared buffer already zeroed otherwise
        zero_halo(pad2_ref)

    def groupnorm(h, gamma, beta, m_cg, m_gc):
        # h: (HW, C) f32.  Group reductions via tiny one-hot matmuls (stays 2-D).
        C = h.shape[1]
        inv_cnt = 1.0 / float(HW * (C // GROUPS))
        s = jnp.sum(h, axis=0, keepdims=True)                                   # (1, C)
        mean_g = jnp.dot(s, m_cg, preferred_element_type=jnp.float32) * inv_cnt  # (1, G)
        mean_c = jnp.dot(mean_g, m_gc, preferred_element_type=jnp.float32)       # (1, C)
        d = h - mean_c
        ss = jnp.sum(d * d, axis=0, keepdims=True)                               # (1, C)
        var_g = jnp.dot(ss, m_cg, preferred_element_type=jnp.float32) * inv_cnt  # (1, G)
        inv_g = jax.lax.rsqrt(var_g + EPS)
        inv_c = jnp.dot(inv_g, m_gc, preferred_element_type=jnp.float32)         # (1, C)
        return d * (inv_c * gamma) + beta

    def silu(h):
        # sigmoid(x) = 0.5*(tanh(x/2)+1): one EUP transcendental instead of exp + recip.
        return h * (0.5 * jnp.tanh(0.5 * h) + 0.5)

    def conv3x3(h, pad_ref, w_ref, bias):
        # h: (HW, Ci) f32; pad_ref: (HW + 2W + 2, Ci) f32 flat buffer (halos already zero).
        hb = h.astype(jnp.bfloat16)
        pad_ref[base:base + HW, :] = h

        def tap(oh, ow):
            start = base + oh * W + ow                       # static Python int
            patch = pad_ref[start:start + HW, :].astype(jnp.bfloat16)
            k = (oh + 1) * 3 + (ow + 1)
            return jnp.dot(patch, w_ref[k], preferred_element_type=jnp.float32)

        # Center tap (oh=0, ow=0) straight from registers; acc starts from it + bias.
        acc = jnp.dot(hb, w_ref[4], preferred_element_type=jnp.float32) + bias
        # ow = 0 column: no wrap, no mask.
        acc = acc + tap(-1, 0) + tap(1, 0)
        # ow = -1 column: sum the three vertical taps, mask ONCE (commutes through the
        # channel contraction since the mask is per output row).
        acc = acc + (tap(-1, -1) + tap(0, -1) + tap(1, -1)) * left_ok
        # ow = +1 column: same, masked once.
        acc = acc + (tap(-1, 1) + tap(0, 1) + tap(1, 1)) * right_ok
        return acc

    h = groupnorm(x, g1_ref[...], bt1_ref[...], m1cg_ref[...], m1gc_ref[...])
    h = silu(h)
    h = conv3x3(h, pad1_ref, w1_ref, b1_ref[...])
    h = groupnorm(h, g2_ref[...], bt2_ref[...], m2cg_ref[...], m2gc_ref[...])
    h = silu(h)
    h = conv3x3(h, pad2_ref, w2_ref, b2_ref[...])

    if has_res_conv:
        res = jnp.dot(x.astype(jnp.bfloat16), wr_ref[...],
                      preferred_element_type=jnp.float32) + br_ref[...]
    else:
        res = x                        # identity residual: no matmul, no weight DMA
    o_ref[...] = (h + res).astype(o_ref.dtype)


def _group_matrices(C, G):
    cs = C // G
    cidx = jnp.arange(C) // cs
    m_cg = (cidx[:, None] == jnp.arange(G)[None, :]).astype(jnp.float32)  # (C, G)
    return m_cg, jnp.transpose(m_cg)                                      # (G, C)


def _const_spec(a):
    n = a.ndim
    return pl.BlockSpec(a.shape, lambda b, _n=n: (0,) * _n)


def vae_residual_block(x_nchw, params):
    N, Cin, H, W = x_nchw.shape
    Cout = params["w1"].shape[0]
    HW = H * W
    has_res_conv = "wres" in params

    # glue: NCHW -> (N, H*W, C)
    x2d = jnp.transpose(x_nchw, (0, 2, 3, 1)).reshape(N, HW, Cin).astype(jnp.float32)

    g1 = params["gn1_gamma"].reshape(1, Cin).astype(jnp.float32)
    bt1 = params["gn1_beta"].reshape(1, Cin).astype(jnp.float32)
    g2 = params["gn2_gamma"].reshape(1, Cout).astype(jnp.float32)
    bt2 = params["gn2_beta"].reshape(1, Cout).astype(jnp.float32)
    m1cg, m1gc = _group_matrices(Cin, GROUPS)
    m2cg, m2gc = _group_matrices(Cout, GROUPS)
    # torch conv weights (Cout, Cin, kh, kw) -> per-tap (kh*3+kw, Cin, Cout), bf16 for the MXU
    w1 = jnp.transpose(params["w1"], (2, 3, 1, 0)).reshape(9, Cin, Cout).astype(jnp.bfloat16)
    b1 = params["b1"].reshape(1, Cout).astype(jnp.float32)
    w2 = jnp.transpose(params["w2"], (2, 3, 1, 0)).reshape(9, Cout, Cout).astype(jnp.bfloat16)
    b2 = params["b2"].reshape(1, Cout).astype(jnp.float32)

    inputs = [x2d, g1, bt1, m1cg, m1gc, w1, b1, g2, bt2, m2cg, m2gc, w2, b2]
    in_specs = [pl.BlockSpec((None, HW, Cin), lambda b: (b, 0, 0))]
    in_specs += [_const_spec(a) for a in inputs[1:]]

    if has_res_conv:
        wres = jnp.transpose(params["wres"][:, :, 0, 0], (1, 0)).astype(jnp.bfloat16)  # (Cin, Cout)
        bres = params["bres"].reshape(1, Cout).astype(jnp.float32)
        inputs += [wres, bres]
        in_specs += [_const_spec(wres), _const_spec(bres)]

    padlen = HW + 2 * W + 2
    scratch_shapes = [pltpu.VMEM((padlen, Cin), jnp.float32)]
    if has_res_conv:                    # Cin != Cout -> need a second, wider pad buffer
        scratch_shapes.append(pltpu.VMEM((padlen, Cout), jnp.float32))

    kernel = functools.partial(_resblock_kernel, H=H, W=W, has_res_conv=has_res_conv)

    gs = pltpu.PrefetchScalarGridSpec(
        num_scalar_prefetch=0,
        grid=(N,),
        in_specs=in_specs,
        out_specs=pl.BlockSpec((None, HW, Cout), lambda b: (b, 0, 0)),
        scratch_shapes=scratch_shapes,
    )

    out2d = pl.pallas_call(
        kernel,
        out_shape=jax.ShapeDtypeStruct((N, HW, Cout), jnp.float32),
        grid_spec=gs,
        compiler_params=pltpu.CompilerParams(
            dimension_semantics=("parallel",),
            vmem_limit_bytes=48 * 1024 * 1024,
        ),
    )(*inputs)

    # glue: (N, H*W, Cout) -> NCHW
    return jnp.transpose(out2d.reshape(N, H, W, Cout), (0, 3, 1, 2))


# ----------------- pure-JAX reference (for correctness check) -----------------
def _ref_forward(x, params):
    def gn(h, gamma, beta):
        n, c, hh, ww = h.shape
        g = h.reshape(n, GROUPS, c // GROUPS, hh, ww)
        mean = g.mean(axis=(2, 3, 4), keepdims=True)
        var = g.var(axis=(2, 3, 4), keepdims=True)
        g = (g - mean) * jax.lax.rsqrt(var + EPS)
        return g.reshape(n, c, hh, ww) * gamma[None, :, None, None] + beta[None, :, None, None]

    def conv(h, w, b, pad):
        out = jax.lax.conv_general_dilated(
            h, w, (1, 1), [(pad, pad), (pad, pad)],
            dimension_numbers=("NCHW", "OIHW", "NCHW"))
        return out + b[None, :, None, None]

    res = x
    h = gn(x, params["gn1_gamma"], params["gn1_beta"])
    h = jax.nn.silu(h)
    h = conv(h, params["w1"], params["b1"], 1)
    h = gn(h, params["gn2_gamma"], params["gn2_beta"])
    h = jax.nn.silu(h)
    h = conv(h, params["w2"], params["b2"], 1)
    if "wres" in params:
        res = conv(res, params["wres"], params["bres"], 0)
    return h + res


if __name__ == "__main__":
    def make_params(keys, Cin, Cout):
        def u(k, shape, fan_in):
            bound = float(fan_in) ** -0.5
            return jax.random.uniform(k, shape, jnp.float32, -bound, bound)
        p = dict(
            gn1_gamma=jnp.ones((Cin,), jnp.float32), gn1_beta=jnp.zeros((Cin,), jnp.float32),
            w1=u(keys[1], (Cout, Cin, 3, 3), Cin * 9), b1=u(keys[2], (Cout,), Cin * 9),
            gn2_gamma=jnp.ones((Cout,), jnp.float32), gn2_beta=jnp.zeros((Cout,), jnp.float32),
            w2=u(keys[3], (Cout, Cout, 3, 3), Cout * 9), b2=u(keys[4], (Cout,), Cout * 9),
        )
        if Cin != Cout:  # residual_layer = Conv2d(Cin, Cout, 1)
            p["wres"] = u(keys[5], (Cout, Cin, 1, 1), Cin)
            p["bres"] = u(keys[6], (Cout,), Cin)
        return p

    # Case 1: Cin != Cout -> 1x1-conv residual path (two pad scratch buffers).
    N, Cin, Cout, H, W = 2, 32, 64, 16, 16
    keys = jax.random.split(jax.random.PRNGKey(0), 8)
    x = jax.random.normal(keys[0], (N, Cin, H, W), jnp.float32)
    params = make_params(keys, Cin, Cout)
    out = jax.block_until_ready(vae_residual_block(x, params))
    assert out.shape == (N, Cout, H, W)
    err = float(jnp.max(jnp.abs(out - _ref_forward(x, params))))
    if err > 5e-2:
        raise AssertionError(f"res-conv case mismatch, max abs err = {err}")

    # Case 2: Cin == Cout -> identity residual (residual matmul skipped, shared pad scratch).
    keys2 = jax.random.split(jax.random.PRNGKey(1), 8)
    C2 = 64
    x2 = jax.random.normal(keys2[0], (N, C2, H, W), jnp.float32)
    params2 = make_params(keys2, C2, C2)
    out2 = jax.block_until_ready(vae_residual_block(x2, params2))
    assert out2.shape == (N, C2, H, W)
    err2 = float(jnp.max(jnp.abs(out2 - _ref_forward(x2, params2))))
    if err2 > 5e-2:
        raise AssertionError(f"identity case mismatch, max abs err = {err2}")

    print("KERNEL_OK")
</pallas_src>

<mosaic_0001>
module attributes {stable_mosaic.version = 11 : i64} {
  func.func @_resblock_kernel(%arg0: i32, %arg1: memref<1x256x32xf32, #tpu.memory_space<vmem>>, %arg2: memref<1x32xf32, #tpu.memory_space<vmem>>, %arg3: memref<1x32xf32, #tpu.memory_space<vmem>>, %arg4: memref<32x32xf32, #tpu.memory_space<vmem>>, %arg5: memref<32x32xf32, #tpu.memory_space<vmem>>, %arg6: memref<9x32x64xbf16, #tpu.memory_space<vmem>>, %arg7: memref<1x64xf32, #tpu.memory_space<vmem>>, %arg8: memref<1x64xf32, #tpu.memory_space<vmem>>, %arg9: memref<1x64xf32, #tpu.memory_space<vmem>>, %arg10: memref<64x32xf32, #tpu.memory_space<vmem>>, %arg11: memref<32x64xf32, #tpu.memory_space<vmem>>, %arg12: memref<9x64x64xbf16, #tpu.memory_space<vmem>>, %arg13: memref<1x64xf32, #tpu.memory_space<vmem>>, %arg14: memref<32x64xbf16, #tpu.memory_space<vmem>>, %arg15: memref<1x64xf32, #tpu.memory_space<vmem>>, %arg16: memref<1x256x64xf32, #tpu.memory_space<vmem>>, %arg17: memref<290x32xf32, #tpu.memory_space<vmem>>, %arg18: memref<290x64xf32, #tpu.memory_space<vmem>>) attributes {dimension_semantics = [#tpu.dimension_semantics<parallel>], iteration_bounds = array<i64: 2>, scalar_prefetch = 0 : i64, scratch_operands = 2 : i64, tpu.core_type = #tpu.core_type<tc>, window_params = [{transform_indices = @transform_0, window_bounds = array<i64: 1, 256, 32>}, {pipeline_mode = #tpu.pipeline_mode<synchronous>, transform_indices = @transform_1, window_bounds = array<i64: 1, 32>}, {pipeline_mode = #tpu.pipeline_mode<synchronous>, transform_indices = @transform_2, window_bounds = array<i64: 1, 32>}, {pipeline_mode = #tpu.pipeline_mode<synchronous>, transform_indices = @transform_3, window_bounds = array<i64: 32, 32>}, {pipeline_mode = #tpu.pipeline_mode<synchronous>, transform_indices = @transform_4, window_bounds = array<i64: 32, 32>}, {pipeline_mode = #tpu.pipeline_mode<synchronous>, transform_indices = @transform_5, window_bounds = array<i64: 9, 32, 64>}, {pipeline_mode = #tpu.pipeline_mode<synchronous>, transform_indices = @transform_6, window_bounds = array<i64: 1, 64>}, {pipeline_mode = #tpu.pipeline_mode<synchronous>, transform_indices = @transform_7, window_bounds = array<i64: 1, 64>}, {pipeline_mode = #tpu.pipeline_mode<synchronous>, transform_indices = @transform_8, window_bounds = array<i64: 1, 64>}, {pipeline_mode = #tpu.pipeline_mode<synchronous>, transform_indices = @transform_9, window_bounds = array<i64: 64, 32>}, {pipeline_mode = #tpu.pipeline_mode<synchronous>, transform_indices = @transform_10, window_bounds = array<i64: 32, 64>}, {pipeline_mode = #tpu.pipeline_mode<synchronous>, transform_indices = @transform_11, window_bounds = array<i64: 9, 64, 64>}, {pipeline_mode = #tpu.pipeline_mode<synchronous>, transform_indices = @transform_12, window_bounds = array<i64: 1, 64>}, {pipeline_mode = #tpu.pipeline_mode<synchronous>, transform_indices = @transform_13, window_bounds = array<i64: 32, 64>}, {pipeline_mode = #tpu.pipeline_mode<synchronous>, transform_indices = @transform_14, window_bounds = array<i64: 1, 64>}, {transform_indices = @transform_15, window_bounds = array<i64: 1, 256, 64>}]} {
    %c0 = arith.constant 0 : index
    %c0_0 = arith.constant 0 : index
    %c0_1 = arith.constant 0 : index
    %0 = vector.load %arg1[%c0, %c0_0, %c0_1] : memref<1x256x32xf32, #tpu.memory_space<vmem>>, vector<1x256x32xf32>
    %1 = vector.shape_cast %0 : vector<1x256x32xf32> to vector<256x32xf32>
    %2 = tpu.iota {dimensions = array<i32: 0>} : vector<256x1xi32>
    %c16_i32 = arith.constant 16 : i32
    %c0_i32 = arith.constant 0 : i32
    %3 = arith.cmpi eq, %c16_i32, %c0_i32 : i32
    %c1_i32 = arith.constant 1 : i32
    %4 = arith.select %3, %c1_i32, %c16_i32 : i32
    %5 = vector.broadcast %4 : i32 to vector<256x1xi32>
    %6 = arith.remsi %2, %5 : vector<256x1xi32>
    %c0_i32_2 = arith.constant 0 : i32
    %7 = vector.broadcast %c0_i32_2 : i32 to vector<256x1xi32>
    %8 = arith.cmpi ne, %6, %7 : vector<256x1xi32>
    %c0_i32_3 = arith.constant 0 : i32
    %9 = vector.broadcast %c0_i32_3 : i32 to vector<256x1xi32>
    %10 = arith.cmpi slt, %6, %9 : vector<256x1xi32>
    %c0_i32_4 = arith.constant 0 : i32
    %11 = arith.cmpi slt, %4, %c0_i32_4 : i32
    %12 = vector.broadcast %11 : i1 to vector<256x1xi1>
    %13 = vector.broadcast %12 : vector<256x1xi1> to vector<256x1xi1>
    %14 = arith.xori %10, %13 : vector<256x1xi1>
    %15 = arith.andi %14, %8 : vector<256x1xi1>
    %16 = vector.broadcast %4 : i32 to vector<256x1xi32>
    %17 = arith.addi %6, %16 : vector<256x1xi32>
    %18 = arith.select %15, %17, %6 : vector<256x1xi1>, vector<256x1xi32>
    %c1_i32_5 = arith.constant 1 : i32
    %19 = vector.broadcast %c1_i32_5 : i32 to vector<256x1xi32>
    %20 = arith.cmpi sge, %18, %19 : vector<256x1xi32>
    %21 = arith.extui %20 : vector<256x1xi1> to vector<256x1xi32>
    %22 = arith.sitofp %21 : vector<256x1xi32> to vector<256x1xf32>
    %c14_i32 = arith.constant 14 : i32
    %23 = vector.broadcast %c14_i32 : i32 to vector<256x1xi32>
    %24 = arith.cmpi sle, %18, %23 : vector<256x1xi32>
    %25 = arith.extui %24 : vector<256x1xi1> to vector<256x1xi32>
    %26 = arith.sitofp %25 : vector<256x1xi32> to vector<256x1xf32>
    %cst = arith.constant 0.000000e+00 : f32
    %27 = vector.broadcast %cst : f32 to vector<17x32xf32>
    %c0_6 = arith.constant 0 : index
    %c0_7 = arith.constant 0 : index
    %28 = vector.load %arg17[%c0_6, %c0_7] : memref<290x32xf32, #tpu.memory_space<vmem>>, vector<17x32xf32>
    tpu.vector_store %arg17[%c0_6, %c0_7], %27 {strides = array<i32>} : memref<290x32xf32, #tpu.memory_space<vmem>>, vector<17x32xf32>,
    %c273 = arith.constant 273 : index
    %c0_8 = arith.constant 0 : index
    %29 = vector.load %arg17[%c273, %c0_8] : memref<290x32xf32, #tpu.memory_space<vmem>>, vector<17x32xf32>
    tpu.vector_store %arg17[%c273, %c0_8], %27 {strides = array<i32>} : memref<290x32xf32, #tpu.memory_space<vmem>>, vector<17x32xf32>,
    %cst_9 = arith.constant 0.000000e+00 : f32
    %30 = vector.broadcast %cst_9 : f32 to vector<17x64xf32>
    %c0_10 = arith.constant 0 : index
    %c0_11 = arith.constant 0 : index
    %31 = vector.load %arg18[%c0_10, %c0_11] : memref<290x64xf32, #tpu.memory_space<vmem>>, vector<17x64xf32>
    tpu.vector_store %arg18[%c0_10, %c0_11], %30 {strides = array<i32>} : memref<290x64xf32, #tpu.memory_space<vmem>>, vector<17x64xf32>,
    %c273_12 = arith.constant 273 : index
    %c0_13 = arith.constant 0 : index
    %32 = vector.load %arg18[%c273_12, %c0_13] : memref<290x64xf32, #tpu.memory_space<vmem>>, vector<17x64xf32>
    tpu.vector_store %arg18[%c273_12, %c0_13], %30 {strides = array<i32>} : memref<290x64xf32, #tpu.memory_space<vmem>>, vector<17x64xf32>,
    %c0_14 = arith.constant 0 : index
    %c0_15 = arith.constant 0 : index
    %33 = vector.load %arg2[%c0_14, %c0_15] : memref<1x32xf32, #tpu.memory_space<vmem>>, vector<1x32xf32>
    %c0_16 = arith.constant 0 : index
    %c0_17 = arith.constant 0 : index
    %34 = vector.load %arg3[%c0_16, %c0_17] : memref<1x32xf32, #tpu.memory_space<vmem>>, vector<1x32xf32>
    %c0_18 = arith.constant 0 : index
    %c0_19 = arith.constant 0 : index
    %35 = vector.load %arg4[%c0_18, %c0_19] : memref<32x32xf32, #tpu.memory_space<vmem>>, vector<32x32xf32>
    %c0_20 = arith.constant 0 : index
    %c0_21 = arith.constant 0 : index
    %36 = vector.load %arg5[%c0_20, %c0_21] : memref<32x32xf32, #tpu.memory_space<vmem>>, vector<32x32xf32>
    %cst_22 = arith.constant dense<0.000000e+00> : vector<32xf32>
    %37 = vector.multi_reduction <add>, %1, %cst_22 [0] : vector<256x32xf32> to vector<32xf32>
    %38 = vector.shape_cast %37 : vector<32xf32> to vector<1x32xf32>
    %cst_23 = arith.constant dense<0.000000e+00> : vector<1x32xf32>
    %39 = tpu.matmul %38, %35, %cst_23 {dimension_numbers = #tpu.dot_dimension_numbers<[1], [0], [0], [1], [0, 0, 1, 1], [], []>} : vector<1x32xf32>, vector<32x32xf32>, vector<1x32xf32> -> vector<1x32xf32>
    %cst_24 = arith.constant 3.906250e-03 : f32
    %40 = vector.broadcast %cst_24 : f32 to vector<1x32xf32>
    %41 = arith.mulf %39, %40 : vector<1x32xf32>
    %cst_25 = arith.constant dense<0.000000e+00> : vector<1x32xf32>
    %42 = tpu.matmul %41, %36, %cst_25 {dimension_numbers = #tpu.dot_dimension_numbers<[1], [0], [0], [1], [0, 0, 1, 1], [], []>} : vector<1x32xf32>, vector<32x32xf32>, vector<1x32xf32> -> vector<1x32xf32>
    %43 = vector.broadcast %42 : vector<1x32xf32> to vector<256x32xf32>
    %44 = arith.subf %1, %43 : vector<256x32xf32>
    %45 = arith.mulf %44, %44 : vector<256x32xf32>
    %cst_26 = arith.constant dense<0.000000e+00> : vector<32xf32>
    %46 = vector.multi_reduction <add>, %45, %cst_26 [0] : vector<256x32xf32> to vector<32xf32>
    %47 = vector.shape_cast %46 : vector<32xf32> to vector<1x32xf32>
    %cst_27 = arith.constant dense<0.000000e+00> : vector<1x32xf32>
    %48 = tpu.matmul %47, %35, %cst_27 {dimension_numbers = #tpu.dot_dimension_numbers<[1], [0], [0], [1], [0, 0, 1, 1], [], []>} : vector<1x32xf32>, vector<32x32xf32>, vector<1x32xf32> -> vector<1x32xf32>
    %cst_28 = arith.constant 3.906250e-03 : f32
    %49 = vector.broadcast %cst_28 : f32 to vector<1x32xf32>
    %50 = arith.mulf %48, %49 : vector<1x32xf32>
    %cst_29 = arith.constant 9.99999974E-6 : f32
    %51 = vector.broadcast %cst_29 : f32 to vector<1x32xf32>
    %52 = arith.addf %50, %51 : vector<1x32xf32>
    %53 = math.rsqrt %52 : vector<1x32xf32>
    %cst_30 = arith.constant dense<0.000000e+00> : vector<1x32xf32>
    %54 = tpu.matmul %53, %36, %cst_30 {dimension_numbers = #tpu.dot_dimension_numbers<[1], [0], [0], [1], [0, 0, 1, 1], [], []>} : vector<1x32xf32>, vector<32x32xf32>, vector<1x32xf32> -> vector<1x32xf32>
    %55 = arith.mulf %54, %33 : vector<1x32xf32>
    %56 = vector.broadcast %55 : vector<1x32xf32> to vector<256x32xf32>
    %57 = arith.mulf %44, %56 : vector<256x32xf32>
    %58 = vector.broadcast %34 : vector<1x32xf32> to vector<256x32xf32>
    %59 = arith.addf %57, %58 : vector<256x32xf32>
    %cst_31 = arith.constant 5.000000e-01 : f32
    %60 = vector.broadcast %cst_31 : f32 to vector<256x32xf32>
    %61 = arith.mulf %60, %59 : vector<256x32xf32>
    %62 = math.tanh %61 : vector<256x32xf32>
    %cst_32 = arith.constant 5.000000e-01 : f32
    %63 = vector.broadcast %cst_32 : f32 to vector<256x32xf32>
    %64 = arith.mulf %63, %62 : vector<256x32xf32>
    %cst_33 = arith.constant 5.000000e-01 : f32
    %65 = vector.broadcast %cst_33 : f32 to vector<256x32xf32>
    %66 = arith.addf %64, %65 : vector<256x32xf32>
    %67 = arith.mulf %59, %66 : vector<256x32xf32>
    %c0_34 = arith.constant 0 : index
    %c0_35 = arith.constant 0 : index
    %68 = vector.load %arg7[%c0_34, %c0_35] : memref<1x64xf32, #tpu.memory_space<vmem>>, vector<1x64xf32>
    %69 = arith.truncf %67 : vector<256x32xf32> to vector<256x32xbf16>
    %c17 = arith.constant 17 : index
    %c0_36 = arith.constant 0 : index
    %70 = vector.load %arg17[%c17, %c0_36] : memref<290x32xf32, #tpu.memory_space<vmem>>, vector<256x32xf32>
    tpu.vector_store %arg17[%c17, %c0_36], %67 {strides = array<i32>} : memref<290x32xf32, #tpu.memory_space<vmem>>, vector<256x32xf32>,
    %c4 = arith.constant 4 : index
    %c0_37 = arith.constant 0 : index
    %c0_38 = arith.constant 0 : index
    %71 = vector.load %arg6[%c4, %c0_37, %c0_38] : memref<9x32x64xbf16, #tpu.memory_space<vmem>>, vector<1x32x64xbf16>
    %72 = vector.shape_cast %71 : vector<1x32x64xbf16> to vector<32x64xbf16>
    %cst_39 = arith.constant dense<0.000000e+00> : vector<256x64xf32>
    %73 = tpu.matmul %69, %72, %cst_39 {dimension_numbers = #tpu.dot_dimension_numbers<[1], [0], [0], [1], [0, 0, 1, 1], [], []>} : vector<256x32xbf16>, vector<32x64xbf16>, vector<256x64xf32> -> vector<256x64xf32>
    %74 = vector.broadcast %68 : vector<1x64xf32> to vector<256x64xf32>
    %75 = arith.addf %73, %74 : vector<256x64xf32>
    %c1 = arith.constant 1 : index
    %c0_40 = arith.constant 0 : index
    %76 = vector.load %arg17[%c1, %c0_40] : memref<290x32xf32, #tpu.memory_space<vmem>>, vector<256x32xf32>
    %77 = arith.truncf %76 : vector<256x32xf32> to vector<256x32xbf16>
    %c1_41 = arith.constant 1 : index
    %c0_42 = arith.constant 0 : index
    %c0_43 = arith.constant 0 : index
    %78 = vector.load %arg6[%c1_41, %c0_42, %c0_43] : memref<9x32x64xbf16, #tpu.memory_space<vmem>>, vector<1x32x64xbf16>
    %79 = vector.shape_cast %78 : vector<1x32x64xbf16> to vector<32x64xbf16>
    %cst_44 = arith.constant dense<0.000000e+00> : vector<256x64xf32>
    %80 = tpu.matmul %77, %79, %cst_44 {dimension_numbers = #tpu.dot_dimension_numbers<[1], [0], [0], [1], [0, 0, 1, 1], [], []>} : vector<256x32xbf16>, vector<32x64xbf16>, vector<256x64xf32> -> vector<256x64xf32>
    %81 = arith.addf %75, %80 : vector<256x64xf32>
    %c33 = arith.constant 33 : index
    %c0_45 = arith.constant 0 : index
    %82 = vector.load %arg17[%c33, %c0_45] : memref<290x32xf32, #tpu.memory_space<vmem>>, vector<256x32xf32>
    %83 = arith.truncf %82 : vector<256x32xf32> to vector<256x32xbf16>
    %c7 = arith.constant 7 : index
    %c0_46 = arith.constant 0 : index
    %c0_47 = arith.constant 0 : index
    %84 = vector.load %arg6[%c7, %c0_46, %c0_47] : memref<9x32x64xbf16, #tpu.memory_space<vmem>>, vector<1x32x64xbf16>
    %85 = vector.shape_cast %84 : vector<1x32x64xbf16> to vector<32x64xbf16>
    %cst_48 = arith.constant dense<0.000000e+00> : vector<256x64xf32>
    %86 = tpu.matmul %83, %85, %cst_48 {dimension_numbers = #tpu.dot_dimension_numbers<[1], [0], [0], [1], [0, 0, 1, 1], [], []>} : vector<256x32xbf16>, vector<32x64xbf16>, vector<256x64xf32> -> vector<256x64xf32>
    %87 = arith.addf %81, %86 : vector<256x64xf32>
    %c0_49 = arith.constant 0 : index
    %c0_50 = arith.constant 0 : index
    %88 = vector.load %arg17[%c0_49, %c0_50] : memref<290x32xf32, #tpu.memory_space<vmem>>, vector<256x32xf32>
    %89 = arith.truncf %88 : vector<256x32xf32> to vector<256x32xbf16>
    %c0_51 = arith.constant 0 : index
    %c0_52 = arith.constant 0 : index
    %c0_53 = arith.constant 0 : index
    %90 = vector.load %arg6[%c0_51, %c0_52, %c0_53] : memref<9x32x64xbf16, #tpu.memory_space<vmem>>, vector<1x32x64xbf16>
    %91 = vector.shape_cast %90 : vector<1x32x64xbf16> to vector<32x64xbf16>
    %cst_54 = arith.constant dense<0.000000e+00> : vector<256x64xf32>
    %92 = tpu.matmul %89, %91, %cst_54 {dimension_numbers = #tpu.dot_dimension_numbers<[1], [0], [0], [1], [0, 0, 1, 1], [], []>} : vector<256x32xbf16>, vector<32x64xbf16>, vector<256x64xf32> -> vector<256x64xf32>
    %c16 = arith.constant 16 : index
    %c0_55 = arith.constant 0 : index
    %93 = vector.load %arg17[%c16, %c0_55] : memref<290x32xf32, #tpu.memory_space<vmem>>, vector<256x32xf32>
    %94 = arith.truncf %93 : vector<256x32xf32> to vector<256x32xbf16>
    %c3 = arith.constant 3 : index
    %c0_56 = arith.constant 0 : index
    %c0_57 = arith.constant 0 : index
    %95 = vector.load %arg6[%c3, %c0_56, %c0_57] : memref<9x32x64xbf16, #tpu.memory_space<vmem>>, vector<1x32x64xbf16>
    %96 = vector.shape_cast %95 : vector<1x32x64xbf16> to vector<32x64xbf16>
    %cst_58 = arith.constant dense<0.000000e+00> : vector<256x64xf32>
    %97 = tpu.matmul %94, %96, %cst_58 {dimension_numbers = #tpu.dot_dimension_numbers<[1], [0], [0], [1], [0, 0, 1, 1], [], []>} : vector<256x32xbf16>, vector<32x64xbf16>, vector<256x64xf32> -> vector<256x64xf32>
    %98 = arith.addf %92, %97 : vector<256x64xf32>
    %c32 = arith.constant 32 : index
    %c0_59 = arith.constant 0 : index
    %99 = vector.load %arg17[%c32, %c0_59] : memref<290x32xf32, #tpu.memory_space<vmem>>, vector<256x32xf32>
    %100 = arith.truncf %99 : vector<256x32xf32> to vector<256x32xbf16>
    %c6 = arith.constant 6 : index
    %c0_60 = arith.constant 0 : index
    %c0_61 = arith.constant 0 : index
    %101 = vector.load %arg6[%c6, %c0_60, %c0_61] : memref<9x32x64xbf16, #tpu.memory_space<vmem>>, vector<1x32x64xbf16>
    %102 = vector.shape_cast %101 : vector<1x32x64xbf16> to vector<32x64xbf16>
    %cst_62 = arith.constant dense<0.000000e+00> : vector<256x64xf32>
    %103 = tpu.matmul %100, %102, %cst_62 {dimension_numbers = #tpu.dot_dimension_numbers<[1], [0], [0], [1], [0, 0, 1, 1], [], []>} : vector<256x32xbf16>, vector<32x64xbf16>, vector<256x64xf32> -> vector<256x64xf32>
    %104 = arith.addf %98, %103 : vector<256x64xf32>
    %105 = vector.broadcast %22 : vector<256x1xf32> to vector<256x64xf32>
    %106 = arith.mulf %104, %105 : vector<256x64xf32>
    %107 = arith.addf %87, %106 : vector<256x64xf32>
    %c2 = arith.constant 2 : index
    %c0_63 = arith.constant 0 : index
    %108 = vector.load %arg17[%c2, %c0_63] : memref<290x32xf32, #tpu.memory_space<vmem>>, vector<256x32xf32>
    %109 = arith.truncf %108 : vector<256x32xf32> to vector<256x32xbf16>
    %c2_64 = arith.constant 2 : index
    %c0_65 = arith.constant 0 : index
    %c0_66 = arith.constant 0 : index
    %110 = vector.load %arg6[%c2_64, %c0_65, %c0_66] : memref<9x32x64xbf16, #tpu.memory_space<vmem>>, vector<1x32x64xbf16>
    %111 = vector.shape_cast %110 : vector<1x32x64xbf16> to vector<32x64xbf16>
    %cst_67 = arith.constant dense<0.000000e+00> : vector<256x64xf32>
    %112 = tpu.matmul %109, %111, %cst_67 {dimension_numbers = #tpu.dot_dimension_numbers<[1], [0], [0], [1], [0, 0, 1, 1], [], []>} : vector<256x32xbf16>, vector<32x64xbf16>, vector<256x64xf32> -> vector<256x64xf32>
    %c18 = arith.constant 18 : index
    %c0_68 = arith.constant 0 : index
    %113 = vector.load %arg17[%c18, %c0_68] : memref<290x32xf32, #tpu.memory_space<vmem>>, vector<256x32xf32>
    %114 = arith.truncf %113 : vector<256x32xf32> to vector<256x32xbf16>
    %c5 = arith.constant 5 : index
    %c0_69 = arith.constant 0 : index
    %c0_70 = arith.constant 0 : index
    %115 = vector.load %arg6[%c5, %c0_69, %c0_70] : memref<9x32x64xbf16, #tpu.memory_space<vmem>>, vector<1x32x64xbf16>
    %116 = vector.shape_cast %115 : vector<1x32x64xbf16> to vector<32x64xbf16>
    %cst_71 = arith.constant dense<0.000000e+00> : vector<256x64xf32>
    %117 = tpu.matmul %114, %116, %cst_71 {dimension_numbers = #tpu.dot_dimension_numbers<[1], [0], [0], [1], [0, 0, 1, 1], [], []>} : vector<256x32xbf16>, vector<32x64xbf16>, vector<256x64xf32> -> vector<256x64xf32>
    %118 = arith.addf %112, %117 : vector<256x64xf32>
    %c34 = arith.constant 34 : index
    %c0_72 = arith.constant 0 : index
    %119 = vector.load %arg17[%c34, %c0_72] : memref<290x32xf32, #tpu.memory_space<vmem>>, vector<256x32xf32>
    %120 = arith.truncf %119 : vector<256x32xf32> to vector<256x32xbf16>
    %c8 = arith.constant 8 : index
    %c0_73 = arith.constant 0 : index
    %c0_74 = arith.constant 0 : index
    %121 = vector.load %arg6[%c8, %c0_73, %c0_74] : memref<9x32x64xbf16, #tpu.memory_space<vmem>>, vector<1x32x64xbf16>
    %122 = vector.shape_cast %121 : vector<1x32x64xbf16> to vector<32x64xbf16>
    %cst_75 = arith.constant dense<0.000000e+00> : vector<256x64xf32>
    %123 = tpu.matmul %120, %122, %cst_75 {dimension_numbers = #tpu.dot_dimension_numbers<[1], [0], [0], [1], [0, 0, 1, 1], [], []>} : vector<256x32xbf16>, vector<32x64xbf16>, vector<256x64xf32> -> vector<256x64xf32>
    %124 = arith.addf %118, %123 : vector<256x64xf32>
    %125 = vector.broadcast %26 : vector<256x1xf32> to vector<256x64xf32>
    %126 = arith.mulf %124, %125 : vector<256x64xf32>
    %127 = arith.addf %107, %126 : vector<256x64xf32>
    %c0_76 = arith.constant 0 : index
    %c0_77 = arith.constant 0 : index
    %128 = vector.load %arg8[%c0_76, %c0_77] : memref<1x64xf32, #tpu.memory_space<vmem>>, vector<1x64xf32>
    %c0_78 = arith.constant 0 : index
    %c0_79 = arith.constant 0 : index
    %129 = vector.load %arg9[%c0_78, %c0_79] : memref<1x64xf32, #tpu.memory_space<vmem>>, vector<1x64xf32>
    %c0_80 = arith.constant 0 : index
    %c0_81 = arith.constant 0 : index
    %130 = vector.load %arg10[%c0_80, %c0_81] : memref<64x32xf32, #tpu.memory_space<vmem>>, vector<64x32xf32>
    %c0_82 = arith.constant 0 : index
    %c0_83 = arith.constant 0 : index
    %131 = vector.load %arg11[%c0_82, %c0_83] : memref<32x64xf32, #tpu.memory_space<vmem>>, vector<32x64xf32>
    %cst_84 = arith.constant dense<0.000000e+00> : vector<64xf32>
    %132 = vector.multi_reduction <add>, %127, %cst_84 [0] : vector<256x64xf32> to vector<64xf32>
    %133 = vector.shape_cast %132 : vector<64xf32> to vector<1x64xf32>
    %cst_85 = arith.constant dense<0.000000e+00> : vector<1x32xf32>
    %134 = tpu.matmul %133, %130, %cst_85 {dimension_numbers = #tpu.dot_dimension_numbers<[1], [0], [0], [1], [0, 0, 1, 1], [], []>} : vector<1x64xf32>, vector<64x32xf32>, vector<1x32xf32> -> vector<1x32xf32>
    %cst_86 = arith.constant 0.001953125 : f32
    %135 = vector.broadcast %cst_86 : f32 to vector<1x32xf32>
    %136 = arith.mulf %134, %135 : vector<1x32xf32>
    %cst_87 = arith.constant dense<0.000000e+00> : vector<1x64xf32>
    %137 = tpu.matmul %136, %131, %cst_87 {dimension_numbers = #tpu.dot_dimension_numbers<[1], [0], [0], [1], [0, 0, 1, 1], [], []>} : vector<1x32xf32>, vector<32x64xf32>, vector<1x64xf32> -> vector<1x64xf32>
    %138 = vector.broadcast %137 : vector<1x64xf32> to vector<256x64xf32>
    %139 = arith.subf %127, %138 : vector<256x64xf32>
    %140 = arith.mulf %139, %139 : vector<256x64xf32>
    %cst_88 = arith.constant dense<0.000000e+00> : vector<64xf32>
    %141 = vector.multi_reduction <add>, %140, %cst_88 [0] : vector<256x64xf32> to vector<64xf32>
    %142 = vector.shape_cast %141 : vector<64xf32> to vector<1x64xf32>
    %cst_89 = arith.constant dense<0.000000e+00> : vector<1x32xf32>
    %143 = tpu.matmul %142, %130, %cst_89 {dimension_numbers = #tpu.dot_dimension_numbers<[1], [0], [0], [1], [0, 0, 1, 1], [], []>} : vector<1x64xf32>, vector<64x32xf32>, vector<1x32xf32> -> vector<1x32xf32>
    %cst_90 = arith.constant 0.001953125 : f32
    %144 = vector.broadcast %cst_90 : f32 to vector<1x32xf32>
    %145 = arith.mulf %143, %144 : vector<1x32xf32>
    %cst_91 = arith.constant 9.99999974E-6 : f32
    %146 = vector.broadcast %cst_91 : f32 to vector<1x32xf32>
    %147 = arith.addf %145, %146 : vector<1x32xf32>
    %148 = math.rsqrt %147 : vector<1x32xf32>
    %cst_92 = arith.constant dense<0.000000e+00> : vector<1x64xf32>
    %149 = tpu.matmul %148, %131, %cst_92 {dimension_numbers = #tpu.dot_dimension_numbers<[1], [0], [0], [1], [0, 0, 1, 1], [], []>} : vector<1x32xf32>, vector<32x64xf32>, vector<1x64xf32> -> vector<1x64xf32>
    %150 = arith.mulf %149, %128 : vector<1x64xf32>
    %151 = vector.broadcast %150 : vector<1x64xf32> to vector<256x64xf32>
    %152 = arith.mulf %139, %151 : vector<256x64xf32>
    %153 = vector.broadcast %129 : vector<1x64xf32> to vector<256x64xf32>
    %154 = arith.addf %152, %153 : vector<256x64xf32>
    %cst_93 = arith.constant 5.000000e-01 : f32
    %155 = vector.broadcast %cst_93 : f32 to vector<256x64xf32>
    %156 = arith.mulf %155, %154 : vector<256x64xf32>
    %157 = math.tanh %156 : vector<256x64xf32>
    %cst_94 = arith.constant 5.000000e-01 : f32
    %158 = vector.broadcast %cst_94 : f32 to vector<256x64xf32>
    %159 = arith.mulf %158, %157 : vector<256x64xf32>
    %cst_95 = arith.constant 5.000000e-01 : f32
    %160 = vector.broadcast %cst_95 : f32 to vector<256x64xf32>
    %161 = arith.addf %159, %160 : vector<256x64xf32>
    %162 = arith.mulf %154, %161 : vector<256x64xf32>
    %c0_96 = arith.constant 0 : index
    %c0_97 = arith.constant 0 : index
    %163 = vector.load %arg13[%c0_96, %c0_97] : memref<1x64xf32, #tpu.memory_space<vmem>>, vector<1x64xf32>
    %164 = arith.truncf %162 : vector<256x64xf32> to vector<256x64xbf16>
    %c17_98 = arith.constant 17 : index
    %c0_99 = arith.constant 0 : index
    %165 = vector.load %arg18[%c17_98, %c0_99] : memref<290x64xf32, #tpu.memory_space<vmem>>, vector<256x64xf32>
    tpu.vector_store %arg18[%c17_98, %c0_99], %162 {strides = array<i32>} : memref<290x64xf32, #tpu.memory_space<vmem>>, vector<256x64xf32>,
    %c4_100 = arith.constant 4 : index
    %c0_101 = arith.constant 0 : index
    %c0_102 = arith.constant 0 : index
    %166 = vector.load %arg12[%c4_100, %c0_101, %c0_102] : memref<9x64x64xbf16, #tpu.memory_space<vmem>>, vector<1x64x64xbf16>
    %167 = vector.shape_cast %166 : vector<1x64x64xbf16> to vector<64x64xbf16>
    %cst_103 = arith.constant dense<0.000000e+00> : vector<256x64xf32>
    %168 = tpu.matmul %164, %167, %cst_103 {dimension_numbers = #tpu.dot_dimension_numbers<[1], [0], [0], [1], [0, 0, 1, 1], [], []>} : vector<256x64xbf16>, vector<64x64xbf16>, vector<256x64xf32> -> vector<256x64xf32>
    %169 = vector.broadcast %163 : vector<1x64xf32> to vector<256x64xf32>
    %170 = arith.addf %168, %169 : vector<256x64xf32>
    %c1_104 = arith.constant 1 : index
    %c0_105 = arith.constant 0 : index
    %171 = vector.load %arg18[%c1_104, %c0_105] : memref<290x64xf32, #tpu.memory_space<vmem>>, vector<256x64xf32>
    %172 = arith.truncf %171 : vector<256x64xf32> to vector<256x64xbf16>
    %c1_106 = arith.constant 1 : index
    %c0_107 = arith.constant 0 : index
    %c0_108 = arith.constant 0 : index
    %173 = vector.load %arg12[%c1_106, %c0_107, %c0_108] : memref<9x64x64xbf16, #tpu.memory_space<vmem>>, vector<1x64x64xbf16>
    %174 = vector.shape_cast %173 : vector<1x64x64xbf16> to vector<64x64xbf16>
    %cst_109 = arith.constant dense<0.000000e+00> : vector<256x64xf32>
    %175 = tpu.matmul %172, %174, %cst_109 {dimension_numbers = #tpu.dot_dimension_numbers<[1], [0], [0], [1], [0, 0, 1, 1], [], []>} : vector<256x64xbf16>, vector<64x64xbf16>, vector<256x64xf32> -> vector<256x64xf32>
    %176 = arith.addf %170, %175 : vector<256x64xf32>
    %c33_110 = arith.constant 33 : index
    %c0_111 = arith.constant 0 : index
    %177 = vector.load %arg18[%c33_110, %c0_111] : memref<290x64xf32, #tpu.memory_space<vmem>>, vector<256x64xf32>
    %178 = arith.truncf %177 : vector<256x64xf32> to vector<256x64xbf16>
    %c7_112 = arith.constant 7 : index
    %c0_113 = arith.constant 0 : index
    %c0_114 = arith.constant 0 : index
    %179 = vector.load %arg12[%c7_112, %c0_113, %c0_114] : memref<9x64x64xbf16, #tpu.memory_space<vmem>>, vector<1x64x64xbf16>
    %180 = vector.shape_cast %179 : vector<1x64x64xbf16> to vector<64x64xbf16>
    %cst_115 = arith.constant dense<0.000000e+00> : vector<256x64xf32>
    %181 = tpu.matmul %178, %180, %cst_115 {dimension_numbers = #tpu.dot_dimension_numbers<[1], [0], [0], [1], [0, 0, 1, 1], [], []>} : vector<256x64xbf16>, vector<64x64xbf16>, vector<256x64xf32> -> vector<256x64xf32>
    %182 = arith.addf %176, %181 : vector<256x64xf32>
    %c0_116 = arith.constant 0 : index
    %c0_117 = arith.constant 0 : index
    %183 = vector.load %arg18[%c0_116, %c0_117] : memref<290x64xf32, #tpu.memory_space<vmem>>, vector<256x64xf32>
    %184 = arith.truncf %183 : vector<256x64xf32> to vector<256x64xbf16>
    %c0_118 = arith.constant 0 : index
    %c0_119 = arith.constant 0 : index
    %c0_120 = arith.constant 0 : index
    %185 = vector.load %arg12[%c0_118, %c0_119, %c0_120] : memref<9x64x64xbf16, #tpu.memory_space<vmem>>, vector<1x64x64xbf16>
    %186 = vector.shape_cast %185 : vector<1x64x64xbf16> to vector<64x64xbf16>
    %cst_121 = arith.constant dense<0.000000e+00> : vector<256x64xf32>
    %187 = tpu.matmul %184, %186, %cst_121 {dimension_numbers = #tpu.dot_dimension_numbers<[1], [0], [0], [1], [0, 0, 1, 1], [], []>} : vector<256x64xbf16>, vector<64x64xbf16>, vector<256x64xf32> -> vector<256x64xf32>
    %c16_122 = arith.constant 16 : index
    %c0_123 = arith.constant 0 : index
    %188 = vector.load %arg18[%c16_122, %c0_123] : memref<290x64xf32, #tpu.memory_space<vmem>>, vector<256x64xf32>
    %189 = arith.truncf %188 : vector<256x64xf32> to vector<256x64xbf16>
    %c3_124 = arith.constant 3 : index
    %c0_125 = arith.constant 0 : index
    %c0_126 = arith.constant 0 : index
    %190 = vector.load %arg12[%c3_124, %c0_125, %c0_126] : memref<9x64x64xbf16, #tpu.memory_space<vmem>>, vector<1x64x64xbf16>
    %191 = vector.shape_cast %190 : vector<1x64x64xbf16> to vector<64x64xbf16>
    %cst_127 = arith.constant dense<0.000000e+00> : vector<256x64xf32>
    %192 = tpu.matmul %189, %191, %cst_127 {dimension_numbers = #tpu.dot_dimension_numbers<[1], [0], [0], [1], [0, 0, 1, 1], [], []>} : vector<256x64xbf16>, vector<64x64xbf16>, vector<256x64xf32> -> vector<256x64xf32>
    %193 = arith.addf %187, %192 : vector<256x64xf32>
    %c32_128 = arith.constant 32 : index
    %c0_129 = arith.constant 0 : index
    %194 = vector.load %arg18[%c32_128, %c0_129] : memref<290x64xf32, #tpu.memory_space<vmem>>, vector<256x64xf32>
    %195 = arith.truncf %194 : vector<256x64xf32> to vector<256x64xbf16>
    %c6_130 = arith.constant 6 : index
    %c0_131 = arith.constant 0 : index
    %c0_132 = arith.constant 0 : index
    %196 = vector.load %arg12[%c6_130, %c0_131, %c0_132] : memref<9x64x64xbf16, #tpu.memory_space<vmem>>, vector<1x64x64xbf16>
    %197 = vector.shape_cast %196 : vector<1x64x64xbf16> to vector<64x64xbf16>
    %cst_133 = arith.constant dense<0.000000e+00> : vector<256x64xf32>
    %198 = tpu.matmul %195, %197, %cst_133 {dimension_numbers = #tpu.dot_dimension_numbers<[1], [0], [0], [1], [0, 0, 1, 1], [], []>} : vector<256x64xbf16>, vector<64x64xbf16>, vector<256x64xf32> -> vector<256x64xf32>
    %199 = arith.addf %193, %198 : vector<256x64xf32>
    %200 = vector.broadcast %22 : vector<256x1xf32> to vector<256x64xf32>
    %201 = arith.mulf %199, %200 : vector<256x64xf32>
    %202 = arith.addf %182, %201 : vector<256x64xf32>
    %c2_134 = arith.constant 2 : index
    %c0_135 = arith.constant 0 : index
    %203 = vector.load %arg18[%c2_134, %c0_135] : memref<290x64xf32, #tpu.memory_space<vmem>>, vector<256x64xf32>
    %204 = arith.truncf %203 : vector<256x64xf32> to vector<256x64xbf16>
    %c2_136 = arith.constant 2 : index
    %c0_137 = arith.constant 0 : index
    %c0_138 = arith.constant 0 : index
    %205 = vector.load %arg12[%c2_136, %c0_137, %c0_138] : memref<9x64x64xbf16, #tpu.memory_space<vmem>>, vector<1x64x64xbf16>
    %206 = vector.shape_cast %205 : vector<1x64x64xbf16> to vector<64x64xbf16>
    %cst_139 = arith.constant dense<0.000000e+00> : vector<256x64xf32>
    %207 = tpu.matmul %204, %206, %cst_139 {dimension_numbers = #tpu.dot_dimension_numbers<[1], [0], [0], [1], [0, 0, 1, 1], [], []>} : vector<256x64xbf16>, vector<64x64xbf16>, vector<256x64xf32> -> vector<256x64xf32>
    %c18_140 = arith.constant 18 : index
    %c0_141 = arith.constant 0 : index
    %208 = vector.load %arg18[%c18_140, %c0_141] : memref<290x64xf32, #tpu.memory_space<vmem>>, vector<256x64xf32>
    %209 = arith.truncf %208 : vector<256x64xf32> to vector<256x64xbf16>
    %c5_142 = arith.constant 5 : index
    %c0_143 = arith.constant 0 : index
    %c0_144 = arith.constant 0 : index
    %210 = vector.load %arg12[%c5_142, %c0_143, %c0_144] : memref<9x64x64xbf16, #tpu.memory_space<vmem>>, vector<1x64x64xbf16>
    %211 = vector.shape_cast %210 : vector<1x64x64xbf16> to vector<64x64xbf16>
    %cst_145 = arith.constant dense<0.000000e+00> : vector<256x64xf32>
    %212 = tpu.matmul %209, %211, %cst_145 {dimension_numbers = #tpu.dot_dimension_numbers<[1], [0], [0], [1], [0, 0, 1, 1], [], []>} : vector<256x64xbf16>, vector<64x64xbf16>, vector<256x64xf32> -> vector<256x64xf32>
    %213 = arith.addf %207, %212 : vector<256x64xf32>
    %c34_146 = arith.constant 34 : index
    %c0_147 = arith.constant 0 : index
    %214 = vector.load %arg18[%c34_146, %c0_147] : memref<290x64xf32, #tpu.memory_space<vmem>>, vector<256x64xf32>
    %215 = arith.truncf %214 : vector<256x64xf32> to vector<256x64xbf16>
    %c8_148 = arith.constant 8 : index
    %c0_149 = arith.constant 0 : index
    %c0_150 = arith.constant 0 : index
    %216 = vector.load %arg12[%c8_148, %c0_149, %c0_150] : memref<9x64x64xbf16, #tpu.memory_space<vmem>>, vector<1x64x64xbf16>
    %217 = vector.shape_cast %216 : vector<1x64x64xbf16> to vector<64x64xbf16>
    %cst_151 = arith.constant dense<0.000000e+00> : vector<256x64xf32>
    %218 = tpu.matmul %215, %217, %cst_151 {dimension_numbers = #tpu.dot_dimension_numbers<[1], [0], [0], [1], [0, 0, 1, 1], [], []>} : vector<256x64xbf16>, vector<64x64xbf16>, vector<256x64xf32> -> vector<256x64xf32>
    %219 = arith.addf %213, %218 : vector<256x64xf32>
    %220 = vector.broadcast %26 : vector<256x1xf32> to vector<256x64xf32>
    %221 = arith.mulf %219, %220 : vector<256x64xf32>
    %222 = arith.addf %202, %221 : vector<256x64xf32>
    %223 = arith.truncf %1 : vector<256x32xf32> to vector<256x32xbf16>
    %c0_152 = arith.constant 0 : index
    %c0_153 = arith.constant 0 : index
    %224 = vector.load %arg14[%c0_152, %c0_153] : memref<32x64xbf16, #tpu.memory_space<vmem>>, vector<32x64xbf16>
    %cst_154 = arith.constant dense<0.000000e+00> : vector<256x64xf32>
    %225 = tpu.matmul %223, %224, %cst_154 {dimension_numbers = #tpu.dot_dimension_numbers<[1], [0], [0], [1], [0, 0, 1, 1], [], []>} : vector<256x32xbf16>, vector<32x64xbf16>, vector<256x64xf32> -> vector<256x64xf32>
    %c0_155 = arith.constant 0 : index
    %c0_156 = arith.constant 0 : index
    %226 = vector.load %arg15[%c0_155, %c0_156] : memref<1x64xf32, #tpu.memory_space<vmem>>, vector<1x64xf32>
    %227 = vector.broadcast %226 : vector<1x64xf32> to vector<256x64xf32>
    %228 = arith.addf %225, %227 : vector<256x64xf32>
    %229 = arith.addf %222, %228 : vector<256x64xf32>
    %c0_157 = arith.constant 0 : index
    %c0_158 = arith.constant 0 : index
    %c0_159 = arith.constant 0 : index
    %230 = vector.load %arg16[%c0_157, %c0_158, %c0_159] : memref<1x256x64xf32, #tpu.memory_space<vmem>>, vector<1x256x64xf32>
    %231 = vector.shape_cast %230 : vector<1x256x64xf32> to vector<256x64xf32>
    %232 = vector.shape_cast %229 : vector<256x64xf32> to vector<1x256x64xf32>
    tpu.vector_store %arg16[%c0_157, %c0_158, %c0_159], %232 {strides = array<i32>} : memref<1x256x64xf32, #tpu.memory_space<vmem>>, vector<1x256x64xf32>,
    return
  }
  func.func @transform_0(%arg0: i32) -> (i32, i32, i32) {
    %c0_i32 = arith.constant 0 : i32
    %c0_i32_0 = arith.constant 0 : i32
    %c0_i32_1 = arith.constant 0 : i32
    return %arg0, %c0_i32, %c0_i32_0 : i32, i32, i32
  }
  func.func @transform_1(%arg0: i32) -> (i32, i32) {
    %c0_i32 = arith.constant 0 : i32
    %c0_i32_0 = arith.constant 0 : i32
    %c0_i32_1 = arith.constant 0 : i32
    return %c0_i32, %c0_i32_0 : i32, i32
  }
  func.func @transform_2(%arg0: i32) -> (i32, i32) {
    %c0_i32 = arith.constant 0 : i32
    %c0_i32_0 = arith.constant 0 : i32
    %c0_i32_1 = arith.constant 0 : i32
    return %c0_i32, %c0_i32_0 : i32, i32
  }
  func.func @transform_3(%arg0: i32) -> (i32, i32) {
    %c0_i32 = arith.constant 0 : i32
    %c0_i32_0 = arith.constant 0 : i32
    %c0_i32_1 = arith.constant 0 : i32
    return %c0_i32, %c0_i32_0 : i32, i32
  }
  func.func @transform_4(%arg0: i32) -> (i32, i32) {
    %c0_i32 = arith.constant 0 : i32
    %c0_i32_0 = arith.constant 0 : i32
    %c0_i32_1 = arith.constant 0 : i32
    return %c0_i32, %c0_i32_0 : i32, i32
  }
  func.func @transform_5(%arg0: i32) -> (i32, i32, i32) {
    %c0_i32 = arith.constant 0 : i32
    %c0_i32_0 = arith.constant 0 : i32
    %c0_i32_1 = arith.constant 0 : i32
    %c0_i32_2 = arith.constant 0 : i32
    return %c0_i32, %c0_i32_0, %c0_i32_1 : i32, i32, i32
  }
  func.func @transform_6(%arg0: i32) -> (i32, i32) {
    %c0_i32 = arith.constant 0 : i32
    %c0_i32_0 = arith.constant 0 : i32
    %c0_i32_1 = arith.constant 0 : i32
    return %c0_i32, %c0_i32_0 : i32, i32
  }
  func.func @transform_7(%arg0: i32) -> (i32, i32) {
    %c0_i32 = arith.constant 0 : i32
    %c0_i32_0 = arith.constant 0 : i32
    %c0_i32_1 = arith.constant 0 : i32
    return %c0_i32, %c0_i32_0 : i32, i32
  }
  func.func @transform_8(%arg0: i32) -> (i32, i32) {
    %c0_i32 = arith.constant 0 : i32
    %c0_i32_0 = arith.constant 0 : i32
    %c0_i32_1 = arith.constant 0 : i32
    return %c0_i32, %c0_i32_0 : i32, i32
  }
  func.func @transform_9(%arg0: i32) -> (i32, i32) {
    %c0_i32 = arith.constant 0 : i32
    %c0_i32_0 = arith.constant 0 : i32
    %c0_i32_1 = arith.constant 0 : i32
    return %c0_i32, %c0_i32_0 : i32, i32
  }
  func.func @transform_10(%arg0: i32) -> (i32, i32) {
    %c0_i32 = arith.constant 0 : i32
    %c0_i32_0 = arith.constant 0 : i32
    %c0_i32_1 = arith.constant 0 : i32
    return %c0_i32, %c0_i32_0 : i32, i32
  }
  func.func @transform_11(%arg0: i32) -> (i32, i32, i32) {
    %c0_i32 = arith.constant 0 : i32
    %c0_i32_0 = arith.constant 0 : i32
    %c0_i32_1 = arith.constant 0 : i32
    %c0_i32_2 = arith.constant 0 : i32
    return %c0_i32, %c0_i32_0, %c0_i32_1 : i32, i32, i32
  }
  func.func @transform_12(%arg0: i32) -> (i32, i32) {
    %c0_i32 = arith.constant 0 : i32
    %c0_i32_0 = arith.constant 0 : i32
    %c0_i32_1 = arith.constant 0 : i32
    return %c0_i32, %c0_i32_0 : i32, i32
  }
  func.func @transform_13(%arg0: i32) -> (i32, i32) {
    %c0_i32 = arith.constant 0 : i32
    %c0_i32_0 = arith.constant 0 : i32
    %c0_i32_1 = arith.constant 0 : i32
    return %c0_i32, %c0_i32_0 : i32, i32
  }
  func.func @transform_14(%arg0: i32) -> (i32, i32) {
    %c0_i32 = arith.constant 0 : i32
    %c0_i32_0 = arith.constant 0 : i32
    %c0_i32_1 = arith.constant 0 : i32
    return %c0_i32, %c0_i32_0 : i32, i32
  }
  func.func @transform_15(%arg0: i32) -> (i32, i32, i32) {
    %c0_i32 = arith.constant 0 : i32
    %c0_i32_0 = arith.constant 0 : i32
    %c0_i32_1 = arith.constant 0 : i32
    return %arg0, %c0_i32, %c0_i32_0 : i32, i32, i32
  }
}

</mosaic_0001>

<bundles_post_ra>
// kernel: tpu_custom_call.1
= control target key start
LH: loop header
LB: loop body
LE: loop exit
PB: predicated region body
PF: predicated region fallthrough
CT: control target
= control target key end

     0   :  { %s7487_s18 = smov 0   ;;  %s11420_s0 = inlined_call_operand.vmem [shape: f32[2,256,32], index: 0, kind: input, shape index: {}]   ;;  %s11421_s1 = inlined_call_operand.vmem [shape: f32[1,32], index: 1, kind: input, shape index: {}]   ;;  %s11422_s2 = inlined_call_operand.vmem [shape: f32[1,32], index: 2, kind: input, shape index: {}]   ;;  %s11423_s3 = inlined_call_operand.vmem [shape: f32[32,32], index: 3, kind: input, shape index: {}]   ;;  %s11424_s4 = inlined_call_operand.vmem [shape: f32[32,32], index: 4, kind: input, shape index: {}]   ;;  %s11425_s5 = inlined_call_operand.vmem [shape: bf16[9,32,64], index: 5, kind: input, shape index: {}]   ;;  %s11426_s6 = inlined_call_operand.vmem [shape: f32[1,64], index: 6, kind: input, shape index: {}]   ;;  %s11427_s7 = inlined_call_operand.vmem [shape: f32[1,64], index: 7, kind: input, shape index: {}]   ;;  %s11428_s8 = inlined_call_operand.vmem [shape: f32[1,64], index: 8, kind: input, shape index: {}]   ;;  %s11429_s9 = inlined_call_operand.vmem [shape: f32[64,32], index: 9, kind: input, shape index: {}]   ;;  %s11430_s10 = inlined_call_operand.vmem [shape: f32[32,64], index: 10, kind: input, shape index: {}]   ;;  %s11431_s11 = inlined_call_operand.vmem [shape: bf16[9,64,64], index: 11, kind: input, shape index: {}]   ;;  %s11432_s12 = inlined_call_operand.vmem [shape: f32[1,64], index: 12, kind: input, shape index: {}]   ;;  %s11433_s13 = inlined_call_operand.vmem [shape: bf16[32,64], index: 13, kind: input, shape index: {}]   ;;  %s11434_s14 = inlined_call_operand.vmem [shape: f32[1,64], index: 14, kind: input, shape index: {}]   ;;  %s11435_s15 = inlined_call_operand.vmem [shape: f32[2,256,64], index: 15, kind: output, shape index: {}]  }
   0x1 LB: > { %s6481_s19 = sadd.s32 4294967295, %s7404_s18   ;;  %p6485_p0 = scmp.ge.s32.totalorder %s7404_s18, 1  ;;  %s7404_s18 = sphi %s7487_s18, %s25_s18  }
   0x2   : > { %p437_p1 = scmp.lt.s32.totalorder %s7404_s18, 3 }
   0x4   : > { %p438_p2 = pnand %p6485_p0, %p437_p1 }
   0x6   : > { %441 = sbr.rel (%p438_p2) target bundleno = 3180 (0xc6c), region = 80 }
   0xb   : > { %v1158_v0 = vld [vmem:[%s11423_s3 + $0x18] sm:$0xff]  ;;  %v1157_v1 = vld [vmem:[%s11423_s3 + $0x10] sm:$0xff]  ;;  %p485_p3 = scmp.lt.s32.totalorder %s6481_s19, 1  ;;  %v1156_v2 = vld [vmem:[%s11423_s3 + $0x8] sm:$0xff]  ;;  %vm1137_vm0 = vcmask 261120   ;;  %vm1140_vm4 = vcmask 253952  }
   0xc   : > { %1247 = vmatpush.msra.mxu0 %v1158_v0  ;;  %1428 = vmatpush.msra.mxu2 %v1158_v0  ;;  %v1155_v3 = vld [vmem:[%s11423_s3] sm:$0xff]  ;;  %vm1145_vm6 = vcmask 523264  }
   0xd   : > { %s11870_s19 = smov (!%p485_p3, %s6481_s19), 1 }
   0xe   : > { %1248 = vmatpush.msra.mxu0 %v1157_v1  ;;  %1429 = vmatpush.msra.mxu2 %v1157_v1  ;;  %s7156_s28 = sshll.u32 %s11870_s19, 8 }
   0xf   : > { %s7515_s16 = scalar_lea.vmem %s11420_s0, %s7156_s28  ;;  %s11205_s25 = scalar_lea.vmem %s11435_s15, %s7156_s28 }
  0x10   : > { %1249 = vmatpush.msra.mxu0 %v1156_v2  ;;  %1430 = vmatpush.msra.mxu2 %v1156_v2  ;;  %v7518_v4 = vld [vmem:[%s7515_s16] sm:$0xff]  ;;  %v7521_v5 = vld [vmem:[%s7515_s16 + $0x8] sm:$0xff]  ;;  %v7524_v6 = vld [vmem:[%s7515_s16 + $0x10] sm:$0xff] }
  0x11   : > { %v7527_v7 = vld [vmem:[%s7515_s16 + $0x18] sm:$0xff]  ;;  %v1163_v8 = vsel %vm1137_vm0, %v7518_v4, 0.0  ;;  %v1164_v9 = vsel %vm1137_vm0, %v7521_v5, 0.0  ;;  %v1166_v10 = vsel %vm1137_vm0, %v7524_v6, 0.0  ;;  %v7536_v11 = vld [vmem:[%s7515_s16 + $0x20] sm:$0xff]  ;;  %v7541_v14 = vld [vmem:[%s7515_s16 + $0x28] sm:$0xff] }
  0x12   : > { %1250 = vmatpush.msra.mxu0 %v1155_v3  ;;  %1431 = vmatpush.msra.mxu2 %v1155_v3  ;;  %v1165_v12 = vadd.f32 %v1164_v9, %v1163_v8  ;;  %v1168_v13 = vsel %vm1137_vm0, %v7527_v7, 0.0  ;;  %v1170_v16 = vsel %vm1137_vm0, %v7536_v11, 0.0  ;;  %v7546_v17 = vld [vmem:[%s7515_s16 + $0x30] sm:$0xff]  ;;  %v1172_v19 = vsel %vm1137_vm0, %v7541_v14, 0.0  ;;  %v7551_v20 = vld [vmem:[%s7515_s16 + $0x38] sm:$0xff]  ;;  %v7556_v23 = vld [vmem:[%s7515_s16 + $0x40] sm:$0xff] }
  0x13   : > { %v1174_v22 = vsel %vm1137_vm0, %v7546_v17, 0.0  ;;  %v1176_v25 = vsel %vm1137_vm0, %v7551_v20, 0.0  ;;  %v7561_v26 = vld [vmem:[%s7515_s16 + $0x48] sm:$0xff]  ;;  %v1178_v28 = vsel %vm1137_vm0, %v7556_v23, 0.0  ;;  %v7566_v29 = vld [vmem:[%s7515_s16 + $0x50] sm:$0xff]  ;;  %v7571_v32 = vld [vmem:[%s7515_s16 + $0x58] sm:$0xff] }
  0x14   : > { %v1167_v15 = vadd.f32 %v1166_v10, %v1165_v12  ;;  %v1180_v31 = vsel %vm1137_vm0, %v7561_v26, 0.0  ;;  %v1182_v34 = vsel %vm1137_vm0, %v7566_v29, 0.0  ;;  %v7576_v35 = vld [vmem:[%s7515_s16 + $0x60] sm:$0xff]  ;;  %v1184_v37 = vsel %vm1137_vm0, %v7571_v32, 0.0  ;;  %v7581_v38 = vld [vmem:[%s7515_s16 + $0x68] sm:$0xff]  ;;  %v7586_v41 = vld [vmem:[%s7515_s16 + $0x70] sm:$0xff] }
  0x15   : > { %v1186_v40 = vsel %vm1137_vm0, %v7576_v35, 0.0  ;;  %v1188_v43 = vsel %vm1137_vm0, %v7581_v38, 0.0  ;;  %v7591_v44 = vld [vmem:[%s7515_s16 + $0x78] sm:$0xff]  ;;  %v1190_v46 = vsel %vm1137_vm0, %v7586_v41, 0.0  ;;  %v7596_v47 = vld [vmem:[%s7515_s16 + $0x80] sm:$0xff]  ;;  %v7601_v50 = vld [vmem:[%s7515_s16 + $0x88] sm:$0xff] }
  0x16   : > { %v1169_v18 = vadd.f32 %v1168_v13, %v1167_v15  ;;  %v1192_v49 = vsel %vm1137_vm0, %v7591_v44, 0.0  ;;  %v1194_v52 = vsel %vm1137_vm0, %v7596_v47, 0.0  ;;  %v7606_v53 = vld [vmem:[%s7515_s16 + $0x90] sm:$0xff]  ;;  %v1196_v55 = vsel %vm1137_vm0, %v7601_v50, 0.0  ;;  %v7611_v56 = vld [vmem:[%s7515_s16 + $0x98] sm:$0xff]  ;;  %v7616_v59 = vld [vmem:[%s7515_s16 + $0xa0] sm:$0xff] }
  0x17   : > { %v1198_v58 = vsel %vm1137_vm0, %v7606_v53, 0.0  ;;  %v1200_v61 = vsel %vm1137_vm0, %v7611_v56, 0.0  ;;  %v7621_v62 = vld [vmem:[%s7515_s16 + $0xa8] sm:$0xff]  ;;  %v1202_v0 = vsel %vm1137_vm0, %v7616_v59, 0.0  ;;  %v7626_v1 = vld [vmem:[%s7515_s16 + $0xb0] sm:$0xff]  ;;  %v7631_v8 = vld [vmem:[%s7515_s16 + $0xb8] sm:$0xff] }
  0x18   : > { %v1171_v21 = vadd.f32 %v1170_v16, %v1169_v18  ;;  %v1204_v3 = vsel %vm1137_vm0, %v7621_v62, 0.0  ;;  %v1206_v10 = vsel %vm1137_vm0, %v7626_v1, 0.0  ;;  %v7636_v12 = vld [vmem:[%s7515_s16 + $0xc0] sm:$0xff]  ;;  %v1208_v15 = vsel %vm1137_vm0, %v7631_v8, 0.0  ;;  %v7641_v16 = vld [vmem:[%s7515_s16 + $0xc8] sm:$0xff] }
  0x1a   : > { %v1173_v24 = vadd.f32 %v1172_v19, %v1171_v21  ;;  %v1162_v19 = vld [vmem:[%s11424_s4 + $0x18] sm:$0xff]  ;;  %v1161_v21 = vld [vmem:[%s11424_s4 + $0x10] sm:$0xff] }
  0x1b   : > { %1271 = vmatpush.msra.mxu1 %v1162_v19  ;;  %1463 = vmatpush.msra.mxu3 %v1162_v19 }
  0x1c   : > { %v1175_v27 = vadd.f32 %v1174_v22, %v1173_v24  ;;  %v1210_v22 = vsel %vm1137_vm0, %v7636_v12, 0.0  ;;  %v7652_v24 = vld [vmem:[%s7515_s16 + $0xd0] sm:$0xff] }
  0x1d   : > { %1272 = vmatpush.msra.mxu1 %v1161_v21  ;;  %1464 = vmatpush.msra.mxu3 %v1161_v21 }
  0x1e   : > { %v1177_v30 = vadd.f32 %v1176_v25, %v1175_v27  ;;  %v1212_v27 = vsel %vm1137_vm0, %v7641_v16, 0.0 }
  0x20   : > { %v1179_v33 = vadd.f32 %v1178_v28, %v1177_v30  ;;  %v7657_v28 = vld [vmem:[%s7515_s16 + $0xd8] sm:$0xff] }
  0x22   : > { %v1181_v36 = vadd.f32 %v1180_v31, %v1179_v33  ;;  %v1214_v31 = vsel %vm1137_vm0, %v7652_v24, 0.0  ;;  %v7662_v33 = vld [vmem:[%s7515_s16 + $0xe0] sm:$0xff] }
  0x24   : > { %v1183_v39 = vadd.f32 %v1182_v34, %v1181_v36  ;;  %v1216_v36 = vsel %vm1137_vm0, %v7657_v28, 0.0 }
  0x26   : > { %v1185_v42 = vadd.f32 %v1184_v37, %v1183_v39  ;;  %v7667_v37 = vld [vmem:[%s7515_s16 + $0xe8] sm:$0xff] }
  0x28   : > { %v1187_v45 = vadd.f32 %v1186_v40, %v1185_v42  ;;  %v1218_v40 = vsel %vm1137_vm0, %v7662_v33, 0.0  ;;  %v7672_v42 = vld [vmem:[%s7515_s16 + $0xf0] sm:$0xff] }
  0x2a   : > { %v1189_v48 = vadd.f32 %v1188_v43, %v1187_v45  ;;  %v1220_v45 = vsel %vm1137_vm0, %v7667_v37, 0.0 }
  0x2c   : > { %v1191_v51 = vadd.f32 %v1190_v46, %v1189_v48  ;;  %v7677_v46 = vld [vmem:[%s7515_s16 + $0xf8] sm:$0xff] }
  0x2e   : > { %v1193_v54 = vadd.f32 %v1192_v49, %v1191_v51  ;;  %v1222_v49 = vsel %vm1137_vm0, %v7672_v42, 0.0 }
  0x30   : > { %v1195_v57 = vadd.f32 %v1194_v52, %v1193_v54  ;;  %v1224_v52 = vsel %vm1137_vm0, %v7677_v46, 0.0 }
  0x32   : > { %v1197_v60 = vadd.f32 %v1196_v55, %v1195_v57 }
  0x34   : > { %v1199_v63 = vadd.f32 %v1198_v58, %v1197_v60 }
  0x36   : > { %v1201_v2 = vadd.f32 %v1200_v61, %v1199_v63 }
  0x38   : > { %v1203_v9 = vadd.f32 %v1202_v0, %v1201_v2  ;;  %v1160_v2 = vld [vmem:[%s11424_s4 + $0x8] sm:$0xff] }
  0x39   : > { %1273 = vmatpush.msra.mxu1 %v1160_v2  ;;  %1465 = vmatpush.msra.mxu3 %v1160_v2 }
  0x3a   : > { %v1205_v13 = vadd.f32 %v1204_v3, %v1203_v9  ;;  %v1159_v3 = vld [vmem:[%s11424_s4] sm:$0xff] }
  0x3b   : > { %1274 = vmatpush.msra.mxu1 %v1159_v3  ;;  %1466 = vmatpush.msra.mxu3 %v1159_v3 }
  0x3c   : > { %v1207_v18 = vadd.f32 %v1206_v10, %v1205_v13 }
  0x3e   : > { %v1209_v25 = vadd.f32 %v1208_v15, %v1207_v18 }
  0x40   : > { %v1211_v30 = vadd.f32 %v1210_v22, %v1209_v25 }
  0x42   : > { %v1213_v34 = vadd.f32 %v1212_v27, %v1211_v30 }
  0x44   : > { %v1215_v39 = vadd.f32 %v1214_v31, %v1213_v34 }
  0x46   : > { %v1217_v43 = vadd.f32 %v1216_v36, %v1215_v39 }
  0x48   : > { %v1219_v48 = vadd.f32 %v1218_v40, %v1217_v43 }
  0x4a   : > { %v1221_v51 = vadd.f32 %v1220_v45, %v1219_v48 }
  0x4c   : > { %v1223_v54 = vadd.f32 %v1222_v49, %v1221_v51 }
  0x4e   : > { %v1225_v55 = vadd.f32 %v1224_v52, %v1223_v54 }
  0x50   : > { %v1226_v57 = vrot.slane %v1225_v55, 4 }
  0x52   : > { %v1227_v58 = vadd.f32 %v1226_v57, %v1225_v55 }
  0x54   : > { %v1228_v60 = vrot.slane %v1227_v58, 2 }
  0x56   : > { %v1229_v61 = vadd.f32 %v1228_v60, %v1227_v58 }
  0x58   : > { %v1230_v63 = vrot.slane %v1229_v61, 1 }
  0x5a   : > { %v1231_v0 = vadd.f32 %v1230_v63, %v1229_v61 }
  0x5c   : > { %6522 = vmatmul.msk.f32.vlgmr.msra.gmra.mxu0 %vm1137_vm0, %v1231_v0 }
  0xd9   : > { %v1252_v9 = vpop.f32.mrf.mxu0 }
  0xda   : > { %v1255_v10 = vmul.f32 0.00390625, %v1252_v9 }
  0xdc   : > { %6523 = vmatmul.msk.f32.vlgmr.msra.gmra.mxu1 %vm1137_vm0, %v1255_v10 }
 0x159   : > { %v1276_v13 = vpop.f32.mrf.mxu1 }
 0x15a   : > { %v7691_v15 = vperm.slane %v1276_v13, 0 }
 0x15c   : > { %v7695_v18 = vsub.f32 %v7518_v4, %v7691_v15  ;;  %v7699_v19 = vsub.f32 %v7521_v5, %v7691_v15  ;;  %v7703_v21 = vsub.f32 %v7524_v6, %v7691_v15  ;;  %v7707_v22 = vsub.f32 %v7527_v7, %v7691_v15 }
 0x15d   : > { %v7715_v4 = vsub.f32 %v7536_v11, %v7691_v15  ;;  %v7721_v6 = vsub.f32 %v7541_v14, %v7691_v15  ;;  %v7729_v36 = vsub.f32 %v7546_v17, %v7691_v15  ;;  %v7736_v14 = vsub.f32 %v7551_v20, %v7691_v15 }
 0x15e   : > { %v1312_v25 = vmul.f32 %v7695_v18, %v7695_v18  ;;  %v1313_v27 = vmul.f32 %v7699_v19, %v7699_v19  ;;  %v1314_v5 = vmul.f32 %v7703_v21, %v7703_v21  ;;  %v1315_v7 = vmul.f32 %v7707_v22, %v7707_v22 }
 0x15f   : > { %v1316_v11 = vmul.f32 %v7715_v4, %v7715_v4  ;;  %v1317_v43 = vmul.f32 %v7721_v6, %v7721_v6  ;;  %v7743_v17 = vsub.f32 %v7556_v23, %v7691_v15  ;;  %v1318_v49 = vmul.f32 %v7729_v36, %v7729_v36 }
 0x160   : > { %v1344_v30 = vsel %vm1137_vm0, %v1312_v25, 0.0  ;;  %v1345_v31 = vsel %vm1137_vm0, %v1313_v27, 0.0  ;;  %v1347_v39 = vsel %vm1137_vm0, %v1314_v5, 0.0  ;;  %v1349_v45 = vsel %vm1137_vm0, %v1315_v7, 0.0 }
 0x161   : > { %v1346_v34 = vadd.f32 %v1345_v31, %v1344_v30  ;;  %v1351_v51 = vsel %vm1137_vm0, %v1316_v11, 0.0  ;;  %v7750_v20 = vsub.f32 %v7561_v26, %v7691_v15  ;;  %v1319_v54 = vmul.f32 %v7736_v14, %v7736_v14 }
 0x162   : > { %v1353_v55 = vsel %vm1137_vm0, %v1317_v43, 0.0  ;;  %v7757_v23 = vsub.f32 %v7566_v29, %v7691_v15  ;;  %v1320_v58 = vmul.f32 %v7743_v17, %v7743_v17  ;;  %v1355_v60 = vsel %vm1137_vm0, %v1318_v49, 0.0 }
 0x163   : > { %v1348_v40 = vadd.f32 %v1347_v39, %v1346_v34  ;;  %v7764_v26 = vsub.f32 %v7571_v32, %v7691_v15  ;;  %v1321_v63 = vmul.f32 %v7750_v20, %v7750_v20  ;;  %v1357_v0 = vsel %vm1137_vm0, %v1319_v54, 0.0 }
 0x164   : > { %v7771_v29 = vsub.f32 %v7576_v35, %v7691_v15  ;;  %v1322_v3 = vmul.f32 %v7757_v23, %v7757_v23  ;;  %v1359_v9 = vsel %vm1137_vm0, %v1320_v58, 0.0  ;;  %v7778_v32 = vsub.f32 %v7581_v38, %v7691_v15 }
 0x165   : > { %v1350_v48 = vadd.f32 %v1349_v45, %v1348_v40  ;;  %v1323_v13 = vmul.f32 %v7764_v26, %v7764_v26  ;;  %v1361_v25 = vsel %vm1137_vm0, %v1321_v63, 0.0  ;;  %v7785_v35 = vsub.f32 %v7586_v41, %v7691_v15 }
 0x166   : > { %v1324_v5 = vmul.f32 %v7771_v29, %v7771_v29  ;;  %v1363_v7 = vsel %vm1137_vm0, %v1322_v3, 0.0  ;;  %v7792_v38 = vsub.f32 %v7591_v44, %v7691_v15  ;;  %v1325_v31 = vmul.f32 %v7778_v32, %v7778_v32 }
 0x167   : > { %v1352_v52 = vadd.f32 %v1351_v51, %v1350_v48  ;;  %v1365_v34 = vsel %vm1137_vm0, %v1323_v13, 0.0  ;;  %v7799_v41 = vsub.f32 %v7596_v47, %v7691_v15  ;;  %v1326_v39 = vmul.f32 %v7785_v35, %v7785_v35 }
 0x168   : > { %v1367_v40 = vsel %vm1137_vm0, %v1324_v5, 0.0  ;;  %v7806_v44 = vsub.f32 %v7601_v50, %v7691_v15  ;;  %v1327_v45 = vmul.f32 %v7792_v38, %v7792_v38  ;;  %v1369_v48 = vsel %vm1137_vm0, %v1325_v31, 0.0 }
 0x169   : > { %v1354_v57 = vadd.f32 %v1353_v55, %v1352_v52  ;;  %v7813_v47 = vsub.f32 %v7606_v53, %v7691_v15  ;;  %v1328_v51 = vmul.f32 %v7799_v41, %v7799_v41  ;;  %v1371_v52 = vsel %vm1137_vm0, %v1326_v39, 0.0 }
 0x16a   : > { %v7820_v50 = vsub.f32 %v7611_v56, %v7691_v15  ;;  %v1329_v55 = vmul.f32 %v7806_v44, %v7806_v44  ;;  %v7827_v53 = vsub.f32 %v7616_v59, %v7691_v15  ;;  %v7834_v56 = vsub.f32 %v7621_v62, %v7691_v15 }
 0x16b   : > { %v1356_v61 = vadd.f32 %v1355_v60, %v1354_v57  ;;  %v1373_v57 = vsel %vm1137_vm0, %v1327_v45, 0.0  ;;  %v1330_v60 = vmul.f32 %v7813_v47, %v7813_v47  ;;  %v7841_v59 = vsub.f32 %v7626_v1, %v7691_v15 }
 0x16c   : > { %v7848_v62 = vsub.f32 %v7631_v8, %v7691_v15  ;;  %v7855_v1 = vsub.f32 %v7636_v12, %v7691_v15  ;;  %v7862_v8 = vsub.f32 %v7641_v16, %v7691_v15  ;;  %v7869_v12 = vsub.f32 %v7652_v24, %v7691_v15 }
 0x16d   : > { %v1358_v2 = vadd.f32 %v1357_v0, %v1356_v61  ;;  %v1375_v61 = vsel %vm1137_vm0, %v1328_v51, 0.0  ;;  %v1331_v0 = vmul.f32 %v7820_v50, %v7820_v50  ;;  %v7876_v16 = vsub.f32 %v7657_v28, %v7691_v15 }
 0x16e   : > { %v7883_v24 = vsub.f32 %v7662_v33, %v7691_v15  ;;  %v7890_v28 = vsub.f32 %v7667_v37, %v7691_v15  ;;  %v7897_v33 = vsub.f32 %v7672_v42, %v7691_v15  ;;  %v7904_v37 = vsub.f32 %v7677_v46, %v7691_v15 }
 0x16f   : > { %v1360_v10 = vadd.f32 %v1359_v9, %v1358_v2  ;;  %v1377_v2 = vsel %vm1137_vm0, %v1329_v55, 0.0  ;;  %v1332_v9 = vmul.f32 %v7827_v53, %v7827_v53 }
 0x170   : > { %v1342_v42 = vmul.f32 %v7897_v33, %v7897_v33 }
 0x171   : > { %v1362_v27 = vadd.f32 %v1361_v25, %v1360_v10  ;;  %v1379_v10 = vsel %vm1137_vm0, %v1330_v60, 0.0  ;;  %v1333_v25 = vmul.f32 %v7834_v56, %v7834_v56 }
 0x172   : > { %v1403_v46 = vsel %vm1137_vm0, %v1342_v42, 0.0  ;;  %v7936_v42 = vld [vmem:[%s11425_s5 + $0x38] sm:$0xff] }
 0x173   : > { %v1364_v30 = vadd.f32 %v1363_v7, %v1362_v27  ;;  %v1381_v27 = vsel %vm1137_vm0, %v1331_v0, 0.0  ;;  %v1334_v7 = vmul.f32 %v7841_v59, %v7841_v59  ;;  %7218 = vmatpush.bf16.msrb.mxu3 %v7936_v42 }
 0x175   : > { %v1366_v11 = vadd.f32 %v1365_v34, %v1364_v30  ;;  %v1383_v30 = vsel %vm1137_vm0, %v1332_v9, 0.0  ;;  %v1335_v34 = vmul.f32 %v7848_v62, %v7848_v62 }
 0x177   : > { %v1368_v43 = vadd.f32 %v1367_v40, %v1366_v11  ;;  %v1385_v11 = vsel %vm1137_vm0, %v1333_v25, 0.0  ;;  %v1336_v40 = vmul.f32 %v7855_v1, %v7855_v1  ;;  %v1343_v25 = vmul.f32 %v7904_v37, %v7904_v37 }
 0x179   : > { %v1370_v49 = vadd.f32 %v1369_v48, %v1368_v43  ;;  %v1387_v43 = vsel %vm1137_vm0, %v1334_v7, 0.0  ;;  %v1337_v48 = vmul.f32 %v7862_v8, %v7862_v8  ;;  %v1405_v7 = vsel %vm1137_vm0, %v1343_v25, 0.0 }
 0x17b   : > { %v1372_v54 = vadd.f32 %v1371_v52, %v1370_v49  ;;  %v1389_v49 = vsel %vm1137_vm0, %v1335_v34, 0.0  ;;  %v1338_v52 = vmul.f32 %v7869_v12, %v7869_v12 }
 0x17d   : > { %v1374_v58 = vadd.f32 %v1373_v57, %v1372_v54  ;;  %v1391_v54 = vsel %vm1137_vm0, %v1336_v40, 0.0  ;;  %v1339_v57 = vmul.f32 %v7876_v16, %v7876_v16 }
 0x17f   : > { %v1376_v63 = vadd.f32 %v1375_v61, %v1374_v58  ;;  %v1393_v58 = vsel %vm1137_vm0, %v1337_v48, 0.0  ;;  %v1340_v61 = vmul.f32 %v7883_v24, %v7883_v24 }
 0x181   : > { %v1378_v3 = vadd.f32 %v1377_v2, %v1376_v63  ;;  %v1395_v63 = vsel %vm1137_vm0, %v1338_v52, 0.0  ;;  %v1341_v2 = vmul.f32 %v7890_v28, %v7890_v28 }
 0x183   : > { %v1380_v13 = vadd.f32 %v1379_v10, %v1378_v3  ;;  %v1397_v3 = vsel %vm1137_vm0, %v1339_v57, 0.0  ;;  %v1399_v10 = vsel %vm1137_vm0, %v1340_v61, 0.0  ;;  %v7159_v61 = vld [vmem:[%s11425_s5 + $0x48] sm:$0xff] }
 0x184   : > { %1823 = vmatpush.bf16.msrb.mxu0 %v7159_v61  ;;  %7214 = vmatpush.bf16.msrb.mxu1 %v7159_v61 }
 0x185   : > { %v1382_v5 = vadd.f32 %v1381_v27, %v1380_v13  ;;  %v1401_v27 = vsel %vm1137_vm0, %v1341_v2, 0.0 }
 0x187   : > { %v1384_v31 = vadd.f32 %v1383_v30, %v1382_v5 }
 0x189   : > { %v1386_v39 = vadd.f32 %v1385_v11, %v1384_v31 }
 0x18b   : > { %v1388_v45 = vadd.f32 %v1387_v43, %v1386_v39 }
 0x18d   : > { %v1390_v51 = vadd.f32 %v1389_v49, %v1388_v45 }
 0x18f   : > { %v1392_v55 = vadd.f32 %v1391_v54, %v1390_v51 }
 0x191   : > { %v1394_v60 = vadd.f32 %v1393_v58, %v1392_v55 }
 0x193   : > { %v1396_v0 = vadd.f32 %v1395_v63, %v1394_v60  ;;  %v7158_v63 = vld [vmem:[%s11425_s5 + $0x40] sm:$0xff] }
 0x194   : > { %1824 = vmatpush.bf16.msrb.mxu0 %v7158_v63  ;;  %7215 = vmatpush.bf16.msrb.mxu1 %v7158_v63 }
 0x195   : > { %v1398_v9 = vadd.f32 %v1397_v3, %v1396_v0  ;;  %v1153_v0 = vld [vmem:[%s11421_s1] sm:$0x1] }
 0x197   : > { %v1400_v13 = vadd.f32 %v1399_v10, %v1398_v9  ;;  %v7931_v9 = vld [vmem:[%s11425_s5 + $0x78] sm:$0xff]  ;;  %v7165_v10 = vld [vmem:[%s11425_s5 + $0x8] sm:$0xff] }
 0x198   : > { %7216 = vmatpush.bf16.msrb.mxu2 %v7931_v9  ;;  %2604 = vmatpush.bf16.msra.mxu0 %v7165_v10 }
 0x199   : > { %v1402_v5 = vadd.f32 %v1401_v27, %v1400_v13  ;;  %v7944_v13 = vld [vmem:[%s11422_s2] ss:$0 sm:$0xff]  ;;  %v7953_v27 = vld [vmem:[%s11425_s5 + $0x70] sm:$0xff] }
 0x19b   : > { %v1404_v15 = vadd.f32 %v1403_v46, %v1402_v5  ;;  %v7958_v5 = vld [vmem:[%s11425_s5 + $0x30] sm:$0xff] }
 0x19c   : > { %7217 = vmatpush.bf16.msrb.mxu2 %v7953_v27  ;;  %7219 = vmatpush.bf16.msrb.mxu3 %v7958_v5 }
 0x19d   : > { %v1406_v30 = vadd.f32 %v1405_v7, %v1404_v15 }
 0x19f   : > { %v1407_v31 = vrot.slane %v1406_v30, 4 }
 0x1a1   : > { %v1408_v34 = vadd.f32 %v1407_v31, %v1406_v30 }
 0x1a3   : > { %v1409_v11 = vrot.slane %v1408_v34, 2 }
 0x1a5   : > { %v1410_v39 = vadd.f32 %v1409_v11, %v1408_v34 }
 0x1a7   : > { %v1411_v40 = vrot.slane %v1410_v39, 1 }
 0x1a9   : > { %v1412_v43 = vadd.f32 %v1411_v40, %v1410_v39 }
 0x1ab   : > { %6524 = vmatmul.msk.f32.vlgmr.msra.gmra.mxu2 %vm1137_vm0, %v1412_v43 }
 0x22e   : > { %v1433_v45 = vpop.f32.mrf.mxu2 }
 0x22f   : > { %v1436_v48 = vmul.f32 0.00390625, %v1433_v45 }
 0x231   : > { %v1437_v49 = vadd.f32 1e-05, %v1436_v48 }
 0x233   : > { %7234 = vrsqrt.f32 %v1437_v49  ;;  %vm1444_vm2 = vweird.f32 %v1437_v49 }
 0x239   : > { %v7235_v51 = vpop.eup %7234 }
 0x23a   : > { %v1439_v52 = vmul.f32 %v7235_v51, %v1437_v49  ;;  %vm1445_vm1 = vweird.f32 %v7235_v51 }
 0x23b   : > { %vm1446_vm3 = vmor %vm1444_vm2, %vm1445_vm1 }
 0x23c   : > { %v1440_v54 = vmul.f32 %v7235_v51, %v1439_v52 }
 0x23e   : > { %v1441_v55 = vmul.f32 0.5, %v1440_v54 }
 0x240   : > { %v1442_v57 = vsub.f32 1.5, %v1441_v55 }
 0x242   : > { %v1443_v58 = vmul.f32 %v7235_v51, %v1442_v57 }
 0x244   : > { %v1447_v60 = vsel %vm1446_vm3, %v7235_v51, %v1443_v58 }
 0x245   : > { %6525 = vmatmul.msk.f32.vlgmr.msra.gmra.mxu3 %vm1137_vm0, %v1447_v60 }
 0x2c8   : > { %v1468_v2 = vpop.f32.mrf.mxu3 }
 0x2c9   : > { %v1471_v3 = vmul.f32 %v1468_v2, %v1153_v0 }
 0x2cb   : > { %v7946_v25 = vperm.slane %v1471_v3, 0 }
 0x2cd   : > { %v1494_v46 = vmul.f32 %v7946_v25, %v7834_v56  ;;  %v1495_v15 = vmul.f32 %v7946_v25, %v7841_v59  ;;  %v1496_v7 = vmul.f32 %v7946_v25, %v7848_v62  ;;  %v1497_v30 = vmul.f32 %v7946_v25, %v7855_v1 }
 0x2ce   : > { %v1498_v31 = vmul.f32 %v7946_v25, %v7862_v8  ;;  %v1473_v34 = vmul.f32 %v7946_v25, %v7695_v18  ;;  %v1474_v56 = vmul.f32 %v7946_v25, %v7699_v19  ;;  %v1499_v59 = vmul.f32 %v7946_v25, %v7869_v12 }
 0x2cf   : > { %v7973_v11 = vadd.f32 %v7944_v13, %v1494_v46  ;;  %v7981_v62 = vadd.f32 %v7944_v13, %v1496_v7  ;;  %v7984_v1 = vadd.f32 %v7944_v13, %v1497_v30  ;;  %v7995_v19 = vmul.f32 %v7946_v25, %v7820_v50 }
 0x2d0   : > { %v7987_v8 = vadd.f32 %v7944_v13, %v1498_v31  ;;  %v7990_v18 = vadd.f32 %v7944_v13, %v1473_v34  ;;  %v7998_v12 = vadd.f32 %v7944_v13, %v1474_v56  ;;  %v1500_v39 = vmul.f32 %v7946_v25, %v7876_v16 }
 0x2d1   : > { %v8003_v40 = vadd.f32 %v7944_v13, %v1495_v15  ;;  %v8006_v43 = vmul.f32 0.5, %v7973_v11  ;;  %v1563_v45 = vmul.f32 0.5, %v7981_v62  ;;  %v1564_v48 = vmul.f32 0.5, %v7984_v1 }
 0x2d2   : > { %v1565_v49 = vmul.f32 0.5, %v7987_v8  ;;  %v1540_v50 = vmul.f32 0.5, %v7990_v18  ;;  %v8013_v51 = vadd.f32 %v7944_v13, %v1499_v59  ;;  %v8016_v52 = vadd.f32 %v7944_v13, %v1500_v39 }
 0x2d3   : > { %v1541_v16 = vmul.f32 0.5, %v7998_v12  ;;  %v1483_v54 = vmul.f32 %v7946_v25, %v7757_v23  ;;  %v1484_v55 = vmul.f32 %v7946_v25, %v7764_v26  ;;  %v1480_v57 = vmul.f32 %v7946_v25, %v7736_v14 }
 0x2d4   : > { %7236 = vtanh.f32 %v1563_v45  ;;  %v1566_v58 = vmul.f32 0.5, %v8013_v51  ;;  %v1567_v60 = vmul.f32 0.5, %v8016_v52  ;;  %v1481_v61 = vmul.f32 %v7946_v25, %v7743_v17 }
 0x2d5   : > { %7238 = vtanh.f32 %v1564_v48  ;;  %v8030_v63 = vadd.f32 %v7944_v13, %v1483_v54  ;;  %v8033_v23 = vadd.f32 %v7944_v13, %v1484_v55  ;;  %v1482_v26 = vmul.f32 %v7946_v25, %v7750_v20 }
 0x2d6   : > { %7240 = vtanh.f32 %v1565_v49  ;;  %v8038_v14 = vadd.f32 %v7944_v13, %v1480_v57  ;;  %v8041_v0 = vadd.f32 %v7944_v13, %v1481_v61  ;;  %v1475_v17 = vmul.f32 %v7946_v25, %v7703_v21 }
 0x2d7   : > { %v8046_v2 = vmul.f32 0.5, %v8003_v40  ;;  %7242 = vtanh.f32 %v1540_v50  ;;  %v1550_v3 = vmul.f32 0.5, %v8030_v63  ;;  %v8050_v10 = vadd.f32 %v7944_v13, %v1482_v26 }
 0x2d8   : > { %7244 = vtanh.f32 %v1541_v16  ;;  %v1551_v20 = vmul.f32 0.5, %v8033_v23  ;;  %v1547_v46 = vmul.f32 0.5, %v8038_v14  ;;  %v1476_v15 = vmul.f32 %v7946_v25, %v7707_v22 }
 0x2d9   : > { %7246 = vtanh.f32 %v1566_v58  ;;  %v1548_v21 = vmul.f32 0.5, %v8041_v0  ;;  %v8058_v7 = vadd.f32 %v7944_v13, %v1475_v17  ;;  %v1501_v30 = vmul.f32 %v7946_v25, %v7883_v24 }
 0x2da   : > { %v7237_v31 = vpop.eup %7236  ;;  %7248 = vtanh.f32 %v1567_v60  ;;  %v1549_v34 = vmul.f32 0.5, %v8050_v10  ;;  %v8064_v56 = vadd.f32 %v7944_v13, %v1476_v15  ;;  %v1502_v59 = vmul.f32 %v7946_v25, %v7890_v28 }
 0x2db   : > { %v7239_v22 = vpop.eup %7238  ;;  %v1627_v39 = vmul.f32 0.5, %v7237_v31  ;;  %7250 = vtanh.f32 %v1550_v3  ;;  %v1542_v45 = vmul.f32 0.5, %v8058_v7  ;;  %v8070_v48 = vadd.f32 %v7944_v13, %v1501_v30 }
 0x2dc   : > { %v7241_v49 = vpop.eup %7240  ;;  %v1628_v24 = vmul.f32 0.5, %v7239_v22  ;;  %7252 = vtanh.f32 %v1551_v20  ;;  %v1543_v50 = vmul.f32 0.5, %v8064_v56  ;;  %v8074_v16 = vadd.f32 %v7944_v13, %v1502_v59 }
 0x2dd   : > { %v7243_v54 = vpop.eup %7242  ;;  %v1629_v55 = vmul.f32 0.5, %v7241_v49  ;;  %v1659_v57 = vadd.f32 0.5, %v1627_v39  ;;  %7254 = vtanh.f32 %v1547_v46  ;;  %v1568_v28 = vmul.f32 0.5, %v8070_v48 }
 0x2de   : > { %v7245_v58 = vpop.eup %7244  ;;  %v1660_v60 = vadd.f32 0.5, %v1628_v24  ;;  %v1604_v61 = vmul.f32 0.5, %v7243_v54  ;;  %7256 = vtanh.f32 %v1548_v21  ;;  %v1569_v26 = vmul.f32 0.5, %v8074_v16 }
 0x2df   : > { %v7247_v17 = vpop.eup %7246  ;;  %v1661_v3 = vadd.f32 0.5, %v1629_v55  ;;  %v8079_v20 = vmul.f32 %v1659_v57, %v7981_v62  ;;  %v1605_v15 = vmul.f32 0.5, %v7245_v58  ;;  %7258 = vtanh.f32 %v1549_v34 }
 0x2e0   : > { %v7249_v30 = vpop.eup %7248  ;;  %v8082_v31 = vmul.f32 %v1660_v60, %v7984_v1  ;;  %v1636_v46 = vadd.f32 0.5, %v1604_v61  ;;  %v1630_v59 = vmul.f32 0.5, %v7247_v17  ;;  %7260 = vtanh.f32 %v1542_v45 }
 0x2e1   : > { %v7251_v22 = vpop.eup %7250  ;;  %v8085_v39 = vmul.f32 %v1661_v3, %v7987_v8  ;;  %1740 = vst.msk [vmem:[#allocation2 + $0xc9] sm:$0xff] %vm1137_vm0, %v8079_v20  ;;  %v1637_v21 = vadd.f32 0.5, %v1605_v15  ;;  %v1631_v49 = vmul.f32 0.5, %v7249_v30  ;;  %7262 = vtanh.f32 %v1543_v50 }
 0x2e2   : > { %v7253_v62 = vpop.eup %7252  ;;  %1741 = vst.msk [vmem:[#allocation2 + $0xd1] sm:$0xff] %vm1137_vm0, %v8082_v31  ;;  %v1668_v1 = vmul.f32 %v1636_v46, %v7990_v18  ;;  %v1662_v34 = vadd.f32 0.5, %v1630_v59  ;;  %v1614_v24 = vmul.f32 0.5, %v7251_v22  ;;  %7264 = vtanh.f32 %v1568_v28 }
 0x2e3   : > { %v7255_v45 = vpop.eup %7254  ;;  %1742 = vst.msk [vmem:[#allocation2 + $0xd9] sm:$0xff] %vm1137_vm0, %v8085_v39  ;;  %v1669_v8 = vmul.f32 %v1637_v21, %v7998_v12  ;;  %v1663_v54 = vadd.f32 0.5, %v1631_v49  ;;  %v1615_v55 = vmul.f32 0.5, %v7253_v62  ;;  %7266 = vtanh.f32 %v1569_v26 }
 0x2e4   : > { %v7257_v57 = vpop.eup %7256  ;;  %1717 = vst.msk [vmem:[#allocation2 + $0x11] sm:$0xff] %vm1137_vm0, %v1668_v1  ;;  %v1694_v50 = vmul.f32 %v1662_v34, %v8013_v51  ;;  %v1646_v58 = vadd.f32 0.5, %v1614_v24  ;;  %v1611_v60 = vmul.f32 0.5, %v7255_v45  ;;  %v1485_v18 = vmul.f32 %v7946_v25, %v7771_v29 }
 0x2e5   : > { %v7259_v28 = vpop.eup %7258  ;;  %v1701_v61 = vpack.c.bf16 %v1669_v8, %v1668_v1  ;;  %1718 = vst.msk [vmem:[#allocation2 + $0x19] sm:$0xff] %vm1137_vm0, %v1669_v8  ;;  %v1695_v17 = vmul.f32 %v1663_v54, %v8016_v52  ;;  %v1647_v12 = vadd.f32 0.5, %v1615_v55  ;;  %v1612_v3 = vmul.f32 0.5, %v7257_v57 }
 0x2e6   : > { %v7261_v15 = vpop.eup %7260  ;;  %1743 = vst.msk [vmem:[#allocation2 + $0xe1] sm:$0xff] %vm1137_vm0, %v1694_v50  ;;  %v8103_v26 = vmul.f32 %v1646_v58, %v8030_v63  ;;  %v1613_v51 = vmul.f32 0.5, %v7259_v28  ;;  %v1643_v30 = vadd.f32 0.5, %v1611_v60  ;;  %v1486_v46 = vmul.f32 %v7946_v25, %v7778_v32 }
 0x2e7   : > { %v7263_v29 = vpop.eup %7262  ;;  %6538 = vmatmul.msk.bf16.vlgmr.msrb.gmra.mxu0 %vm1137_vm0, %v1701_v61  ;;  %v1714_v59 = vpack.c.bf16 %v1695_v17, %v1694_v50  ;;  %1744 = vst.msk [vmem:[#allocation2 + $0xe9] sm:$0xff] %vm1137_vm0, %v1695_v17  ;;  %v8110_v52 = vmul.f32 %v1647_v12, %v8033_v23  ;;  %v1644_v22 = vadd.f32 0.5, %v1612_v3  ;;  %v1606_v21 = vmul.f32 0.5, %v7261_v15 }
 0x2e8   : > { %v7265_v49 = vpop.eup %7264  ;;  %1727 = vst.msk [vmem:[#allocation2 + $0x61] sm:$0xff] %vm1137_vm0, %v8103_v26  ;;  %v1645_v63 = vadd.f32 0.5, %v1613_v51  ;;  %v8115_v62 = vmul.f32 %v1643_v30, %v8038_v14  ;;  %v1607_v32 = vmul.f32 0.5, %v7263_v29  ;;  %v8118_v1 = vadd.f32 %v7944_v13, %v1485_v18  ;;  %v7161_v14 = vld [vmem:[%s11425_s5 + $0x18] sm:$0xff] }
 0x2e9   : > { %v7267_v34 = vpop.eup %7266  ;;  %6551 = vmatmul.msk.bf16.vlgmr.msrb.gmra.mxu1 %vm1137_vm0, %v1714_v59  ;;  %1728 = vst.msk [vmem:[#allocation2 + $0x69] sm:$0xff] %vm1137_vm0, %v8110_v52  ;;  %v8124_v23 = vmul.f32 %v1644_v22, %v8041_v0  ;;  %v1638_v24 = vadd.f32 0.5, %v1606_v21  ;;  %v1632_v45 = vmul.f32 0.5, %v7265_v49  ;;  %v8127_v8 = vadd.f32 %v7944_v13, %v1486_v46 }
 0x2ea   : > { %v8133_v54 = vmul.f32 %v1645_v63, %v8050_v10  ;;  %1724 = vst.msk [vmem:[#allocation2 + $0x49] sm:$0xff] %vm1137_vm0, %v8115_v62  ;;  %v1639_v55 = vadd.f32 0.5, %v1607_v32  ;;  %v1633_v57 = vmul.f32 0.5, %v7267_v34  ;;  %v1552_v0 = vmul.f32 0.5, %v8118_v1  ;;  %2025 = vmatpush.bf16.msra.mxu1 %v7161_v14 }
 0x2eb   : > { %1725 = vst.msk [vmem:[#allocation2 + $0x51] sm:$0xff] %vm1137_vm0, %v8124_v23  ;;  %v8141_v50 = vmul.f32 %v1638_v24, %v8058_v7  ;;  %v1664_v58 = vadd.f32 0.5, %v1632_v45  ;;  %v1553_v60 = vmul.f32 0.5, %v8127_v8  ;;  %v1477_v10 = vmul.f32 %v7946_v25, %v7715_v4 }
 0x2ec   : > { %1726 = vst.msk [vmem:[#allocation2 + $0x59] sm:$0xff] %vm1137_vm0, %v8133_v54  ;;  %v8149_v18 = vmul.f32 %v1639_v55, %v8064_v56  ;;  %v1665_v28 = vadd.f32 0.5, %v1633_v57  ;;  %7268 = vtanh.f32 %v1552_v0  ;;  %v1478_v61 = vmul.f32 %v7946_v25, %v7721_v6 }
 0x2ed   : > { %1719 = vst.msk [vmem:[#allocation2 + $0x21] sm:$0xff] %vm1137_vm0, %v8141_v50  ;;  %v8156_v7 = vmul.f32 %v1664_v58, %v8070_v48  ;;  %7270 = vtanh.f32 %v1553_v60  ;;  %v8159_v4 = vadd.f32 %v7944_v13, %v1477_v10  ;;  %v1503_v17 = vmul.f32 %v7946_v25, %v7897_v33  ;;  %v7160_v10 = vld [vmem:[%s11425_s5 + $0x10] sm:$0xff] }
 0x2ee   : > { %7272 = vtanh.f32 %v8006_v43  ;;  %1720 = vst.msk [vmem:[#allocation2 + $0x29] sm:$0xff] %vm1137_vm0, %v8149_v18  ;;  %v8167_v6 = vmul.f32 %v1665_v28, %v8074_v16  ;;  %v8170_v56 = vadd.f32 %v7944_v13, %v1478_v61  ;;  %v1504_v48 = vmul.f32 %v7946_v25, %v7904_v37  ;;  %2026 = vmatpush.bf16.msra.mxu1 %v7160_v10 }
 0x2ef   : > { %v2148_v12 = vld [vmem:[#allocation2 + $0x61] sm:$0xff]  ;;  %1745 = vst.msk [vmem:[#allocation2 + $0xf1] sm:$0xff] %vm1137_vm0, %v8156_v7  ;;  %v1544_v33 = vmul.f32 0.5, %v8159_v4  ;;  %v8178_v43 = vadd.f32 %v7944_v13, %v1503_v17  ;;  %v1487_v3 = vmul.f32 %v7946_v25, %v7785_v35  ;;  %v1488_v16 = vmul.f32 %v7946_v25, %v7792_v38 }
 0x2f0   : > { %7274 = vtanh.f32 %v8046_v2  ;;  %v2149_v15 = vld [vmem:[#allocation2 + $0x69] sm:$0xff]  ;;  %1746 = vst.msk [vmem:[#allocation2 + $0xf9] sm:$0xff] %vm1137_vm0, %v8167_v6  ;;  %v1545_v37 = vmul.f32 0.5, %v8170_v56  ;;  %v8189_v51 = vadd.f32 %v7944_v13, %v1504_v48  ;;  %v1479_v30 = vmul.f32 %v7946_v25, %v7729_v36 }
 0x2f1   : > { %v8193_v46 = vpack.c.bf16 %v2149_v15, %v2148_v12  ;;  %7276 = vtanh.f32 %v1544_v33  ;;  %v1570_v35 = vmul.f32 0.5, %v8178_v43  ;;  %v8197_v38 = vadd.f32 %v7944_v13, %v1487_v3  ;;  %v2387_v10 = vld [vmem:[#allocation2 + $0x68] sm:$0xff] }
 0x2f2   : > { %v7269_v2 = vpop.eup %7268  ;;  %v2384_v29 = vld [vmem:[#allocation2 + $0x50] sm:$0xff]  ;;  %7278 = vtanh.f32 %v1545_v37  ;;  %v1571_v59 = vmul.f32 0.5, %v8189_v51  ;;  %v8201_v22 = vadd.f32 %v7944_v13, %v1488_v16  ;;  %v8204_v21 = vadd.f32 %v7944_v13, %v1479_v30  ;;  %2259 = vmatpush.bf16.msrb.mxu1 %v7931_v9 }
 0x2f3   : > { %v7271_v36 = vpop.eup %7270  ;;  %6598 = vmatmul.msk.bf16.vlgmr.msrb.gmra.mxu2 %vm1137_vm0, %v8193_v46  ;;  %v2385_v49 = vld [vmem:[#allocation2 + $0x58] sm:$0xff]  ;;  %v1616_v63 = vmul.f32 0.5, %v7269_v2  ;;  %7280 = vtanh.f32 %v1570_v35  ;;  %v1554_v32 = vmul.f32 0.5, %v8197_v38  ;;  %v1702_v45 = vpack.c.bf16 %v8149_v18, %v8141_v50 }
 0x2f4   : > { %v8209_v34 = vpop.eup %7272  ;;  %v8211_v24 = vpack.c.bf16 %v2385_v49, %v2384_v29  ;;  %v1617_v14 = vmul.f32 0.5, %v7271_v36  ;;  %7282 = vtanh.f32 %v1571_v59  ;;  %v11436_v55 = vmov 0.0  }
 0x2f5   : > { %1138 = vst.msk [vmem:[#allocation2] sm:$0xff] %vm1137_vm0, %v11436_v55  ;;  %v1648_v57 = vadd.f32 0.5, %v1616_v63  ;;  %v1555_v0 = vmul.f32 0.5, %v8201_v22  ;;  %7284 = vtanh.f32 %v1554_v32  ;;  %v1546_v58 = vmul.f32 0.5, %v8204_v21 }
 0x2f6   : > { %1139 = vst.msk [vmem:[#allocation2 + $0x8] sm:$0xff] %vm1137_vm0, %v11436_v55  ;;  %v7275_v60 = vpop.eup %7274  ;;  %6626 = vmatmul.msk.bf16.vlgmr.msrb.gmra.mxu3 %vm1137_vm0, %v8211_v24  ;;  %v1649_v50 = vadd.f32 0.5, %v1617_v14  ;;  %v1489_v18 = vmul.f32 %v7946_v25, %v7799_v41  ;;  %v1490_v28 = vmul.f32 %v7946_v25, %v7806_v44  ;;  %v8234_v17 = vmul.f32 %v7946_v25, %v7827_v53 }
 0x2f7   : > { %1142 = vst.msk [vmem:[#allocation2 + $0x111] sm:$0xff] %vm1137_vm0, %v11436_v55  ;;  %v7277_v61 = vpop.eup %7276  ;;  %6539 = vmatmul.msk.bf16.gmra.mxu0 %vm1137_vm0, %v1702_v45  ;;  %v1715_v48 = vpack.c.bf16 %v8167_v6, %v8156_v7  ;;  %v8240_v12 = vmul.f32 %v1648_v57, %v8118_v1  ;;  %7286 = vtanh.f32 %v1555_v0  ;;  %v8262_v3 = vadd.f32 %v7944_v13, %v7995_v19 }
 0x2f8   : > { %1141 = vst.msk [vmem:[#allocation2 + $0x10] sm:$0x1] %vm1140_vm4, %v11436_v55  ;;  %v7279_v41 = vpop.eup %7278  ;;  %v8245_v44 = vmul.f32 %v1649_v50, %v8127_v8  ;;  %v1608_v33 = vmul.f32 0.5, %v7277_v61  ;;  %7288 = vtanh.f32 %v1546_v58  ;;  %v8250_v53 = vadd.f32 %v7944_v13, %v1489_v18  ;;  %2260 = vmatpush.bf16.msrb.mxu1 %v7953_v27 }
 0x2f9   : > { %1143 = vst.msk [vmem:[#allocation2 + $0x119] sm:$0xff] %vm1137_vm0, %v11436_v55  ;;  %v7281_v7 = vpop.eup %7280  ;;  %6552 = vmatmul.msk.bf16.gmra.mxu1 %vm1137_vm0, %v1715_v48  ;;  %v1609_v1 = vmul.f32 0.5, %v7279_v41  ;;  %v8256_v6 = vadd.f32 %v7944_v13, %v1490_v28  ;;  %v1491_v8 = vmul.f32 %v7946_v25, %v7813_v47  ;;  %v1706_v35 = vpack.c.bf16 %v8110_v52, %v8103_v26 }
 0x2fa   : > { %1729 = vst.msk [vmem:[#allocation2 + $0x71] sm:$0xff] %vm1137_vm0, %v8240_v12  ;;  %v7283_v16 = vpop.eup %7282  ;;  %v1640_v15 = vadd.f32 0.5, %v1608_v33  ;;  %v1634_v37 = vmul.f32 0.5, %v7281_v7  ;;  %v1556_v30 = vmul.f32 0.5, %v8250_v53  ;;  %v1559_v50 = vmul.f32 0.5, %v8262_v3 }
 0x2fb   : > { %1730 = vst.msk [vmem:[#allocation2 + $0x79] sm:$0xff] %vm1137_vm0, %v8245_v44  ;;  %v7285_v2 = vpop.eup %7284  ;;  %v1641_v29 = vadd.f32 0.5, %v1609_v1  ;;  %v1635_v47 = vmul.f32 0.5, %v7283_v16  ;;  %v1557_v25 = vmul.f32 0.5, %v8256_v6  ;;  %v8274_v19 = vadd.f32 %v7944_v13, %v1491_v8 }
 0x2fc   : > { %1144 = vst.msk [vmem:[#allocation2 + $0x121] sm:$0x1] %vm1140_vm4, %v11436_v55  ;;  %v1672_v59 = vmul.f32 %v1640_v15, %v8159_v4  ;;  %v1666_v36 = vadd.f32 0.5, %v1634_v37  ;;  %v1618_v49 = vmul.f32 0.5, %v7285_v2  ;;  %7290 = vtanh.f32 %v1556_v30  ;;  %v2386_v4 = vld [vmem:[#allocation2 + $0x60] sm:$0xff] }
 0x2fd   : > { %v7287_v63 = vpop.eup %7286  ;;  %v1673_v32 = vmul.f32 %v1641_v29, %v8170_v56  ;;  %v1667_v9 = vadd.f32 0.5, %v1635_v47  ;;  %7292 = vtanh.f32 %v1557_v25  ;;  %v1558_v45 = vmul.f32 0.5, %v8274_v19 }
 0x2fe   : > { %v7289_v14 = vpop.eup %7288  ;;  %1721 = vst.msk [vmem:[#allocation2 + $0x31] sm:$0xff] %vm1137_vm0, %v1672_v59  ;;  %v1698_v57 = vmul.f32 %v1666_v36, %v8178_v43  ;;  %v1619_v0 = vmul.f32 0.5, %v7287_v63  ;;  %v1650_v58 = vadd.f32 0.5, %v1618_v49  ;;  %v1626_v28 = vmul.f32 0.5, %v7275_v60 }
 0x2ff   : > { %1722 = vst.msk [vmem:[#allocation2 + $0x39] sm:$0xff] %vm1137_vm0, %v1673_v32  ;;  %v1699_v56 = vmul.f32 %v1667_v9, %v8189_v51  ;;  %v1610_v18 = vmul.f32 0.5, %v7289_v14  ;;  %7294 = vtanh.f32 %v1558_v45  ;;  %v1528_v33 = vadd.f32 %v7944_v13, %v8234_v17 }
 0x300   : > { %1747 = vst.msk [vmem:[#allocation2 + $0x101] sm:$0xff] %vm1137_vm0, %v1698_v57  ;;  %v1651_v48 = vadd.f32 0.5, %v1619_v0  ;;  %v8287_v43 = vmul.f32 %v1650_v58, %v8197_v38  ;;  %7296 = vtanh.f32 %v1559_v50  ;;  %v8294_v60 = vpack.c.bf16 %v2387_v10, %v2386_v4 }
 0x301   : > { %v2150_v61 = vld [vmem:[#allocation2 + $0x71] sm:$0xff]  ;;  %1748 = vst.msk [vmem:[#allocation2 + $0x109] sm:$0xff] %vm1137_vm0, %v1699_v56  ;;  %v1642_v27 = vadd.f32 0.5, %v1610_v18  ;;  %v1625_v38 = vmul.f32 0.5, %v8209_v34  ;;  %v1560_v37 = vmul.f32 0.5, %v1528_v33  ;;  %v1707_v13 = vpack.c.bf16 %v8245_v44, %v8240_v12  ;;  %v1915_v12 = vld [vmem:[#allocation2 + $0x49] sm:$0xff] }
 0x302   : > { %v2151_v41 = vld [vmem:[#allocation2 + $0x79] sm:$0xff]  ;;  %v7291_v7 = vpop.eup %7290  ;;  %v8297_v1 = vmul.f32 %v1651_v48, %v8201_v22  ;;  %1731 = vst.msk [vmem:[#allocation2 + $0x81] sm:$0xff] %vm1137_vm0, %v8287_v43  ;;  %v1658_v30 = vadd.f32 0.5, %v1626_v28  ;;  %v1703_v2 = vpack.c.bf16 %v1673_v32, %v1672_v59  ;;  %v1716_v63 = vpack.c.bf16 %v1699_v56, %v1698_v57  ;;  %v2388_v28 = vld [vmem:[#allocation2 + $0x70] sm:$0xff] }
 0x303   : > { %v8292_v51 = vpack.c.bf16 %v2151_v41, %v2150_v61  ;;  %v7293_v8 = vpop.eup %7292  ;;  %v1674_v16 = vmul.f32 %v1642_v27, %v8204_v21  ;;  %v1620_v15 = vmul.f32 0.5, %v7291_v7  ;;  %v1657_v17 = vadd.f32 0.5, %v1625_v38  ;;  %v2389_v61 = vld [vmem:[#allocation2 + $0x78] sm:$0xff]  ;;  %v1907_v41 = vld [vmem:[#allocation2 + $0x9] sm:$0xff] }
 0x304   : > { %1732 = vst.msk [vmem:[#allocation2 + $0x89] sm:$0xff] %vm1137_vm0, %v8297_v1  ;;  %v1621_v22 = vmul.f32 0.5, %v7293_v8  ;;  %v1708_v34 = vpack.c.bf16 %v8297_v1, %v8287_v43  ;;  %7298 = vtanh.f32 %v1560_v37  ;;  %v8318_v36 = vmul.f32 %v1658_v30, %v8003_v40  ;;  %v1909_v30 = vld [vmem:[#allocation2 + $0x19] sm:$0xff]  ;;  %v1916_v43 = vld [vmem:[#allocation2 + $0x51] sm:$0xff] }
 0x305   : > { %6599 = vmatmul.msk.bf16.gmra.mxu2 %vm1137_vm0, %v8292_v51  ;;  %1723 = vst.msk [vmem:[#allocation2 + $0x41] sm:$0xff] %vm1137_vm0, %v1674_v16  ;;  %v1652_v21 = vadd.f32 0.5, %v1620_v15  ;;  %v7295_v29 = vpop.eup %7294  ;;  %v8315_v25 = vmul.f32 %v1657_v17, %v7973_v11  ;;  %v1713_v0 = vpack.c.bf16 %v8085_v39, %v8082_v31  ;;  %v8364_v7 = vpack.c.bf16 %v2389_v61, %v2388_v28  ;;  %v1912_v26 = vld [vmem:[#allocation2 + $0x31] sm:$0xff]  ;;  %v2161_v28 = vld [vmem:[#allocation2 + $0xc9] sm:$0xff]  ;;  %v1917_v1 = vld [vmem:[#allocation2 + $0x59] sm:$0xff] }
 0x306   : > { %6627 = vmatmul.msk.bf16.gmra.mxu3 %vm1137_vm0, %v8294_v60  ;;  %v1653_v47 = vadd.f32 0.5, %v1621_v22  ;;  %v7297_v49 = vpop.eup %7296  ;;  %v1622_v32 = vmul.f32 0.5, %v7295_v29  ;;  %1739 = vst.msk [vmem:[#allocation2 + $0xc1] sm:$0xff] %vm1137_vm0, %v8318_v36  ;;  %v1913_v52 = vld [vmem:[#allocation2 + $0x39] sm:$0xff]  ;;  %v2375_v39 = vld [vmem:[#allocation2 + $0x8] sm:$0xff] }
 0x307   : > { %6540 = vmatmul.msk.bf16.gmra.mxu0 %vm1137_vm0, %v1703_v2  ;;  %v8322_v59 = vmul.f32 %v1652_v21, %v8250_v53  ;;  %v1623_v45 = vmul.f32 0.5, %v7297_v49  ;;  %1738 = vst.msk [vmem:[#allocation2 + $0xb9] sm:$0xff] %vm1137_vm0, %v8315_v25  ;;  %v1705_v2 = vpack.c.bf16 %v8133_v54, %v8124_v23  ;;  %v1910_v23 = vld [vmem:[#allocation2 + $0x21] sm:$0xff]  ;;  %v1911_v54 = vld [vmem:[#allocation2 + $0x29] sm:$0xff] }
 0x308   : > { %v8325_v9 = vmul.f32 %v1653_v47, %v8256_v6  ;;  %v1654_v11 = vadd.f32 0.5, %v1622_v32  ;;  %v1712_v6 = vpack.c.bf16 %v8079_v20, %v8318_v36  ;;  %v7164_v32 = vld [vmem:[%s11425_s5] sm:$0xff] }
 0x309   : > { %6553 = vmatmul.msk.bf16.gmra.mxu1 %vm1137_vm0, %v1716_v63  ;;  %1733 = vst.msk [vmem:[#allocation2 + $0x91] sm:$0xff] %vm1137_vm0, %v8322_v59  ;;  %v1655_v40 = vadd.f32 0.5, %v1623_v45  ;;  %v2152_v10 = vld [vmem:[#allocation2 + $0x81] sm:$0xff]  ;;  %v8400_v45 = vpack.c.bf16 %v1911_v54, %v1910_v23  ;;  %2605 = vmatpush.bf16.msra.mxu0 %v7164_v32  ;;  %v2401_v23 = vld [vmem:[#allocation2 + $0xd8] sm:$0xff] }
 0x30a   : > { %1734 = vst.msk [vmem:[#allocation2 + $0x99] sm:$0xff] %vm1137_vm0, %v8325_v9  ;;  %v1709_v53 = vpack.c.bf16 %v8325_v9, %v8322_v59  ;;  %v7299_v14 = vpop.eup %7298  ;;  %v8339_v57 = vmul.f32 %v1654_v11, %v8274_v19  ;;  %v2390_v37 = vld [vmem:[#allocation2 + $0x80] sm:$0xff] }
 0x30b   : > { %v8346_v58 = vmul.f32 %v1655_v40, %v8262_v3  ;;  %v1624_v50 = vmul.f32 0.5, %v7299_v14  ;;  %v2153_v56 = vld [vmem:[#allocation2 + $0x89] sm:$0xff]  ;;  %v1906_v3 = vld [vmem:[#allocation2 + $0x1] sm:$0xff] }
 0x30c   : > { %1735 = vst.msk [vmem:[#allocation2 + $0xa1] sm:$0xff] %vm1137_vm0, %v8339_v57  ;;  %v8356_v48 = vpack.c.bf16 %v2153_v56, %v2152_v10  ;;  %v1938_v38 = vpack.c.bf16 %v1907_v41, %v1906_v3  ;;  %v2391_v22 = vld [vmem:[#allocation2 + $0x88] sm:$0xff]  ;;  %v2374_v31 = vld [vmem:[#allocation2] sm:$0xff] }
 0x30d   : > { %1736 = vst.msk [vmem:[#allocation2 + $0xa9] sm:$0xff] %vm1137_vm0, %v8346_v58  ;;  %v1656_v4 = vadd.f32 0.5, %v1624_v50  ;;  %v1710_v19 = vpack.c.bf16 %v8346_v58, %v8339_v57  ;;  %v2160_v56 = vld [vmem:[#allocation2 + $0xc1] sm:$0xff] }
 0x30e   : > { %v2159_v40 = vld [vmem:[#allocation2 + $0xb9] sm:$0xff]  ;;  %v8420_v41 = vpack.c.bf16 %v2161_v28, %v2160_v56 }
 0x30f   : > { %v8354_v18 = vmul.f32 %v1656_v4, %v1528_v33  ;;  %v1704_v33 = vpack.c.bf16 %v8115_v62, %v1674_v16  ;;  %v8377_v62 = vpack.c.bf16 %v2391_v22, %v2390_v37  ;;  %v1908_v16 = vld [vmem:[#allocation2 + $0x11] sm:$0xff]  ;;  %v2399_v37 = vld [vmem:[#allocation2 + $0xc8] sm:$0xff]  ;;  %v2402_v28 = vld [vmem:[#allocation2 + $0xe0] sm:$0xff] }
 0x310   : > { %v2154_v8 = vld [vmem:[#allocation2 + $0x91] sm:$0xff] }
 0x311   : > { %1737 = vst.msk [vmem:[#allocation2 + $0xb1] sm:$0xff] %vm1137_vm0, %v8354_v18  ;;  %v1711_v27 = vpack.c.bf16 %v8315_v25, %v8354_v18  ;;  %v2155_v15 = vld [vmem:[#allocation2 + $0x99] sm:$0xff]  ;;  %v2392_v29 = vld [vmem:[#allocation2 + $0x90] sm:$0xff] }
 0x312   : > { %v8373_v17 = vpack.c.bf16 %v2155_v15, %v2154_v8  ;;  %v2393_v47 = vld [vmem:[#allocation2 + $0x98] sm:$0xff]  ;;  %v2398_v15 = vld [vmem:[#allocation2 + $0xc0] sm:$0xff] }
 0x313   : > { %v8389_v63 = vpack.c.bf16 %v2393_v47, %v2392_v29  ;;  %v2394_v14 = vld [vmem:[#allocation2 + $0xa0] sm:$0xff]  ;;  %v2165_v29 = vld [vmem:[#allocation2 + $0xe9] sm:$0xff] }
 0x314   : > { %v2157_v21 = vld [vmem:[#allocation2 + $0xa9] sm:$0xff]  ;;  %v2163_v8 = vld [vmem:[#allocation2 + $0xd9] sm:$0xff] }
 0x315   : > { %6600 = vmatmul.msk.bf16.gmra.mxu2 %vm1137_vm0, %v8356_v48  ;;  %v2395_v50 = vld [vmem:[#allocation2 + $0xa8] sm:$0xff]  ;;  %v2400_v47 = vld [vmem:[#allocation2 + $0xd0] sm:$0xff] }
 0x316   : > { %6628 = vmatmul.msk.bf16.gmra.mxu3 %vm1137_vm0, %v8364_v7  ;;  %v8408_v10 = vpack.c.bf16 %v2395_v50, %v2394_v14  ;;  %v8464_v59 = vpack.c.bf16 %v2401_v23, %v2400_v47 }
 0x317   : > { %6541 = vmatmul.msk.bf16.gmra.mxu0 %vm1137_vm0, %v1704_v33 }
 0x318   : > { %v2158_v11 = vld [vmem:[#allocation2 + $0xb1] sm:$0xff] }
 0x319   : > { %6566 = vmatmul.msk.bf16.vlgmr.msra.gmra.mxu1 %vm1137_vm0, %v1938_v38  ;;  %v8404_v4 = vpack.c.bf16 %v2159_v40, %v2158_v11  ;;  %v2396_v61 = vld [vmem:[#allocation2 + $0xb0] sm:$0xff]  ;;  %v2397_v3 = vld [vmem:[#allocation2 + $0xb8] sm:$0xff]  ;;  %v1914_v38 = vld [vmem:[#allocation2 + $0x41] sm:$0xff] }
 0x31a   : > { %2500 = vmatpush.bf16.msra.mxu1 %v7936_v42  ;;  %v1939_v42 = vpack.c.bf16 %v1909_v30, %v1908_v16  ;;  %v8424_v33 = vpack.c.bf16 %v2397_v3, %v2396_v61  ;;  %v8432_v44 = vpack.c.bf16 %v1915_v12, %v1914_v38  ;;  %v8440_v16 = vpack.c.bf16 %v2399_v37, %v2398_v15  ;;  %v2403_v61 = vld [vmem:[#allocation2 + $0xe8] sm:$0xff]  ;;  %v7173_v12 = vld [vmem:[%s11425_s5 + $0x58] sm:$0xff]  ;;  %v2404_v37 = vld [vmem:[#allocation2 + $0xf0] sm:$0xff] }
 0x31b   : > { %v8494_v58 = vpack.c.bf16 %v2403_v61, %v2402_v28  ;;  %3112 = vmatpush.bf16.msra.mxu2 %v7173_v12  ;;  %v2169_v15 = vld [vmem:[#allocation2 + $0x109] sm:$0xff] }
 0x31e   : > { %2501 = vmatpush.bf16.msra.mxu1 %v7958_v5  ;;  %v2156_v5 = vld [vmem:[#allocation2 + $0xa1] sm:$0xff] }
 0x31f   : > { %v8385_v49 = vpack.c.bf16 %v2157_v21, %v2156_v5  ;;  %v2164_v21 = vld [vmem:[#allocation2 + $0xe1] sm:$0xff] }
 0x320   : > { %v8460_v54 = vpack.c.bf16 %v2165_v29, %v2164_v21  ;;  %v7172_v21 = vld [vmem:[%s11425_s5 + $0x50] sm:$0xff]  ;;  %v7170_v29 = vld [vmem:[%s11425_s5 + $0x20] sm:$0xff] }
 0x321   : > { %3113 = vmatpush.bf16.msra.mxu2 %v7172_v21 }
 0x325   : > { %6601 = vmatmul.msk.bf16.gmra.mxu2 %vm1137_vm0, %v8373_v17 }
 0x326   : > { %6629 = vmatmul.msk.bf16.gmra.mxu3 %vm1137_vm0, %v8377_v62 }
 0x327   : > { %6542 = vmatmul.msk.bf16.gmra.mxu0 %vm1137_vm0, %v1705_v2  ;;  %v8452_v2 = vpack.c.bf16 %v1917_v1, %v1916_v43  ;;  %v8527_v43 = vld [vmem:[%s11426_s6] ss:$0 sm:$0xff] }
 0x329   : > { %6567 = vmatmul.msk.bf16.gmra.mxu1 %vm1137_vm0, %v1939_v42 }
 0x335   : > { %6602 = vmatmul.msk.bf16.gmra.mxu2 %vm1137_vm0, %v8385_v49 }
 0x336   : > { %6630 = vmatmul.msk.bf16.gmra.mxu3 %vm1137_vm0, %v8389_v63 }
 0x337   : > { %6543 = vmatmul.msk.bf16.gmra.mxu0 %vm1137_vm0, %v1706_v35  ;;  %v8416_v35 = vpack.c.bf16 %v1913_v52, %v1912_v26  ;;  %v2166_v26 = vld [vmem:[#allocation2 + $0xf1] sm:$0xff]  ;;  %v2167_v52 = vld [vmem:[#allocation2 + $0xf9] sm:$0xff] }
 0x338   : > { %v8490_v57 = vpack.c.bf16 %v2167_v52, %v2166_v26 }
 0x339   : > { %6568 = vmatmul.msk.bf16.gmra.mxu1 %vm1137_vm0, %v8400_v45 }
 0x345   : > { %6603 = vmatmul.msk.bf16.gmra.mxu2 %vm1137_vm0, %v8404_v4 }
 0x346   : > { %6631 = vmatmul.msk.bf16.gmra.mxu3 %vm1137_vm0, %v8408_v10 }
 0x347   : > { %6544 = vmatmul.msk.bf16.gmra.mxu0 %vm1137_vm0, %v1707_v13  ;;  %v2162_v13 = vld [vmem:[#allocation2 + $0xd1] sm:$0xff] }
 0x348   : > { %v8436_v22 = vpack.c.bf16 %v2163_v8, %v2162_v13  ;;  %v7171_v13 = vld [vmem:[%s11425_s5 + $0x28] sm:$0xff] }
 0x349   : > { %6569 = vmatmul.msk.bf16.gmra.mxu1 %vm1137_vm0, %v8416_v35  ;;  %3216 = vmatpush.bf16.msra.mxu3 %v7171_v13 }
 0x34d   : > { %3217 = vmatpush.bf16.msra.mxu3 %v7170_v29 }
 0x355   : > { %6604 = vmatmul.msk.bf16.gmra.mxu2 %vm1137_vm0, %v8420_v41 }
 0x356   : > { %6632 = vmatmul.msk.bf16.gmra.mxu3 %vm1137_vm0, %v8424_v33 }
 0x357   : > { %6545 = vmatmul.msk.bf16.gmra.mxu0 %vm1137_vm0, %v1708_v34 }
 0x359   : > { %6570 = vmatmul.msk.bf16.gmra.mxu1 %vm1137_vm0, %v8432_v44 }
 0x364   : > { %v8442_v30 = vpop.f32.mrf.mxu0 }
 0x365   : > { %6605 = vmatmul.msk.bf16.gmra.mxu2 %vm1137_vm0, %v8436_v22  ;;  %v1827_v52 = vadd.f32 %v8527_v43, %v8442_v30  ;;  %v7175_v30 = vld [vmem:[%s11425_s5 + $0x88] sm:$0xff] }
 0x366   : > { %6633 = vmatmul.msk.bf16.gmra.mxu3 %vm1137_vm0, %v8440_v16  ;;  %v8446_v34 = vpop.f32.mrf.mxu1  ;;  %3418 = vmatpush.bf16.msrb.mxu0 %v7175_v30 }
 0x367   : > { %6546 = vmatmul.msk.bf16.gmra.mxu0 %vm1137_vm0, %v1709_v53 }
 0x369   : > { %6571 = vmatmul.msk.bf16.gmra.mxu1 %vm1137_vm0, %v8452_v2 }
 0x36c   : > { %v8456_v42 = vpop.f32.mrf.mxu0 }
 0x36e   : > { %v8458_v5 = vpop.f32.mrf.mxu1 }
 0x374   : > { %v8466_v9 = vpop.f32.mrf.mxu0 }
 0x375   : > { %6606 = vmatmul.msk.bf16.gmra.mxu2 %vm1137_vm0, %v8460_v54 }
 0x376   : > { %6634 = vmatmul.msk.bf16.gmra.mxu3 %vm1137_vm0, %v8464_v59  ;;  %v8470_v53 = vpop.f32.mrf.mxu2  ;;  %v8472_v32 = vpop.f32.mrf.mxu1 }
 0x377   : > { %6547 = vmatmul.msk.bf16.gmra.mxu0 %vm1137_vm0, %v1710_v19 }
 0x379   : > { %v8478_v11 = vpop.f32.mrf.mxu3  ;;  %6572 = vmatmul.msk.bf16.gmra.mxu1 %vm1137_vm0, %v8193_v46 }
 0x37c   : > { %v8482_v40 = vpop.f32.mrf.mxu0 }
 0x37e   : > { %v8484_v14 = vpop.f32.mrf.mxu2  ;;  %v8486_v50 = vpop.f32.mrf.mxu1 }
 0x381   : > { %v8488_v56 = vpop.f32.mrf.mxu3 }
 0x384   : > { %v8496_v46 = vpop.f32.mrf.mxu0 }
 0x385   : > { %6607 = vmatmul.msk.bf16.gmra.mxu2 %vm1137_vm0, %v8490_v57 }
 0x386   : > { %6635 = vmatmul.msk.bf16.gmra.mxu3 %vm1137_vm0, %v8494_v58  ;;  %v8500_v19 = vpop.f32.mrf.mxu1 }
 0x387   : > { %6548 = vmatmul.msk.bf16.gmra.mxu0 %vm1137_vm0, %v1711_v27  ;;  %v2168_v27 = vld [vmem:[#allocation2 + $0x101] sm:$0xff] }
 0x388   : > { %v8502_v3 = vpop.f32.mrf.mxu2  ;;  %v2186_v47 = vpack.c.bf16 %v2169_v15, %v2168_v27  ;;  %v1829_v15 = vadd.f32 %v8527_v43, %v8456_v42  ;;  %v1832_v42 = vadd.f32 %v8527_v43, %v8466_v9  ;;  %v1834_v9 = vadd.f32 %v8527_v43, %v8482_v40 }
 0x389   : > { %11490 = vst [vmem:[#allocation4_spill] sm:$0xff] %v8502_v3  ;;  %v8508_v38 = vpop.f32.mrf.mxu3  ;;  %6573 = vmatmul.msk.bf16.gmra.mxu1 %vm1137_vm0, %v8292_v51  ;;  %v2405_v51 = vld [vmem:[#allocation2 + $0xf8] sm:$0xff]  ;;  %v1837_v40 = vadd.f32 %v8527_v43, %v8496_v46  ;;  %v2383_v3 = vld [vmem:[#allocation2 + $0x48] sm:$0xff] }
 0x38a   : > { %11491 = vst [vmem:[#allocation5_spill] sm:$0xff] %v8508_v38  ;;  %v8538_v23 = vpack.c.bf16 %v2405_v51, %v2404_v37  ;;  %v2170_v37 = vld [vmem:[#allocation2 + $0x111] sm:$0xff]  ;;  %v2171_v51 = vld [vmem:[#allocation2 + $0x119] sm:$0xff] }
 0x38b   : > { %v2187_v21 = vpack.c.bf16 %v2171_v51, %v2170_v37 }
 0x38c   : > { %v8518_v8 = vpop.f32.mrf.mxu0 }
 0x38e   : > { %v8520_v25 = vpop.f32.mrf.mxu1 }
 0x390   : > { %v8522_v18 = vpop.f32.mrf.mxu2 }
 0x391   : > { %11492 = vst [vmem:[#allocation6_spill] sm:$0xff] %v8522_v18  ;;  %v8529_v1 = vpop.f32.mrf.mxu3 }
 0x392   : > { %11493 = vst [vmem:[#allocation7_spill] sm:$0xff] %v8529_v1 }
 0x394   : > { %v8540_v26 = vpop.f32.mrf.mxu0 }
 0x395   : > { %6608 = vmatmul.msk.bf16.gmra.mxu2 %vm1137_vm0, %v2186_v47  ;;  %v2427_v47 = vld [vmem:[#allocation2 + $0x108] sm:$0xff] }
 0x396   : > { %6636 = vmatmul.msk.bf16.gmra.mxu3 %vm1137_vm0, %v8538_v23  ;;  %v2028_v28 = vpop.f32.mrf.mxu1 }
 0x397   : > { %v8548_v12 = vadd.f32 %v2028_v28, %v1827_v52  ;;  %6549 = vmatmul.msk.bf16.gmra.mxu0 %vm1137_vm0, %v1712_v6 }
 0x398   : > { %v8546_v61 = vpop.f32.mrf.mxu2 }
 0x399   : > { %11494 = vst [vmem:[#allocation8_spill] sm:$0xff] %v8546_v61  ;;  %v8554_v13 = vpop.f32.mrf.mxu3  ;;  %6574 = vmatmul.msk.bf16.gmra.mxu1 %vm1137_vm0, %v8356_v48  ;;  %v2426_v48 = vld [vmem:[#allocation2 + $0x100] sm:$0xff] }
 0x39a   : > { %11495 = vst [vmem:[#allocation9_spill] sm:$0xff] %v8554_v13  ;;  %v2428_v52 = vpack.c.bf16 %v2427_v47, %v2426_v48  ;;  %v2987_v47 = vld [vmem:[#allocation2 + $0x12] sm:$0xff] }
 0x39b   : > { %v2381_v13 = vld [vmem:[#allocation2 + $0x38] sm:$0xff] }
 0x39c   : > { %v8561_v27 = vpop.f32.mrf.mxu0 }
 0x39e   : > { %v2030_v20 = vpop.f32.mrf.mxu1 }
 0x39f   : > { %v8567_v6 = vadd.f32 %v2030_v20, %v1829_v15 }
 0x3a0   : > { %v8565_v36 = vpop.f32.mrf.mxu2 }
 0x3a1   : > { %11496 = vst [vmem:[#allocation10_spill] sm:$0xff] %v8565_v36  ;;  %v8569_v29 = vpop.f32.mrf.mxu3 }
 0x3a2   : > { %11497 = vst [vmem:[#allocation11_spill] sm:$0xff] %v8569_v29 }
 0x3a4   : > { %v8572_v28 = vpop.f32.mrf.mxu0 }
 0x3a5   : > { %6609 = vmatmul.msk.bf16.gmra.mxu2 %vm1137_vm0, %v2187_v21 }
 0x3a6   : > { %6637 = vmatmul.msk.bf16.gmra.mxu3 %vm1137_vm0, %v2428_v52  ;;  %v2033_v30 = vpop.f32.mrf.mxu1  ;;  %v2988_v52 = vld [vmem:[#allocation2 + $0x1a] sm:$0xff] }
 0x3a7   : > { %v8579_v15 = vadd.f32 %v2033_v30, %v1832_v42  ;;  %6550 = vmatmul.msk.bf16.gmra.mxu0 %vm1137_vm0, %v1713_v0  ;;  %v2985_v42 = vld [vmem:[#allocation2 + $0x2] sm:$0xff]  ;;  %v2986_v30 = vld [vmem:[#allocation2 + $0xa] sm:$0xff] }
 0x3a8   : > { %v8577_v55 = vpop.f32.mrf.mxu2 }
 0x3a9   : > { %11498 = vst [vmem:[#allocation12_spill] sm:$0xff] %v8577_v55  ;;  %v8585_v37 = vpop.f32.mrf.mxu3  ;;  %6575 = vmatmul.msk.bf16.gmra.mxu1 %vm1137_vm0, %v8373_v17  ;;  %v3018_v55 = vpack.c.bf16 %v2988_v52, %v2987_v47  ;;  %v2406_v17 = vpack.c.bf16 %v2375_v39, %v2374_v31  ;;  %v1839_v52 = vadd.f32 %v8527_v43, %v8518_v8  ;;  %v2989_v39 = vld [vmem:[#allocation2 + $0x22] sm:$0xff] }
 0x3aa   : > { %11499 = vst [vmem:[#allocation13_spill] sm:$0xff] %v8585_v37  ;;  %v3017_v37 = vpack.c.bf16 %v2986_v30, %v2985_v42  ;;  %v2990_v42 = vld [vmem:[#allocation2 + $0x2a] sm:$0xff]  ;;  %v1842_v8 = vadd.f32 %v8527_v43, %v8540_v26  ;;  %v1844_v26 = vadd.f32 %v8527_v43, %v8561_v27  ;;  %v1847_v27 = vadd.f32 %v8527_v43, %v8572_v28 }
 0x3ac   : > { %v8589_v51 = vpop.f32.mrf.mxu0 }
 0x3ad   : > { %v1849_v28 = vadd.f32 %v8527_v43, %v8589_v51 }
 0x3ae   : > { %v2035_v20 = vpop.f32.mrf.mxu1 }
 0x3af   : > { %v8595_v48 = vadd.f32 %v2035_v20, %v1834_v9 }
 0x3b0   : > { %v8593_v21 = vpop.f32.mrf.mxu2 }
 0x3b1   : > { %11500 = vst [vmem:[#allocation14_spill] sm:$0xff] %v8593_v21  ;;  %v8597_v0 = vpop.f32.mrf.mxu3 }
 0x3b2   : > { %11501 = vst [vmem:[#allocation15_spill] sm:$0xff] %v8597_v0 }
 0x3b4   : > { %v8600_v36 = vpop.f32.mrf.mxu0 }
 0x3b5   : > { %6706 = vmatmul.msk.bf16.vlgmr.msra.gmra.mxu2 %vm1137_vm0, %v3018_v55  ;;  %v1852_v51 = vadd.f32 %v8527_v43, %v8600_v36 }
 0x3b6   : > { %6730 = vmatmul.msk.bf16.vlgmr.msra.gmra.mxu3 %vm1137_vm0, %v3017_v37  ;;  %v2038_v9 = vpop.f32.mrf.mxu1 }
 0x3b7   : > { %v8607_v21 = vadd.f32 %v2038_v9, %v1837_v40  ;;  %6646 = vmatmul.msk.bf16.vlgmr.msra.gmra.mxu0 %vm1137_vm0, %v2406_v17  ;;  %v8624_v17 = vpack.c.bf16 %v2990_v42, %v2989_v39  ;;  %v2376_v40 = vld [vmem:[#allocation2 + $0x10] sm:$0xff]  ;;  %v2377_v9 = vld [vmem:[#allocation2 + $0x18] sm:$0xff] }
 0x3b8   : > { %v8605_v20 = vpop.f32.mrf.mxu2 }
 0x3b9   : > { %11502 = vst [vmem:[#allocation16_spill] sm:$0xff] %v8605_v20  ;;  %v8610_v0 = vpop.f32.mrf.mxu3  ;;  %6576 = vmatmul.msk.bf16.gmra.mxu1 %vm1137_vm0, %v8385_v49  ;;  %v8632_v20 = vpack.c.bf16 %v2377_v9, %v2376_v40 }
 0x3ba   : > { %11503 = vst [vmem:[#allocation17_spill] sm:$0xff] %v8610_v0  ;;  %v2379_v0 = vld [vmem:[#allocation2 + $0x28] sm:$0xff] }
 0x3bc   : > { %v8614_v47 = vpop.f32.mrf.mxu0 }
 0x3be   : > { %v2040_v46 = vpop.f32.mrf.mxu1 }
 0x3bf   : > { %v8620_v37 = vadd.f32 %v2040_v46, %v1839_v52 }
 0x3c0   : > { %v8618_v31 = vpop.f32.mrf.mxu2 }
 0x3c1   : > { %11504 = vst [vmem:[#allocation18_spill] sm:$0xff] %v8618_v31  ;;  %v8622_v30 = vpop.f32.mrf.mxu3 }
 0x3c2   : > { %11505 = vst [vmem:[#allocation19_spill] sm:$0xff] %v8622_v30 }
 0x3c4   : > { %v8628_v49 = vpop.f32.mrf.mxu0 }
 0x3c5   : > { %6707 = vmatmul.msk.bf16.gmra.mxu2 %vm1137_vm0, %v8624_v17 }
 0x3c6   : > { %6731 = vmatmul.msk.bf16.gmra.mxu3 %vm1137_vm0, %v3018_v55  ;;  %v2043_v52 = vpop.f32.mrf.mxu1 }
 0x3c7   : > { %v8637_v31 = vadd.f32 %v2043_v52, %v1842_v8  ;;  %6647 = vmatmul.msk.bf16.gmra.mxu0 %vm1137_vm0, %v8632_v20  ;;  %v2991_v8 = vld [vmem:[#allocation2 + $0x32] sm:$0xff]  ;;  %v2992_v52 = vld [vmem:[#allocation2 + $0x3a] sm:$0xff] }
 0x3c8   : > { %v8635_v46 = vpop.f32.mrf.mxu2  ;;  %v8655_v30 = vpack.c.bf16 %v2992_v52, %v2991_v8 }
 0x3c9   : > { %11506 = vst [vmem:[#allocation20_spill] sm:$0xff] %v8635_v46  ;;  %v8641_v39 = vpop.f32.mrf.mxu3  ;;  %6577 = vmatmul.msk.bf16.gmra.mxu1 %vm1137_vm0, %v8404_v4 }
 0x3ca   : > { %11507 = vst [vmem:[#allocation21_spill] sm:$0xff] %v8641_v39  ;;  %v2378_v39 = vld [vmem:[#allocation2 + $0x20] sm:$0xff] }
 0x3cb   : > { %v8663_v29 = vpack.c.bf16 %v2379_v0, %v2378_v39 }
 0x3cc   : > { %v8645_v42 = vpop.f32.mrf.mxu0 }
 0x3ce   : > { %v2045_v40 = vpop.f32.mrf.mxu1 }
 0x3cf   : > { %v8651_v9 = vadd.f32 %v2045_v40, %v1844_v26 }
 0x3d0   : > { %v8649_v55 = vpop.f32.mrf.mxu2 }
 0x3d1   : > { %11508 = vst [vmem:[#allocation22_spill] sm:$0xff] %v8649_v55  ;;  %v8653_v46 = vpop.f32.mrf.mxu3 }
 0x3d2   : > { %11509 = vst [vmem:[#allocation23_spill] sm:$0xff] %v8653_v46 }
 0x3d4   : > { %v8659_v4 = vpop.f32.mrf.mxu0 }
 0x3d5   : > { %6708 = vmatmul.msk.bf16.gmra.mxu2 %vm1137_vm0, %v8655_v30 }
 0x3d6   : > { %6732 = vmatmul.msk.bf16.gmra.mxu3 %vm1137_vm0, %v8624_v17  ;;  %v2048_v26 = vpop.f32.mrf.mxu1 }
 0x3d7   : > { %v8669_v8 = vadd.f32 %v2048_v26, %v1847_v27  ;;  %6648 = vmatmul.msk.bf16.gmra.mxu0 %vm1137_vm0, %v8663_v29  ;;  %v2993_v27 = vld [vmem:[#allocation2 + $0x42] sm:$0xff]  ;;  %v2994_v26 = vld [vmem:[#allocation2 + $0x4a] sm:$0xff] }
 0x3d8   : > { %v8667_v40 = vpop.f32.mrf.mxu2  ;;  %v8687_v61 = vpack.c.bf16 %v2994_v26, %v2993_v27 }
 0x3d9   : > { %11510 = vst [vmem:[#allocation24_spill] sm:$0xff] %v8667_v40  ;;  %v8673_v52 = vpop.f32.mrf.mxu3  ;;  %6578 = vmatmul.msk.bf16.gmra.mxu1 %vm1137_vm0, %v8420_v41 }
 0x3da   : > { %11511 = vst [vmem:[#allocation25_spill] sm:$0xff] %v8673_v52  ;;  %v2380_v52 = vld [vmem:[#allocation2 + $0x30] sm:$0xff] }
 0x3db   : > { %v8693_v18 = vpack.c.bf16 %v2381_v13, %v2380_v52  ;;  %v1854_v13 = vadd.f32 %v8527_v43, %v8614_v47  ;;  %v1857_v47 = vadd.f32 %v8527_v43, %v8628_v49 }
 0x3dc   : > { %v8677_v55 = vpop.f32.mrf.mxu0 }
 0x3de   : > { %v2050_v0 = vpop.f32.mrf.mxu1 }
 0x3df   : > { %v8683_v46 = vadd.f32 %v2050_v0, %v1849_v28 }
 0x3e0   : > { %v8681_v39 = vpop.f32.mrf.mxu2 }
 0x3e1   : > { %11512 = vst [vmem:[#allocation26_spill] sm:$0xff] %v8681_v39  ;;  %v8685_v40 = vpop.f32.mrf.mxu3 }
 0x3e2   : > { %11513 = vst [vmem:[#allocation27_spill] sm:$0xff] %v8685_v40 }
 0x3e4   : > { %v1866_v41 = vpop.f32.mrf.mxu0 }
 0x3e5   : > { %6709 = vmatmul.msk.bf16.gmra.mxu2 %vm1137_vm0, %v8687_v61 }
 0x3e6   : > { %6733 = vmatmul.msk.bf16.gmra.mxu3 %vm1137_vm0, %v8655_v30  ;;  %v2053_v28 = vpop.f32.mrf.mxu1 }
 0x3e7   : > { %v8699_v39 = vadd.f32 %v2053_v28, %v1852_v51  ;;  %6649 = vmatmul.msk.bf16.gmra.mxu0 %vm1137_vm0, %v8693_v18  ;;  %v2995_v51 = vld [vmem:[#allocation2 + $0x52] sm:$0xff]  ;;  %v2996_v28 = vld [vmem:[#allocation2 + $0x5a] sm:$0xff] }
 0x3e8   : > { %v8697_v0 = vpop.f32.mrf.mxu2  ;;  %v8717_v1 = vpack.c.bf16 %v2996_v28, %v2995_v51 }
 0x3e9   : > { %11514 = vst [vmem:[#allocation28_spill] sm:$0xff] %v8697_v0  ;;  %v8703_v27 = vpop.f32.mrf.mxu3  ;;  %6579 = vmatmul.msk.bf16.gmra.mxu1 %vm1137_vm0, %v8436_v22 }
 0x3ea   : > { %11515 = vst [vmem:[#allocation29_spill] sm:$0xff] %v8699_v39 }
 0x3eb   : > { %11516 = vst [vmem:[#allocation30_spill] sm:$0xff] %v8703_v27  ;;  %v2382_v27 = vld [vmem:[#allocation2 + $0x40] sm:$0xff] }
 0x3ec   : > { %v8707_v26 = vpop.f32.mrf.mxu0  ;;  %v8723_v39 = vpack.c.bf16 %v2383_v3, %v2382_v27  ;;  %v1859_v3 = vadd.f32 %v8527_v43, %v8645_v42 }
 0x3ee   : > { %v2055_v36 = vpop.f32.mrf.mxu1 }
 0x3ef   : > { %v8713_v40 = vadd.f32 %v2055_v36, %v1854_v13 }
 0x3f0   : > { %v8711_v52 = vpop.f32.mrf.mxu2 }
 0x3f1   : > { %11517 = vst [vmem:[#allocation31_spill] sm:$0xff] %v8711_v52  ;;  %v8715_v0 = vpop.f32.mrf.mxu3 }
 0x3f2   : > { %11518 = vst [vmem:[#allocation32_spill] sm:$0xff] %v8713_v40 }
 0x3f3   : > { %11519 = vst [vmem:[#allocation33_spill] sm:$0xff] %v8715_v0 }
 0x3f4   : > { %v1871_v22 = vpop.f32.mrf.mxu0 }
 0x3f5   : > { %6710 = vmatmul.msk.bf16.gmra.mxu2 %vm1137_vm0, %v8717_v1 }
 0x3f6   : > { %6734 = vmatmul.msk.bf16.gmra.mxu3 %vm1137_vm0, %v8687_v61  ;;  %v2058_v13 = vpop.f32.mrf.mxu1 }
 0x3f7   : > { %v8729_v52 = vadd.f32 %v2058_v13, %v1857_v47  ;;  %6650 = vmatmul.msk.bf16.gmra.mxu0 %vm1137_vm0, %v8723_v39  ;;  %v2998_v47 = vld [vmem:[#allocation2 + $0x6a] sm:$0xff] }
 0x3f8   : > { %v8727_v36 = vpop.f32.mrf.mxu2 }
 0x3f9   : > { %11520 = vst [vmem:[#allocation34_spill] sm:$0xff] %v8727_v36  ;;  %v8733_v51 = vpop.f32.mrf.mxu3  ;;  %6580 = vmatmul.msk.bf16.gmra.mxu1 %vm1137_vm0, %v8460_v54  ;;  %v2997_v36 = vld [vmem:[#allocation2 + $0x62] sm:$0xff]  ;;  %v1862_v54 = vadd.f32 %v8527_v43, %v8659_v4  ;;  %v1864_v4 = vadd.f32 %v8527_v43, %v8677_v55 }
 0x3fa   : > { %11521 = vst [vmem:[#allocation35_spill] sm:$0xff] %v8729_v52  ;;  %v8745_v52 = vpack.c.bf16 %v2998_v47, %v2997_v36 }
 0x3fb   : > { %11522 = vst [vmem:[#allocation36_spill] sm:$0xff] %v8733_v51 }
 0x3fc   : > { %v1873_v28 = vpop.f32.mrf.mxu0 }
 0x3fe   : > { %v2060_v49 = vpop.f32.mrf.mxu1 }
 0x3ff   : > { %v8741_v0 = vadd.f32 %v2060_v49, %v1859_v3 }
 0x400   : > { %v8739_v27 = vpop.f32.mrf.mxu2 }
 0x401   : > { %11523 = vst [vmem:[#allocation37_spill] sm:$0xff] %v8739_v27  ;;  %v8743_v13 = vpop.f32.mrf.mxu3 }
 0x402   : > { %11524 = vst [vmem:[#allocation38_spill] sm:$0xff] %v8741_v0 }
 0x403   : > { %11525 = vst [vmem:[#allocation39_spill] sm:$0xff] %v8743_v13 }
 0x404   : > { %v1876_v51 = vpop.f32.mrf.mxu0 }
 0x405   : > { %6711 = vmatmul.msk.bf16.gmra.mxu2 %vm1137_vm0, %v8745_v52 }
 0x406   : > { %6735 = vmatmul.msk.bf16.gmra.mxu3 %vm1137_vm0, %v8717_v1  ;;  %v2063_v42 = vpop.f32.mrf.mxu1 }
 0x407   : > { %v8755_v3 = vadd.f32 %v2063_v42, %v1862_v54  ;;  %6651 = vmatmul.msk.bf16.gmra.mxu0 %vm1137_vm0, %v8211_v24  ;;  %v3000_v54 = vld [vmem:[#allocation2 + $0x7a] sm:$0xff] }
 0x408   : > { %v8753_v27 = vpop.f32.mrf.mxu2 }
 0x409   : > { %11526 = vst [vmem:[#allocation40_spill] sm:$0xff] %v8753_v27  ;;  %v8759_v36 = vpop.f32.mrf.mxu3  ;;  %6581 = vmatmul.msk.bf16.gmra.mxu1 %vm1137_vm0, %v8490_v57  ;;  %v2999_v27 = vld [vmem:[#allocation2 + $0x72] sm:$0xff]  ;;  %v1867_v57 = vadd.f32 %v8527_v43, %v1866_v41  ;;  %v7174_v41 = vld [vmem:[%s11425_s5 + $0x80] sm:$0xff] }
 0x40a   : > { %11527 = vst [vmem:[#allocation41_spill] sm:$0xff] %v8755_v3  ;;  %v8771_v3 = vpack.c.bf16 %v3000_v54, %v2999_v27  ;;  %3419 = vmatpush.bf16.msrb.mxu0 %v7174_v41  ;;  %v1869_v54 = vadd.f32 %v8527_v43, %v8707_v26  ;;  %v1872_v41 = vadd.f32 %v8527_v43, %v1871_v22 }
 0x40b   : > { %11528 = vst [vmem:[#allocation42_spill] sm:$0xff] %v8759_v36  ;;  %v1874_v22 = vadd.f32 %v8527_v43, %v1873_v28 }
 0x40c   : > { %v1878_v49 = vpop.f32.mrf.mxu0 }
 0x40e   : > { %v2065_v47 = vpop.f32.mrf.mxu1 }
 0x40f   : > { %v8767_v0 = vadd.f32 %v2065_v47, %v1864_v4 }
 0x410   : > { %v8765_v13 = vpop.f32.mrf.mxu2 }
 0x411   : > { %11529 = vst [vmem:[#allocation43_spill] sm:$0xff] %v8765_v13  ;;  %v8769_v42 = vpop.f32.mrf.mxu3  ;;  %v3002_v13 = vld [vmem:[#allocation2 + $0x8a] sm:$0xff] }
 0x412   : > { %11530 = vst [vmem:[#allocation44_spill] sm:$0xff] %v8767_v0  ;;  %v3007_v0 = vld [vmem:[#allocation2 + $0xb2] sm:$0xff] }
 0x413   : > { %11531 = vst [vmem:[#allocation45_spill] sm:$0xff] %v8769_v42 }
 0x414   : > { %v1881_v24 = vpop.f32.mrf.mxu0 }
 0x415   : > { %6712 = vmatmul.msk.bf16.gmra.mxu2 %vm1137_vm0, %v8771_v3 }
 0x416   : > { %6736 = vmatmul.msk.bf16.gmra.mxu3 %vm1137_vm0, %v8745_v52  ;;  %v2068_v55 = vpop.f32.mrf.mxu1 }
 0x417   : > { %v8780_v4 = vadd.f32 %v2068_v55, %v1867_v57  ;;  %6652 = vmatmul.msk.bf16.gmra.mxu0 %vm1137_vm0, %v8294_v60  ;;  %v3001_v60 = vld [vmem:[#allocation2 + $0x82] sm:$0xff] }
 0x418   : > { %v8778_v36 = vpop.f32.mrf.mxu2  ;;  %v8799_v42 = vpack.c.bf16 %v3002_v13, %v3001_v60 }
 0x419   : > { %11532 = vst [vmem:[#allocation46_spill] sm:$0xff] %v8778_v36  ;;  %v8784_v47 = vpop.f32.mrf.mxu3  ;;  %6594 = vmatmul.msk.bf16.vlgmr.msrb.gmra.mxu1 %vm1137_vm0, %v8400_v45 }
 0x41a   : > { %11533 = vst [vmem:[#allocation47_spill] sm:$0xff] %v8780_v4 }
 0x41b   : > { %11534 = vst [vmem:[#allocation48_spill] sm:$0xff] %v8784_v47 }
 0x41c   : > { %v1883_v27 = vpop.f32.mrf.mxu0 }
 0x41e   : > { %v2070_v36 = vpop.f32.mrf.mxu1 }
 0x41f   : > { %v8795_v55 = vadd.f32 %v2070_v36, %v1869_v54 }
 0x420   : > { %v8793_v57 = vpop.f32.mrf.mxu2 }
 0x421   : > { %11535 = vst [vmem:[#allocation49_spill] sm:$0xff] %v8793_v57  ;;  %v8797_v47 = vpop.f32.mrf.mxu3 }
 0x422   : > { %11536 = vst [vmem:[#allocation50_spill] sm:$0xff] %v8795_v55  ;;  %v3005_v55 = vld [vmem:[#allocation2 + $0xa2] sm:$0xff] }
 0x423   : > { %11537 = vst [vmem:[#allocation51_spill] sm:$0xff] %v8797_v47 }
 0x424   : > { %v1886_v45 = vpop.f32.mrf.mxu0 }
 0x425   : > { %6713 = vmatmul.msk.bf16.gmra.mxu2 %vm1137_vm0, %v8799_v42 }
 0x426   : > { %6737 = vmatmul.msk.bf16.gmra.mxu3 %vm1137_vm0, %v8771_v3  ;;  %v2073_v26 = vpop.f32.mrf.mxu1 }
 0x427   : > { %v8808_v36 = vadd.f32 %v2073_v26, %v1872_v41  ;;  %6653 = vmatmul.msk.bf16.gmra.mxu0 %vm1137_vm0, %v8364_v7  ;;  %v3004_v41 = vld [vmem:[#allocation2 + $0x9a] sm:$0xff] }
 0x428   : > { %v8806_v4 = vpop.f32.mrf.mxu2 }
 0x429   : > { %11538 = vst [vmem:[#allocation52_spill] sm:$0xff] %v8806_v4  ;;  %v8812_v54 = vpop.f32.mrf.mxu3  ;;  %6595 = vmatmul.msk.bf16.gmra.mxu1 %vm1137_vm0, %v8416_v35  ;;  %v3003_v4 = vld [vmem:[#allocation2 + $0x92] sm:$0xff]  ;;  %v1877_v35 = vadd.f32 %v8527_v43, %v1876_v51  ;;  %v1879_v51 = vadd.f32 %v8527_v43, %v1878_v49 }
 0x42a   : > { %11539 = vst [vmem:[#allocation53_spill] sm:$0xff] %v8808_v36  ;;  %v8825_v36 = vpack.c.bf16 %v3004_v41, %v3003_v4 }
 0x42b   : > { %11540 = vst [vmem:[#allocation54_spill] sm:$0xff] %v8812_v54 }
 0x42c   : > { %v8816_v13 = vpop.f32.mrf.mxu0 }
 0x42e   : > { %v2075_v60 = vpop.f32.mrf.mxu1 }
 0x42f   : > { %v8821_v47 = vadd.f32 %v2075_v60, %v1874_v22 }
 0x430   : > { %v8819_v57 = vpop.f32.mrf.mxu2 }
 0x431   : > { %11541 = vst [vmem:[#allocation55_spill] sm:$0xff] %v8819_v57  ;;  %v8823_v26 = vpop.f32.mrf.mxu3 }
 0x432   : > { %11542 = vst [vmem:[#allocation56_spill] sm:$0xff] %v8821_v47 }
 0x433   : > { %11543 = vst [vmem:[#allocation57_spill] sm:$0xff] %v8823_v26 }
 0x434   : > { %v8829_v7 = vpop.f32.mrf.mxu0 }
 0x435   : > { %6714 = vmatmul.msk.bf16.gmra.mxu2 %vm1137_vm0, %v8825_v36 }
 0x436   : > { %6738 = vmatmul.msk.bf16.gmra.mxu3 %vm1137_vm0, %v8799_v42  ;;  %v2078_v28 = vpop.f32.mrf.mxu1 }
 0x437   : > { %v8834_v22 = vadd.f32 %v2078_v28, %v1877_v35  ;;  %6654 = vmatmul.msk.bf16.gmra.mxu0 %vm1137_vm0, %v8377_v62  ;;  %v3006_v35 = vld [vmem:[#allocation2 + $0xaa] sm:$0xff] }
 0x438   : > { %v3115_v57 = vpop.f32.mrf.mxu2  ;;  %v8849_v62 = vpack.c.bf16 %v3006_v35, %v3005_v55 }
 0x439   : > { %11544 = vst [vmem:[#allocation58_spill] sm:$0xff] %v8834_v22  ;;  %v3219_v60 = vpop.f32.mrf.mxu3  ;;  %6596 = vmatmul.msk.bf16.gmra.mxu1 %vm1137_vm0, %v8432_v44 }
 0x43a   : > { %v8840_v4 = vadd.f32 %v3219_v60, %v3115_v57  ;;  %v1882_v57 = vadd.f32 %v8527_v43, %v1881_v24  ;;  %v1884_v24 = vadd.f32 %v8527_v43, %v1883_v27 }
 0x43c   : > { %v8842_v41 = vpop.f32.mrf.mxu0 }
 0x43e   : > { %v2080_v26 = vpop.f32.mrf.mxu1 }
 0x43f   : > { %v8845_v47 = vadd.f32 %v2080_v26, %v1879_v51 }
 0x440   : > { %v3117_v54 = vpop.f32.mrf.mxu2 }
 0x441   : > { %11545 = vst [vmem:[#allocation59_spill] sm:$0xff] %v8845_v47  ;;  %v3221_v28 = vpop.f32.mrf.mxu3 }
 0x442   : > { %v8847_v22 = vadd.f32 %v3221_v28, %v3117_v54 }
 0x444   : > { %v8853_v44 = vpop.f32.mrf.mxu0 }
 0x445   : > { %6715 = vmatmul.msk.bf16.gmra.mxu2 %vm1137_vm0, %v8849_v62 }
 0x446   : > { %6739 = vmatmul.msk.bf16.gmra.mxu3 %vm1137_vm0, %v8825_v36  ;;  %v2083_v49 = vpop.f32.mrf.mxu1 }
 0x447   : > { %v8858_v60 = vadd.f32 %v2083_v49, %v1882_v57  ;;  %6655 = vmatmul.msk.bf16.gmra.mxu0 %vm1137_vm0, %v8389_v63  ;;  %v3008_v57 = vld [vmem:[#allocation2 + $0xba] sm:$0xff] }
 0x448   : > { %v3120_v26 = vpop.f32.mrf.mxu2  ;;  %v8873_v63 = vpack.c.bf16 %v3008_v57, %v3007_v0  ;;  %v1889_v57 = vadd.f32 %v8527_v43, %v8816_v13 }
 0x449   : > { %11546 = vst [vmem:[#allocation60_spill] sm:$0xff] %v8858_v60  ;;  %v3224_v54 = vpop.f32.mrf.mxu3  ;;  %6597 = vmatmul.msk.bf16.gmra.mxu1 %vm1137_vm0, %v8452_v2 }
 0x44a   : > { %v8864_v55 = vadd.f32 %v3224_v54, %v3120_v26  ;;  %v1887_v26 = vadd.f32 %v8527_v43, %v1886_v45  ;;  %v7169_v45 = vld [vmem:[%s11425_s5 + $0x68] sm:$0xff] }
 0x44b   : > { %2806 = vmatpush.bf16.msrb.mxu1 %v7169_v45  ;;  %v1892_v45 = vadd.f32 %v8527_v43, %v8446_v34  ;;  %v1894_v34 = vadd.f32 %v8527_v43, %v8458_v5 }
 0x44c   : > { %v8866_v51 = vpop.f32.mrf.mxu0 }
 0x44e   : > { %v2085_v35 = vpop.f32.mrf.mxu1 }
 0x44f   : > { %v8869_v47 = vadd.f32 %v2085_v35, %v1884_v24 }
 0x450   : > { %v3122_v28 = vpop.f32.mrf.mxu2 }
 0x451   : > { %11547 = vst [vmem:[#allocation61_spill] sm:$0xff] %v8869_v47  ;;  %v3226_v49 = vpop.f32.mrf.mxu3 }
 0x452   : > { %v8871_v60 = vadd.f32 %v3226_v49, %v3122_v28 }
 0x454   : > { %v8877_v2 = vpop.f32.mrf.mxu0 }
 0x455   : > { %6716 = vmatmul.msk.bf16.gmra.mxu2 %vm1137_vm0, %v8873_v63 }
 0x456   : > { %6740 = vmatmul.msk.bf16.gmra.mxu3 %vm1137_vm0, %v8849_v62  ;;  %v2088_v27 = vpop.f32.mrf.mxu1 }
 0x457   : > { %v8882_v24 = vadd.f32 %v2088_v27, %v1887_v26  ;;  %6656 = vmatmul.msk.bf16.gmra.mxu0 %vm1137_vm0, %v8408_v10  ;;  %v3009_v10 = vld [vmem:[#allocation2 + $0xc2] sm:$0xff] }
 0x458   : > { %v3125_v54 = vpop.f32.mrf.mxu2 }
 0x459   : > { %11548 = vst [vmem:[#allocation62_spill] sm:$0xff] %v8882_v24  ;;  %v3229_v35 = vpop.f32.mrf.mxu3  ;;  %6622 = vmatmul.msk.bf16.vlgmr.msra.gmra.mxu1 %vm1137_vm0, %v8632_v20  ;;  %v3010_v24 = vld [vmem:[#allocation2 + $0xca] sm:$0xff] }
 0x45a   : > { %v8888_v0 = vadd.f32 %v3229_v35, %v3125_v54  ;;  %v8901_v54 = vpack.c.bf16 %v3010_v24, %v3009_v10 }
 0x45c   : > { %v8893_v28 = vpop.f32.mrf.mxu0 }
 0x45e   : > { %v2090_v49 = vpop.f32.mrf.mxu1 }
 0x45f   : > { %v8897_v27 = vadd.f32 %v2090_v49, %v1889_v57 }
 0x460   : > { %v3127_v26 = vpop.f32.mrf.mxu2 }
 0x461   : > { %11549 = vst [vmem:[#allocation63_spill] sm:$0xff] %v8897_v27  ;;  %v3231_v47 = vpop.f32.mrf.mxu3 }
 0x462   : > { %v8899_v20 = vadd.f32 %v3231_v47, %v3127_v26 }
 0x464   : > { %v8905_v35 = vpop.f32.mrf.mxu0 }
 0x465   : > { %6717 = vmatmul.msk.bf16.gmra.mxu2 %vm1137_vm0, %v8901_v54 }
 0x466   : > { %6741 = vmatmul.msk.bf16.gmra.mxu3 %vm1137_vm0, %v8873_v63  ;;  %v2093_v13 = vpop.f32.mrf.mxu1 }
 0x467   : > { %v8911_v49 = vadd.f32 %v2093_v13, %v1892_v45  ;;  %6657 = vmatmul.msk.bf16.gmra.mxu0 %vm1137_vm0, %v8424_v33  ;;  %v3011_v45 = vld [vmem:[#allocation2 + $0xd2] sm:$0xff]  ;;  %v3012_v13 = vld [vmem:[#allocation2 + $0xda] sm:$0xff] }
 0x468   : > { %v3130_v57 = vpop.f32.mrf.mxu2  ;;  %v8927_v33 = vpack.c.bf16 %v3012_v13, %v3011_v45  ;;  %v1899_v45 = vadd.f32 %v8527_v43, %v8486_v50 }
 0x469   : > { %11550 = vst [vmem:[#allocation64_spill] sm:$0xff] %v8911_v49  ;;  %v3234_v47 = vpop.f32.mrf.mxu3  ;;  %6623 = vmatmul.msk.bf16.gmra.mxu1 %vm1137_vm0, %v8663_v29 }
 0x46a   : > { %v8917_v24 = vadd.f32 %v3234_v47, %v3130_v57  ;;  %v1897_v47 = vadd.f32 %v8527_v43, %v8472_v32  ;;  %v7168_v32 = vld [vmem:[%s11425_s5 + $0x60] sm:$0xff] }
 0x46b   : > { %2807 = vmatpush.bf16.msrb.mxu1 %v7168_v32  ;;  %v1902_v32 = vadd.f32 %v8527_v43, %v8500_v19  ;;  %v1904_v19 = vadd.f32 %v8527_v43, %v8520_v25 }
 0x46c   : > { %v8919_v26 = vpop.f32.mrf.mxu0 }
 0x46e   : > { %v2095_v10 = vpop.f32.mrf.mxu1 }
 0x46f   : > { %v8923_v40 = vadd.f32 %v2095_v10, %v1894_v34 }
 0x470   : > { %v3132_v27 = vpop.f32.mrf.mxu2 }
 0x471   : > { %11551 = vst [vmem:[#allocation65_spill] sm:$0xff] %v8923_v40  ;;  %v3236_v49 = vpop.f32.mrf.mxu3 }
 0x472   : > { %v8925_v38 = vadd.f32 %v3236_v49, %v3132_v27 }
 0x474   : > { %11552 = vst [vmem:[#allocation66_spill] sm:$0xff] %v8925_v38  ;;  %v8931_v57 = vpop.f32.mrf.mxu0 }
 0x475   : > { %6718 = vmatmul.msk.bf16.gmra.mxu2 %vm1137_vm0, %v8927_v33 }
 0x476   : > { %6742 = vmatmul.msk.bf16.gmra.mxu3 %vm1137_vm0, %v8901_v54  ;;  %v2098_v5 = vpop.f32.mrf.mxu1 }
 0x477   : > { %v8939_v10 = vadd.f32 %v2098_v5, %v1897_v47  ;;  %6658 = vmatmul.msk.bf16.gmra.mxu0 %vm1137_vm0, %v8440_v16  ;;  %v3013_v16 = vld [vmem:[#allocation2 + $0xe2] sm:$0xff] }
 0x478   : > { %v8937_v34 = vpop.f32.mrf.mxu2 }
 0x479   : > { %11553 = vst [vmem:[#allocation67_spill] sm:$0xff] %v8937_v34  ;;  %v8943_v27 = vpop.f32.mrf.mxu3  ;;  %6624 = vmatmul.msk.bf16.gmra.mxu1 %vm1137_vm0, %v8693_v18 }
 0x47a   : > { %11554 = vst [vmem:[#allocation68_spill] sm:$0xff] %v8939_v10  ;;  %v3014_v10 = vld [vmem:[#allocation2 + $0xea] sm:$0xff] }
 0x47b   : > { %11555 = vst [vmem:[#allocation69_spill] sm:$0xff] %v8943_v27  ;;  %v8958_v34 = vpack.c.bf16 %v3014_v10, %v3013_v16 }
 0x47c   : > { %v8950_v49 = vpop.f32.mrf.mxu0 }
 0x47e   : > { %v2100_v13 = vpop.f32.mrf.mxu1 }
 0x47f   : > { %v8954_v5 = vadd.f32 %v2100_v13, %v1899_v45 }
 0x480   : > { %v3137_v47 = vpop.f32.mrf.mxu2 }
 0x481   : > { %11556 = vst [vmem:[#allocation70_spill] sm:$0xff] %v8954_v5  ;;  %v3241_v40 = vpop.f32.mrf.mxu3 }
 0x482   : > { %v8956_v27 = vadd.f32 %v3241_v40, %v3137_v47 }
 0x484   : > { %v8962_v38 = vpop.f32.mrf.mxu0 }
 0x485   : > { %6719 = vmatmul.msk.bf16.gmra.mxu2 %vm1137_vm0, %v8958_v34 }
 0x486   : > { %6743 = vmatmul.msk.bf16.gmra.mxu3 %vm1137_vm0, %v8927_v33  ;;  %v2103_v50 = vpop.f32.mrf.mxu1 }
 0x487   : > { %v8970_v13 = vadd.f32 %v2103_v50, %v1902_v32  ;;  %6659 = vmatmul.msk.bf16.gmra.mxu0 %vm1137_vm0, %v8464_v59  ;;  %v3016_v32 = vld [vmem:[#allocation2 + $0xfa] sm:$0xff] }
 0x488   : > { %v8968_v45 = vpop.f32.mrf.mxu2 }
 0x489   : > { %11557 = vst [vmem:[#allocation71_spill] sm:$0xff] %v8968_v45  ;;  %v8974_v40 = vpop.f32.mrf.mxu3  ;;  %6625 = vmatmul.msk.bf16.gmra.mxu1 %vm1137_vm0, %v8723_v39  ;;  %v3015_v45 = vld [vmem:[#allocation2 + $0xf2] sm:$0xff] }
 0x48a   : > { %11558 = vst [vmem:[#allocation72_spill] sm:$0xff] %v8970_v13  ;;  %v8986_v59 = vpack.c.bf16 %v3016_v32, %v3015_v45 }
 0x48b   : > { %11559 = vst [vmem:[#allocation73_spill] sm:$0xff] %v8974_v40 }
 0x48c   : > { %v8978_v10 = vpop.f32.mrf.mxu0  ;;  %11562 = vst [vmem:[#allocation76_spill] sm:$0xff] %v8986_v59 }
 0x48e   : > { %v2105_v47 = vpop.f32.mrf.mxu1 }
 0x48f   : > { %v8982_v5 = vadd.f32 %v2105_v47, %v1904_v19 }
 0x490   : > { %v3142_v16 = vpop.f32.mrf.mxu2 }
 0x491   : > { %11560 = vst [vmem:[#allocation74_spill] sm:$0xff] %v8982_v5  ;;  %v3246_v50 = vpop.f32.mrf.mxu3  ;;  %v3038_v5 = vld [vmem:[#allocation2 + $0x102] sm:$0xff] }
 0x492   : > { %v8984_v13 = vadd.f32 %v3246_v50, %v3142_v16 }
 0x494   : > { %11561 = vst [vmem:[#allocation75_spill] sm:$0xff] %v8984_v13  ;;  %v8990_v40 = vpop.f32.mrf.mxu0 }
 0x495   : > { %6720 = vmatmul.msk.bf16.gmra.mxu2 %vm1137_vm0, %v8986_v59 }
 0x496   : > { %6744 = vmatmul.msk.bf16.gmra.mxu3 %vm1137_vm0, %v8958_v34  ;;  %v2262_v25 = vpop.f32.mrf.mxu1 }
 0x497   : > { %v8997_v19 = vadd.f32 %v2262_v25, %v8548_v12  ;;  %6660 = vmatmul.msk.bf16.gmra.mxu0 %vm1137_vm0, %v8494_v58 }
 0x498   : > { %v8994_v43 = vpop.f32.mrf.mxu2 }
 0x499   : > { %11563 = vst [vmem:[#allocation77_spill] sm:$0xff] %v8994_v43  ;;  %v9001_v47 = vpop.f32.mrf.mxu3  ;;  %6674 = vmatmul.msk.bf16.vlgmr.msrb.gmra.mxu1 %vm1137_vm0, %v8663_v29  ;;  %v3039_v43 = vld [vmem:[#allocation2 + $0x10a] sm:$0xff] }
 0x49a   : > { %11564 = vst [vmem:[#allocation78_spill] sm:$0xff] %v9001_v47  ;;  %v9012_v25 = vpack.c.bf16 %v3039_v43, %v3038_v5 }
 0x49c   : > { %v9005_v45 = vpop.f32.mrf.mxu0  ;;  %11566 = vst [vmem:[#allocation80_spill] sm:$0xff] %v9012_v25 }
 0x49e   : > { %v2264_v16 = vpop.f32.mrf.mxu1 }
 0x49f   : > { %v9008_v50 = vadd.f32 %v2264_v16, %v8567_v6 }
 0x4a0   : > { %v3147_v32 = vpop.f32.mrf.mxu2 }
 0x4a1   : > { %v3251_v13 = vpop.f32.mrf.mxu3 }
 0x4a2   : > { %v9010_v12 = vadd.f32 %v3251_v13, %v3147_v32 }
 0x4a4   : > { %11565 = vst [vmem:[#allocation79_spill] sm:$0xff] %v9010_v12  ;;  %v9016_v58 = vpop.f32.mrf.mxu0 }
 0x4a5   : > { %6721 = vmatmul.msk.bf16.gmra.mxu2 %vm1137_vm0, %v9012_v25 }
 0x4a6   : > { %6745 = vmatmul.msk.bf16.gmra.mxu3 %vm1137_vm0, %v8986_v59  ;;  %v2267_v29 = vpop.f32.mrf.mxu1 }
 0x4a7   : > { %v9023_v6 = vadd.f32 %v2267_v29, %v8579_v15  ;;  %6661 = vmatmul.msk.bf16.gmra.mxu0 %vm1137_vm0, %v8538_v23 }
 0x4a8   : > { %v9020_v47 = vpop.f32.mrf.mxu2 }
 0x4a9   : > { %11567 = vst [vmem:[#allocation81_spill] sm:$0xff] %v9020_v47  ;;  %v9027_v13 = vpop.f32.mrf.mxu3  ;;  %6675 = vmatmul.msk.bf16.gmra.mxu1 %vm1137_vm0, %v8693_v18 }
 0x4aa   : > { %11568 = vst [vmem:[#allocation82_spill] sm:$0xff] %v9027_v13  ;;  %v2694_v13 = vld [vmem:[#allocation2 + $0x58] sm:$0xff] }
 0x4ac   : > { %v9031_v5 = vpop.f32.mrf.mxu0 }
 0x4ad   : > { %11569 = vst [vmem:[#allocation83_spill] sm:$0xff] %v9031_v5  ;;  %v2704_v5 = vld [vmem:[#allocation2 + $0xa8] sm:$0xff] }
 0x4ae   : > { %v2269_v43 = vpop.f32.mrf.mxu1 }
 0x4af   : > { %v9034_v32 = vadd.f32 %v2269_v43, %v8595_v48 }
 0x4b0   : > { %v3152_v16 = vpop.f32.mrf.mxu2 }
 0x4b1   : > { %v3256_v12 = vpop.f32.mrf.mxu3 }
 0x4b2   : > { %v9036_v47 = vadd.f32 %v3256_v12, %v3152_v16 }
 0x4b4   : > { %11570 = vst [vmem:[#allocation84_spill] sm:$0xff] %v9036_v47  ;;  %v9038_v15 = vpop.f32.mrf.mxu0 }
 0x4b5   : > { %11571 = vst [vmem:[#allocation85_spill] sm:$0xff] %v9038_v15 }
 0x4b6   : > { %v2272_v29 = vpop.f32.mrf.mxu1 }
 0x4b7   : > { %v9043_v23 = vadd.f32 %v2272_v29, %v8607_v21  ;;  %6758 = vmatmul.msk.bf16.vlgmr.msrb.gmra.mxu0 %vm1137_vm0, %v8624_v17  ;;  %v2693_v29 = vld [vmem:[#allocation2 + $0x50] sm:$0xff] }
 0x4b8   : > { %v9040_v25 = vpop.f32.mrf.mxu2 }
 0x4b9   : > { %11572 = vst [vmem:[#allocation86_spill] sm:$0xff] %v9040_v25  ;;  %v9047_v18 = vpop.f32.mrf.mxu3  ;;  %6676 = vmatmul.msk.bf16.gmra.mxu1 %vm1137_vm0, %v8723_v39  ;;  %v2722_v39 = vpack.c.bf16 %v2694_v13, %v2693_v29  ;;  %v2695_v13 = vld [vmem:[#allocation2 + $0x60] sm:$0xff]  ;;  %v2696_v29 = vld [vmem:[#allocation2 + $0x68] sm:$0xff] }
 0x4ba   : > { %11573 = vst [vmem:[#allocation87_spill] sm:$0xff] %v9047_v18 }
 0x4bc   : > { %v9051_v48 = vpop.f32.mrf.mxu0 }
 0x4bd   : > { %11574 = vst [vmem:[#allocation88_spill] sm:$0xff] %v9051_v48 }
 0x4be   : > { %v2274_v12 = vpop.f32.mrf.mxu1 }
 0x4bf   : > { %v9054_v16 = vadd.f32 %v2274_v12, %v8620_v37 }
 0x4c0   : > { %v3157_v43 = vpop.f32.mrf.mxu2 }
 0x4c1   : > { %v3261_v47 = vpop.f32.mrf.mxu3 }
 0x4c2   : > { %v9056_v25 = vadd.f32 %v3261_v47, %v3157_v43 }
 0x4c4   : > { %11575 = vst [vmem:[#allocation89_spill] sm:$0xff] %v9056_v25  ;;  %v9058_v21 = vpop.f32.mrf.mxu0 }
 0x4c5   : > { %11576 = vst [vmem:[#allocation90_spill] sm:$0xff] %v9058_v21  ;;  %v2703_v21 = vld [vmem:[#allocation2 + $0xa0] sm:$0xff] }
 0x4c6   : > { %v2277_v17 = vpop.f32.mrf.mxu1 }
 0x4c7   : > { %v9063_v18 = vadd.f32 %v2277_v17, %v8637_v31  ;;  %6759 = vmatmul.msk.bf16.gmra.mxu0 %vm1137_vm0, %v8655_v30  ;;  %v2723_v30 = vpack.c.bf16 %v2696_v29, %v2695_v13 }
 0x4c8   : > { %v9060_v15 = vpop.f32.mrf.mxu2 }
 0x4c9   : > { %11577 = vst [vmem:[#allocation91_spill] sm:$0xff] %v9060_v15  ;;  %v9067_v48 = vpop.f32.mrf.mxu3  ;;  %6677 = vmatmul.msk.bf16.gmra.mxu1 %vm1137_vm0, %v2722_v39 }
 0x4ca   : > { %11578 = vst [vmem:[#allocation92_spill] sm:$0xff] %v9067_v48 }
 0x4cc   : > { %v9070_v37 = vpop.f32.mrf.mxu0 }
 0x4cd   : > { %11579 = vst [vmem:[#allocation93_spill] sm:$0xff] %v9070_v37 }
 0x4ce   : > { %v2279_v47 = vpop.f32.mrf.mxu1 }
 0x4cf   : > { %v9073_v43 = vadd.f32 %v2279_v47, %v8651_v9  ;;  %v2697_v9 = vld [vmem:[#allocation2 + $0x70] sm:$0xff]  ;;  %v2698_v47 = vld [vmem:[#allocation2 + $0x78] sm:$0xff] }
 0x4d0   : > { %v3162_v12 = vpop.f32.mrf.mxu2 }
 0x4d1   : > { %v3266_v25 = vpop.f32.mrf.mxu3 }
 0x4d2   : > { %v9075_v15 = vadd.f32 %v3266_v25, %v3162_v12  ;;  %v2724_v12 = vpack.c.bf16 %v2698_v47, %v2697_v9 }
 0x4d4   : > { %11580 = vst [vmem:[#allocation94_spill] sm:$0xff] %v9075_v15  ;;  %v9077_v31 = vpop.f32.mrf.mxu0  ;;  %v2700_v15 = vld [vmem:[#allocation2 + $0x88] sm:$0xff] }
 0x4d5   : > { %11581 = vst [vmem:[#allocation95_spill] sm:$0xff] %v9077_v31 }
 0x4d6   : > { %v2503_v17 = vpop.f32.mrf.mxu1 }
 0x4d7   : > { %6760 = vmatmul.msk.bf16.gmra.mxu0 %vm1137_vm0, %v8687_v61 }
 0x4d9   : > { %6678 = vmatmul.msk.bf16.gmra.mxu1 %vm1137_vm0, %v2723_v30  ;;  %v2699_v30 = vld [vmem:[#allocation2 + $0x80] sm:$0xff] }
 0x4dc   : > { %v9082_v39 = vpop.f32.mrf.mxu0 }
 0x4dd   : > { %11582 = vst [vmem:[#allocation96_spill] sm:$0xff] %v9082_v39 }
 0x4de   : > { %v2505_v48 = vpop.f32.mrf.mxu1 }
 0x4e4   : > { %v9084_v37 = vpop.f32.mrf.mxu0 }
 0x4e5   : > { %11583 = vst [vmem:[#allocation97_spill] sm:$0xff] %v9084_v37  ;;  %v2725_v37 = vpack.c.bf16 %v2700_v15, %v2699_v30  ;;  %v528_v15 = vlaneseq }
 0x4e6   : > { %v2508_v25 = vpop.f32.mrf.mxu1 }
 0x4e7   : > { %6761 = vmatmul.msk.bf16.gmra.mxu0 %vm1137_vm0, %v8717_v1 }
 0x4e9   : > { %6679 = vmatmul.msk.bf16.gmra.mxu1 %vm1137_vm0, %v2724_v12  ;;  %v2701_v12 = vld [vmem:[#allocation2 + $0x90] sm:$0xff] }
 0x4ec   : > { %v9089_v13 = vpop.f32.mrf.mxu0 }
 0x4ed   : > { %11584 = vst [vmem:[#allocation98_spill] sm:$0xff] %v9089_v13  ;;  %v2702_v13 = vld [vmem:[#allocation2 + $0x98] sm:$0xff] }
 0x4ee   : > { %v9091_v29 = vpop.f32.mrf.mxu1 }
 0x4f4   : > { %v9093_v61 = vpop.f32.mrf.mxu0 }
 0x4f5   : > { %11585 = vst [vmem:[#allocation99_spill] sm:$0xff] %v9093_v61  ;;  %v2726_v61 = vpack.c.bf16 %v2702_v13, %v2701_v12  ;;  %v2608_v13 = vadd.f32 %v8829_v7, %v2503_v17  ;;  %v11589_v12 = vmov 0.0  }
 0x4f6   : > { %v9095_v39 = vpop.f32.mrf.mxu1  ;;  %1146 = vst.msk [vmem:[#allocation3] sm:$0xff] %vm1145_vm6, %v11589_v12 }
 0x4f7   : > { %6762 = vmatmul.msk.bf16.gmra.mxu0 %vm1137_vm0, %v8745_v52  ;;  %v9111_v52 = vshrl.u32 %v528_v15, 7  ;;  %v2727_v15 = vpack.c.bf16 %v2704_v5, %v2703_v21  ;;  %1147 = vst.msk [vmem:[#allocation3 + $0x8] sm:$0xff] %vm1145_vm6, %v11589_v12 }
 0x4f8   : > { %1150 = vst.msk [vmem:[#allocation3 + $0x111] sm:$0xff] %vm1145_vm6, %v11589_v12 }
 0x4f9   : > { %6680 = vmatmul.msk.bf16.gmra.mxu1 %vm1137_vm0, %v2725_v37  ;;  %1151 = vst.msk [vmem:[#allocation3 + $0x119] sm:$0xff] %vm1145_vm6, %v11589_v12 }
 0x4fc   : > { %v9100_v9 = vpop.f32.mrf.mxu0 }
 0x4fd   : > { %11586 = vst [vmem:[#allocation100_spill] sm:$0xff] %v9100_v9  ;;  %v565_v9 = vand.u32 15, %v9111_v52 }
 0x4fe   : > { %v9102_v1 = vpop.f32.mrf.mxu1 }
 0x4ff   : > { %vm945_vm5 = vcmp.ge.s32.totalorder %v565_v9, 1  ;;  %v531_v9 = vadd.s32 16, %v9111_v52 }
 0x501   : > { %v579_v17 = vand.u32 15, %v531_v9 }
 0x503   : > { %vm947_vm7 = vcmp.ge.s32.totalorder %v579_v17, 1 }
 0x504   : > { %v9104_v47 = vpop.f32.mrf.mxu0 }
 0x505   : > { %11587 = vst [vmem:[#allocation101_spill] sm:$0xff] %v9104_v47 }
 0x506   : > { %v9106_v31 = vpop.f32.mrf.mxu1 }
 0x507   : > { %6763 = vmatmul.msk.bf16.gmra.mxu0 %vm1137_vm0, %v8771_v3  ;;  %v9122_v3 = vsel %vm945_vm5, 1.0, %v11589_v12 }
 0x508   : > { %11590 = vst [vmem:[#allocation103_spill] sm:$0xff] %v9122_v3 }
 0x509   : > { %6681 = vmatmul.msk.bf16.gmra.mxu1 %vm1137_vm0, %v2726_v61 }
 0x50c   : > { %v9113_v37 = vpop.f32.mrf.mxu0 }
 0x50d   : > { %11588 = vst [vmem:[#allocation102_spill] sm:$0xff] %v9113_v37 }
 0x50e   : > { %v9115_v30 = vpop.f32.mrf.mxu1 }
 0x514   : > { %v9118_v47 = vpop.f32.mrf.mxu0 }
 0x516   : > { %v2809_v59 = vpop.f32.mrf.mxu1 }
 0x517   : > { %v2889_v61 = vadd.f32 %v2809_v59, %v2608_v13  ;;  %6764 = vmatmul.msk.bf16.gmra.mxu0 %vm1137_vm0, %v8799_v42  ;;  %v2610_v42 = vadd.f32 %v8842_v41, %v2505_v48  ;;  %v2613_v41 = vadd.f32 %v8853_v44, %v2508_v25  ;;  %v9149_v48 = vsel %vm947_vm7, 1.0, %v11589_v12 }
 0x518   : > { %11591 = vst [vmem:[#allocation104_spill] sm:$0xff] %v9149_v48  ;;  %v2615_v44 = vadd.f32 %v8866_v51, %v9091_v29 }
 0x519   : > { %v2921_v37 = vmul.f32 %v9122_v3, %v2889_v61  ;;  %6682 = vmatmul.msk.bf16.gmra.mxu1 %vm1137_vm0, %v2727_v15  ;;  %v2705_v61 = vld [vmem:[#allocation2 + $0xb0] sm:$0xff]  ;;  %v2706_v15 = vld [vmem:[#allocation2 + $0xb8] sm:$0xff] }
 0x51b   : > { %v2953_v7 = vadd.f32 %v2921_v37, %v8997_v19  ;;  %v3606_v19 = vld [vmem:[%s11429_s9 + $0x38] sm:$0xff] }
 0x51c   : > { %v9134_v59 = vpop.f32.mrf.mxu0  ;;  %3691 = vmatpush.msra.mxu1 %v3606_v19  ;;  %3872 = vmatpush.msrb.mxu3 %v3606_v19 }
 0x51e   : > { %v2811_v5 = vpop.f32.mrf.mxu1 }
 0x51f   : > { %v2890_v21 = vadd.f32 %v2811_v5, %v2610_v42  ;;  %v2728_v5 = vpack.c.bf16 %v2706_v15, %v2705_v61 }
 0x521   : > { %v2954_v13 = vadd.f32 %v2890_v21, %v9008_v50  ;;  %v533_v21 = vadd.s32 32, %v9111_v52 }
 0x524   : > { %v9145_v37 = vpop.f32.mrf.mxu0 }
 0x526   : > { %v2814_v42 = vpop.f32.mrf.mxu1 }
 0x527   : > { %v2891_v9 = vadd.f32 %v2814_v42, %v2613_v41  ;;  %6765 = vmatmul.msk.bf16.gmra.mxu0 %vm1137_vm0, %v8825_v36  ;;  %v593_v41 = vand.u32 15, %v533_v21  ;;  %v530_v36 = vadd.s32 8, %v9111_v52  ;;  %v2707_v42 = vld [vmem:[#allocation2 + $0xc0] sm:$0xff] }
 0x529   : > { %v2923_v50 = vmul.f32 %v9149_v48, %v2891_v9  ;;  %6683 = vmatmul.msk.bf16.gmra.mxu1 %vm1137_vm0, %v2728_v5  ;;  %vm949_vm8 = vcmp.ge.s32.totalorder %v593_v41, 1  ;;  %v2708_v9 = vld [vmem:[#allocation2 + $0xc8] sm:$0xff]  ;;  %v2618_v5 = vadd.f32 %v8877_v2, %v9095_v39  ;;  %v535_v2 = vadd.s32 48, %v9111_v52 }
 0x52a   : > { %v9167_v48 = vsel %vm949_vm8, 1.0, %v11589_v12 }
 0x52b   : > { %v2955_v17 = vadd.f32 %v2923_v50, %v9023_v6  ;;  %v572_v50 = vand.u32 15, %v530_v36  ;;  %11592 = vst [vmem:[#allocation105_spill] sm:$0xff] %v9167_v48 }
 0x52c   : > { %v9157_v19 = vpop.f32.mrf.mxu0 }
 0x52d   : > { %vm1042_vm9 = vcmp.le.s32.totalorder %v572_v50, 14 }
 0x52e   : > { %v2816_v25 = vpop.f32.mrf.mxu1  ;;  %v9178_v39 = vsel %vm1042_vm9, 1.0, %v11589_v12 }
 0x52f   : > { %v2892_v3 = vadd.f32 %v2816_v25, %v2615_v44  ;;  %11594 = vst [vmem:[#allocation107_spill] sm:$0xff] %v9178_v39 }
 0x531   : > { %v2956_v61 = vadd.f32 %v2892_v3, %v9034_v32  ;;  %v2729_v32 = vpack.c.bf16 %v2708_v9, %v2707_v42 }
 0x534   : > { %v3421_v15 = vpop.f32.mrf.mxu0 }
 0x535   : > { %v3501_v6 = vadd.f32 %v3421_v15, %v8840_v4  ;;  %v607_v15 = vand.u32 15, %v535_v2 }
 0x536   : > { %v2819_v51 = vpop.f32.mrf.mxu1 }
 0x537   : > { %v2893_v29 = vadd.f32 %v2819_v51, %v2618_v5  ;;  %v9169_v21 = vadd.f32 %v3501_v6, %v2953_v7  ;;  %6766 = vmatmul.msk.bf16.gmra.mxu0 %vm1137_vm0, %v8849_v62  ;;  %v2620_v7 = vadd.f32 %v8893_v28, %v9102_v1  ;;  %vm951_vm10 = vcmp.ge.s32.totalorder %v607_v15, 1  ;;  %v3605_v5 = vld [vmem:[%s11429_s9 + $0x30] sm:$0xff] }
 0x538   : > { %v2709_v1 = vld [vmem:[#allocation2 + $0xd0] sm:$0xff]  ;;  %3692 = vmatpush.msra.mxu1 %v3605_v5  ;;  %3873 = vmatpush.msrb.mxu3 %v3605_v5  ;;  %v2623_v6 = vadd.f32 %v8905_v35, %v9106_v31  ;;  %v537_v35 = vadd.s32 64, %v9111_v52  ;;  %v2711_v5 = vld [vmem:[#allocation2 + $0xe0] sm:$0xff] }
 0x539   : > { %11593 = vst [vmem:[#allocation106_spill] sm:$0xff] %v9169_v21  ;;  %v2925_v3 = vmul.f32 %v9167_v48, %v2893_v29  ;;  %6684 = vmatmul.msk.bf16.gmra.mxu1 %vm1137_vm0, %v2729_v32 }
 0x53b   : > { %v2957_v4 = vadd.f32 %v2925_v3, %v9043_v23  ;;  %v532_v23 = vadd.s32 24, %v9111_v52 }
 0x53c   : > { %v3423_v44 = vpop.f32.mrf.mxu0 }
 0x53d   : > { %v3502_v25 = vadd.f32 %v3423_v44, %v8847_v22  ;;  %v2710_v22 = vld [vmem:[#allocation2 + $0xd8] sm:$0xff]  ;;  %v586_v50 = vand.u32 15, %v532_v23 }
 0x53e   : > { %v2821_v41 = vpop.f32.mrf.mxu1  ;;  %v2730_v3 = vpack.c.bf16 %v2710_v22, %v2709_v1 }
 0x53f   : > { %v2894_v62 = vadd.f32 %v2821_v41, %v2620_v7  ;;  %v3534_v36 = vmul.f32 %v9178_v39, %v3502_v25  ;;  %vm1044_vm11 = vcmp.le.s32.totalorder %v586_v50, 14 }
 0x540   : > { %v9208_v31 = vsel %vm1044_vm11, 1.0, %v11589_v12 }
 0x541   : > { %v9185_v42 = vadd.f32 %v2894_v62, %v9054_v16  ;;  %v9187_v9 = vadd.f32 %v3534_v36, %v2954_v13  ;;  %v9197_v13 = vsel %vm951_vm10, 1.0, %v11589_v12  ;;  %11598 = vst [vmem:[#allocation111_spill] sm:$0xff] %v9208_v31  ;;  %v621_v62 = vand.u32 15, %v537_v35 }
 0x542   : > { %11596 = vst [vmem:[#allocation109_spill] sm:$0xff] %v9197_v13 }
 0x543   : > { %11595 = vst [vmem:[#allocation108_spill] sm:$0xff] %v9187_v9  ;;  %vm953_vm12 = vcmp.ge.s32.totalorder %v621_v62, 1  ;;  %v3612_v48 = vsel %vm1145_vm6, %v9187_v9, 0.0 }
 0x544   : > { %v3426_v28 = vpop.f32.mrf.mxu0  ;;  %v9224_v1 = vsel %vm953_vm12, 1.0, %v11589_v12 }
 0x545   : > { %v3503_v16 = vadd.f32 %v3426_v28, %v8864_v55  ;;  %v2712_v28 = vld [vmem:[#allocation2 + $0xe8] sm:$0xff]  ;;  %11599 = vst [vmem:[#allocation112_spill] sm:$0xff] %v9224_v1 }
 0x546   : > { %v2824_v51 = vpop.f32.mrf.mxu1 }
 0x547   : > { %v2895_v29 = vadd.f32 %v2824_v51, %v2623_v6  ;;  %v9199_v32 = vadd.f32 %v3503_v16, %v2955_v17  ;;  %6767 = vmatmul.msk.bf16.gmra.mxu0 %vm1137_vm0, %v8873_v63  ;;  %v2625_v17 = vadd.f32 %v8919_v26, %v9115_v30  ;;  %v2628_v26 = vadd.f32 %v8931_v57, %v8478_v11 }
 0x548   : > { %v2350_v16 = vadd.f32 %v8470_v53, %v8669_v8  ;;  %v539_v11 = vadd.s32 80, %v9111_v52  ;;  %v2630_v51 = vadd.f32 %v8950_v49, %v8488_v56  ;;  %v2351_v53 = vadd.f32 %v8484_v14, %v8683_v46  ;;  %v3604_v56 = vld [vmem:[%s11429_s9 + $0x28] sm:$0xff]  ;;  %v2713_v49 = vld [vmem:[#allocation2 + $0xf0] sm:$0xff]  ;;  %v11601_v14 = vld [vmem:[#allocation5_spill] sm:$0xff] }
 0x549   : > { %11597 = vst [vmem:[#allocation110_spill] sm:$0xff] %v9199_v32  ;;  %v2927_v2 = vmul.f32 %v9197_v13, %v2895_v29  ;;  %6685 = vmatmul.msk.bf16.gmra.mxu1 %vm1137_vm0, %v2730_v3  ;;  %3874 = vmatpush.msrb.mxu3 %v3604_v56  ;;  %v2633_v46 = vadd.f32 %v8962_v38, %v11601_v14  ;;  %v541_v38 = vadd.s32 96, %v9111_v52 }
 0x54a   : > { %3693 = vmatpush.msra.mxu1 %v3604_v56 }
 0x54b   : > { %v2959_v55 = vadd.f32 %v2927_v2, %v9063_v18  ;;  %v534_v18 = vadd.s32 40, %v9111_v52  ;;  %v635_v2 = vand.u32 15, %v539_v11  ;;  %v11609_v11 = vld [vmem:[#allocation6_spill] sm:$0xff] }
 0x54c   : > { %v3428_v44 = vpop.f32.mrf.mxu0 }
 0x54d   : > { %v3504_v7 = vadd.f32 %v3428_v44, %v8871_v60  ;;  %v600_v30 = vand.u32 15, %v534_v18  ;;  %vm955_vm14 = vcmp.ge.s32.totalorder %v635_v2, 1  ;;  %v11611_v2 = vld [vmem:[#allocation67_spill] sm:$0xff] }
 0x54e   : > { %v2826_v25 = vpop.f32.mrf.mxu1 }
 0x54f   : > { %v2896_v63 = vadd.f32 %v2826_v25, %v2625_v17  ;;  %v3536_v41 = vmul.f32 %v9208_v31, %v3504_v7  ;;  %vm1046_vm13 = vcmp.le.s32.totalorder %v600_v30, 14  ;;  %v536_v17 = vadd.s32 56, %v9111_v52  ;;  %v2714_v7 = vld [vmem:[#allocation2 + $0xf8] sm:$0xff] }
 0x550   : > { %v9236_v57 = vsel %vm1046_vm13, 1.0, %v11589_v12 }
 0x551   : > { %v9215_v36 = vadd.f32 %v2896_v63, %v9073_v43  ;;  %v9217_v15 = vadd.f32 %v3536_v41, %v2956_v61  ;;  %v2731_v61 = vpack.c.bf16 %v2712_v28, %v2711_v5  ;;  %11600 = vst [vmem:[#allocation113_spill] sm:$0xff] %v9236_v57  ;;  %v614_v63 = vand.u32 15, %v536_v17  ;;  %v11603_v5 = vld [vmem:[#allocation29_spill] sm:$0xff]  ;;  %v11604_v28 = vld [vmem:[#allocation4_spill] sm:$0xff] }
 0x552   : > { %v11612_v17 = vld [vmem:[#allocation69_spill] sm:$0xff] }
 0x553   : > { %vm1048_vm15 = vcmp.le.s32.totalorder %v614_v63, 14 }
 0x554   : > { %v3431_v23 = vpop.f32.mrf.mxu0  ;;  %v9269_v30 = vsel %vm1048_vm15, 1.0, %v11589_v12 }
 0x555   : > { %v3505_v60 = vadd.f32 %v3431_v23, %v8888_v0  ;;  %v2732_v23 = vpack.c.bf16 %v2714_v7, %v2713_v49  ;;  %11605 = vst [vmem:[#allocation29_spill] sm:$0xff] %v9269_v30  ;;  %v2716_v49 = vld [vmem:[#allocation2 + $0x108] sm:$0xff]  ;;  %v11613_v7 = vld [vmem:[#allocation9_spill] sm:$0xff] }
 0x556   : > { %v2829_v22 = vpop.f32.mrf.mxu1  ;;  %v2638_v14 = vadd.f32 %v8990_v40, %v11613_v7  ;;  %v543_v40 = vadd.s32 112, %v9111_v52 }
 0x557   : > { %v2897_v43 = vadd.f32 %v2829_v22, %v2628_v26  ;;  %v9226_v6 = vadd.f32 %v3505_v60, %v2957_v4  ;;  %6768 = vmatmul.msk.bf16.gmra.mxu0 %vm1137_vm0, %v8901_v54  ;;  %v2352_v26 = vadd.f32 %v11604_v28, %v11603_v5  ;;  %v11606_v22 = vld [vmem:[#allocation7_spill] sm:$0xff]  ;;  %v11617_v28 = vld [vmem:[#allocation8_spill] sm:$0xff] }
 0x558   : > { %v11616_v5 = vld [vmem:[#allocation35_spill] sm:$0xff] }
 0x559   : > { %v2929_v50 = vmul.f32 %v9224_v1, %v2897_v43  ;;  %6686 = vmatmul.msk.bf16.gmra.mxu1 %vm1137_vm0, %v2731_v61  ;;  %v2635_v43 = vadd.f32 %v8978_v10, %v11606_v22  ;;  %v11607_v61 = vld [vmem:[#allocation66_spill] sm:$0xff]  ;;  %v3240_v10 = vadd.f32 %v11612_v17, %v11611_v2  ;;  %v11619_v22 = vld [vmem:[#allocation11_spill] sm:$0xff]  ;;  %v11624_v17 = vld [vmem:[#allocation73_spill] sm:$0xff] }
 0x55a   : > { %v11623_v2 = vld [vmem:[#allocation71_spill] sm:$0xff] }
 0x55b   : > { %v2961_v0 = vadd.f32 %v2929_v50, %v2350_v16  ;;  %v11608_v50 = vld [vmem:[#allocation32_spill] sm:$0xff] }
 0x55c   : > { %v3433_v4 = vpop.f32.mrf.mxu0 }
 0x55d   : > { %v3506_v54 = vadd.f32 %v3433_v4, %v8899_v20  ;;  %v2353_v4 = vadd.f32 %v11609_v11, %v11608_v50 }
 0x55e   : > { %v2831_v29 = vpop.f32.mrf.mxu1 }
 0x55f   : > { %v2898_v8 = vadd.f32 %v2831_v29, %v2630_v51  ;;  %v3538_v3 = vmul.f32 %v9236_v57, %v3506_v54  ;;  %v649_v29 = vand.u32 15, %v541_v38 }
 0x561   : > { %v9244_v35 = vadd.f32 %v2898_v8, %v2351_v53  ;;  %v9247_v44 = vadd.f32 %v3538_v3, %v9185_v42  ;;  %v9257_v42 = vsel %vm955_vm14, 1.0, %v11589_v12  ;;  %v538_v3 = vadd.s32 72, %v9111_v52 }
 0x562   : > { %11602 = vst [vmem:[#allocation5_spill] sm:$0xff] %v9257_v42  ;;  %vm957_vm1 = vcmp.ge.s32.totalorder %v649_v29, 1 }
 0x563   : > { %v9288_v63 = vsel %vm957_vm1, 1.0, %v11589_v12 }
 0x564   : > { %v3436_v20 = vpop.f32.mrf.mxu0  ;;  %11614 = vst [vmem:[#allocation7_spill] sm:$0xff] %v9288_v63 }
 0x565   : > { %v3507_v25 = vadd.f32 %v3436_v20, %v8917_v24  ;;  %v2715_v20 = vld [vmem:[#allocation2 + $0x100] sm:$0xff] }
 0x566   : > { %v2834_v41 = vpop.f32.mrf.mxu1 }
 0x567   : > { %v2899_v62 = vadd.f32 %v2834_v41, %v2633_v46  ;;  %v9259_v18 = vadd.f32 %v3507_v25, %v2959_v55  ;;  %6769 = vmatmul.msk.bf16.gmra.mxu0 %vm1137_vm0, %v8927_v33  ;;  %v628_v25 = vand.u32 15, %v538_v3  ;;  %v540_v3 = vadd.s32 88, %v9111_v52 }
 0x569   : > { %v2931_v60 = vmul.f32 %v9257_v42, %v2899_v62  ;;  %6687 = vmatmul.msk.bf16.gmra.mxu1 %vm1137_vm0, %v2732_v23  ;;  %v2733_v23 = vpack.c.bf16 %v2716_v49, %v2715_v20  ;;  %vm1050_vm2 = vcmp.le.s32.totalorder %v628_v25, 14  ;;  %v2718_v20 = vld [vmem:[#allocation2 + $0x118] sm:$0xff] }
 0x56a   : > { %v11625_v49 = vld [vmem:[#allocation13_spill] sm:$0xff] }
 0x56b   : > { %v2963_v24 = vadd.f32 %v2931_v60, %v2352_v26  ;;  %v2354_v26 = vadd.f32 %v11617_v28, %v11616_v5  ;;  %v2643_v7 = vadd.f32 %v9016_v58, %v11625_v49  ;;  %v11628_v5 = vld [vmem:[#allocation76_spill] sm:$0xff]  ;;  %v11629_v28 = vld [vmem:[#allocation41_spill] sm:$0xff]  ;;  %v545_v58 = vadd.s32 128, %v9111_v52 }
 0x56c   : > { %v3438_v55 = vpop.f32.mrf.mxu0 }
 0x56d   : > { %v3508_v33 = vadd.f32 %v3438_v55, %v11607_v61  ;;  %v9300_v55 = vsel %vm1050_vm2, 1.0, %v11589_v12 }
 0x56e   : > { %v2836_v16 = vpop.f32.mrf.mxu1  ;;  %11618 = vst [vmem:[#allocation32_spill] sm:$0xff] %v9300_v55 }
 0x56f   : > { %v2900_v51 = vadd.f32 %v2836_v16, %v2635_v43  ;;  %v3540_v54 = vmul.f32 %v9269_v30, %v3508_v33  ;;  %v2640_v43 = vadd.f32 %v9005_v45, %v11619_v22  ;;  %v11620_v33 = vld [vmem:[#allocation38_spill] sm:$0xff]  ;;  %v3245_v45 = vadd.f32 %v11624_v17, %v11623_v2 }
 0x570   : > { %v11621_v16 = vld [vmem:[#allocation10_spill] sm:$0xff]  ;;  %v677_v17 = vand.u32 15, %v545_v58  ;;  %v11646_v58 = vld [vmem:[#allocation16_spill] sm:$0xff] }
 0x571   : > { %v9277_v53 = vadd.f32 %v2900_v51, %v2353_v4  ;;  %v9280_v8 = vadd.f32 %v3540_v54, %v9215_v36  ;;  %v2355_v50 = vadd.f32 %v11621_v16, %v11620_v33  ;;  %v663_v51 = vand.u32 15, %v543_v40  ;;  %v11634_v33 = vld [vmem:[#allocation75_spill] sm:$0xff] }
 0x572   : > { %vm961_vm5 = vcmp.ge.s32.totalorder %v677_v17, 1  ;;  %v11652_v17 = vld [vmem:[#allocation18_spill] sm:$0xff] }
 0x573   : > { %11610 = vst [vmem:[#allocation4_spill] sm:$0xff] %v9280_v8  ;;  %vm959_vm3 = vcmp.ge.s32.totalorder %v663_v51, 1 }
 0x574   : > { %v3441_v56 = vpop.f32.mrf.mxu0 }
 0x575   : > { %v3509_v46 = vadd.f32 %v3441_v56, %v3240_v10  ;;  %v2717_v56 = vld [vmem:[#allocation2 + $0x110] sm:$0xff] }
 0x576   : > { %v2839_v41 = vpop.f32.mrf.mxu1 }
 0x577   : > { %v2901_v36 = vadd.f32 %v2839_v41, %v2638_v14  ;;  %v9290_v62 = vadd.f32 %v3509_v46, %v2961_v0  ;;  %6770 = vmatmul.msk.bf16.gmra.mxu0 %vm1137_vm0, %v8958_v34  ;;  %v642_v14 = vand.u32 15, %v540_v3  ;;  %v9322_v46 = vsel %vm959_vm3, 1.0, %v11589_v12 }
 0x578   : > { %11626 = vst [vmem:[#allocation67_spill] sm:$0xff] %v9322_v46 }
 0x579   : > { %11615 = vst [vmem:[#allocation66_spill] sm:$0xff] %v9290_v62  ;;  %v2933_v60 = vmul.f32 %v9288_v63, %v2901_v36  ;;  %6688 = vmatmul.msk.bf16.gmra.mxu1 %vm1137_vm0, %v2733_v23  ;;  %v2734_v23 = vpack.c.bf16 %v2718_v20, %v2717_v56  ;;  %vm1052_vm4 = vcmp.le.s32.totalorder %v642_v14, 14  ;;  %v11638_v56 = vld [vmem:[#allocation77_spill] sm:$0xff]  ;;  %v11639_v20 = vld [vmem:[#allocation78_spill] sm:$0xff] }
 0x57a   : > { %v9334_v22 = vsel %vm1052_vm4, 1.0, %v11589_v12  ;;  %v3250_v49 = vadd.f32 %v11639_v20, %v11638_v56  ;;  %v11641_v14 = vld [vmem:[#allocation85_spill] sm:$0xff] }
 0x57b   : > { %v2965_v38 = vadd.f32 %v2933_v60, %v2354_v26  ;;  %v11630_v26 = vld [vmem:[#allocation12_spill] sm:$0xff]  ;;  %11631 = vst [vmem:[#allocation9_spill] sm:$0xff] %v9334_v22 }
 0x57c   : > { %v3443_v0 = vpop.f32.mrf.mxu0  ;;  %v2356_v60 = vadd.f32 %v11630_v26, %v11629_v28 }
 0x57d   : > { %v3510_v34 = vadd.f32 %v3443_v0, %v8956_v27  ;;  %v3603_v27 = vld [vmem:[%s11429_s9 + $0x20] sm:$0xff] }
 0x57e   : > { %v2841_v61 = vpop.f32.mrf.mxu1  ;;  %3694 = vmatpush.msra.mxu1 %v3603_v27  ;;  %3875 = vmatpush.msrb.mxu3 %v3603_v27 }
 0x57f   : > { %v2902_v11 = vadd.f32 %v2841_v61, %v2640_v43  ;;  %v3542_v4 = vmul.f32 %v9300_v55, %v3510_v34  ;;  %v11632_v43 = vld [vmem:[#allocation15_spill] sm:$0xff] }
 0x580   : > { %v11633_v34 = vld [vmem:[#allocation83_spill] sm:$0xff] }
 0x581   : > { %v9308_v54 = vadd.f32 %v2902_v11, %v2355_v50  ;;  %v9311_v29 = vadd.f32 %v3542_v4, %v9244_v35  ;;  %v2645_v61 = vadd.f32 %v11633_v34, %v11632_v43  ;;  %v11635_v11 = vld [vmem:[#allocation44_spill] sm:$0xff]  ;;  %v11636_v4 = vld [vmem:[#allocation14_spill] sm:$0xff]  ;;  %v547_v34 = vadd.s32 144, %v9111_v52 }
 0x582   : > { %v2357_v51 = vadd.f32 %v11636_v4, %v11635_v11  ;;  %v11649_v11 = vld [vmem:[#allocation88_spill] sm:$0xff]  ;;  %v11650_v4 = vld [vmem:[#allocation79_spill] sm:$0xff] }
 0x583   : > { %11622 = vst [vmem:[#allocation6_spill] sm:$0xff] %v9311_v29 }
 0x584   : > { %v3446_v10 = vpop.f32.mrf.mxu0 }
 0x585   : > { %v3511_v35 = vadd.f32 %v3446_v10, %v3245_v45  ;;  %v542_v10 = vadd.s32 104, %v9111_v52 }
 0x586   : > { %v2844_v25 = vpop.f32.mrf.mxu1 }
 0x587   : > { %v2903_v41 = vadd.f32 %v2844_v25, %v2643_v7  ;;  %v9324_v36 = vadd.f32 %v3511_v35, %v2963_v24  ;;  %6771 = vmatmul.msk.bf16.gmra.mxu0 %vm1137_vm0, %v11628_v5  ;;  %v11640_v35 = vld [vmem:[#allocation17_spill] sm:$0xff]  ;;  %v9353_v5 = vsel %vm961_vm5, 1.0, %v11589_v12 }
 0x588   : > { %v2648_v25 = vadd.f32 %v11641_v14, %v11640_v35  ;;  %11642 = vst [vmem:[#allocation8_spill] sm:$0xff] %v9353_v5  ;;  %v3330_v35 = vld [vmem:[#allocation2 + $0x11a] sm:$0xff] }
 0x589   : > { %11627 = vst [vmem:[#allocation69_spill] sm:$0xff] %v9324_v36  ;;  %v2935_v40 = vmul.f32 %v9322_v46, %v2903_v41  ;;  %6689 = vmatmul.msk.bf16.gmra.mxu1 %vm1137_vm0, %v2734_v23  ;;  %v656_v23 = vand.u32 15, %v542_v10 }
 0x58b   : > { %v2967_v0 = vadd.f32 %v2935_v40, %v2356_v60  ;;  %v11645_v40 = vld [vmem:[#allocation47_spill] sm:$0xff]  ;;  %vm1054_vm7 = vcmp.le.s32.totalorder %v656_v23, 14  ;;  %v11653_v23 = vld [vmem:[#allocation81_spill] sm:$0xff] }
 0x58c   : > { %v3448_v24 = vpop.f32.mrf.mxu0 }
 0x58d   : > { %v3512_v16 = vadd.f32 %v3448_v24, %v11634_v33  ;;  %v2358_v24 = vadd.f32 %v11646_v58, %v11645_v40  ;;  %v9364_v33 = vsel %vm1054_vm7, 1.0, %v11589_v12  ;;  %v3602_v40 = vld [vmem:[%s11429_s9 + $0x18] sm:$0xff] }
 0x58e   : > { %v2846_v50 = vpop.f32.mrf.mxu1  ;;  %11647 = vst [vmem:[#allocation38_spill] sm:$0xff] %v9364_v33  ;;  %v9386_v58 = vld [vmem:[%s11430_s10 + $0x18] sm:$0xff]  ;;  %3695 = vmatpush.msra.mxu1 %v3602_v40  ;;  %3876 = vmatpush.msrb.mxu3 %v3602_v40  ;;  %v11665_v40 = vld [vmem:[#allocation22_spill] sm:$0xff] }
 0x58f   : > { %v2904_v3 = vadd.f32 %v2846_v50, %v2645_v61  ;;  %v3544_v2 = vmul.f32 %v9334_v22, %v3512_v16  ;;  %v11648_v50 = vld [vmem:[#allocation19_spill] sm:$0xff]  ;;  %3719 = vmatpush.msrb.mxu2 %v9386_v58  ;;  %v11680_v22 = vld [vmem:[#allocation92_spill] sm:$0xff] }
 0x591   : > { %v9342_v45 = vadd.f32 %v2904_v3, %v2357_v51  ;;  %v9345_v27 = vadd.f32 %v3544_v2, %v9277_v53  ;;  %v11644_v53 = vld [vmem:[#allocation80_spill] sm:$0xff]  ;;  %v11651_v2 = vld [vmem:[#allocation50_spill] sm:$0xff] }
 0x592   : > { %v2359_v10 = vadd.f32 %v11652_v17, %v11651_v2  ;;  %v11659_v2 = vld [vmem:[#allocation20_spill] sm:$0xff] }
 0x593   : > { %11637 = vst [vmem:[#allocation35_spill] sm:$0xff] %v9345_v27 }
 0x594   : > { %v3451_v7 = vpop.f32.mrf.mxu0 }
 0x595   : > { %v3513_v41 = vadd.f32 %v3451_v7, %v3250_v49  ;;  %v691_v49 = vand.u32 15, %v547_v34  ;;  %v3329_v7 = vld [vmem:[#allocation2 + $0x112] sm:$0xff] }
 0x596   : > { %v2849_v28 = vpop.f32.mrf.mxu1 }
 0x597   : > { %v2905_v26 = vadd.f32 %v2849_v28, %v2648_v25  ;;  %v9355_v60 = vadd.f32 %v3513_v41, %v2965_v38  ;;  %6772 = vmatmul.msk.bf16.gmra.mxu0 %vm1137_vm0, %v11644_v53  ;;  %v2650_v38 = vadd.f32 %v11649_v11, %v11648_v50  ;;  %v544_v41 = vadd.s32 120, %v9111_v52  ;;  %v11654_v28 = vld [vmem:[#allocation82_spill] sm:$0xff] }
 0x598   : > { %vm963_vm8 = vcmp.ge.s32.totalorder %v691_v49, 1  ;;  %v3346_v53 = vpack.c.bf16 %v3330_v35, %v3329_v7  ;;  %v11661_v35 = vld [vmem:[#allocation23_spill] sm:$0xff] }
 0x599   : > { %11643 = vst [vmem:[#allocation11_spill] sm:$0xff] %v9355_v60  ;;  %v2937_v43 = vmul.f32 %v9353_v5, %v2905_v26  ;;  %v3255_v26 = vadd.f32 %v11654_v28, %v11653_v23  ;;  %v670_v50 = vand.u32 15, %v544_v41  ;;  %v9392_v11 = vsel %vm963_vm8, 1.0, %v11589_v12  ;;  %v11662_v41 = vld [vmem:[#allocation93_spill] sm:$0xff] }
 0x59a   : > { %11657 = vst [vmem:[#allocation10_spill] sm:$0xff] %v9392_v11  ;;  %v2655_v23 = vadd.f32 %v11662_v41, %v11661_v35 }
 0x59b   : > { %v2969_v61 = vadd.f32 %v2937_v43, %v2358_v24  ;;  %v11656_v43 = vld [vmem:[#allocation90_spill] sm:$0xff]  ;;  %vm1056_vm9 = vcmp.le.s32.totalorder %v670_v50, 14 }
 0x59c   : > { %v3453_v16 = vpop.f32.mrf.mxu0  ;;  %v9402_v49 = vsel %vm1056_vm9, 1.0, %v11589_v12 }
 0x59d   : > { %v3514_v51 = vadd.f32 %v3453_v16, %v11650_v4  ;;  %11660 = vst [vmem:[#allocation71_spill] sm:$0xff] %v9402_v49 }
 0x59e   : > { %v2851_v3 = vpop.f32.mrf.mxu1 }
 0x59f   : > { %v2906_v56 = vadd.f32 %v2851_v3, %v2650_v38  ;;  %v3546_v20 = vmul.f32 %v9364_v33, %v3514_v51  ;;  %v11658_v3 = vld [vmem:[#allocation53_spill] sm:$0xff]  ;;  %v11679_v33 = vld [vmem:[#allocation91_spill] sm:$0xff] }
 0x5a0   : > { %v2360_v17 = vadd.f32 %v11659_v2, %v11658_v3  ;;  %v11667_v3 = vld [vmem:[#allocation87_spill] sm:$0xff] }
 0x5a1   : > { %v9372_v14 = vadd.f32 %v2906_v56, %v2359_v10  ;;  %v9375_v25 = vadd.f32 %v3546_v20, %v9308_v54  ;;  %v11655_v54 = vld [vmem:[#allocation21_spill] sm:$0xff]  ;;  %v549_v56 = vadd.s32 160, %v9111_v52 }
 0x5a2   : > { %v2653_v34 = vadd.f32 %v11656_v43, %v11655_v54 }
 0x5a4   : > { %v3456_v24 = vpop.f32.mrf.mxu0 }
 0x5a5   : > { %v3515_v16 = vadd.f32 %v3456_v24, %v3255_v26 }
 0x5a6   : > { %v2854_v38 = vpop.f32.mrf.mxu1 }
 0x5a7   : > { %v2907_v4 = vadd.f32 %v2854_v38, %v2653_v34  ;;  %v9394_v51 = vadd.f32 %v3515_v16, %v2967_v0  ;;  %6773 = vmatmul.msk.bf16.gmra.mxu0 %vm1137_vm0, %v3346_v53  ;;  %v11663_v0 = vld [vmem:[#allocation84_spill] sm:$0xff]  ;;  %v705_v34 = vand.u32 15, %v549_v56  ;;  %v546_v38 = vadd.s32 136, %v9111_v52 }
 0x5a8   : > { %v11664_v53 = vld [vmem:[#allocation56_spill] sm:$0xff] }
 0x5a9   : > { %v2939_v10 = vmul.f32 %v9392_v11, %v2907_v4  ;;  %v2361_v24 = vadd.f32 %v11665_v40, %v11664_v53  ;;  %v11666_v4 = vld [vmem:[#allocation86_spill] sm:$0xff]  ;;  %vm965_vm10 = vcmp.ge.s32.totalorder %v705_v34, 1  ;;  %v11672_v53 = vld [vmem:[#allocation24_spill] sm:$0xff]  ;;  %v551_v34 = vadd.s32 176, %v9111_v52 }
 0x5aa   : > { %v3260_v2 = vadd.f32 %v11667_v3, %v11666_v4  ;;  %v557_v11 = vadd.s32 224, %v9111_v52 }
 0x5ab   : > { %v2971_v20 = vadd.f32 %v2939_v10, %v2360_v17  ;;  %v11668_v10 = vld [vmem:[#allocation25_spill] sm:$0xff] }
 0x5ac   : > { %v3458_v7 = vpop.f32.mrf.mxu0 }
 0x5ad   : > { %v3516_v28 = vadd.f32 %v3458_v7, %v11663_v0  ;;  %v11669_v7 = vld [vmem:[#allocation95_spill] sm:$0xff]  ;;  %v9421_v0 = vsel %vm965_vm10, 1.0, %v11589_v12 }
 0x5ae   : > { %v2856_v26 = vpop.f32.mrf.mxu1  ;;  %v2658_v35 = vadd.f32 %v11669_v7, %v11668_v10  ;;  %11670 = vst [vmem:[#allocation73_spill] sm:$0xff] %v9421_v0 }
 0x5af   : > { %v2908_v54 = vadd.f32 %v2856_v26, %v2655_v23  ;;  %v3548_v43 = vmul.f32 %v9402_v49, %v3516_v28  ;;  %v684_v23 = vand.u32 15, %v546_v38 }
 0x5b1   : > { %v9410_v16 = vadd.f32 %v2908_v54, %v2361_v24  ;;  %v9413_v50 = vadd.f32 %v3548_v43, %v9342_v45  ;;  %v11671_v45 = vld [vmem:[#allocation58_spill] sm:$0xff]  ;;  %v3165_v24 = vpop.f32.mrf.mxu2  ;;  %vm1058_vm11 = vcmp.le.s32.totalorder %v684_v23, 14  ;;  %v3269_v43 = vpop.f32.mrf.mxu3 }
 0x5b2   : > { %v2362_v40 = vadd.f32 %v11672_v53, %v11671_v45  ;;  %v9430_v38 = vsel %vm1058_vm11, 1.0, %v11589_v12  ;;  %v3270_v39 = vadd.f32 %v3269_v43, %v3165_v24 }
 0x5b3   : > { %11673 = vst [vmem:[#allocation13_spill] sm:$0xff] %v9430_v38 }
 0x5b4   : > { %v3461_v17 = vpop.f32.mrf.mxu0 }
 0x5b5   : > { %v3517_v41 = vadd.f32 %v3461_v17, %v3260_v2  ;;  %v11674_v2 = vld [vmem:[#allocation27_spill] sm:$0xff]  ;;  %v11675_v17 = vld [vmem:[#allocation96_spill] sm:$0xff] }
 0x5b6   : > { %v2859_v56 = vpop.f32.mrf.mxu1  ;;  %v2660_v10 = vadd.f32 %v11675_v17, %v11674_v2  ;;  %v3265_v2 = vadd.f32 %v11680_v22, %v11679_v33 }
 0x5b7   : > { %v2909_v28 = vadd.f32 %v2859_v56, %v2658_v35  ;;  %v9423_v26 = vadd.f32 %v3517_v41, %v2969_v61  ;;  %v11676_v61 = vld [vmem:[#allocation89_spill] sm:$0xff]  ;;  %v11677_v41 = vld [vmem:[#allocation59_spill] sm:$0xff]  ;;  %v11678_v56 = vld [vmem:[#allocation26_spill] sm:$0xff] }
 0x5b8   : > { %v2363_v45 = vadd.f32 %v11678_v56, %v11677_v41 }
 0x5b9   : > { %v2941_v54 = vmul.f32 %v9421_v0, %v2909_v28  ;;  %v719_v28 = vand.u32 15, %v551_v34  ;;  %v9446_v17 = vpop.f32.mrf.mxu2 }
 0x5bb   : > { %v2973_v4 = vadd.f32 %v2941_v54, %v2362_v40  ;;  %v548_v54 = vadd.s32 152, %v9111_v52  ;;  %vm967_vm12 = vcmp.ge.s32.totalorder %v719_v28, 1 }
 0x5bc   : > { %v3463_v3 = vpop.f32.mrf.mxu0  ;;  %v9456_v56 = vsel %vm967_vm12, 1.0, %v11589_v12 }
 0x5bd   : > { %v3518_v7 = vadd.f32 %v3463_v3, %v11676_v61  ;;  %v3601_v3 = vld [vmem:[%s11429_s9 + $0x10] sm:$0xff]  ;;  %v11681_v61 = vld [vmem:[#allocation30_spill] sm:$0xff]  ;;  %v698_v41 = vand.u32 15, %v548_v54  ;;  %11683 = vst [vmem:[#allocation76_spill] sm:$0xff] %v9456_v56 }
 0x5be   : > { %v2861_v35 = vpop.f32.mrf.mxu1  ;;  %3696 = vmatpush.msra.mxu1 %v3601_v3  ;;  %3877 = vmatpush.msrb.mxu3 %v3601_v3  ;;  %v553_v3 = vadd.s32 192, %v9111_v52 }
 0x5bf   : > { %v2910_v53 = vadd.f32 %v2861_v35, %v2660_v10  ;;  %v3550_v23 = vmul.f32 %v9430_v38, %v3518_v7  ;;  %v9451_v10 = vpop.f32.mrf.mxu3  ;;  %vm1060_vm13 = vcmp.le.s32.totalorder %v698_v41, 14  ;;  %v11691_v41 = vld [vmem:[#allocation31_spill] sm:$0xff] }
 0x5c1   : > { %v9438_v49 = vadd.f32 %v2910_v53, %v2363_v45  ;;  %v9441_v40 = vadd.f32 %v3550_v23, %v9372_v14  ;;  %v11682_v14 = vld [vmem:[#allocation97_spill] sm:$0xff]  ;;  %v11684_v53 = vld [vmem:[#allocation60_spill] sm:$0xff] }
 0x5c2   : > { %v2663_v7 = vadd.f32 %v11682_v14, %v11681_v61  ;;  %v11685_v23 = vld [vmem:[#allocation28_spill] sm:$0xff]  ;;  %v11687_v61 = vld [vmem:[#allocation33_spill] sm:$0xff]  ;;  %v11688_v14 = vld [vmem:[#allocation98_spill] sm:$0xff] }
 0x5c3   : > { %v2364_v28 = vadd.f32 %v11685_v23, %v11684_v53 }
 0x5c4   : > { %v3466_v34 = vpop.f32.mrf.mxu0 }
 0x5c5   : > { %v3519_v35 = vadd.f32 %v3466_v34, %v3265_v2  ;;  %v9467_v2 = vsel %vm1060_vm13, 1.0, %v11589_v12  ;;  %v9469_v34 = vpop.f32.mrf.mxu2  ;;  %vm1148_vm13 = vcmask 516096  }
 0x5c6   : > { %v2864_v22 = vpop.f32.mrf.mxu1  ;;  %11686 = vst [vmem:[#allocation41_spill] sm:$0xff] %v9467_v2 }
 0x5c7   : > { %v2911_v33 = vadd.f32 %v2864_v22, %v2663_v7  ;;  %v9458_v45 = vadd.f32 %v3519_v35, %v2971_v20  ;;  %v2665_v20 = vadd.f32 %v11688_v14, %v11687_v61  ;;  %v11689_v7 = vld [vmem:[#allocation94_spill] sm:$0xff]  ;;  %v9474_v22 = vpop.f32.mrf.mxu3  ;;  %v11692_v14 = vld [vmem:[#allocation36_spill] sm:$0xff]  ;;  %1149 = vst.msk [vmem:[#allocation3 + $0x10] sm:$0x1] %vm1148_vm13, %v11589_v12 }
 0x5c8   : > { %1152 = vst.msk [vmem:[#allocation3 + $0x121] sm:$0x1] %vm1148_vm13, %v11589_v12 }
 0x5c9   : > { %v2943_v38 = vmul.f32 %v9456_v56, %v2911_v33  ;;  %v11690_v33 = vld [vmem:[#allocation61_spill] sm:$0xff] }
 0x5ca   : > { %v2365_v23 = vadd.f32 %v11691_v41, %v11690_v33  ;;  %v555_v41 = vadd.s32 208, %v9111_v52 }
 0x5cb   : > { %v9464_v55 = vadd.f32 %v2943_v38, %v2364_v28  ;;  %v733_v28 = vand.u32 15, %v553_v3 }
 0x5cc   : > { %v3468_v54 = vpop.f32.mrf.mxu0 }
 0x5cd   : > { %v3520_v35 = vadd.f32 %v3468_v54, %v11689_v7  ;;  %vm969_vm14 = vcmp.ge.s32.totalorder %v733_v28, 1  ;;  %v11693_v54 = vld [vmem:[#allocation99_spill] sm:$0xff]  ;;  %v11698_v28 = vld [vmem:[#allocation100_spill] sm:$0xff] }
 0x5ce   : > { %v2866_v53 = vpop.f32.mrf.mxu1  ;;  %v2668_v7 = vadd.f32 %v11693_v54, %v11692_v14  ;;  %v9487_v0 = vsel %vm969_vm14, 1.0, %v11589_v12  ;;  %v11699_v54 = vld [vmem:[#allocation63_spill] sm:$0xff] }
 0x5cf   : > { %v2912_v30 = vadd.f32 %v2866_v53, %v2665_v20  ;;  %v3552_v38 = vmul.f32 %v9467_v2, %v3520_v35  ;;  %11694 = vst [vmem:[#allocation12_spill] sm:$0xff] %v9487_v0  ;;  %v9489_v20 = vpop.f32.mrf.mxu2  ;;  %v11696_v53 = vld [vmem:[#allocation34_spill] sm:$0xff] }
 0x5d1   : > { %v9479_v57 = vadd.f32 %v2912_v30, %v2365_v23  ;;  %v9482_v31 = vadd.f32 %v3552_v38, %v9410_v16  ;;  %v9493_v30 = vpop.f32.mrf.mxu3  ;;  %v11695_v16 = vld [vmem:[#allocation62_spill] sm:$0xff]  ;;  %v11697_v38 = vld [vmem:[#allocation39_spill] sm:$0xff] }
 0x5d2   : > { %v2366_v24 = vadd.f32 %v11696_v53, %v11695_v16  ;;  %v3600_v53 = vld [vmem:[%s11429_s9 + $0x8] sm:$0xff] }
 0x5d3   : > { %3697 = vmatpush.msra.mxu1 %v3600_v53  ;;  %3878 = vmatpush.msrb.mxu3 %v3600_v53  ;;  %v11708_v53 = vld [vmem:[#allocation45_spill] sm:$0xff] }
 0x5d4   : > { %v3471_v61 = vpop.f32.mrf.mxu0 }
 0x5d5   : > { %v3521_v56 = vadd.f32 %v3471_v61, %v3270_v39  ;;  %v2670_v61 = vadd.f32 %v11698_v28, %v11697_v38  ;;  %v11703_v38 = vld [vmem:[#allocation101_spill] sm:$0xff] }
 0x5d6   : > { %v2869_v33 = vpop.f32.mrf.mxu1 }
 0x5d7   : > { %v2913_v35 = vadd.f32 %v2869_v33, %v2668_v7  ;;  %v9491_v3 = vadd.f32 %v3521_v56, %v2973_v4  ;;  %v11700_v4 = vld [vmem:[#allocation37_spill] sm:$0xff]  ;;  %v747_v33 = vand.u32 15, %v555_v41  ;;  %v9507_v2 = vpop.f32.mrf.mxu2  ;;  %v11702_v41 = vld [vmem:[#allocation42_spill] sm:$0xff] }
 0x5d8   : > { %v2367_v56 = vadd.f32 %v11700_v4, %v11699_v54  ;;  %v2673_v28 = vadd.f32 %v11703_v38, %v11702_v41  ;;  %v11705_v4 = vld [vmem:[#allocation64_spill] sm:$0xff]  ;;  %v11709_v38 = vld [vmem:[#allocation102_spill] sm:$0xff] }
 0x5d9   : > { %v2945_v43 = vmul.f32 %v9487_v0, %v2913_v35  ;;  %v9511_v35 = vpop.f32.mrf.mxu3  ;;  %vm971_vm15 = vcmp.ge.s32.totalorder %v747_v33, 1  ;;  %v2675_v63 = vadd.f32 %v11709_v38, %v11708_v53 }
 0x5db   : > { %v9499_v23 = vadd.f32 %v2945_v43, %v2366_v24  ;;  %v9519_v24 = vld [vmem:[%s11430_s10 + $0x10] sm:$0xff] }
 0x5dc   : > { %v9501_v39 = vpop.f32.mrf.mxu0  ;;  %3720 = vmatpush.msrb.mxu2 %v9519_v24 }
 0x5de   : > { %v2871_v14 = vpop.f32.mrf.mxu1 }
 0x5df   : > { %v2914_v7 = vadd.f32 %v2871_v14, %v2670_v61  ;;  %v9527_v61 = vsel %vm971_vm15, 1.0, %v11589_v12  ;;  %v9532_v0 = vpop.f32.mrf.mxu2 }
 0x5e0   : > { %11704 = vst [vmem:[#allocation83_spill] sm:$0xff] %v9527_v61 }
 0x5e1   : > { %v9509_v16 = vadd.f32 %v2914_v7, %v2367_v56  ;;  %v11706_v56 = vld [vmem:[#allocation40_spill] sm:$0xff]  ;;  %v9537_v46 = vpop.f32.mrf.mxu3 }
 0x5e2   : > { %v2368_v7 = vadd.f32 %v11706_v56, %v11705_v4  ;;  %v761_v56 = vand.u32 15, %v557_v11 }
 0x5e3   : > { %11701 = vst [vmem:[#allocation15_spill] sm:$0xff] %v9509_v16 }
 0x5e4   : > { %v9521_v43 = vpop.f32.mrf.mxu0  ;;  %vm973_vm1 = vcmp.ge.s32.totalorder %v761_v56, 1  ;;  %v3616_v56 = vsel %vm1145_vm6, %v9217_v15, 0.0 }
 0x5e5   : > { %v9558_v38 = vsel %vm973_vm1, 1.0, %v11589_v12 }
 0x5e6   : > { %v2874_v14 = vpop.f32.mrf.mxu1  ;;  %11714 = vst [vmem:[#allocation14_spill] sm:$0xff] %v9558_v38 }
 0x5e7   : > { %v2915_v54 = vadd.f32 %v2874_v14, %v2673_v28  ;;  %v11710_v28 = vld [vmem:[#allocation65_spill] sm:$0xff]  ;;  %v11711_v14 = vld [vmem:[#allocation43_spill] sm:$0xff] }
 0x5e8   : > { %v2369_v1 = vadd.f32 %v11711_v14, %v11710_v28  ;;  %v11715_v14 = vld [vmem:[#allocation68_spill] sm:$0xff] }
 0x5e9   : > { %v2947_v33 = vmul.f32 %v9527_v61, %v2915_v54  ;;  %v9555_v53 = vpop.f32.mrf.mxu3 }
 0x5eb   : > { %v9535_v5 = vadd.f32 %v2947_v33, %v2368_v7  ;;  %v9549_v7 = vpop.f32.mrf.mxu2  ;;  %v11713_v33 = vld [vmem:[#allocation48_spill] sm:$0xff] }
 0x5ec   : > { %v9539_v41 = vpop.f32.mrf.mxu0  ;;  %v2678_v13 = vadd.f32 %v9118_v47, %v11713_v33 }
 0x5ed   : > { %11707 = vst [vmem:[#allocation75_spill] sm:$0xff] %v9535_v5  ;;  %v559_v5 = vadd.s32 240, %v9111_v52 }
 0x5ee   : > { %v2876_v42 = vpop.f32.mrf.mxu1 }
 0x5ef   : > { %v2916_v4 = vadd.f32 %v2876_v42, %v2675_v63  ;;  %v3614_v63 = vsel %vm1145_vm6, %v9199_v32, 0.0 }
 0x5f1   : > { %v9545_v54 = vadd.f32 %v2916_v4, %v2369_v1  ;;  %v3611_v1 = vsel %vm1145_vm6, %v9169_v21, 0.0  ;;  %v11716_v4 = vld [vmem:[#allocation46_spill] sm:$0xff] }
 0x5f2   : > { %v3613_v28 = vadd.f32 %v3612_v48, %v3611_v1  ;;  %v2370_v47 = vadd.f32 %v11716_v4, %v11715_v14  ;;  %v11717_v48 = vld [vmem:[#allocation51_spill] sm:$0xff] }
 0x5f3   : > { %11712 = vst [vmem:[#allocation44_spill] sm:$0xff] %v9545_v54  ;;  %v3618_v54 = vsel %vm1145_vm6, %v9226_v6, 0.0  ;;  %v9582_v4 = vpop.f32.mrf.mxu2 }
 0x5f4   : > { %v9547_v61 = vpop.f32.mrf.mxu0  ;;  %v3615_v9 = vadd.f32 %v3614_v63, %v3613_v28  ;;  %v11719_v63 = vld [vmem:[#allocation49_spill] sm:$0xff] }
 0x5f6   : > { %v2879_v42 = vpop.f32.mrf.mxu1  ;;  %v3617_v16 = vadd.f32 %v3616_v56, %v3615_v9  ;;  %v775_v9 = vand.u32 15, %v559_v5  ;;  %v9586_v56 = vpop.f32.mrf.mxu3  ;;  %v11720_v5 = vld [vmem:[#allocation54_spill] sm:$0xff] }
 0x5f7   : > { %v2917_v11 = vadd.f32 %v2879_v42, %v2678_v13  ;;  %v2680_v13 = vadd.f32 %v9134_v59, %v11717_v48  ;;  %v3620_v42 = vsel %vm1145_vm6, %v9247_v44, 0.0  ;;  %v3624_v59 = vsel %vm1145_vm6, %v9280_v8, 0.0 }
 0x5f8   : > { %v3619_v1 = vadd.f32 %v3618_v54, %v3617_v16  ;;  %v3626_v54 = vsel %vm1145_vm6, %v9290_v62, 0.0  ;;  %vm975_vm2 = vcmp.ge.s32.totalorder %v775_v9, 1 }
 0x5f9   : > { %v2949_v33 = vmul.f32 %v9558_v38, %v2917_v11  ;;  %v11718_v11 = vld [vmem:[#allocation70_spill] sm:$0xff] }
 0x5fa   : > { %v2371_v28 = vadd.f32 %v11719_v63, %v11718_v11  ;;  %v3621_v38 = vadd.f32 %v3620_v42, %v3619_v1  ;;  %v3599_v11 = vld [vmem:[%s11429_s9] sm:$0xff]  ;;  %v2683_v42 = vadd.f32 %v9145_v37, %v11720_v5  ;;  %v3628_v1 = vsel %vm1145_vm6, %v9311_v29, 0.0  ;;  %v11722_v37 = vld [vmem:[#allocation72_spill] sm:$0xff] }
 0x5fb   : > { %v9572_v21 = vadd.f32 %v2949_v33, %v2370_v47  ;;  %v3622_v47 = vsel %vm1145_vm6, %v9259_v18, 0.0  ;;  %3698 = vmatpush.msra.mxu1 %v3599_v11  ;;  %3879 = vmatpush.msrb.mxu3 %v3599_v11  ;;  %v9613_v5 = vpop.f32.mrf.mxu2 }
 0x5fc   : > { %v9574_v32 = vpop.f32.mrf.mxu0  ;;  %v3623_v16 = vadd.f32 %v3622_v47, %v3621_v38  ;;  %v3630_v47 = vsel %vm1145_vm6, %v9324_v36, 0.0  ;;  %v552_v36 = vadd.s32 184, %v9111_v52 }
 0x5fd   : > { %3911 = vmatpush.msrb.mxu1 %v9386_v58  ;;  %v3632_v58 = vsel %vm1145_vm6, %v9345_v27, 0.0  ;;  %v3636_v27 = vsel %vm1145_vm6, %v9375_v25, 0.0 }
 0x5fe   : > { %v2881_v14 = vpop.f32.mrf.mxu1  ;;  %v3625_v63 = vadd.f32 %v3624_v59, %v3623_v16  ;;  %v11723_v16 = vld [vmem:[#allocation52_spill] sm:$0xff]  ;;  %v726_v8 = vand.u32 15, %v552_v36 }
 0x5ff   : > { %v2918_v33 = vadd.f32 %v2881_v14, %v2680_v13  ;;  %v9605_v14 = vsel %vm975_vm2, 1.0, %v11589_v12  ;;  %3912 = vmatpush.msrb.mxu1 %v9519_v24  ;;  %v2372_v11 = vadd.f32 %v11723_v16, %v11722_v37  ;;  %v11724_v37 = vld [vmem:[#allocation57_spill] sm:$0xff] }
 0x600   : > { %v3627_v38 = vadd.f32 %v3626_v54, %v3625_v63  ;;  %11721 = vst [vmem:[#allocation77_spill] sm:$0xff] %v9605_v14  ;;  %v9618_v63 = vpop.f32.mrf.mxu3  ;;  %v2685_v16 = vadd.f32 %v9157_v19, %v11724_v37  ;;  %vm1064_vm4 = vcmp.le.s32.totalorder %v726_v8, 14 }
 0x601   : > { %v9590_v48 = vadd.f32 %v2918_v33, %v2371_v28  ;;  %v550_v33 = vadd.s32 168, %v9111_v52 }
 0x602   : > { %v3629_v59 = vadd.f32 %v3628_v1, %v3627_v38 }
 0x603   : > { %v712_v24 = vand.u32 15, %v550_v33  ;;  %v3638_v33 = vsel %vm1145_vm6, %v9394_v51, 0.0 }
 0x604   : > { %v9597_v13 = vpop.f32.mrf.mxu0  ;;  %v3631_v29 = vadd.f32 %v3630_v47, %v3629_v59  ;;  %v3272_v47 = vadd.f32 %v9451_v10, %v9446_v17  ;;  %v3277_v17 = vadd.f32 %v9493_v30, %v9489_v20  ;;  %v3275_v20 = vadd.f32 %v9474_v22, %v9469_v34 }
 0x605   : > { %vm1062_vm3 = vcmp.le.s32.totalorder %v712_v24, 14  ;;  %v556_v24 = vadd.s32 216, %v9111_v52  ;;  %v3644_v30 = vsel %vm1145_vm6, %v9441_v40, 0.0  ;;  %v558_v34 = vadd.s32 232, %v9111_v52 }
 0x606   : > { %v2884_v28 = vpop.f32.mrf.mxu1  ;;  %v3633_v38 = vadd.f32 %v3632_v58, %v3631_v29  ;;  %v554_v29 = vadd.s32 200, %v9111_v52  ;;  %v3640_v58 = vsel %vm1145_vm6, %v9413_v50, 0.0  ;;  %v9644_v10 = vsel %vm1062_vm3, 1.0, %v11589_v12 }
 0x607   : > { %v2919_v9 = vadd.f32 %v2884_v28, %v2683_v42  ;;  %v3634_v42 = vsel %vm1145_vm6, %v9355_v60, 0.0  ;;  %11727 = vst [vmem:[#allocation78_spill] sm:$0xff] %v9644_v10 }
 0x608   : > { %v3635_v59 = vadd.f32 %v3634_v42, %v3633_v38  ;;  %v3187_v42 = vpop.f32.mrf.mxu2  ;;  %v3291_v38 = vpop.f32.mrf.mxu3 }
 0x609   : > { %v2951_v54 = vmul.f32 %v9605_v14, %v2919_v9  ;;  %v11725_v9 = vld [vmem:[#allocation74_spill] sm:$0xff]  ;;  %v11726_v14 = vld [vmem:[#allocation55_spill] sm:$0xff] }
 0x60a   : > { %v2373_v62 = vadd.f32 %v11726_v14, %v11725_v9  ;;  %v3637_v19 = vadd.f32 %v3636_v27, %v3635_v59  ;;  %v740_v27 = vand.u32 15, %v554_v29  ;;  %v3282_v9 = vadd.f32 %v9537_v46, %v9532_v0 }
 0x60b   : > { %v9623_v1 = vadd.f32 %v2951_v54, %v2372_v11  ;;  %v3522_v54 = vadd.f32 %v9501_v39, %v3272_v47  ;;  %v3646_v59 = vsel %vm1145_vm6, %v9458_v45, 0.0 }
 0x60c   : > { %v3488_v28 = vpop.f32.mrf.mxu0  ;;  %v3639_v36 = vadd.f32 %v3638_v33, %v3637_v19  ;;  %vm1066_vm5 = vcmp.le.s32.totalorder %v740_v27, 14  ;;  %v754_v33 = vand.u32 15, %v556_v24  ;;  %v3648_v19 = vsel %vm1145_vm6, %v9482_v31, 0.0 }
 0x60d   : > { %v3554_v8 = vmul.f32 %v9644_v10, %v3522_v54  ;;  %v3526_v0 = vadd.f32 %v9574_v32, %v3282_v9  ;;  %v3650_v54 = vsel %vm1145_vm6, %v9491_v3, 0.0 }
 0x60e   : > { %v2886_v60 = vpop.f32.mrf.mxu1  ;;  %v3641_v37 = vadd.f32 %v3640_v58, %v3639_v36  ;;  %vm1068_vm7 = vcmp.le.s32.totalorder %v754_v33, 14  ;;  %v11733_v33 = vld [vmem:[#allocation75_spill] sm:$0xff] }
 0x60f   : > { %v2920_v11 = vadd.f32 %v2886_v60, %v2685_v16  ;;  %v3642_v60 = vsel %vm1145_vm6, %v9423_v26, 0.0  ;;  %v9656_v16 = vsel %vm1064_vm4, 1.0, %v11589_v12  ;;  %v9670_v46 = vadd.f32 %v3554_v8, %v9438_v49 }
 0x610   : > { %11728 = vst [vmem:[#allocation17_spill] sm:$0xff] %v9656_v16  ;;  %v3643_v47 = vadd.f32 %v3642_v60, %v3641_v37  ;;  %v768_v49 = vand.u32 15, %v558_v34  ;;  %v3190_v37 = vpop.f32.mrf.mxu2 }
 0x611   : > { %v9639_v14 = vadd.f32 %v2920_v11, %v2373_v62  ;;  %v3524_v62 = vadd.f32 %v9539_v41, %v3277_v17  ;;  %v3523_v41 = vadd.f32 %v9521_v43, %v3275_v20  ;;  %v3280_v11 = vadd.f32 %v9511_v35, %v9507_v2 }
 0x612   : > { %v3645_v22 = vadd.f32 %v3644_v30, %v3643_v47  ;;  %v3287_v43 = vadd.f32 %v9586_v56, %v9582_v4  ;;  %v9678_v17 = vsel %vm1066_vm5, 1.0, %v11589_v12  ;;  %v3285_v4 = vadd.f32 %v9555_v53, %v9549_v7 }
 0x613   : > { %v3556_v29 = vmul.f32 %v9656_v16, %v3524_v62  ;;  %11729 = vst [vmem:[#allocation85_spill] sm:$0xff] %v9678_v17  ;;  %v9681_v2 = vadd.f32 %v3523_v41, %v9464_v55  ;;  %v3525_v35 = vadd.f32 %v9547_v61, %v3280_v11  ;;  %v3652_v56 = vsel %vm1145_vm6, %v9670_v46, 0.0  ;;  %v3294_v62 = vpop.f32.mrf.mxu3 }
 0x614   : > { %v3491_v39 = vpop.f32.mrf.mxu0  ;;  %v3647_v58 = vadd.f32 %v3646_v59, %v3645_v22  ;;  %v3558_v27 = vmul.f32 %v9678_v17, %v3526_v0  ;;  %v3528_v24 = vadd.f32 %v3488_v28, %v3287_v43  ;;  %v3292_v55 = vadd.f32 %v3291_v38, %v3187_v42  ;;  %v11731_v38 = vld [vmem:[#allocation15_spill] sm:$0xff]  ;;  %v11734_v0 = vld [vmem:[#allocation44_spill] sm:$0xff] }
 0x615   : > { %v9685_v32 = vadd.f32 %v3556_v29, %v9479_v57  ;;  %v9693_v20 = vsel %vm1068_vm7, 1.0, %v11589_v12  ;;  %v3654_v57 = vsel %vm1145_vm6, %v9681_v2, 0.0  ;;  %v9698_v30 = vadd.f32 %v3525_v35, %v9499_v23 }
 0x616   : > { %v3649_v36 = vadd.f32 %v3648_v19, %v3647_v58  ;;  %11730 = vst [vmem:[#allocation80_spill] sm:$0xff] %v9693_v20  ;;  %v3527_v7 = vadd.f32 %v9597_v13, %v3285_v4  ;;  %vm1070_vm8 = vcmp.le.s32.totalorder %v768_v49, 14  ;;  %v3290_v53 = vadd.f32 %v9618_v63, %v9613_v5  ;;  %v3608_v13 = vld [vmem:[%s11430_s10 + $0x8] sm:$0xff]  ;;  %v3607_v5 = vld [vmem:[%s11430_s10] sm:$0xff] }
 0x617   : > { %v3656_v42 = vsel %vm1145_vm6, %v9685_v32, 0.0  ;;  %v9706_v8 = vadd.f32 %v3558_v27, %v11731_v38  ;;  %v3560_v9 = vmul.f32 %v9693_v20, %v3528_v24  ;;  %v560_v59 = vadd.s32 248, %v9111_v52  ;;  %3721 = vmatpush.msrb.mxu2 %v3608_v13  ;;  %3913 = vmatpush.msrb.mxu1 %v3608_v13 }
 0x618   : > { %v3651_v61 = vadd.f32 %v3650_v54, %v3649_v36  ;;  %v9711_v41 = vsel %vm1070_vm8, 1.0, %v11589_v12  ;;  %v3658_v63 = vsel %vm1145_vm6, %v9698_v30, 0.0  ;;  %v9722_v34 = vadd.f32 %v3527_v7, %v11733_v33 }
 0x619   : > { %11732 = vst [vmem:[#allocation47_spill] sm:$0xff] %v9711_v41  ;;  %v3529_v22 = vadd.f32 %v3491_v39, %v3290_v53  ;;  %v3295_v52 = vadd.f32 %v3294_v62, %v3190_v37  ;;  %v3660_v19 = vsel %vm1145_vm6, %v9706_v8, 0.0  ;;  %v9727_v43 = vadd.f32 %v3560_v9, %v11734_v0  ;;  %3722 = vmatpush.msrb.mxu2 %v3607_v5  ;;  %v11736_v0 = vld [vmem:[#allocation106_spill] sm:$0xff] }
 0x61a   : > { %v3653_v28 = vadd.f32 %v3652_v56, %v3651_v61  ;;  %v782_v54 = vand.u32 15, %v560_v59  ;;  %3914 = vmatpush.msrb.mxu1 %v3607_v5  ;;  %v3662_v39 = vsel %vm1145_vm6, %v9722_v34, 0.0 }
 0x61b   : > { %v9733_v49 = vadd.f32 %v3529_v22, %v9572_v21  ;;  %v3296_v4 = vpop.f32.mrf.mxu3  ;;  %v3664_v27 = vsel %vm1145_vm6, %v9727_v43, 0.0 }
 0x61c   : > { %v3493_v60 = vpop.f32.mrf.mxu0  ;;  %v3655_v23 = vadd.f32 %v3654_v57, %v3653_v28  ;;  %vm1072_vm9 = vcmp.le.s32.totalorder %v782_v54, 14  ;;  %v11737_v54 = vld [vmem:[#allocation108_spill] sm:$0xff] }
 0x61d   : > { %v3530_v47 = vadd.f32 %v3493_v60, %v3292_v55  ;;  %v3192_v60 = vpop.f32.mrf.mxu2  ;;  %v3666_v62 = vsel %vm1145_vm6, %v9733_v49, 0.0  ;;  %v9746_v57 = vsel %vm1072_vm9, 1.0, %v11589_v12 }
 0x61e   : > { %v3657_v29 = vadd.f32 %v3656_v42, %v3655_v23  ;;  %v3297_v37 = vadd.f32 %v3296_v4, %v3192_v60  ;;  %11735 = vst [vmem:[#allocation16_spill] sm:$0xff] %v9746_v57 }
 0x61f   : > { %v3562_v58 = vmul.f32 %v9711_v41, %v3530_v47 }
 0x620   : > { %v3659_v35 = vadd.f32 %v3658_v63, %v3657_v29 }
 0x621   : > { %v9738_v24 = vadd.f32 %v3562_v58, %v9590_v48 }
 0x622   : > { %v3661_v56 = vadd.f32 %v3660_v19, %v3659_v35 }
 0x623   : > { %v3668_v53 = vsel %vm1145_vm6, %v9738_v24, 0.0 }
 0x624   : > { %v3496_v11 = vpop.f32.mrf.mxu0  ;;  %v3663_v55 = vadd.f32 %v3662_v39, %v3661_v56  ;;  %v11738_v39 = vld [vmem:[#allocation110_spill] sm:$0xff] }
 0x625   : > { %v3531_v36 = vadd.f32 %v3496_v11, %v3295_v52 }
 0x626   : > { %v3665_v21 = vadd.f32 %v3664_v27, %v3663_v55 }
 0x627   : > { %v9743_v61 = vadd.f32 %v3531_v36, %v9623_v1 }
 0x628   : > { %v3667_v48 = vadd.f32 %v3666_v62, %v3665_v21 }
 0x629   : > { %v3670_v42 = vsel %vm1145_vm6, %v9743_v61, 0.0 }
 0x62a   : > { %v3669_v9 = vadd.f32 %v3668_v53, %v3667_v48 }
 0x62c   : > { %v3498_v7 = vpop.f32.mrf.mxu0  ;;  %v3671_v1 = vadd.f32 %v3670_v42, %v3669_v9 }
 0x62d   : > { %v3532_v28 = vadd.f32 %v3498_v7, %v3297_v37 }
 0x62f   : > { %v3564_v38 = vmul.f32 %v9746_v57, %v3532_v28 }
 0x631   : > { %v9754_v47 = vadd.f32 %v3564_v38, %v9639_v14 }
 0x633   : > { %v3672_v59 = vsel %vm1145_vm6, %v9754_v47, 0.0 }
 0x634   : > { %v3673_v23 = vadd.f32 %v3672_v59, %v3671_v1  ;;  %v11740_v59 = vld [vmem:[#allocation66_spill] sm:$0xff] }
 0x636   : > { %v3674_v13 = vrot.slane %v3673_v23, 4 }
 0x638   : > { %v3675_v5 = vadd.f32 %v3674_v13, %v3673_v23 }
 0x63a   : > { %v3676_v63 = vrot.slane %v3675_v5, 2 }
 0x63c   : > { %v3677_v33 = vadd.f32 %v3676_v63, %v3675_v5  ;;  %v11741_v63 = vld [vmem:[#allocation6_spill] sm:$0xff] }
 0x63e   : > { %v3678_v22 = vrot.slane %v3677_v33, 1 }
 0x640   : > { %v3679_v52 = vadd.f32 %v3678_v22, %v3677_v33 }
 0x642   : > { %6774 = vmatmul.msk.f32.vlgmr.msra.gmra.mxu1 %vm1145_vm6, %v3679_v52 }
 0x6bf   : > { %v3700_v29 = vpop.f32.mrf.mxu1 }
 0x6c0   : > { %v3703_v11 = vmul.f32 0.001953125, %v3700_v29 }
 0x6c2   : > { %6775 = vmatmul.msk.f32.vlgmr.msrb.gmra.mxu2 %vm1137_vm0, %v3703_v11  ;;  %v11742_v11 = vld [vmem:[#allocation69_spill] sm:$0xff] }
 0x745   : > { %v3724_v19 = vpop.f32.mrf.mxu2 }
 0x746   : > { %v9760_v14 = vperm.slane %v3724_v19, 0 }
 0x748   : > { %v9764_v58 = vsub.f32 %v11736_v0, %v9760_v14  ;;  %v9768_v35 = vsub.f32 %v11737_v54, %v9760_v14  ;;  %v9772_v36 = vsub.f32 %v11738_v39, %v9760_v14  ;;  %v9776_v60 = vsub.f32 %v9217_v15, %v9760_v14 }
 0x749   : > { %v9784_v27 = vsub.f32 %v9226_v6, %v9760_v14  ;;  %v9790_v37 = vsub.f32 %v9247_v44, %v9760_v14  ;;  %v9798_v53 = vsub.f32 %v9259_v18, %v9760_v14  ;;  %v11739_v44 = vld [vmem:[#allocation4_spill] sm:$0xff]  ;;  %v9812_v18 = vsub.f32 %v11740_v59, %v9760_v14 }
 0x74a   : > { %v3760_v4 = vmul.f32 %v9764_v58, %v9764_v58  ;;  %v3761_v56 = vmul.f32 %v9768_v35, %v9768_v35  ;;  %v3762_v55 = vmul.f32 %v9772_v36, %v9772_v36  ;;  %v3763_v15 = vmul.f32 %v9776_v60, %v9776_v60 }
 0x74b   : > { %v3764_v6 = vmul.f32 %v9784_v27, %v9784_v27  ;;  %v9805_v42 = vsub.f32 %v11739_v44, %v9760_v14  ;;  %v3765_v38 = vmul.f32 %v9790_v37, %v9790_v37  ;;  %v3766_v23 = vmul.f32 %v9798_v53, %v9798_v53 }
 0x74c   : > { %v3792_v62 = vsel %vm1145_vm6, %v3760_v4, 0.0  ;;  %v3793_v21 = vsel %vm1145_vm6, %v3761_v56, 0.0  ;;  %v3795_v28 = vsel %vm1145_vm6, %v3762_v55, 0.0  ;;  %v3797_v9 = vsel %vm1145_vm6, %v3763_v15, 0.0  ;;  %v11743_v4 = vld [vmem:[#allocation35_spill] sm:$0xff] }
 0x74d   : > { %v3794_v7 = vadd.f32 %v3793_v21, %v3792_v62  ;;  %v3799_v13 = vsel %vm1145_vm6, %v3764_v6, 0.0  ;;  %v9819_v33 = vsub.f32 %v11741_v63, %v9760_v14  ;;  %v3767_v22 = vmul.f32 %v9805_v42, %v9805_v42  ;;  %v11744_v21 = vld [vmem:[#allocation11_spill] sm:$0xff] }
 0x74e   : > { %v3801_v52 = vsel %vm1145_vm6, %v3765_v38, 0.0  ;;  %v9826_v19 = vsub.f32 %v11742_v11, %v9760_v14  ;;  %v3768_v0 = vmul.f32 %v9812_v18, %v9812_v18  ;;  %v3803_v54 = vsel %vm1145_vm6, %v3766_v23, 0.0 }
 0x74f   : > { %v3796_v48 = vadd.f32 %v3795_v28, %v3794_v7  ;;  %v9833_v56 = vsub.f32 %v11743_v4, %v9760_v14  ;;  %v3769_v55 = vmul.f32 %v9819_v33, %v9819_v33  ;;  %v3805_v15 = vsel %vm1145_vm6, %v3767_v22, 0.0 }
 0x750   : > { %v9840_v7 = vsub.f32 %v11744_v21, %v9760_v14  ;;  %v3770_v6 = vmul.f32 %v9826_v19, %v9826_v19  ;;  %v3807_v28 = vsel %vm1145_vm6, %v3768_v0, 0.0  ;;  %v9847_v44 = vsub.f32 %v9375_v25, %v9760_v14 }
 0x751   : > { %v3798_v1 = vadd.f32 %v3797_v9, %v3796_v48  ;;  %v3771_v38 = vmul.f32 %v9833_v56, %v9833_v56  ;;  %v3809_v9 = vsel %vm1145_vm6, %v3769_v55, 0.0  ;;  %v9854_v59 = vsub.f32 %v9394_v51, %v9760_v14 }
 0x752   : > { %v3772_v23 = vmul.f32 %v9840_v7, %v9840_v7  ;;  %v9861_v25 = vsub.f32 %v9413_v50, %v9760_v14  ;;  %v3773_v63 = vmul.f32 %v9847_v44, %v9847_v44  ;;  %v9868_v51 = vsub.f32 %v9423_v26, %v9760_v14 }
 0x753   : > { %v3800_v5 = vadd.f32 %v3799_v13, %v3798_v1  ;;  %v3811_v13 = vsel %vm1145_vm6, %v3770_v6, 0.0  ;;  %v3813_v22 = vsel %vm1145_vm6, %v3771_v38, 0.0  ;;  %v9875_v50 = vsub.f32 %v9441_v40, %v9760_v14 }
 0x754   : > { %v3815_v11 = vsel %vm1145_vm6, %v3772_v23, 0.0  ;;  %v9882_v26 = vsub.f32 %v9458_v45, %v9760_v14  ;;  %v3776_v55 = vmul.f32 %v9868_v51, %v9868_v51  ;;  %v9889_v40 = vsub.f32 %v9482_v31, %v9760_v14 }
 0x755   : > { %v3802_v29 = vadd.f32 %v3801_v52, %v3800_v5  ;;  %v3777_v21 = vmul.f32 %v9875_v50, %v9875_v50  ;;  %v9896_v45 = vsub.f32 %v9491_v3, %v9760_v14  ;;  %v9903_v31 = vsub.f32 %v9670_v46, %v9760_v14 }
 0x756   : > { %v3823_v38 = vsel %vm1145_vm6, %v3776_v55, 0.0  ;;  %v9910_v3 = vsub.f32 %v9681_v2, %v9760_v14  ;;  %v9917_v46 = vsub.f32 %v9685_v32, %v9760_v14  ;;  %v9924_v2 = vsub.f32 %v9698_v30, %v9760_v14 }
 0x757   : > { %v3804_v39 = vadd.f32 %v3803_v54, %v3802_v29  ;;  %v3774_v29 = vmul.f32 %v9854_v59, %v9854_v59  ;;  %v3775_v54 = vmul.f32 %v9861_v25, %v9861_v25  ;;  %v3825_v23 = vsel %vm1145_vm6, %v3777_v21, 0.0 }
 0x758   : > { %v9931_v32 = vsub.f32 %v9706_v8, %v9760_v14  ;;  %v9938_v30 = vsub.f32 %v9722_v34, %v9760_v14  ;;  %v9945_v8 = vsub.f32 %v9727_v43, %v9760_v14  ;;  %v9952_v34 = vsub.f32 %v9733_v49, %v9760_v14 }
 0x759   : > { %v3806_v62 = vadd.f32 %v3805_v15, %v3804_v39  ;;  %v3817_v39 = vsel %vm1145_vm6, %v3773_v63, 0.0  ;;  %v3819_v15 = vsel %vm1145_vm6, %v3774_v29, 0.0  ;;  %v3821_v6 = vsel %vm1145_vm6, %v3775_v54, 0.0 }
 0x75a   : > { %v9959_v43 = vsub.f32 %v9738_v24, %v9760_v14  ;;  %v9966_v49 = vsub.f32 %v9743_v61, %v9760_v14  ;;  %v9973_v24 = vsub.f32 %v9754_v47, %v9760_v14 }
 0x75b   : > { %v3808_v48 = vadd.f32 %v3807_v28, %v3806_v62 }
 0x75c   : > { %v3790_v61 = vmul.f32 %v9966_v49, %v9966_v49 }
 0x75d   : > { %v3810_v1 = vadd.f32 %v3809_v9, %v3808_v48  ;;  %v3778_v48 = vmul.f32 %v9882_v26, %v9882_v26 }
 0x75e   : > { %v3851_v47 = vsel %vm1145_vm6, %v3790_v61, 0.0 }
 0x75f   : > { %v3812_v5 = vadd.f32 %v3811_v13, %v3810_v1  ;;  %v3779_v1 = vmul.f32 %v9889_v40, %v9889_v40  ;;  %v3827_v63 = vsel %vm1145_vm6, %v3778_v48, 0.0 }
 0x761   : > { %v3814_v52 = vadd.f32 %v3813_v22, %v3812_v5  ;;  %v3780_v5 = vmul.f32 %v9896_v45, %v9896_v45  ;;  %v3829_v29 = vsel %vm1145_vm6, %v3779_v1, 0.0 }
 0x763   : > { %v3816_v0 = vadd.f32 %v3815_v11, %v3814_v52  ;;  %v3781_v52 = vmul.f32 %v9903_v31, %v9903_v31  ;;  %v3831_v54 = vsel %vm1145_vm6, %v3780_v5, 0.0 }
 0x765   : > { %v3818_v4 = vadd.f32 %v3817_v39, %v3816_v0  ;;  %v3782_v0 = vmul.f32 %v9910_v3, %v9910_v3  ;;  %v3833_v55 = vsel %vm1145_vm6, %v3781_v52, 0.0 }
 0x767   : > { %v3820_v62 = vadd.f32 %v3819_v15, %v3818_v4  ;;  %v3783_v4 = vmul.f32 %v9917_v46, %v9917_v46  ;;  %v3835_v21 = vsel %vm1145_vm6, %v3782_v0, 0.0 }
 0x769   : > { %v3822_v28 = vadd.f32 %v3821_v6, %v3820_v62  ;;  %v3784_v62 = vmul.f32 %v9924_v2, %v9924_v2  ;;  %v3837_v48 = vsel %vm1145_vm6, %v3783_v4, 0.0 }
 0x76b   : > { %v3824_v9 = vadd.f32 %v3823_v38, %v3822_v28  ;;  %v3785_v28 = vmul.f32 %v9931_v32, %v9931_v32  ;;  %v3839_v1 = vsel %vm1145_vm6, %v3784_v62, 0.0 }
 0x76d   : > { %v3826_v13 = vadd.f32 %v3825_v23, %v3824_v9  ;;  %v3786_v9 = vmul.f32 %v9938_v30, %v9938_v30  ;;  %v3841_v5 = vsel %vm1145_vm6, %v3785_v28, 0.0 }
 0x76f   : > { %v3828_v22 = vadd.f32 %v3827_v63, %v3826_v13  ;;  %v3787_v13 = vmul.f32 %v9945_v8, %v9945_v8  ;;  %v3843_v52 = vsel %vm1145_vm6, %v3786_v9, 0.0 }
 0x771   : > { %v3830_v11 = vadd.f32 %v3829_v29, %v3828_v22  ;;  %v3788_v22 = vmul.f32 %v9952_v34, %v9952_v34  ;;  %v3845_v0 = vsel %vm1145_vm6, %v3787_v13, 0.0 }
 0x773   : > { %v3832_v39 = vadd.f32 %v3831_v54, %v3830_v11  ;;  %v3789_v11 = vmul.f32 %v9959_v43, %v9959_v43 }
 0x775   : > { %v3834_v15 = vadd.f32 %v3833_v55, %v3832_v39  ;;  %v3847_v39 = vsel %vm1145_vm6, %v3788_v22, 0.0  ;;  %v3791_v55 = vmul.f32 %v9973_v24, %v9973_v24 }
 0x777   : > { %v3836_v6 = vadd.f32 %v3835_v21, %v3834_v15  ;;  %v3849_v15 = vsel %vm1145_vm6, %v3789_v11, 0.0  ;;  %v3853_v21 = vsel %vm1145_vm6, %v3791_v55, 0.0  ;;  %v3597_v55 = vld [vmem:[%s11427_s7] sm:$0x1] }
 0x779   : > { %v3838_v38 = vadd.f32 %v3837_v48, %v3836_v6 }
 0x77b   : > { %v3840_v23 = vadd.f32 %v3839_v1, %v3838_v38 }
 0x77d   : > { %v3842_v63 = vadd.f32 %v3841_v5, %v3840_v23 }
 0x77f   : > { %v3844_v29 = vadd.f32 %v3843_v52, %v3842_v63 }
 0x781   : > { %v3846_v54 = vadd.f32 %v3845_v0, %v3844_v29 }
 0x783   : > { %v3848_v4 = vadd.f32 %v3847_v39, %v3846_v54  ;;  %v7183_v39 = vld [vmem:[%s11431_s11 + $0x38] sm:$0xff] }
 0x784   : > { %4503 = vmatpush.bf16.msra.mxu3 %v7183_v39 }
 0x785   : > { %v3850_v62 = vadd.f32 %v3849_v15, %v3848_v4  ;;  %v7182_v4 = vld [vmem:[%s11431_s11 + $0x30] sm:$0xff] }
 0x787   : > { %v3852_v14 = vadd.f32 %v3851_v47, %v3850_v62 }
 0x788   : > { %4504 = vmatpush.bf16.msra.mxu3 %v7182_v4 }
 0x789   : > { %v3854_v6 = vadd.f32 %v3853_v21, %v3852_v14 }
 0x78b   : > { %v3855_v28 = vrot.slane %v3854_v6, 4 }
 0x78d   : > { %v3856_v48 = vadd.f32 %v3855_v28, %v3854_v6 }
 0x78f   : > { %v3857_v38 = vrot.slane %v3856_v48, 2 }
 0x791   : > { %v3858_v9 = vadd.f32 %v3857_v38, %v3856_v48 }
 0x793   : > { %v3859_v1 = vrot.slane %v3858_v9, 1 }
 0x795   : > { %v3860_v23 = vadd.f32 %v3859_v1, %v3858_v9 }
 0x797   : > { %6776 = vmatmul.msk.f32.vlgmr.msrb.gmra.mxu3 %vm1145_vm6, %v3860_v23 }
 0x81a   : > { %v3881_v13 = vpop.f32.mrf.mxu3 }
 0x81b   : > { %v3884_v5 = vmul.f32 0.001953125, %v3881_v13 }
 0x81d   : > { %v3885_v63 = vadd.f32 1e-05, %v3884_v5 }
 0x81f   : > { %7300 = vrsqrt.f32 %v3885_v63  ;;  %vm3892_vm11 = vweird.f32 %v3885_v63 }
 0x825   : > { %v7301_v22 = vpop.eup %7300 }
 0x826   : > { %v3887_v52 = vmul.f32 %v7301_v22, %v3885_v63  ;;  %vm3893_vm10 = vweird.f32 %v7301_v22 }
 0x827   : > { %vm3894_vm12 = vmor %vm3892_vm11, %vm3893_vm10 }
 0x828   : > { %v3888_v29 = vmul.f32 %v7301_v22, %v3887_v52 }
 0x82a   : > { %v3889_v11 = vmul.f32 0.5, %v3888_v29 }
 0x82c   : > { %v3890_v0 = vsub.f32 1.5, %v3889_v11 }
 0x82e   : > { %v3891_v54 = vmul.f32 %v7301_v22, %v3890_v0 }
 0x830   : > { %v3895_v61 = vsel %vm3894_vm12, %v7301_v22, %v3891_v54 }
 0x831   : > { %6777 = vmatmul.msk.f32.vlgmr.msrb.gmra.mxu1 %vm1137_vm0, %v3895_v61 }
 0x8ae   : > { %v3916_v15 = vpop.f32.mrf.mxu1 }
 0x8af   : > { %v3919_v62 = vmul.f32 %v3916_v15, %v3597_v55 }
 0x8b1   : > { %v3920_v47 = vperm.slane %v3919_v62, 0 }
 0x8b3   : > { %v3921_v14 = vmul.f32 %v3920_v47, %v9764_v58  ;;  %v3922_v21 = vmul.f32 %v3920_v47, %v9768_v35  ;;  %v3923_v6 = vmul.f32 %v3920_v47, %v9772_v36  ;;  %v3924_v28 = vmul.f32 %v3920_v47, %v9776_v60 }
 0x8b4   : > { %v3925_v48 = vmul.f32 %v3920_v47, %v9784_v27  ;;  %v3926_v38 = vmul.f32 %v3920_v47, %v9790_v37  ;;  %v3927_v9 = vmul.f32 %v3920_v47, %v9798_v53  ;;  %v3928_v1 = vmul.f32 %v3920_v47, %v9805_v42  ;;  %v10015_v37 = vld [vmem:[%s11428_s8] ss:$0 sm:$0xff] }
 0x8b5   : > { %v3929_v23 = vmul.f32 %v3920_v47, %v9812_v18  ;;  %v3930_v13 = vmul.f32 %v3920_v47, %v9819_v33  ;;  %v3931_v58 = vmul.f32 %v3920_v47, %v9826_v19  ;;  %v3932_v35 = vmul.f32 %v3920_v47, %v9833_v56 }
 0x8b6   : > { %v3933_v36 = vmul.f32 %v3920_v47, %v9840_v7  ;;  %v3934_v60 = vmul.f32 %v3920_v47, %v9847_v44  ;;  %v3935_v27 = vmul.f32 %v3920_v47, %v9854_v59  ;;  %v3936_v53 = vmul.f32 %v3920_v47, %v9861_v25 }
 0x8b7   : > { %v3937_v42 = vmul.f32 %v3920_v47, %v9868_v51  ;;  %v3938_v18 = vmul.f32 %v3920_v47, %v9875_v50  ;;  %v3939_v33 = vmul.f32 %v3920_v47, %v9882_v26  ;;  %v3940_v19 = vmul.f32 %v3920_v47, %v9889_v40 }
 0x8b8   : > { %v3941_v56 = vmul.f32 %v3920_v47, %v9896_v45  ;;  %v3942_v7 = vmul.f32 %v3920_v47, %v9903_v31  ;;  %v3943_v44 = vmul.f32 %v3920_v47, %v9910_v3  ;;  %v3944_v59 = vmul.f32 %v3920_v47, %v9917_v46 }
 0x8b9   : > { %v3945_v5 = vmul.f32 %v3920_v47, %v9924_v2  ;;  %v3946_v25 = vmul.f32 %v3920_v47, %v9931_v32  ;;  %v3947_v51 = vmul.f32 %v3920_v47, %v9938_v30  ;;  %v3948_v50 = vmul.f32 %v3920_v47, %v9945_v8 }
 0x8ba   : > { %v3949_v26 = vmul.f32 %v3920_v47, %v9952_v34  ;;  %v3950_v40 = vmul.f32 %v3920_v47, %v9959_v43  ;;  %v3951_v45 = vmul.f32 %v3920_v47, %v9966_v49  ;;  %v3952_v31 = vmul.f32 %v3920_v47, %v9973_v24 }
 0x8bb   : > { %v10035_v3 = vadd.f32 %v10015_v37, %v3921_v14  ;;  %v10038_v46 = vadd.f32 %v10015_v37, %v3922_v21  ;;  %v10041_v2 = vadd.f32 %v10015_v37, %v3923_v6  ;;  %v10044_v32 = vadd.f32 %v10015_v37, %v3924_v28 }
 0x8bc   : > { %v10047_v30 = vadd.f32 %v10015_v37, %v3925_v48  ;;  %v10050_v8 = vadd.f32 %v10015_v37, %v3926_v38  ;;  %v10053_v34 = vadd.f32 %v10015_v37, %v3927_v9  ;;  %v10056_v43 = vadd.f32 %v10015_v37, %v3928_v1  ;;  %v7179_v1 = vld [vmem:[%s11431_s11 + $0x98] sm:$0xff] }
 0x8bd   : > { %v10059_v49 = vadd.f32 %v10015_v37, %v3929_v23  ;;  %v10062_v24 = vadd.f32 %v10015_v37, %v3930_v13  ;;  %v10065_v63 = vadd.f32 %v10015_v37, %v3931_v58  ;;  %v10068_v22 = vadd.f32 %v10015_v37, %v3932_v35  ;;  %v7181_v23 = vld [vmem:[%s11431_s11 + $0x28] sm:$0xff]  ;;  %4285 = vmatpush.bf16.msra.mxu2 %v7179_v1 }
 0x8be   : > { %v10071_v52 = vadd.f32 %v10015_v37, %v3933_v36  ;;  %v10074_v29 = vadd.f32 %v10015_v37, %v3934_v60  ;;  %v10077_v11 = vadd.f32 %v10015_v37, %v3935_v27  ;;  %v10080_v0 = vadd.f32 %v10015_v37, %v3936_v53  ;;  %4505 = vmatpush.bf16.msra.mxu3 %v7181_v23  ;;  %v7177_v1 = vld [vmem:[%s11431_s11 + $0x88] sm:$0xff]  ;;  %v7187_v23 = vld [vmem:[%s11431_s11 + $0xf8] sm:$0xff] }
 0x8bf   : > { %v10083_v54 = vadd.f32 %v10015_v37, %v3937_v42  ;;  %v10086_v61 = vadd.f32 %v10015_v37, %v3938_v18  ;;  %v10089_v39 = vadd.f32 %v10015_v37, %v3939_v33  ;;  %v10092_v4 = vadd.f32 %v10015_v37, %v3940_v19  ;;  %4753 = vmatpush.bf16.msra.mxu1 %v7187_v23 }
 0x8c0   : > { %v10095_v55 = vadd.f32 %v10015_v37, %v3941_v56  ;;  %v10098_v15 = vadd.f32 %v10015_v37, %v3942_v7  ;;  %v10101_v62 = vadd.f32 %v10015_v37, %v3943_v44  ;;  %v10104_v47 = vadd.f32 %v10015_v37, %v3944_v59  ;;  %v7178_v44 = vld [vmem:[%s11431_s11 + $0x90] sm:$0xff]  ;;  %v7180_v59 = vld [vmem:[%s11431_s11 + $0x20] sm:$0xff] }
 0x8c1   : > { %v10107_v14 = vadd.f32 %v10015_v37, %v3945_v5  ;;  %v10110_v21 = vadd.f32 %v10015_v37, %v3946_v25  ;;  %v3988_v6 = vmul.f32 0.5, %v10035_v3  ;;  %v10114_v28 = vadd.f32 %v10015_v37, %v3947_v51  ;;  %4286 = vmatpush.bf16.msra.mxu2 %v7178_v44 }
 0x8c2   : > { %11745 = vst [vmem:[#allocation19_spill] sm:$0xff] %v10104_v47  ;;  %v10117_v48 = vadd.f32 %v10015_v37, %v3948_v50  ;;  %v10120_v38 = vadd.f32 %v10015_v37, %v3949_v26  ;;  %v3989_v9 = vmul.f32 0.5, %v10038_v46  ;;  %v10130_v13 = vadd.f32 %v10015_v37, %v3950_v40  ;;  %4506 = vmatpush.bf16.msra.mxu3 %v7180_v59  ;;  %v4370_v59 = vld [vmem:[#allocation3 + $0x1] sm:$0xff] }
 0x8c3   : > { %11746 = vst [vmem:[#allocation88_spill] sm:$0xff] %v10107_v14  ;;  %v10133_v58 = vadd.f32 %v10015_v37, %v3951_v45  ;;  %v3990_v35 = vmul.f32 0.5, %v10041_v2  ;;  %v3991_v36 = vmul.f32 0.5, %v10044_v32  ;;  %v3992_v60 = vmul.f32 0.5, %v10047_v30 }
 0x8c4   : > { %11747 = vst [vmem:[#allocation79_spill] sm:$0xff] %v10110_v21  ;;  %v3993_v27 = vmul.f32 0.5, %v10050_v8  ;;  %v3994_v53 = vmul.f32 0.5, %v10053_v34  ;;  %v3995_v42 = vmul.f32 0.5, %v10056_v43  ;;  %v3996_v18 = vmul.f32 0.5, %v10059_v49 }
 0x8c5   : > { %11748 = vst [vmem:[#allocation50_spill] sm:$0xff] %v10114_v28  ;;  %v3997_v33 = vmul.f32 0.5, %v10062_v24  ;;  %7302 = vtanh.f32 %v3988_v6  ;;  %v10144_v19 = vadd.f32 %v10015_v37, %v3952_v31  ;;  %v3998_v56 = vmul.f32 0.5, %v10065_v63  ;;  %4287 = vmatpush.bf16.msra.mxu2 %v7177_v1  ;;  %v7186_v1 = vld [vmem:[%s11431_s11 + $0xf0] sm:$0xff] }
 0x8c6   : > { %11749 = vst [vmem:[#allocation18_spill] sm:$0xff] %v10117_v48  ;;  %v3999_v7 = vmul.f32 0.5, %v10068_v22  ;;  %7304 = vtanh.f32 %v3989_v9  ;;  %v4000_v5 = vmul.f32 0.5, %v10071_v52  ;;  %v10157_v37 = vmul.f32 0.5, %v10074_v29  ;;  %4754 = vmatpush.bf16.msra.mxu1 %v7186_v1 }
 0x8c7   : > { %11750 = vst [vmem:[#allocation81_spill] sm:$0xff] %v10120_v38  ;;  %v10160_v25 = vmul.f32 0.5, %v10077_v11  ;;  %7306 = vtanh.f32 %v3990_v35  ;;  %v10164_v51 = vmul.f32 0.5, %v10080_v0  ;;  %v10167_v50 = vmul.f32 0.5, %v10083_v54  ;;  %v7195_v35 = vld [vmem:[%s11431_s11 + $0x78] sm:$0xff] }
 0x8c8   : > { %11751 = vst [vmem:[#allocation82_spill] sm:$0xff] %v10130_v13  ;;  %v10170_v26 = vmul.f32 0.5, %v10086_v61  ;;  %7308 = vtanh.f32 %v3991_v36  ;;  %v10173_v40 = vmul.f32 0.5, %v10089_v39  ;;  %v10176_v45 = vmul.f32 0.5, %v10092_v4  ;;  %5014 = vmatpush.bf16.msra.mxu0 %v7195_v35 }
 0x8c9   : > { %11752 = vst [vmem:[#allocation21_spill] sm:$0xff] %v10133_v58  ;;  %v10179_v12 = vmul.f32 0.5, %v10095_v55  ;;  %7310 = vtanh.f32 %v3992_v60  ;;  %v10182_v31 = vmul.f32 0.5, %v10098_v15  ;;  %v10185_v6 = vmul.f32 0.5, %v10101_v62 }
 0x8ca   : > { %11753 = vst [vmem:[#allocation90_spill] sm:$0xff] %v10144_v19  ;;  %v10188_v9 = vmul.f32 0.5, %v10104_v47  ;;  %7312 = vtanh.f32 %v3993_v27  ;;  %v10200_v60 = vmul.f32 0.5, %v10107_v14  ;;  %v10203_v44 = vmul.f32 0.5, %v10110_v21  ;;  %v4371_v21 = vld [vmem:[#allocation3 + $0x9] sm:$0xff] }
 0x8cb   : > { %v7303_v36 = vpop.eup %7302  ;;  %v10206_v27 = vmul.f32 0.5, %v10114_v28  ;;  %7314 = vtanh.f32 %v3994_v53  ;;  %v10209_v41 = vmul.f32 0.5, %v10117_v48  ;;  %v10212_v20 = vmul.f32 0.5, %v10120_v38 }
 0x8cc   : > { %v7305_v57 = vpop.eup %7304  ;;  %7316 = vtanh.f32 %v3995_v42  ;;  %v4052_v17 = vmul.f32 0.5, %v7303_v36  ;;  %v10215_v10 = vmul.f32 0.5, %v10130_v13  ;;  %v10218_v28 = vmul.f32 0.5, %v10133_v58  ;;  %v7176_v42 = vld [vmem:[%s11431_s11 + $0x80] sm:$0xff] }
 0x8cd   : > { %v7307_v16 = vpop.eup %7306  ;;  %7318 = vtanh.f32 %v3996_v18  ;;  %v4053_v53 = vmul.f32 0.5, %v7305_v57  ;;  %v4402_v47 = vpack.c.bf16 %v4371_v21, %v4370_v59  ;;  %v7194_v18 = vld [vmem:[%s11431_s11 + $0x70] sm:$0xff]  ;;  %v10230_v23 = vmul.f32 0.5, %v10144_v19  ;;  %4288 = vmatpush.bf16.msra.mxu2 %v7176_v42 }
 0x8ce   : > { %v7309_v48 = vpop.eup %7308  ;;  %7320 = vtanh.f32 %v3997_v33  ;;  %v4054_v14 = vmul.f32 0.5, %v7307_v16  ;;  %v4084_v38 = vadd.f32 0.5, %v4052_v17  ;;  %5015 = vmatpush.bf16.msra.mxu0 %v7194_v18 }
 0x8cf   : > { %v7311_v57 = vpop.eup %7310  ;;  %7322 = vtanh.f32 %v3998_v56  ;;  %v4055_v16 = vmul.f32 0.5, %v7309_v48  ;;  %v4085_v17 = vadd.f32 0.5, %v4053_v53  ;;  %6842 = vmatmul.msk.bf16.vlgmr.msra.gmra.mxu3 %vm1145_vm6, %v4402_v47  ;;  %v7191_v48 = vld [vmem:[%s11431_s11 + $0x18] sm:$0xff]  ;;  %v7193_v47 = vld [vmem:[%s11431_s11 + $0x68] sm:$0xff] }
 0x8d0   : > { %v7313_v21 = vpop.eup %7312  ;;  %7324 = vtanh.f32 %v3999_v7  ;;  %v4056_v33 = vmul.f32 0.5, %v7311_v57  ;;  %v4086_v35 = vadd.f32 0.5, %v4054_v14  ;;  %v10233_v36 = vmul.f32 %v4084_v38, %v10035_v3  ;;  %v7185_v3 = vld [vmem:[%s11431_s11 + $0xe8] sm:$0xff]  ;;  %v7199_v7 = vld [vmem:[%s11431_s11 + $0xd8] sm:$0xff] }
 0x8d1   : > { %v7315_v59 = vpop.eup %7314  ;;  %7326 = vtanh.f32 %v4000_v5  ;;  %v4057_v58 = vmul.f32 0.5, %v7313_v21  ;;  %v4087_v13 = vadd.f32 0.5, %v4055_v16  ;;  %v10237_v19 = vmul.f32 %v4085_v17, %v10038_v46  ;;  %5130 = vmatpush.bf16.msrb.mxu2 %v7191_v48  ;;  %5348 = vmatpush.bf16.msrb.mxu3 %v7199_v7 }
 0x8d2   : > { %v7317_v14 = vpop.eup %7316  ;;  %7328 = vtanh.f32 %v10157_v37  ;;  %v4058_v38 = vmul.f32 0.5, %v7315_v59  ;;  %v4088_v46 = vadd.f32 0.5, %v4056_v33  ;;  %v10250_v56 = vmul.f32 %v4086_v35, %v10041_v2  ;;  %4165 = vst.msk [vmem:[#allocation3 + $0x11] sm:$0xff] %vm1145_vm6, %v10233_v36  ;;  %4755 = vmatpush.bf16.msra.mxu1 %v7185_v3  ;;  %5016 = vmatpush.bf16.msra.mxu0 %v7193_v47 }
 0x8d3   : > { %v7319_v5 = vpop.eup %7318  ;;  %7330 = vtanh.f32 %v10160_v25  ;;  %v4059_v53 = vmul.f32 0.5, %v7317_v14  ;;  %v4089_v42 = vadd.f32 0.5, %v4057_v58  ;;  %v10259_v1 = vmul.f32 %v4087_v13, %v10044_v32  ;;  %4166 = vst.msk [vmem:[#allocation3 + $0x19] sm:$0xff] %vm1145_vm6, %v10237_v19 }
 0x8d4   : > { %v7321_v2 = vpop.eup %7320  ;;  %7332 = vtanh.f32 %v10164_v51  ;;  %v4060_v37 = vmul.f32 0.5, %v7319_v5  ;;  %v4090_v18 = vadd.f32 0.5, %v4058_v38  ;;  %v10265_v57 = vmul.f32 %v4088_v46, %v10047_v30  ;;  %4167 = vst.msk [vmem:[#allocation3 + $0x21] sm:$0xff] %vm1145_vm6, %v10250_v56  ;;  %v7184_v30 = vld [vmem:[%s11431_s11 + $0xe0] sm:$0xff] }
 0x8d5   : > { %v7323_v58 = vpop.eup %7322  ;;  %7334 = vtanh.f32 %v10167_v50  ;;  %v4061_v32 = vmul.f32 0.5, %v7321_v2  ;;  %v4091_v13 = vadd.f32 0.5, %v4059_v53  ;;  %v10271_v25 = vmul.f32 %v4089_v42, %v10050_v8  ;;  %4168 = vst.msk [vmem:[#allocation3 + $0x29] sm:$0xff] %vm1145_vm6, %v10259_v1  ;;  %v7192_v51 = vld [vmem:[%s11431_s11 + $0x60] sm:$0xff] }
 0x8d6   : > { %v7325_v16 = vpop.eup %7324  ;;  %7336 = vtanh.f32 %v10170_v26  ;;  %v4062_v50 = vmul.f32 0.5, %v7323_v58  ;;  %v4092_v17 = vadd.f32 0.5, %v4060_v37  ;;  %v10283_v8 = vmul.f32 %v4090_v18, %v10053_v34  ;;  %4169 = vst.msk [vmem:[#allocation3 + $0x31] sm:$0xff] %vm1145_vm6, %v10265_v57  ;;  %4756 = vmatpush.bf16.msra.mxu1 %v7184_v30  ;;  %5017 = vmatpush.bf16.msra.mxu0 %v7192_v51 }
 0x8d7   : > { %v7327_v21 = vpop.eup %7326  ;;  %7338 = vtanh.f32 %v10173_v40  ;;  %v4063_v33 = vmul.f32 0.5, %v7325_v16  ;;  %v4093_v35 = vadd.f32 0.5, %v4061_v32  ;;  %v10289_v59 = vmul.f32 %v4091_v13, %v10056_v43  ;;  %4170 = vst.msk [vmem:[#allocation3 + $0x39] sm:$0xff] %vm1145_vm6, %v10271_v25 }
 0x8d8   : > { %v7329_v26 = vpop.eup %7328  ;;  %7340 = vtanh.f32 %v10176_v45  ;;  %v4064_v48 = vmul.f32 0.5, %v7327_v21  ;;  %v4094_v34 = vadd.f32 0.5, %v4062_v50  ;;  %v10295_v3 = vmul.f32 %v4092_v17, %v10059_v49  ;;  %4171 = vst.msk [vmem:[#allocation3 + $0x41] sm:$0xff] %vm1145_vm6, %v10283_v8 }
 0x8d9   : > { %v7331_v40 = vpop.eup %7330  ;;  %7342 = vtanh.f32 %v10179_v12  ;;  %v4065_v47 = vmul.f32 0.5, %v7329_v26  ;;  %v4095_v43 = vadd.f32 0.5, %v4063_v33  ;;  %v10301_v14 = vmul.f32 %v4093_v35, %v10062_v24  ;;  %4172 = vst.msk [vmem:[#allocation3 + $0x49] sm:$0xff] %vm1145_vm6, %v10289_v59 }
 0x8da   : > { %v7333_v45 = vpop.eup %7332  ;;  %7344 = vtanh.f32 %v10182_v31  ;;  %v4066_v49 = vmul.f32 0.5, %v7331_v40  ;;  %v4096_v38 = vadd.f32 0.5, %v4064_v48  ;;  %v10307_v46 = vmul.f32 %v4094_v34, %v10065_v63  ;;  %4173 = vst.msk [vmem:[#allocation3 + $0x51] sm:$0xff] %vm1145_vm6, %v10295_v3  ;;  %v4373_v26 = vld [vmem:[#allocation3 + $0x19] sm:$0xff] }
 0x8db   : > { %v7335_v12 = vpop.eup %7334  ;;  %7346 = vtanh.f32 %v10185_v6  ;;  %v4067_v24 = vmul.f32 0.5, %v7333_v45  ;;  %v4097_v7 = vadd.f32 0.5, %v4065_v47  ;;  %v10313_v5 = vmul.f32 %v4095_v43, %v10068_v22  ;;  %4174 = vst.msk [vmem:[#allocation3 + $0x59] sm:$0xff] %vm1145_vm6, %v10301_v14 }
 0x8dc   : > { %v7337_v31 = vpop.eup %7336  ;;  %7348 = vtanh.f32 %v10188_v9  ;;  %v4068_v53 = vmul.f32 0.5, %v7335_v12  ;;  %v4098_v63 = vadd.f32 0.5, %v4066_v49  ;;  %v10319_v42 = vmul.f32 %v4096_v38, %v10071_v52  ;;  %4175 = vst.msk [vmem:[#allocation3 + $0x61] sm:$0xff] %vm1145_vm6, %v10307_v46  ;;  %v4621_v47 = vld [vmem:[#allocation3 + $0x29] sm:$0xff] }
 0x8dd   : > { %v7339_v6 = vpop.eup %7338  ;;  %7350 = vtanh.f32 %v10200_v60  ;;  %v4069_v2 = vmul.f32 0.5, %v7337_v31  ;;  %v4099_v22 = vadd.f32 0.5, %v4067_v24  ;;  %v10325_v37 = vmul.f32 %v4097_v7, %v10074_v29  ;;  %4176 = vst.msk [vmem:[#allocation3 + $0x69] sm:$0xff] %vm1145_vm6, %v10313_v5 }
 0x8de   : > { %v7341_v9 = vpop.eup %7340  ;;  %7352 = vtanh.f32 %v10203_v44  ;;  %v4070_v18 = vmul.f32 0.5, %v7339_v6  ;;  %v4100_v52 = vadd.f32 0.5, %v4068_v53  ;;  %v10331_v58 = vmul.f32 %v4098_v63, %v10077_v11  ;;  %4177 = vst.msk [vmem:[#allocation3 + $0x71] sm:$0xff] %vm1145_vm6, %v10319_v42 }
 0x8df   : > { %v7343_v60 = vpop.eup %7342  ;;  %7354 = vtanh.f32 %v10206_v27  ;;  %v4071_v32 = vmul.f32 0.5, %v7341_v9  ;;  %v4101_v29 = vadd.f32 0.5, %v4069_v2  ;;  %v10337_v13 = vmul.f32 %v4099_v22, %v10080_v0  ;;  %4178 = vst.msk [vmem:[#allocation3 + $0x79] sm:$0xff] %vm1145_vm6, %v10325_v37  ;;  %v11754_v2 = vld [vmem:[#allocation19_spill] sm:$0xff] }
 0x8e0   : > { %v7345_v44 = vpop.eup %7344  ;;  %7356 = vtanh.f32 %v10209_v41  ;;  %v4072_v30 = vmul.f32 0.5, %v7343_v60  ;;  %v4102_v11 = vadd.f32 0.5, %v4070_v18  ;;  %v10343_v51 = vmul.f32 %v4100_v52, %v10083_v54  ;;  %4179 = vst.msk [vmem:[#allocation3 + $0x81] sm:$0xff] %vm1145_vm6, %v10331_v58  ;;  %v11755_v18 = vld [vmem:[#allocation88_spill] sm:$0xff] }
 0x8e1   : > { %v7347_v27 = vpop.eup %7346  ;;  %7358 = vtanh.f32 %v10212_v20  ;;  %v4073_v16 = vmul.f32 0.5, %v7345_v44  ;;  %v4103_v0 = vadd.f32 0.5, %v4071_v32  ;;  %v10349_v50 = vmul.f32 %v4101_v29, %v10086_v61  ;;  %4180 = vst.msk [vmem:[#allocation3 + $0x89] sm:$0xff] %vm1145_vm6, %v10337_v13 }
 0x8e2   : > { %v7349_v41 = vpop.eup %7348  ;;  %7360 = vtanh.f32 %v10215_v10  ;;  %v4074_v17 = vmul.f32 0.5, %v7347_v27  ;;  %v4104_v54 = vadd.f32 0.5, %v4072_v30  ;;  %v10355_v21 = vmul.f32 %v4102_v11, %v10089_v39  ;;  %4181 = vst.msk [vmem:[#allocation3 + $0x91] sm:$0xff] %vm1145_vm6, %v10343_v51  ;;  %v4372_v10 = vld [vmem:[#allocation3 + $0x11] sm:$0xff]  ;;  %v11756_v30 = vld [vmem:[#allocation79_spill] sm:$0xff] }
 0x8e3   : > { %v7351_v20 = vpop.eup %7350  ;;  %7362 = vtanh.f32 %v10218_v28  ;;  %v4075_v33 = vmul.f32 0.5, %v7349_v41  ;;  %v4105_v61 = vadd.f32 0.5, %v4073_v16  ;;  %v10361_v35 = vmul.f32 %v4103_v0, %v10092_v4  ;;  %4182 = vst.msk [vmem:[#allocation3 + $0x99] sm:$0xff] %vm1145_vm6, %v10349_v50  ;;  %v4620_v28 = vld [vmem:[#allocation3 + $0x21] sm:$0xff]  ;;  %v11757_v41 = vld [vmem:[#allocation50_spill] sm:$0xff] }
 0x8e4   : > { %v7353_v48 = vpop.eup %7352  ;;  %7364 = vtanh.f32 %v10230_v23  ;;  %v4076_v39 = vmul.f32 0.5, %v7351_v20  ;;  %v4106_v34 = vadd.f32 0.5, %v4074_v17  ;;  %v10367_v40 = vmul.f32 %v4104_v54, %v10095_v55  ;;  %4183 = vst.msk [vmem:[#allocation3 + $0xa1] sm:$0xff] %vm1145_vm6, %v10355_v21  ;;  %v4872_v23 = vld [vmem:[#allocation3 + $0x10] sm:$0xff]  ;;  %v4873_v55 = vld [vmem:[#allocation3 + $0x18] sm:$0xff] }
 0x8e5   : > { %v7355_v4 = vpop.eup %7354  ;;  %v4077_v43 = vmul.f32 0.5, %v7353_v48  ;;  %v4107_v45 = vadd.f32 0.5, %v4075_v33  ;;  %v10372_v49 = vmul.f32 %v4105_v61, %v10098_v15  ;;  %v4149_v38 = vpack.c.bf16 %v10237_v19, %v10233_v36  ;;  %4184 = vst.msk [vmem:[#allocation3 + $0xa9] sm:$0xff] %vm1145_vm6, %v10361_v35  ;;  %v11758_v33 = vld [vmem:[#allocation18_spill] sm:$0xff] }
 0x8e6   : > { %v7357_v12 = vpop.eup %7356  ;;  %v4078_v24 = vmul.f32 0.5, %v7355_v4  ;;  %v4108_v7 = vadd.f32 0.5, %v4076_v39  ;;  %v10379_v31 = vmul.f32 %v4106_v34, %v10101_v62  ;;  %4185 = vst.msk [vmem:[#allocation3 + $0xb1] sm:$0xff] %vm1145_vm6, %v10367_v40  ;;  %v4403_v53 = vpack.c.bf16 %v4373_v26, %v4372_v10  ;;  %v11759_v26 = vld [vmem:[#allocation81_spill] sm:$0xff]  ;;  %v11760_v34 = vld [vmem:[#allocation82_spill] sm:$0xff] }
 0x8e7   : > { %v7359_v15 = vpop.eup %7358  ;;  %v4079_v63 = vmul.f32 0.5, %v7357_v12  ;;  %v4109_v6 = vadd.f32 0.5, %v4077_v43  ;;  %v10384_v19 = vmul.f32 %v4107_v45, %v11754_v2  ;;  %4186 = vst.msk [vmem:[#allocation3 + $0xb9] sm:$0xff] %vm1145_vm6, %v10372_v49  ;;  %6802 = vmatmul.msk.bf16.vlgmr.msra.gmra.mxu2 %vm1145_vm6, %v4149_v38  ;;  %v4652_v36 = vpack.c.bf16 %v4621_v47, %v4620_v28  ;;  %v11761_v47 = vld [vmem:[#allocation21_spill] sm:$0xff]  ;;  %v11762_v45 = vld [vmem:[#allocation90_spill] sm:$0xff]  ;;  %v4875_v2 = vld [vmem:[#allocation3 + $0x28] sm:$0xff] }
 0x8e8   : > { %v7361_v22 = vpop.eup %7360  ;;  %v4080_v9 = vmul.f32 0.5, %v7359_v15  ;;  %v4110_v62 = vadd.f32 0.5, %v4078_v24  ;;  %v10390_v52 = vmul.f32 %v4108_v7, %v11755_v18  ;;  %4187 = vst.msk [vmem:[#allocation3 + $0xc1] sm:$0xff] %vm1145_vm6, %v10379_v31  ;;  %6843 = vmatmul.msk.bf16.gmra.mxu3 %vm1145_vm6, %v4403_v53  ;;  %v10395_v60 = vpack.c.bf16 %v4873_v55, %v4872_v23  ;;  %v4622_v7 = vld [vmem:[#allocation3 + $0x31] sm:$0xff]  ;;  %v4623_v53 = vld [vmem:[#allocation3 + $0x39] sm:$0xff] }
 0x8e9   : > { %v7363_v32 = vpop.eup %7362  ;;  %v4081_v29 = vmul.f32 0.5, %v7361_v22  ;;  %v4111_v44 = vadd.f32 0.5, %v4079_v63  ;;  %v10398_v11 = vmul.f32 %v4109_v6, %v11756_v30  ;;  %4188 = vst.msk [vmem:[#allocation3 + $0xc9] sm:$0xff] %vm1145_vm6, %v10384_v19  ;;  %6882 = vmatmul.msk.bf16.vlgmr.msra.gmra.mxu1 %vm1145_vm6, %v4652_v36  ;;  %v4153_v43 = vpack.c.bf16 %v10301_v14, %v10295_v3  ;;  %v4874_v6 = vld [vmem:[#allocation3 + $0x20] sm:$0xff]  ;;  %v4876_v30 = vld [vmem:[#allocation3 + $0x30] sm:$0xff] }
 0x8ea   : > { %v7365_v27 = vpop.eup %7364  ;;  %v4082_v16 = vmul.f32 0.5, %v7363_v32  ;;  %v4112_v0 = vadd.f32 0.5, %v4080_v9  ;;  %v10404_v17 = vmul.f32 %v4110_v62, %v11757_v41  ;;  %4189 = vst.msk [vmem:[#allocation3 + $0xd1] sm:$0xff] %vm1145_vm6, %v10390_v52  ;;  %6922 = vmatmul.msk.bf16.vlgmr.msra.gmra.mxu0 %vm1145_vm6, %v10395_v60  ;;  %v4154_v23 = vpack.c.bf16 %v10313_v5, %v10307_v46  ;;  %v7189_v5 = vld [vmem:[%s11431_s11 + $0x8] sm:$0xff] }
 0x8eb   : > { %v4083_v54 = vmul.f32 0.5, %v7365_v27  ;;  %v4113_v20 = vadd.f32 0.5, %v4081_v29  ;;  %v10411_v61 = vmul.f32 %v4111_v44, %v11758_v33  ;;  %4190 = vst.msk [vmem:[#allocation3 + $0xd9] sm:$0xff] %vm1145_vm6, %v10398_v11  ;;  %v4155_v55 = vpack.c.bf16 %v10325_v37, %v10319_v42  ;;  %v4625_v29 = vld [vmem:[#allocation3 + $0x49] sm:$0xff]  ;;  %v4877_v27 = vld [vmem:[#allocation3 + $0x38] sm:$0xff]  ;;  %v7197_v42 = vld [vmem:[%s11431_s11 + $0xc8] sm:$0xff] }
 0x8ec   : > { %v4114_v10 = vadd.f32 0.5, %v4082_v16  ;;  %v10416_v48 = vmul.f32 %v4112_v0, %v11759_v26  ;;  %4191 = vst.msk [vmem:[#allocation3 + $0xe1] sm:$0xff] %vm1145_vm6, %v10404_v17  ;;  %v4156_v3 = vpack.c.bf16 %v10337_v13, %v10331_v58  ;;  %v4157_v14 = vpack.c.bf16 %v10349_v50, %v10343_v51  ;;  %v7198_v0 = vld [vmem:[%s11431_s11 + $0xd0] sm:$0xff]  ;;  %v4634_v37 = vld [vmem:[#allocation3 + $0x91] sm:$0xff] }
 0x8ed   : > { %v4115_v39 = vadd.f32 0.5, %v4083_v54  ;;  %v10421_v28 = vmul.f32 %v4113_v20, %v11760_v34  ;;  %4192 = vst.msk [vmem:[#allocation3 + $0xe9] sm:$0xff] %vm1145_vm6, %v10411_v61  ;;  %v4158_v12 = vpack.c.bf16 %v10361_v35, %v10355_v21  ;;  %v4159_v24 = vpack.c.bf16 %v10372_v49, %v10367_v40  ;;  %5349 = vmatpush.bf16.msrb.mxu3 %v7198_v0  ;;  %v4878_v20 = vld [vmem:[#allocation3 + $0x40] sm:$0xff]  ;;  %v4879_v33 = vld [vmem:[#allocation3 + $0x48] sm:$0xff]  ;;  %v10546_v58 = vld [vmem:[%s11432_s12] ss:$0 sm:$0xff] }
 0x8ee   : > { %v10426_v4 = vmul.f32 %v4114_v10, %v11761_v47  ;;  %4193 = vst.msk [vmem:[#allocation3 + $0xf1] sm:$0xff] %vm1145_vm6, %v10416_v48  ;;  %v4160_v15 = vpack.c.bf16 %v10384_v19, %v10379_v31  ;;  %v4150_v63 = vpack.c.bf16 %v10259_v1, %v10250_v56  ;;  %v4161_v22 = vpack.c.bf16 %v10398_v11, %v10390_v52  ;;  %v4624_v1 = vld [vmem:[#allocation3 + $0x41] sm:$0xff]  ;;  %v4629_v34 = vld [vmem:[#allocation3 + $0x69] sm:$0xff] }
 0x8ef   : > { %v10433_v38 = vmul.f32 %v4115_v39, %v11762_v45  ;;  %4194 = vst.msk [vmem:[#allocation3 + $0xf9] sm:$0xff] %vm1145_vm6, %v10421_v28  ;;  %v4162_v9 = vpack.c.bf16 %v10411_v61, %v10404_v17  ;;  %v4163_v62 = vpack.c.bf16 %v10421_v28, %v10416_v48  ;;  %v4653_v32 = vpack.c.bf16 %v4623_v53, %v4622_v7  ;;  %v4628_v39 = vld [vmem:[#allocation3 + $0x61] sm:$0xff]  ;;  %v4880_v47 = vld [vmem:[#allocation3 + $0x50] sm:$0xff]  ;;  %v4881_v45 = vld [vmem:[#allocation3 + $0x58] sm:$0xff] }
 0x8f0   : > { %4195 = vst.msk [vmem:[#allocation3 + $0x101] sm:$0xff] %vm1145_vm6, %v10426_v4  ;;  %v10467_v56 = vpack.c.bf16 %v4875_v2, %v4874_v6  ;;  %v4151_v44 = vpack.c.bf16 %v10271_v25, %v10265_v57  ;;  %v4654_v16 = vpack.c.bf16 %v4625_v29, %v4624_v1  ;;  %v10482_v41 = vpack.c.bf16 %v4877_v27, %v4876_v30  ;;  %v4626_v57 = vld [vmem:[#allocation3 + $0x51] sm:$0xff]  ;;  %v4627_v25 = vld [vmem:[#allocation3 + $0x59] sm:$0xff]  ;;  %v4883_v6 = vld [vmem:[#allocation3 + $0x68] sm:$0xff] }
 0x8f1   : > { %4196 = vst.msk [vmem:[#allocation3 + $0x109] sm:$0xff] %vm1145_vm6, %v10433_v38  ;;  %v4164_v18 = vpack.c.bf16 %v10433_v38, %v10426_v4  ;;  %v4152_v54 = vpack.c.bf16 %v10289_v59, %v10283_v8  ;;  %v4655_v10 = vpack.c.bf16 %v4627_v25, %v4626_v57  ;;  %v10491_v26 = vpack.c.bf16 %v4879_v33, %v4878_v20  ;;  %v4630_v7 = vld [vmem:[#allocation3 + $0x71] sm:$0xff]  ;;  %v4631_v53 = vld [vmem:[#allocation3 + $0x79] sm:$0xff]  ;;  %v4633_v1 = vld [vmem:[#allocation3 + $0x89] sm:$0xff] }
 0x8f2   : > { %v4656_v8 = vpack.c.bf16 %v4629_v34, %v4628_v39  ;;  %v10498_v59 = vpack.c.bf16 %v4881_v45, %v4880_v47  ;;  %v4884_v29 = vld [vmem:[#allocation3 + $0x70] sm:$0xff]  ;;  %5350 = vmatpush.bf16.msrb.mxu3 %v7197_v42  ;;  %v4886_v30 = vld [vmem:[#allocation3 + $0x80] sm:$0xff]  ;;  %v4887_v27 = vld [vmem:[#allocation3 + $0x88] sm:$0xff] }
 0x8f3   : > { %v10534_v0 = vpack.c.bf16 %v4887_v27, %v4886_v30  ;;  %v4636_v25 = vld [vmem:[#allocation3 + $0xa1] sm:$0xff]  ;;  %v4888_v20 = vld [vmem:[#allocation3 + $0x90] sm:$0xff]  ;;  %v4889_v33 = vld [vmem:[#allocation3 + $0x98] sm:$0xff] }
 0x8f4   : > { %v10551_v39 = vpack.c.bf16 %v4889_v33, %v4888_v20  ;;  %v4641_v20 = vld [vmem:[#allocation3 + $0xc9] sm:$0xff]  ;;  %v7201_v28 = vld [vmem:[%s11431_s11 + $0x48] sm:$0xff] }
 0x8f5   : > { %v7211_v48 = vld [vmem:[%s11431_s11 + $0x118] sm:$0xff] }
 0x8f7   : > { %6803 = vmatmul.msk.bf16.gmra.mxu2 %vm1145_vm6, %v4150_v63  ;;  %v4882_v63 = vld [vmem:[#allocation3 + $0x60] sm:$0xff] }
 0x8f8   : > { %6844 = vmatmul.msk.bf16.gmra.mxu3 %vm1145_vm6, %v4652_v36  ;;  %v7190_v36 = vld [vmem:[%s11431_s11 + $0x10] sm:$0xff]  ;;  %v10508_v2 = vpack.c.bf16 %v4883_v6, %v4882_v63  ;;  %v4638_v6 = vld [vmem:[#allocation3 + $0xb1] sm:$0xff] }
 0x8f9   : > { %6883 = vmatmul.msk.bf16.gmra.mxu1 %vm1145_vm6, %v4653_v32  ;;  %5131 = vmatpush.bf16.msrb.mxu2 %v7190_v36 }
 0x8fa   : > { %6923 = vmatmul.msk.bf16.gmra.mxu0 %vm1145_vm6, %v10467_v56 }
 0x8fd   : > { %5132 = vmatpush.bf16.msrb.mxu2 %v7189_v5 }
 0x907   : > { %6804 = vmatmul.msk.bf16.gmra.mxu2 %vm1145_vm6, %v4151_v44  ;;  %v4885_v44 = vld [vmem:[#allocation3 + $0x78] sm:$0xff] }
 0x908   : > { %6845 = vmatmul.msk.bf16.gmra.mxu3 %vm1145_vm6, %v4653_v32  ;;  %v4632_v32 = vld [vmem:[#allocation3 + $0x81] sm:$0xff] }
 0x909   : > { %6884 = vmatmul.msk.bf16.gmra.mxu1 %vm1145_vm6, %v4654_v16  ;;  %v4658_v46 = vpack.c.bf16 %v4633_v1, %v4632_v32  ;;  %v4890_v1 = vld [vmem:[#allocation3 + $0xa0] sm:$0xff] }
 0x90a   : > { %6924 = vmatmul.msk.bf16.gmra.mxu0 %vm1145_vm6, %v10482_v41 }
 0x917   : > { %6805 = vmatmul.msk.bf16.gmra.mxu2 %vm1145_vm6, %v4152_v54  ;;  %v4637_v54 = vld [vmem:[#allocation3 + $0xa9] sm:$0xff] }
 0x918   : > { %6846 = vmatmul.msk.bf16.gmra.mxu3 %vm1145_vm6, %v4654_v16 }
 0x919   : > { %6885 = vmatmul.msk.bf16.gmra.mxu1 %vm1145_vm6, %v4655_v10 }
 0x91a   : > { %6925 = vmatmul.msk.bf16.gmra.mxu0 %vm1145_vm6, %v10491_v26 }
 0x927   : > { %6806 = vmatmul.msk.bf16.gmra.mxu2 %vm1145_vm6, %v4153_v43  ;;  %v4657_v43 = vpack.c.bf16 %v4631_v53, %v4630_v7 }
 0x928   : > { %6847 = vmatmul.msk.bf16.gmra.mxu3 %vm1145_vm6, %v4655_v10 }
 0x929   : > { %6886 = vmatmul.msk.bf16.gmra.mxu1 %vm1145_vm6, %v4656_v8 }
 0x92a   : > { %6926 = vmatmul.msk.bf16.gmra.mxu0 %vm1145_vm6, %v10498_v59 }
 0x937   : > { %6807 = vmatmul.msk.bf16.gmra.mxu2 %vm1145_vm6, %v4154_v23  ;;  %v10521_v23 = vpack.c.bf16 %v4885_v44, %v4884_v29  ;;  %v4891_v29 = vld [vmem:[#allocation3 + $0xa8] sm:$0xff] }
 0x938   : > { %6848 = vmatmul.msk.bf16.gmra.mxu3 %vm1145_vm6, %v4656_v8 }
 0x939   : > { %6887 = vmatmul.msk.bf16.gmra.mxu1 %vm1145_vm6, %v4657_v43 }
 0x93a   : > { %6927 = vmatmul.msk.bf16.gmra.mxu0 %vm1145_vm6, %v10508_v2 }
 0x947   : > { %6808 = vmatmul.msk.bf16.gmra.mxu2 %vm1145_vm6, %v4155_v55  ;;  %v4635_v55 = vld [vmem:[#allocation3 + $0x99] sm:$0xff] }
 0x948   : > { %6849 = vmatmul.msk.bf16.gmra.mxu3 %vm1145_vm6, %v4657_v43  ;;  %v4659_v16 = vpack.c.bf16 %v4635_v55, %v4634_v37  ;;  %v4639_v43 = vld [vmem:[#allocation3 + $0xb9] sm:$0xff]  ;;  %v10571_v37 = vpack.c.bf16 %v4891_v29, %v4890_v1 }
 0x949   : > { %6888 = vmatmul.msk.bf16.gmra.mxu1 %vm1145_vm6, %v4658_v46  ;;  %v4661_v42 = vpack.c.bf16 %v4639_v43, %v4638_v6 }
 0x94a   : > { %6928 = vmatmul.msk.bf16.gmra.mxu0 %vm1145_vm6, %v10521_v23 }
 0x952   : > { %v4508_v36 = vpop.f32.mrf.mxu3 }
 0x957   : > { %6809 = vmatmul.msk.bf16.gmra.mxu2 %vm1145_vm6, %v4156_v3  ;;  %v4660_v3 = vpack.c.bf16 %v4637_v54, %v4636_v25  ;;  %v4640_v54 = vld [vmem:[#allocation3 + $0xc1] sm:$0xff] }
 0x958   : > { %6850 = vmatmul.msk.bf16.gmra.mxu3 %vm1145_vm6, %v4658_v46 }
 0x959   : > { %6889 = vmatmul.msk.bf16.gmra.mxu1 %vm1145_vm6, %v4659_v16 }
 0x95a   : > { %6929 = vmatmul.msk.bf16.gmra.mxu0 %vm1145_vm6, %v10534_v0  ;;  %v4510_v57 = vpop.f32.mrf.mxu3 }
 0x966   : > { %v4758_v10 = vpop.f32.mrf.mxu1 }
 0x967   : > { %6810 = vmatmul.msk.bf16.gmra.mxu2 %vm1145_vm6, %v4157_v14  ;;  %v10548_v13 = vpop.f32.mrf.mxu0 }
 0x968   : > { %6851 = vmatmul.msk.bf16.gmra.mxu3 %vm1145_vm6, %v4659_v16 }
 0x969   : > { %6890 = vmatmul.msk.bf16.gmra.mxu1 %vm1145_vm6, %v4660_v3 }
 0x96a   : > { %v4290_v34 = vpop.f32.mrf.mxu2  ;;  %6930 = vmatmul.msk.bf16.gmra.mxu0 %vm1145_vm6, %v10551_v39 }
 0x96b   : > { %v4291_v51 = vadd.f32 %v10546_v58, %v4290_v34  ;;  %v4513_v50 = vpop.f32.mrf.mxu3 }
 0x96d   : > { %v4588_v14 = vadd.f32 %v4508_v36, %v4291_v51 }
 0x96e   : > { %v4760_v47 = vpop.f32.mrf.mxu1 }
 0x96f   : > { %v10557_v45 = vadd.f32 %v4758_v10, %v4588_v14  ;;  %v10559_v8 = vpop.f32.mrf.mxu0  ;;  %v4892_v10 = vld [vmem:[#allocation3 + $0xb0] sm:$0xff]  ;;  %v4662_v14 = vpack.c.bf16 %v4641_v20, %v4640_v54 }
 0x972   : > { %v4292_v7 = vpop.f32.mrf.mxu2 }
 0x973   : > { %v4293_v53 = vadd.f32 %v10546_v58, %v4292_v7  ;;  %v4515_v63 = vpop.f32.mrf.mxu3 }
 0x975   : > { %v4589_v32 = vadd.f32 %v4510_v57, %v4293_v53 }
 0x976   : > { %v4763_v44 = vpop.f32.mrf.mxu1 }
 0x977   : > { %v10562_v46 = vadd.f32 %v4760_v47, %v4589_v32  ;;  %6811 = vmatmul.msk.bf16.gmra.mxu2 %vm1145_vm6, %v4158_v12  ;;  %v10568_v5 = vpop.f32.mrf.mxu0  ;;  %v7188_v47 = vld [vmem:[%s11431_s11] sm:$0xff] }
 0x978   : > { %6852 = vmatmul.msk.bf16.gmra.mxu3 %vm1145_vm6, %v4660_v3  ;;  %v4893_v3 = vld [vmem:[#allocation3 + $0xb8] sm:$0xff]  ;;  %5133 = vmatpush.bf16.msrb.mxu2 %v7188_v47 }
 0x979   : > { %6891 = vmatmul.msk.bf16.gmra.mxu1 %vm1145_vm6, %v4661_v42  ;;  %v10594_v7 = vpack.c.bf16 %v4893_v3, %v4892_v10 }
 0x97a   : > { %v4295_v55 = vpop.f32.mrf.mxu2  ;;  %6931 = vmatmul.msk.bf16.gmra.mxu0 %vm1145_vm6, %v10571_v37 }
 0x97b   : > { %v4296_v30 = vadd.f32 %v10546_v58, %v4295_v55  ;;  %v4518_v27 = vpop.f32.mrf.mxu3  ;;  %v4643_v55 = vld [vmem:[#allocation3 + $0xd9] sm:$0xff] }
 0x97c   : > { %6008 = vmatpush.bf16.msra.mxu2 %v7211_v48 }
 0x97d   : > { %v4590_v16 = vadd.f32 %v4513_v50, %v4296_v30 }
 0x97e   : > { %v4765_v21 = vpop.f32.mrf.mxu1 }
 0x97f   : > { %v10577_v35 = vadd.f32 %v4763_v44, %v4590_v16  ;;  %v10579_v12 = vpop.f32.mrf.mxu0  ;;  %v4894_v16 = vld [vmem:[#allocation3 + $0xc0] sm:$0xff] }
 0x982   : > { %v4297_v36 = vpop.f32.mrf.mxu2 }
 0x983   : > { %v4298_v57 = vadd.f32 %v10546_v58, %v4297_v36  ;;  %v4520_v25 = vpop.f32.mrf.mxu3 }
 0x985   : > { %v4591_v33 = vadd.f32 %v4515_v63, %v4298_v57 }
 0x986   : > { %v4768_v34 = vpop.f32.mrf.mxu1 }
 0x987   : > { %v10582_v51 = vadd.f32 %v4765_v21, %v4591_v33  ;;  %6812 = vmatmul.msk.bf16.gmra.mxu2 %vm1145_vm6, %v4159_v24  ;;  %v10588_v50 = vpop.f32.mrf.mxu0  ;;  %v7196_v24 = vld [vmem:[%s11431_s11 + $0xc0] sm:$0xff]  ;;  %v4895_v21 = vld [vmem:[#allocation3 + $0xc8] sm:$0xff] }
 0x988   : > { %6853 = vmatmul.msk.bf16.gmra.mxu3 %vm1145_vm6, %v4661_v42  ;;  %v4642_v42 = vld [vmem:[#allocation3 + $0xd1] sm:$0xff]  ;;  %v10617_v20 = vpack.c.bf16 %v4895_v21, %v4894_v16 }
 0x989   : > { %6892 = vmatmul.msk.bf16.gmra.mxu1 %vm1145_vm6, %v4662_v14  ;;  %5351 = vmatpush.bf16.msrb.mxu3 %v7196_v24  ;;  %v4663_v54 = vpack.c.bf16 %v4643_v55, %v4642_v42 }
 0x98a   : > { %v4300_v53 = vpop.f32.mrf.mxu2  ;;  %6932 = vmatmul.msk.bf16.gmra.mxu0 %vm1145_vm6, %v10594_v7 }
 0x98b   : > { %v4301_v40 = vadd.f32 %v10546_v58, %v4300_v53  ;;  %v4523_v49 = vpop.f32.mrf.mxu3  ;;  %v4644_v53 = vld [vmem:[#allocation3 + $0xe1] sm:$0xff] }
 0x98d   : > { %v4592_v63 = vadd.f32 %v4518_v27, %v4301_v40  ;;  %v4645_v40 = vld [vmem:[#allocation3 + $0xe9] sm:$0xff] }
 0x98e   : > { %v4770_v6 = vpop.f32.mrf.mxu1  ;;  %v4664_v42 = vpack.c.bf16 %v4645_v40, %v4644_v53 }
 0x98f   : > { %v10603_v43 = vadd.f32 %v4768_v34, %v4592_v63  ;;  %v10605_v32 = vpop.f32.mrf.mxu0  ;;  %v4896_v63 = vld [vmem:[#allocation3 + $0xd0] sm:$0xff] }
 0x992   : > { %v4302_v1 = vpop.f32.mrf.mxu2 }
 0x993   : > { %v4303_v29 = vadd.f32 %v10546_v58, %v4302_v1  ;;  %v4525_v44 = vpop.f32.mrf.mxu3 }
 0x995   : > { %v4593_v30 = vadd.f32 %v4520_v25, %v4303_v29 }
 0x996   : > { %v4773_v36 = vpop.f32.mrf.mxu1 }
 0x997   : > { %v10608_v57 = vadd.f32 %v4770_v6, %v4593_v30  ;;  %6813 = vmatmul.msk.bf16.gmra.mxu2 %vm1145_vm6, %v4160_v15  ;;  %v10614_v27 = vpop.f32.mrf.mxu0  ;;  %v4897_v6 = vld [vmem:[#allocation3 + $0xd8] sm:$0xff] }
 0x998   : > { %6854 = vmatmul.msk.bf16.gmra.mxu3 %vm1145_vm6, %v4662_v14  ;;  %v10637_v55 = vpack.c.bf16 %v4897_v6, %v4896_v63 }
 0x999   : > { %6893 = vmatmul.msk.bf16.gmra.mxu1 %vm1145_vm6, %v4663_v54 }
 0x99a   : > { %v4305_v25 = vpop.f32.mrf.mxu2  ;;  %6933 = vmatmul.msk.bf16.gmra.mxu0 %vm1145_vm6, %v10617_v20 }
 0x99b   : > { %v4306_v33 = vadd.f32 %v10546_v58, %v4305_v25  ;;  %v4528_v10 = vpop.f32.mrf.mxu3 }
 0x99d   : > { %v4594_v3 = vadd.f32 %v4523_v49, %v4306_v33  ;;  %v4646_v33 = vld [vmem:[#allocation3 + $0xf1] sm:$0xff] }
 0x99e   : > { %v4775_v31 = vpop.f32.mrf.mxu1 }
 0x99f   : > { %v10623_v19 = vadd.f32 %v4773_v36, %v4594_v3  ;;  %v10625_v15 = vpop.f32.mrf.mxu0  ;;  %v4647_v3 = vld [vmem:[#allocation3 + $0xf9] sm:$0xff] }
 0x9a2   : > { %v4307_v34 = vpop.f32.mrf.mxu2 }
 0x9a3   : > { %v4308_v14 = vadd.f32 %v10546_v58, %v4307_v34  ;;  %v4530_v47 = vpop.f32.mrf.mxu3  ;;  %v4898_v34 = vld [vmem:[#allocation3 + $0xe0] sm:$0xff] }
 0x9a5   : > { %v4595_v24 = vadd.f32 %v4525_v44, %v4308_v14  ;;  %v4899_v14 = vld [vmem:[#allocation3 + $0xe8] sm:$0xff] }
 0x9a6   : > { %v4778_v1 = vpop.f32.mrf.mxu1  ;;  %v10657_v63 = vpack.c.bf16 %v4899_v14, %v4898_v34 }
 0x9a7   : > { %v10628_v29 = vadd.f32 %v4775_v31, %v4595_v24  ;;  %6814 = vmatmul.msk.bf16.gmra.mxu2 %vm1145_vm6, %v4161_v22  ;;  %v10634_v49 = vpop.f32.mrf.mxu0  ;;  %v4665_v24 = vpack.c.bf16 %v4647_v3, %v4646_v33  ;;  %v4900_v3 = vld [vmem:[#allocation3 + $0xf0] sm:$0xff] }
 0x9a8   : > { %6855 = vmatmul.msk.bf16.gmra.mxu3 %vm1145_vm6, %v4663_v54 }
 0x9a9   : > { %6894 = vmatmul.msk.bf16.gmra.mxu1 %vm1145_vm6, %v4664_v42 }
 0x9aa   : > { %v4310_v44 = vpop.f32.mrf.mxu2  ;;  %6934 = vmatmul.msk.bf16.gmra.mxu0 %vm1145_vm6, %v10637_v55 }
 0x9ab   : > { %v4311_v30 = vadd.f32 %v10546_v58, %v4310_v44  ;;  %v4533_v16 = vpop.f32.mrf.mxu3 }
 0x9ad   : > { %v4596_v21 = vadd.f32 %v4528_v10, %v4311_v30  ;;  %v7203_v30 = vld [vmem:[%s11431_s11 + $0x58] sm:$0xff] }
 0x9ae   : > { %v4780_v52 = vpop.f32.mrf.mxu1  ;;  %5790 = vmatpush.bf16.msrb.mxu0 %v7203_v30  ;;  %v7213_v30 = vld [vmem:[%s11433_s13 + $0x8] sm:$0xff] }
 0x9af   : > { %v10643_v11 = vadd.f32 %v4778_v1, %v4596_v21  ;;  %v10645_v22 = vpop.f32.mrf.mxu0  ;;  %6279 = vmatpush.bf16.msra.mxu3 %v7213_v30 }
 0x9b2   : > { %v4312_v36 = vpop.f32.mrf.mxu2 }
 0x9b3   : > { %v4313_v54 = vadd.f32 %v10546_v58, %v4312_v36  ;;  %v4535_v25 = vpop.f32.mrf.mxu3 }
 0x9b5   : > { %v4597_v31 = vadd.f32 %v4530_v47, %v4313_v54  ;;  %v4649_v54 = vld [vmem:[#allocation3 + $0x109] sm:$0xff] }
 0x9b6   : > { %v4783_v53 = vpop.f32.mrf.mxu1 }
 0x9b7   : > { %v10648_v40 = vadd.f32 %v4780_v52, %v4597_v31  ;;  %6815 = vmatmul.msk.bf16.gmra.mxu2 %vm1145_vm6, %v4162_v9  ;;  %v10654_v10 = vpop.f32.mrf.mxu0  ;;  %v4901_v31 = vld [vmem:[#allocation3 + $0xf8] sm:$0xff] }
 0x9b8   : > { %6856 = vmatmul.msk.bf16.gmra.mxu3 %vm1145_vm6, %v4664_v42  ;;  %v7207_v42 = vld [vmem:[%s11431_s11 + $0xb8] sm:$0xff] }
 0x9b9   : > { %6895 = vmatmul.msk.bf16.gmra.mxu1 %vm1145_vm6, %v4665_v24 }
 0x9ba   : > { %v4315_v47 = vpop.f32.mrf.mxu2  ;;  %6935 = vmatmul.msk.bf16.gmra.mxu0 %vm1145_vm6, %v10657_v63  ;;  %5674 = vmatpush.bf16.msrb.mxu1 %v7207_v42 }
 0x9bb   : > { %v4316_v6 = vadd.f32 %v10546_v58, %v4315_v47  ;;  %v4538_v1 = vpop.f32.mrf.mxu3 }
 0x9bd   : > { %v4598_v44 = vadd.f32 %v4533_v16, %v4316_v6  ;;  %v4648_v16 = vld [vmem:[#allocation3 + $0x101] sm:$0xff] }
 0x9be   : > { %v4785_v17 = vpop.f32.mrf.mxu1  ;;  %v4666_v47 = vpack.c.bf16 %v4649_v54, %v4648_v16  ;;  %v7206_v6 = vld [vmem:[%s11431_s11 + $0xb0] sm:$0xff] }
 0x9bf   : > { %v10663_v61 = vadd.f32 %v4783_v53, %v4598_v44  ;;  %v10665_v9 = vpop.f32.mrf.mxu0  ;;  %v10689_v44 = vpack.c.bf16 %v4901_v31, %v4900_v3  ;;  %5675 = vmatpush.bf16.msrb.mxu1 %v7206_v6  ;;  %v7200_v3 = vld [vmem:[%s11431_s11 + $0x40] sm:$0xff] }
 0x9c2   : > { %v4317_v21 = vpop.f32.mrf.mxu2 }
 0x9c3   : > { %v4318_v52 = vadd.f32 %v10546_v58, %v4317_v21  ;;  %v4540_v36 = vpop.f32.mrf.mxu3 }
 0x9c5   : > { %v4599_v33 = vadd.f32 %v4535_v25, %v4318_v52  ;;  %v7202_v25 = vld [vmem:[%s11431_s11 + $0x50] sm:$0xff] }
 0x9c6   : > { %v4788_v34 = vpop.f32.mrf.mxu1  ;;  %5791 = vmatpush.bf16.msrb.mxu0 %v7202_v25 }
 0x9c7   : > { %v10674_v14 = vadd.f32 %v4785_v17, %v4599_v33  ;;  %6816 = vmatmul.msk.bf16.gmra.mxu2 %vm1145_vm6, %v4163_v62  ;;  %v10680_v53 = vpop.f32.mrf.mxu0  ;;  %v7204_v33 = vld [vmem:[%s11431_s11 + $0xa0] sm:$0xff] }
 0x9c8   : > { %6857 = vmatmul.msk.bf16.gmra.mxu3 %vm1145_vm6, %v4665_v24  ;;  %v7205_v24 = vld [vmem:[%s11431_s11 + $0xa8] sm:$0xff] }
 0x9c9   : > { %6896 = vmatmul.msk.bf16.gmra.mxu1 %vm1145_vm6, %v4666_v47  ;;  %v4650_v47 = vld [vmem:[#allocation3 + $0x111] sm:$0xff] }
 0x9ca   : > { %v4320_v62 = vpop.f32.mrf.mxu2  ;;  %6936 = vmatmul.msk.bf16.gmra.mxu0 %vm1145_vm6, %v10689_v44  ;;  %5676 = vmatpush.bf16.msrb.mxu1 %v7205_v24 }
 0x9cb   : > { %v4321_v17 = vadd.f32 %v10546_v58, %v4320_v62  ;;  %v4543_v42 = vpop.f32.mrf.mxu3  ;;  %5792 = vmatpush.bf16.msrb.mxu0 %v7201_v28  ;;  %v4926_v28 = vld [vmem:[#allocation3 + $0x100] sm:$0xff]  ;;  %v4927_v62 = vld [vmem:[#allocation3 + $0x108] sm:$0xff] }
 0x9cd   : > { %v4600_v21 = vadd.f32 %v4538_v1, %v4321_v17  ;;  %v4651_v1 = vld [vmem:[#allocation3 + $0x119] sm:$0xff] }
 0x9ce   : > { %v4790_v52 = vpop.f32.mrf.mxu1  ;;  %5677 = vmatpush.bf16.msrb.mxu1 %v7204_v33  ;;  %v4667_v48 = vpack.c.bf16 %v4651_v1, %v4650_v47  ;;  %v4871_v47 = vld [vmem:[#allocation3 + $0x8] sm:$0xff] }
 0x9cf   : > { %v10707_v16 = vadd.f32 %v4788_v34, %v4600_v21  ;;  %v10709_v54 = vpop.f32.mrf.mxu0  ;;  %5793 = vmatpush.bf16.msrb.mxu0 %v7200_v3  ;;  %v10726_v21 = vpack.c.bf16 %v4927_v62, %v4926_v28  ;;  %v5531_v28 = vld [vmem:[#allocation3 + $0x12] sm:$0xff]  ;;  %v5532_v62 = vld [vmem:[#allocation3 + $0x1a] sm:$0xff] }
 0x9d0   : > { %11764 = vst [vmem:[#allocation20_spill] sm:$0xff] %v10709_v54  ;;  %v5530_v54 = vld [vmem:[#allocation3 + $0xa] sm:$0xff] }
 0x9d1   : > { %11763 = vst [vmem:[#allocation53_spill] sm:$0xff] %v10707_v16 }
 0x9d2   : > { %v4322_v31 = vpop.f32.mrf.mxu2 }
 0x9d3   : > { %v4323_v6 = vadd.f32 %v10546_v58, %v4322_v31  ;;  %v4545_v25 = vpop.f32.mrf.mxu3  ;;  %v4870_v31 = vld [vmem:[#allocation3] sm:$0xff] }
 0x9d5   : > { %v4601_v34 = vadd.f32 %v4540_v36, %v4323_v6 }
 0x9d6   : > { %v4793_v24 = vpop.f32.mrf.mxu1 }
 0x9d7   : > { %v10718_v17 = vadd.f32 %v4790_v52, %v4601_v34  ;;  %6817 = vmatmul.msk.bf16.gmra.mxu2 %vm1145_vm6, %v4164_v18  ;;  %v10724_v30 = vpop.f32.mrf.mxu0  ;;  %v4902_v34 = vpack.c.bf16 %v4871_v47, %v4870_v31 }
 0x9d8   : > { %11766 = vst [vmem:[#allocation93_spill] sm:$0xff] %v10724_v30  ;;  %6994 = vmatmul.msk.bf16.vlgmr.msrb.gmra.mxu3 %vm1145_vm6, %v10467_v56 }
 0x9d9   : > { %11765 = vst [vmem:[#allocation23_spill] sm:$0xff] %v10718_v17  ;;  %6897 = vmatmul.msk.bf16.gmra.mxu1 %vm1145_vm6, %v4667_v48  ;;  %v5529_v17 = vld [vmem:[#allocation3 + $0x2] sm:$0xff] }
 0x9da   : > { %v4325_v36 = vpop.f32.mrf.mxu2  ;;  %6937 = vmatmul.msk.bf16.gmra.mxu0 %vm1145_vm6, %v10726_v21 }
 0x9db   : > { %v4326_v52 = vadd.f32 %v10546_v58, %v4325_v36  ;;  %v4548_v33 = vpop.f32.mrf.mxu3 }
 0x9dd   : > { %v4602_v3 = vadd.f32 %v4543_v42, %v4326_v52  ;;  %v5561_v52 = vpack.c.bf16 %v5530_v54, %v5529_v17  ;;  %v5534_v54 = vld [vmem:[#allocation3 + $0x2a] sm:$0xff] }
 0x9de   : > { %v4795_v4 = vpop.f32.mrf.mxu1 }
 0x9df   : > { %v10734_v38 = vadd.f32 %v4793_v24, %v4602_v3  ;;  %v10736_v18 = vpop.f32.mrf.mxu0  ;;  %v5562_v24 = vpack.c.bf16 %v5532_v62, %v5531_v28  ;;  %v5533_v62 = vld [vmem:[#allocation3 + $0x22] sm:$0xff] }
 0x9e2   : > { %v4327_v1 = vpop.f32.mrf.mxu2 }
 0x9e3   : > { %v4328_v6 = vadd.f32 %v10546_v58, %v4327_v1  ;;  %v4550_v48 = vpop.f32.mrf.mxu3 }
 0x9e5   : > { %v4603_v30 = vadd.f32 %v4545_v25, %v4328_v6 }
 0x9e6   : > { %v4798_v36 = vpop.f32.mrf.mxu1 }
 0x9e7   : > { %v10739_v16 = vadd.f32 %v4795_v4, %v4603_v30  ;;  %6954 = vmatmul.msk.bf16.vlgmr.msrb.gmra.mxu2 %vm1145_vm6, %v4902_v34  ;;  %v10742_v42 = vpop.f32.mrf.mxu0 }
 0x9e8   : > { %11768 = vst [vmem:[#allocation56_spill] sm:$0xff] %v10742_v42  ;;  %6995 = vmatmul.msk.bf16.gmra.mxu3 %vm1145_vm6, %v10482_v41 }
 0x9e9   : > { %11767 = vst [vmem:[#allocation84_spill] sm:$0xff] %v10739_v16  ;;  %7042 = vmatmul.msk.bf16.vlgmr.msrb.gmra.mxu1 %vm1145_vm6, %v5562_v24 }
 0x9ea   : > { %v4330_v3 = vpop.f32.mrf.mxu2  ;;  %7074 = vmatmul.msk.bf16.vlgmr.msrb.gmra.mxu0 %vm1145_vm6, %v5561_v52 }
 0x9eb   : > { %v4331_v25 = vadd.f32 %v10546_v58, %v4330_v3  ;;  %v4553_v31 = vpop.f32.mrf.mxu3 }
 0x9ed   : > { %v4604_v47 = vadd.f32 %v4548_v33, %v4331_v25  ;;  %v10760_v33 = vpack.c.bf16 %v5534_v54, %v5533_v62  ;;  %v5535_v54 = vld [vmem:[#allocation3 + $0x32] sm:$0xff] }
 0x9ee   : > { %v4800_v30 = vpop.f32.mrf.mxu1 }
 0x9ef   : > { %v10749_v4 = vadd.f32 %v4798_v36, %v4604_v47  ;;  %v10751_v1 = vpop.f32.mrf.mxu0 }
 0x9f0   : > { %11769 = vst [vmem:[#allocation22_spill] sm:$0xff] %v10751_v1 }
 0x9f2   : > { %v4332_v6 = vpop.f32.mrf.mxu2 }
 0x9f3   : > { %v4333_v34 = vadd.f32 %v10546_v58, %v4332_v6  ;;  %v4555_v28 = vpop.f32.mrf.mxu3 }
 0x9f5   : > { %v4605_v17 = vadd.f32 %v4550_v48, %v4333_v34 }
 0x9f6   : > { %v4803_v42 = vpop.f32.mrf.mxu1 }
 0x9f7   : > { %v10754_v16 = vadd.f32 %v4800_v30, %v4605_v17  ;;  %6955 = vmatmul.msk.bf16.gmra.mxu2 %vm1145_vm6, %v10395_v60  ;;  %v10758_v52 = vpop.f32.mrf.mxu0  ;;  %v5536_v17 = vld [vmem:[#allocation3 + $0x3a] sm:$0xff] }
 0x9f8   : > { %11771 = vst [vmem:[#allocation87_spill] sm:$0xff] %v10758_v52  ;;  %6996 = vmatmul.msk.bf16.gmra.mxu3 %vm1145_vm6, %v10491_v26 }
 0x9f9   : > { %11770 = vst [vmem:[#allocation86_spill] sm:$0xff] %v10754_v16  ;;  %7043 = vmatmul.msk.bf16.gmra.mxu1 %vm1145_vm6, %v10760_v33 }
 0x9fa   : > { %v4335_v36 = vpop.f32.mrf.mxu2  ;;  %7075 = vmatmul.msk.bf16.gmra.mxu0 %vm1145_vm6, %v5562_v24 }
 0x9fb   : > { %v4336_v48 = vadd.f32 %v10546_v58, %v4335_v36  ;;  %v4558_v3 = vpop.f32.mrf.mxu3 }
 0x9fd   : > { %v4606_v25 = vadd.f32 %v4553_v31, %v4336_v48  ;;  %v10779_v31 = vpack.c.bf16 %v5536_v17, %v5535_v54  ;;  %v5537_v17 = vld [vmem:[#allocation3 + $0x42] sm:$0xff] }
 0x9fe   : > { %v4805_v47 = vpop.f32.mrf.mxu1 }
 0x9ff   : > { %v10768_v30 = vadd.f32 %v4803_v42, %v4606_v25  ;;  %v10770_v60 = vpop.f32.mrf.mxu0  ;;  %v7210_v42 = vld [vmem:[%s11431_s11 + $0x110] sm:$0xff] }
 0xa00   : > { %11772 = vst [vmem:[#allocation25_spill] sm:$0xff] %v10770_v60  ;;  %6009 = vmatpush.bf16.msra.mxu2 %v7210_v42 }
 0xa02   : > { %v4337_v6 = vpop.f32.mrf.mxu2 }
 0xa03   : > { %v4338_v34 = vadd.f32 %v10546_v58, %v4337_v6  ;;  %v4560_v62 = vpop.f32.mrf.mxu3 }
 0xa05   : > { %v4607_v52 = vadd.f32 %v4555_v28, %v4338_v34 }
 0xa06   : > { %v4808_v16 = vpop.f32.mrf.mxu1 }
 0xa07   : > { %v10773_v1 = vadd.f32 %v4805_v47, %v4607_v52  ;;  %6956 = vmatmul.msk.bf16.gmra.mxu2 %vm1145_vm6, %v10467_v56  ;;  %v10777_v24 = vpop.f32.mrf.mxu0 }
 0xa08   : > { %11774 = vst [vmem:[#allocation58_spill] sm:$0xff] %v10777_v24  ;;  %6997 = vmatmul.msk.bf16.gmra.mxu3 %vm1145_vm6, %v10498_v59  ;;  %v5538_v24 = vld [vmem:[#allocation3 + $0x4a] sm:$0xff] }
 0xa09   : > { %11773 = vst [vmem:[#allocation95_spill] sm:$0xff] %v10773_v1  ;;  %7044 = vmatmul.msk.bf16.gmra.mxu1 %vm1145_vm6, %v10779_v31 }
 0xa0a   : > { %v4340_v28 = vpop.f32.mrf.mxu2  ;;  %7076 = vmatmul.msk.bf16.gmra.mxu0 %vm1145_vm6, %v10760_v33 }
 0xa0b   : > { %v4341_v56 = vadd.f32 %v10546_v58, %v4340_v28  ;;  %v4563_v52 = vpop.f32.mrf.mxu3 }
 0xa0d   : > { %v4608_v36 = vadd.f32 %v4558_v3, %v4341_v56  ;;  %v10802_v3 = vpack.c.bf16 %v5538_v24, %v5537_v17 }
 0xa0e   : > { %v4810_v48 = vpop.f32.mrf.mxu1 }
 0xa0f   : > { %v10791_v25 = vadd.f32 %v4808_v16, %v4608_v36  ;;  %v10793_v47 = vpop.f32.mrf.mxu0 }
 0xa10   : > { %11776 = vst [vmem:[#allocation27_spill] sm:$0xff] %v10793_v47 }
 0xa11   : > { %11775 = vst [vmem:[#allocation24_spill] sm:$0xff] %v10791_v25 }
 0xa12   : > { %v4342_v6 = vpop.f32.mrf.mxu2 }
 0xa13   : > { %v4343_v34 = vadd.f32 %v10546_v58, %v4342_v6  ;;  %v4565_v54 = vpop.f32.mrf.mxu3 }
 0xa15   : > { %v4609_v42 = vadd.f32 %v4560_v62, %v4343_v34 }
 0xa16   : > { %v4813_v1 = vpop.f32.mrf.mxu1 }
 0xa17   : > { %v10796_v60 = vadd.f32 %v4810_v48, %v4609_v42  ;;  %6957 = vmatmul.msk.bf16.gmra.mxu2 %vm1145_vm6, %v10482_v41  ;;  %v10800_v28 = vpop.f32.mrf.mxu0  ;;  %v5539_v42 = vld [vmem:[#allocation3 + $0x52] sm:$0xff] }
 0xa18   : > { %11778 = vst [vmem:[#allocation89_spill] sm:$0xff] %v10800_v28  ;;  %6998 = vmatmul.msk.bf16.gmra.mxu3 %vm1145_vm6, %v10508_v2  ;;  %v5540_v28 = vld [vmem:[#allocation3 + $0x5a] sm:$0xff] }
 0xa19   : > { %11777 = vst [vmem:[#allocation96_spill] sm:$0xff] %v10796_v60  ;;  %7045 = vmatmul.msk.bf16.gmra.mxu1 %vm1145_vm6, %v10802_v3 }
 0xa1a   : > { %v4345_v16 = vpop.f32.mrf.mxu2  ;;  %7077 = vmatmul.msk.bf16.gmra.mxu0 %vm1145_vm6, %v10779_v31 }
 0xa1b   : > { %v4346_v62 = vadd.f32 %v10546_v58, %v4345_v16  ;;  %v4568_v56 = vpop.f32.mrf.mxu3 }
 0xa1d   : > { %v4610_v36 = vadd.f32 %v4563_v52, %v4346_v62  ;;  %v10822_v52 = vpack.c.bf16 %v5540_v28, %v5539_v42  ;;  %v5541_v42 = vld [vmem:[#allocation3 + $0x62] sm:$0xff] }
 0xa1e   : > { %v4815_v48 = vpop.f32.mrf.mxu1 }
 0xa1f   : > { %v10811_v41 = vadd.f32 %v4813_v1, %v4610_v36  ;;  %v10813_v6 = vpop.f32.mrf.mxu0 }
 0xa20   : > { %11780 = vst [vmem:[#allocation26_spill] sm:$0xff] %v10813_v6 }
 0xa21   : > { %11779 = vst [vmem:[#allocation59_spill] sm:$0xff] %v10811_v41 }
 0xa22   : > { %v4347_v24 = vpop.f32.mrf.mxu2 }
 0xa23   : > { %v4348_v34 = vadd.f32 %v10546_v58, %v4347_v24  ;;  %v4570_v17 = vpop.f32.mrf.mxu3 }
 0xa25   : > { %v4611_v60 = vadd.f32 %v4565_v54, %v4348_v34 }
 0xa26   : > { %v4818_v47 = vpop.f32.mrf.mxu1 }
 0xa27   : > { %v10816_v25 = vadd.f32 %v4815_v48, %v4611_v60  ;;  %6958 = vmatmul.msk.bf16.gmra.mxu2 %vm1145_vm6, %v10491_v26  ;;  %v10820_v16 = vpop.f32.mrf.mxu0 }
 0xa28   : > { %11782 = vst [vmem:[#allocation92_spill] sm:$0xff] %v10820_v16  ;;  %6999 = vmatmul.msk.bf16.gmra.mxu3 %vm1145_vm6, %v10521_v23  ;;  %v5542_v16 = vld [vmem:[#allocation3 + $0x6a] sm:$0xff] }
 0xa29   : > { %11781 = vst [vmem:[#allocation91_spill] sm:$0xff] %v10816_v25  ;;  %7046 = vmatmul.msk.bf16.gmra.mxu1 %vm1145_vm6, %v10822_v52 }
 0xa2a   : > { %v4350_v1 = vpop.f32.mrf.mxu2  ;;  %7078 = vmatmul.msk.bf16.gmra.mxu0 %vm1145_vm6, %v10802_v3 }
 0xa2b   : > { %v4351_v60 = vadd.f32 %v10546_v58, %v4350_v1  ;;  %v4573_v54 = vpop.f32.mrf.mxu3 }
 0xa2d   : > { %v4612_v62 = vadd.f32 %v4568_v56, %v4351_v60  ;;  %v10842_v56 = vpack.c.bf16 %v5542_v16, %v5541_v42  ;;  %v5543_v42 = vld [vmem:[#allocation3 + $0x72] sm:$0xff] }
 0xa2e   : > { %v4820_v36 = vpop.f32.mrf.mxu1 }
 0xa2f   : > { %v10831_v26 = vadd.f32 %v4818_v47, %v4612_v62  ;;  %v10833_v48 = vpop.f32.mrf.mxu0 }
 0xa30   : > { %11784 = vst [vmem:[#allocation97_spill] sm:$0xff] %v10833_v48 }
 0xa31   : > { %11783 = vst [vmem:[#allocation30_spill] sm:$0xff] %v10831_v26 }
 0xa32   : > { %v4352_v28 = vpop.f32.mrf.mxu2 }
 0xa33   : > { %v4353_v24 = vadd.f32 %v10546_v58, %v4352_v28  ;;  %v4575_v34 = vpop.f32.mrf.mxu3 }
 0xa35   : > { %v4613_v25 = vadd.f32 %v4570_v17, %v4353_v24 }
 0xa36   : > { %v4823_v6 = vpop.f32.mrf.mxu1 }
 0xa37   : > { %v10836_v41 = vadd.f32 %v4820_v36, %v4613_v25  ;;  %6959 = vmatmul.msk.bf16.gmra.mxu2 %vm1145_vm6, %v10498_v59  ;;  %v10840_v1 = vpop.f32.mrf.mxu0 }
 0xa38   : > { %11786 = vst [vmem:[#allocation28_spill] sm:$0xff] %v10840_v1  ;;  %7000 = vmatmul.msk.bf16.gmra.mxu3 %vm1145_vm6, %v10534_v0  ;;  %v5544_v1 = vld [vmem:[#allocation3 + $0x7a] sm:$0xff] }
 0xa39   : > { %11785 = vst [vmem:[#allocation60_spill] sm:$0xff] %v10836_v41  ;;  %7047 = vmatmul.msk.bf16.gmra.mxu1 %vm1145_vm6, %v10842_v56 }
 0xa3a   : > { %v4355_v47 = vpop.f32.mrf.mxu2  ;;  %7079 = vmatmul.msk.bf16.gmra.mxu0 %vm1145_vm6, %v10822_v52 }
 0xa3b   : > { %v4356_v25 = vadd.f32 %v10546_v58, %v4355_v47  ;;  %v4578_v17 = vpop.f32.mrf.mxu3 }
 0xa3d   : > { %v4614_v60 = vadd.f32 %v4573_v54, %v4356_v25  ;;  %v10862_v54 = vpack.c.bf16 %v5544_v1, %v5543_v42 }
 0xa3e   : > { %v4825_v62 = vpop.f32.mrf.mxu1 }
 0xa3f   : > { %v10851_v59 = vadd.f32 %v4823_v6, %v4614_v60  ;;  %v10853_v36 = vpop.f32.mrf.mxu0  ;;  %v7209_v6 = vld [vmem:[%s11431_s11 + $0x108] sm:$0xff] }
 0xa40   : > { %11788 = vst [vmem:[#allocation98_spill] sm:$0xff] %v10853_v36  ;;  %6010 = vmatpush.bf16.msra.mxu2 %v7209_v6 }
 0xa41   : > { %11787 = vst [vmem:[#allocation33_spill] sm:$0xff] %v10851_v59 }
 0xa42   : > { %v4357_v16 = vpop.f32.mrf.mxu2 }
 0xa43   : > { %v4358_v28 = vadd.f32 %v10546_v58, %v4357_v16  ;;  %v4580_v24 = vpop.f32.mrf.mxu3  ;;  %v7212_v16 = vld [vmem:[%s11433_s13] sm:$0xff] }
 0xa44   : > { %6280 = vmatpush.bf16.msra.mxu3 %v7212_v16 }
 0xa45   : > { %v4615_v41 = vadd.f32 %v4575_v34, %v4358_v28 }
 0xa46   : > { %v4828_v48 = vpop.f32.mrf.mxu1 }
 0xa47   : > { %v10856_v26 = vadd.f32 %v4825_v62, %v4615_v41  ;;  %6960 = vmatmul.msk.bf16.gmra.mxu2 %vm1145_vm6, %v10508_v2  ;;  %v10860_v47 = vpop.f32.mrf.mxu0 }
 0xa48   : > { %11790 = vst [vmem:[#allocation61_spill] sm:$0xff] %v10860_v47  ;;  %7001 = vmatmul.msk.bf16.gmra.mxu3 %vm1145_vm6, %v10551_v39  ;;  %v5545_v47 = vld [vmem:[#allocation3 + $0x82] sm:$0xff] }
 0xa49   : > { %11789 = vst [vmem:[#allocation94_spill] sm:$0xff] %v10856_v26  ;;  %7048 = vmatmul.msk.bf16.gmra.mxu1 %vm1145_vm6, %v10862_v54  ;;  %v5546_v26 = vld [vmem:[#allocation3 + $0x8a] sm:$0xff] }
 0xa4a   : > { %v4360_v41 = vpop.f32.mrf.mxu2  ;;  %7080 = vmatmul.msk.bf16.gmra.mxu0 %vm1145_vm6, %v10842_v56 }
 0xa4b   : > { %v4361_v2 = vadd.f32 %v10546_v58, %v4360_v41  ;;  %v4583_v34 = vpop.f32.mrf.mxu3 }
 0xa4d   : > { %v4616_v1 = vadd.f32 %v4578_v17, %v4361_v2  ;;  %v10888_v17 = vpack.c.bf16 %v5546_v26, %v5545_v47 }
 0xa4e   : > { %v4830_v25 = vpop.f32.mrf.mxu1 }
 0xa4f   : > { %v10874_v60 = vadd.f32 %v4828_v48, %v4616_v1  ;;  %v10876_v62 = vpop.f32.mrf.mxu0 }
 0xa50   : > { %11792 = vst [vmem:[#allocation36_spill] sm:$0xff] %v10876_v62 }
 0xa51   : > { %11791 = vst [vmem:[#allocation31_spill] sm:$0xff] %v10874_v60 }
 0xa52   : > { %v4362_v28 = vpop.f32.mrf.mxu2 }
 0xa53   : > { %v4363_v42 = vadd.f32 %v10546_v58, %v4362_v28  ;;  %v4585_v6 = vpop.f32.mrf.mxu3 }
 0xa55   : > { %v4617_v36 = vadd.f32 %v4580_v24, %v4363_v42  ;;  %v5547_v42 = vld [vmem:[#allocation3 + $0x92] sm:$0xff] }
 0xa56   : > { %v4833_v41 = vpop.f32.mrf.mxu1 }
 0xa57   : > { %v10882_v59 = vadd.f32 %v4830_v25, %v4617_v36  ;;  %6961 = vmatmul.msk.bf16.gmra.mxu2 %vm1145_vm6, %v10521_v23  ;;  %v10886_v48 = vpop.f32.mrf.mxu0 }
 0xa58   : > { %11794 = vst [vmem:[#allocation62_spill] sm:$0xff] %v10886_v48  ;;  %7002 = vmatmul.msk.bf16.gmra.mxu3 %vm1145_vm6, %v10571_v37  ;;  %v5548_v48 = vld [vmem:[#allocation3 + $0x9a] sm:$0xff] }
 0xa59   : > { %11793 = vst [vmem:[#allocation99_spill] sm:$0xff] %v10882_v59  ;;  %7049 = vmatmul.msk.bf16.gmra.mxu1 %vm1145_vm6, %v10888_v17 }
 0xa5a   : > { %v4365_v2 = vpop.f32.mrf.mxu2  ;;  %7081 = vmatmul.msk.bf16.gmra.mxu0 %vm1145_vm6, %v10862_v54 }
 0xa5b   : > { %v4366_v36 = vadd.f32 %v10546_v58, %v4365_v2  ;;  %v5353_v24 = vpop.f32.mrf.mxu3 }
 0xa5d   : > { %v4618_v1 = vadd.f32 %v4583_v34, %v4366_v36  ;;  %v10906_v34 = vpack.c.bf16 %v5548_v48, %v5547_v42 }
 0xa5e   : > { %v4835_v25 = vpop.f32.mrf.mxu1 }
 0xa5f   : > { %v10897_v23 = vadd.f32 %v4833_v41, %v4618_v1  ;;  %v10899_v16 = vpop.f32.mrf.mxu0  ;;  %v11799_v1 = vld [vmem:[#allocation103_spill] sm:$0xff] }
 0xa60   : > { %11796 = vst [vmem:[#allocation39_spill] sm:$0xff] %v10899_v16 }
 0xa61   : > { %11795 = vst [vmem:[#allocation34_spill] sm:$0xff] %v10897_v23 }
 0xa62   : > { %v4367_v26 = vpop.f32.mrf.mxu2 }
 0xa63   : > { %v4368_v47 = vadd.f32 %v10546_v58, %v4367_v26  ;;  %v5355_v28 = vpop.f32.mrf.mxu3 }
 0xa65   : > { %v4619_v59 = vadd.f32 %v4585_v6, %v4368_v47 }
 0xa66   : > { %v5679_v62 = vpop.f32.mrf.mxu1 }
 0xa67   : > { %v10902_v60 = vadd.f32 %v4835_v25, %v4619_v59  ;;  %6962 = vmatmul.msk.bf16.gmra.mxu2 %vm1145_vm6, %v10534_v0  ;;  %v5795_v2 = vpop.f32.mrf.mxu0 }
 0xa68   : > { %v10908_v41 = vadd.f32 %v5795_v2, %v5679_v62  ;;  %7003 = vmatmul.msk.bf16.gmra.mxu3 %vm1145_vm6, %v10594_v7 }
 0xa69   : > { %11797 = vst [vmem:[#allocation100_spill] sm:$0xff] %v10902_v60  ;;  %7050 = vmatmul.msk.bf16.gmra.mxu1 %vm1145_vm6, %v10906_v34  ;;  %v5550_v60 = vld [vmem:[#allocation3 + $0xaa] sm:$0xff] }
 0xa6a   : > { %11798 = vst [vmem:[#allocation63_spill] sm:$0xff] %v10908_v41  ;;  %v5135_v58 = vpop.f32.mrf.mxu2  ;;  %7082 = vmatmul.msk.bf16.gmra.mxu0 %vm1145_vm6, %v10888_v17  ;;  %v5549_v41 = vld [vmem:[#allocation3 + $0xa2] sm:$0xff] }
 0xa6b   : > { %v5136_v59 = vadd.f32 %v5135_v58, %v10548_v13  ;;  %v5358_v6 = vpop.f32.mrf.mxu3  ;;  %v10929_v58 = vpack.c.bf16 %v5550_v60, %v5549_v41 }
 0xa6d   : > { %v5433_v36 = vadd.f32 %v5353_v24, %v5136_v59 }
 0xa6e   : > { %v5681_v0 = vpop.f32.mrf.mxu1 }
 0xa6f   : > { %v5465_v48 = vmul.f32 %v11799_v1, %v5433_v36  ;;  %v5797_v25 = vpop.f32.mrf.mxu0 }
 0xa70   : > { %v10918_v62 = vadd.f32 %v5797_v25, %v5681_v0  ;;  %v5551_v25 = vld [vmem:[#allocation3 + $0xb2] sm:$0xff] }
 0xa71   : > { %v10921_v26 = vadd.f32 %v5465_v48, %v10557_v45 }
 0xa72   : > { %v5137_v47 = vpop.f32.mrf.mxu2 }
 0xa73   : > { %v5138_v42 = vadd.f32 %v5137_v47, %v10559_v8  ;;  %v5360_v2 = vpop.f32.mrf.mxu3  ;;  %v5552_v47 = vld [vmem:[#allocation3 + $0xba] sm:$0xff] }
 0xa75   : > { %v5434_v16 = vadd.f32 %v5355_v28, %v5138_v42  ;;  %v11800_v28 = vld [vmem:[#allocation104_spill] sm:$0xff] }
 0xa76   : > { %v5684_v23 = vpop.f32.mrf.mxu1 }
 0xa77   : > { %v10925_v13 = vadd.f32 %v5434_v16, %v10562_v46  ;;  %6963 = vmatmul.msk.bf16.gmra.mxu2 %vm1145_vm6, %v10551_v39  ;;  %v5800_v24 = vpop.f32.mrf.mxu0 }
 0xa78   : > { %v10931_v59 = vadd.f32 %v5800_v24, %v5684_v23  ;;  %7004 = vmatmul.msk.bf16.gmra.mxu3 %vm1145_vm6, %v10617_v20 }
 0xa79   : > { %7051 = vmatmul.msk.bf16.gmra.mxu1 %vm1145_vm6, %v10929_v58 }
 0xa7a   : > { %v5140_v45 = vpop.f32.mrf.mxu2  ;;  %7083 = vmatmul.msk.bf16.gmra.mxu0 %vm1145_vm6, %v10906_v34 }
 0xa7b   : > { %v5141_v8 = vadd.f32 %v5140_v45, %v10568_v5  ;;  %v5363_v46 = vpop.f32.mrf.mxu3  ;;  %v10952_v45 = vpack.c.bf16 %v5552_v47, %v5551_v25 }
 0xa7d   : > { %v5435_v16 = vadd.f32 %v5358_v6, %v5141_v8 }
 0xa7e   : > { %v5686_v39 = vpop.f32.mrf.mxu1 }
 0xa7f   : > { %v5467_v60 = vmul.f32 %v11800_v28, %v5435_v16  ;;  %v5802_v41 = vpop.f32.mrf.mxu0 }
 0xa80   : > { %v10941_v23 = vadd.f32 %v5802_v41, %v5686_v39  ;;  %v11801_v39 = vld [vmem:[#allocation105_spill] sm:$0xff] }
 0xa81   : > { %v10944_v36 = vadd.f32 %v5467_v60, %v10577_v35  ;;  %v7208_v35 = vld [vmem:[%s11431_s11 + $0x100] sm:$0xff] }
 0xa82   : > { %v5142_v0 = vpop.f32.mrf.mxu2  ;;  %6011 = vmatpush.bf16.msra.mxu2 %v7208_v35 }
 0xa83   : > { %v5143_v1 = vadd.f32 %v5142_v0, %v10579_v12  ;;  %v5365_v48 = vpop.f32.mrf.mxu3 }
 0xa85   : > { %v5436_v42 = vadd.f32 %v5360_v2, %v5143_v1 }
 0xa86   : > { %v5689_v24 = vpop.f32.mrf.mxu1 }
 0xa87   : > { %v10948_v5 = vadd.f32 %v5436_v42, %v10582_v51  ;;  %6964 = vmatmul.msk.bf16.gmra.mxu2 %vm1145_vm6, %v10571_v37  ;;  %v5805_v6 = vpop.f32.mrf.mxu0  ;;  %v5553_v42 = vld [vmem:[#allocation3 + $0xc2] sm:$0xff] }
 0xa88   : > { %v10957_v8 = vadd.f32 %v5805_v6, %v5689_v24  ;;  %7005 = vmatmul.msk.bf16.gmra.mxu3 %vm1145_vm6, %v10637_v55  ;;  %v5554_v24 = vld [vmem:[#allocation3 + $0xca] sm:$0xff] }
 0xa89   : > { %7052 = vmatmul.msk.bf16.gmra.mxu1 %vm1145_vm6, %v10952_v45 }
 0xa8a   : > { %v5145_v12 = vpop.f32.mrf.mxu2  ;;  %7084 = vmatmul.msk.bf16.gmra.mxu0 %vm1145_vm6, %v10929_v58 }
 0xa8b   : > { %v5146_v37 = vadd.f32 %v5145_v12, %v10588_v50  ;;  %v5368_v51 = vpop.f32.mrf.mxu3  ;;  %v10978_v12 = vpack.c.bf16 %v5554_v24, %v5553_v42  ;;  %v5555_v24 = vld [vmem:[#allocation3 + $0xd2] sm:$0xff] }
 0xa8d   : > { %v5437_v2 = vadd.f32 %v5363_v46, %v5146_v37 }
 0xa8e   : > { %v5691_v16 = vpop.f32.mrf.mxu1 }
 0xa8f   : > { %v5469_v28 = vmul.f32 %v11801_v39, %v5437_v2  ;;  %v5807_v60 = vpop.f32.mrf.mxu0  ;;  %v11802_v2 = vld [vmem:[#allocation109_spill] sm:$0xff] }
 0xa90   : > { %v10967_v41 = vadd.f32 %v5807_v60, %v5691_v16 }
 0xa91   : > { %v10970_v0 = vadd.f32 %v5469_v28, %v10603_v43 }
 0xa92   : > { %v5147_v1 = vpop.f32.mrf.mxu2 }
 0xa93   : > { %v5148_v25 = vadd.f32 %v5147_v1, %v10605_v32  ;;  %v5370_v47 = vpop.f32.mrf.mxu3 }
 0xa95   : > { %v5438_v6 = vadd.f32 %v5365_v48, %v5148_v25 }
 0xa96   : > { %v5694_v35 = vpop.f32.mrf.mxu1 }
 0xa97   : > { %v10974_v50 = vadd.f32 %v5438_v6, %v10608_v57  ;;  %6965 = vmatmul.msk.bf16.gmra.mxu2 %vm1145_vm6, %v10594_v7  ;;  %v5810_v46 = vpop.f32.mrf.mxu0  ;;  %v5556_v6 = vld [vmem:[#allocation3 + $0xda] sm:$0xff] }
 0xa98   : > { %v10980_v37 = vadd.f32 %v5810_v46, %v5694_v35  ;;  %7006 = vmatmul.msk.bf16.gmra.mxu3 %vm1145_vm6, %v10657_v63  ;;  %v11803_v46 = vld [vmem:[#allocation112_spill] sm:$0xff] }
 0xa99   : > { %7053 = vmatmul.msk.bf16.gmra.mxu1 %vm1145_vm6, %v10978_v12 }
 0xa9a   : > { %v5150_v43 = vpop.f32.mrf.mxu2  ;;  %7085 = vmatmul.msk.bf16.gmra.mxu0 %vm1145_vm6, %v10952_v45 }
 0xa9b   : > { %v5151_v32 = vadd.f32 %v5150_v43, %v10614_v27  ;;  %v5373_v57 = vpop.f32.mrf.mxu3 }
 0xa9d   : > { %v5439_v48 = vadd.f32 %v5368_v51, %v5151_v32  ;;  %v11001_v51 = vpack.c.bf16 %v5556_v6, %v5555_v24 }
 0xa9e   : > { %v5696_v7 = vpop.f32.mrf.mxu1 }
 0xa9f   : > { %v5471_v16 = vmul.f32 %v11802_v2, %v5439_v48  ;;  %v5812_v39 = vpop.f32.mrf.mxu0  ;;  %v5557_v2 = vld [vmem:[#allocation3 + $0xe2] sm:$0xff] }
 0xaa0   : > { %v10990_v28 = vadd.f32 %v5812_v39, %v5696_v7 }
 0xaa1   : > { %v10993_v60 = vadd.f32 %v5471_v16, %v10623_v19  ;;  %v5558_v16 = vld [vmem:[#allocation3 + $0xea] sm:$0xff] }
 0xaa2   : > { %v5152_v1 = vpop.f32.mrf.mxu2 }
 0xaa3   : > { %v5153_v25 = vadd.f32 %v5152_v1, %v10625_v15  ;;  %v5375_v42 = vpop.f32.mrf.mxu3 }
 0xaa5   : > { %v5440_v35 = vadd.f32 %v5370_v47, %v5153_v25  ;;  %v11804_v25 = vld [vmem:[#allocation5_spill] sm:$0xff] }
 0xaa7   : > { %v10997_v27 = vadd.f32 %v5440_v35, %v10628_v29  ;;  %6966 = vmatmul.msk.bf16.gmra.mxu2 %vm1145_vm6, %v10617_v20  ;;  %v5245_v35 = vld [vmem:[#allocation3 + $0x110] sm:$0xff] }
 0xaa8   : > { %7007 = vmatmul.msk.bf16.gmra.mxu3 %vm1145_vm6, %v10689_v44 }
 0xaa9   : > { %7054 = vmatmul.msk.bf16.gmra.mxu1 %vm1145_vm6, %v11001_v51 }
 0xaaa   : > { %v5155_v19 = vpop.f32.mrf.mxu2  ;;  %7086 = vmatmul.msk.bf16.gmra.mxu0 %vm1145_vm6, %v10978_v12 }
 0xaab   : > { %v5156_v15 = vadd.f32 %v5155_v19, %v10634_v49  ;;  %v5378_v47 = vpop.f32.mrf.mxu3  ;;  %v11020_v49 = vpack.c.bf16 %v5558_v16, %v5557_v2  ;;  %v5246_v19 = vld [vmem:[#allocation3 + $0x118] sm:$0xff] }
 0xaad   : > { %v5441_v29 = vadd.f32 %v5373_v57, %v5156_v15  ;;  %v5559_v15 = vld [vmem:[#allocation3 + $0xf2] sm:$0xff] }
 0xaaf   : > { %v5473_v43 = vmul.f32 %v11803_v46, %v5441_v29  ;;  %v5560_v29 = vld [vmem:[#allocation3 + $0xfa] sm:$0xff] }
 0xab1   : > { %v11012_v20 = vadd.f32 %v5473_v43, %v10643_v11  ;;  %v5262_v43 = vpack.c.bf16 %v5246_v19, %v5245_v35  ;;  %v11808_v19 = vld [vmem:[#allocation23_spill] sm:$0xff] }
 0xab2   : > { %v5157_v32 = vpop.f32.mrf.mxu2 }
 0xab3   : > { %v5158_v48 = vadd.f32 %v5157_v32, %v10645_v22  ;;  %v5380_v7 = vpop.f32.mrf.mxu3 }
 0xab5   : > { %v5442_v39 = vadd.f32 %v5375_v42, %v5158_v48  ;;  %v11805_v48 = vld [vmem:[#allocation7_spill] sm:$0xff] }
 0xab7   : > { %v11016_v1 = vadd.f32 %v5442_v39, %v10648_v40  ;;  %6967 = vmatmul.msk.bf16.gmra.mxu2 %vm1145_vm6, %v10637_v55  ;;  %v11807_v39 = vld [vmem:[#allocation20_spill] sm:$0xff] }
 0xab8   : > { %7008 = vmatmul.msk.bf16.gmra.mxu3 %vm1145_vm6, %v10726_v21 }
 0xab9   : > { %7055 = vmatmul.msk.bf16.gmra.mxu1 %vm1145_vm6, %v11020_v49 }
 0xaba   : > { %v5160_v11 = vpop.f32.mrf.mxu2  ;;  %7087 = vmatmul.msk.bf16.gmra.mxu0 %vm1145_vm6, %v11001_v51 }
 0xabb   : > { %v5161_v22 = vadd.f32 %v5160_v11, %v10654_v10  ;;  %v5383_v57 = vpop.f32.mrf.mxu3  ;;  %v11039_v10 = vpack.c.bf16 %v5560_v29, %v5559_v15 }
 0xabd   : > { %v5443_v40 = vadd.f32 %v5378_v47, %v5161_v22 }
 0xabf   : > { %v5475_v42 = vmul.f32 %v11804_v25, %v5443_v40  ;;  %v5586_v40 = vld [vmem:[#allocation3 + $0x102] sm:$0xff]  ;;  %v5587_v25 = vld [vmem:[#allocation3 + $0x10a] sm:$0xff] }
 0xac1   : > { %v11031_v55 = vadd.f32 %v5475_v42, %v10663_v61  ;;  %v7366_v42 = vld [vmem:[%s7515_s16] sm:$0xff] }
 0xac2   : > { %v5162_v24 = vpop.f32.mrf.mxu2 }
 0xac3   : > { %v5163_v6 = vadd.f32 %v5162_v24, %v10665_v9  ;;  %v5385_v21 = vpop.f32.mrf.mxu3  ;;  %v7367_v24 = vld [vmem:[%s7515_s16 + $0x8] sm:$0xff] }
 0xac5   : > { %v5444_v46 = vadd.f32 %v5380_v7, %v5163_v6  ;;  %v6189_v6 = vpack.c.bf16 %v7367_v24, %v7366_v42 }
 0xac7   : > { %v11035_v32 = vadd.f32 %v5444_v46, %v10674_v14  ;;  %6968 = vmatmul.msk.bf16.gmra.mxu2 %vm1145_vm6, %v10657_v63  ;;  %v11806_v63 = vld [vmem:[#allocation53_spill] sm:$0xff] }
 0xac8   : > { %7009 = vmatmul.msk.bf16.gmra.mxu3 %vm1145_vm6, %v5262_v43 }
 0xac9   : > { %7056 = vmatmul.msk.bf16.gmra.mxu1 %vm1145_vm6, %v11039_v10 }
 0xaca   : > { %v5165_v61 = vpop.f32.mrf.mxu2  ;;  %7088 = vmatmul.msk.bf16.gmra.mxu0 %vm1145_vm6, %v11020_v49 }
 0xacb   : > { %v5166_v9 = vadd.f32 %v5165_v61, %v10680_v53  ;;  %v5388_v14 = vpop.f32.mrf.mxu3  ;;  %v11810_v61 = vld [vmem:[#allocation67_spill] sm:$0xff] }
 0xacd   : > { %v5445_v47 = vadd.f32 %v5383_v57, %v5166_v9  ;;  %v11059_v57 = vpack.c.bf16 %v5587_v25, %v5586_v40  ;;  %v11811_v40 = vld [vmem:[#allocation84_spill] sm:$0xff] }
 0xacf   : > { %v5477_v7 = vmul.f32 %v11805_v48, %v5445_v47 }
 0xad1   : > { %v11049_v2 = vadd.f32 %v5477_v7, %v11806_v63  ;;  %v7368_v63 = vld [vmem:[%s7515_s16 + $0x10] sm:$0xff] }
 0xad2   : > { %v5167_v16 = vpop.f32.mrf.mxu2 }
 0xad3   : > { %v5168_v11 = vadd.f32 %v5167_v16, %v11807_v39  ;;  %v5390_v22 = vpop.f32.mrf.mxu3  ;;  %v7369_v16 = vld [vmem:[%s7515_s16 + $0x18] sm:$0xff] }
 0xad4   : > { %v6190_v39 = vpack.c.bf16 %v7369_v16, %v7368_v63 }
 0xad5   : > { %v5446_v35 = vadd.f32 %v5385_v21, %v5168_v11  ;;  %v11809_v21 = vld [vmem:[#allocation93_spill] sm:$0xff] }
 0xad7   : > { %v11055_v53 = vadd.f32 %v5446_v35, %v11808_v19  ;;  %6969 = vmatmul.msk.bf16.gmra.mxu2 %vm1145_vm6, %v10689_v44 }
 0xad8   : > { %7138 = vmatmul.msk.bf16.vlgmr.msra.gmra.mxu3 %vm1137_vm0, %v6189_v6  ;;  %v11813_v6 = vld [vmem:[#allocation8_spill] sm:$0xff] }
 0xad9   : > { %7057 = vmatmul.msk.bf16.gmra.mxu1 %vm1145_vm6, %v11059_v57 }
 0xada   : > { %v5170_v15 = vpop.f32.mrf.mxu2  ;;  %7089 = vmatmul.msk.bf16.gmra.mxu0 %vm1145_vm6, %v11039_v10 }
 0xadb   : > { %v5171_v29 = vadd.f32 %v5170_v15, %v11809_v21  ;;  %v5393_v46 = vpop.f32.mrf.mxu3 }
 0xadd   : > { %v5447_v43 = vadd.f32 %v5388_v14, %v5171_v29  ;;  %v11812_v14 = vld [vmem:[#allocation56_spill] sm:$0xff] }
 0xadf   : > { %v5479_v9 = vmul.f32 %v11810_v61, %v5447_v43  ;;  %v7370_v43 = vld [vmem:[%s7515_s16 + $0x20] sm:$0xff]  ;;  %v7371_v61 = vld [vmem:[%s7515_s16 + $0x28] sm:$0xff] }
 0xae1   : > { %v11069_v47 = vadd.f32 %v5479_v9, %v10734_v38 }
 0xae2   : > { %v5172_v44 = vpop.f32.mrf.mxu2 }
 0xae3   : > { %v5173_v48 = vadd.f32 %v5172_v44, %v10736_v18  ;;  %v5395_v7 = vpop.f32.mrf.mxu3  ;;  %v11815_v44 = vld [vmem:[#allocation86_spill] sm:$0xff] }
 0xae5   : > { %v5448_v11 = vadd.f32 %v5390_v22, %v5173_v48  ;;  %v11814_v22 = vld [vmem:[#allocation22_spill] sm:$0xff] }
 0xae7   : > { %v11075_v25 = vadd.f32 %v5448_v11, %v11811_v40  ;;  %7114 = vmatmul.msk.bf16.vlgmr.msra.gmra.mxu2 %vm1145_vm6, %v10760_v33  ;;  %v6191_v33 = vpack.c.bf16 %v7371_v61, %v7370_v43  ;;  %v11817_v11 = vld [vmem:[#allocation10_spill] sm:$0xff] }
 0xae8   : > { %7139 = vmatmul.msk.bf16.gmra.mxu3 %vm1137_vm0, %v6190_v39 }
 0xaea   : > { %v5175_v38 = vpop.f32.mrf.mxu2 }
 0xaeb   : > { %v5176_v42 = vadd.f32 %v5175_v38, %v11812_v14  ;;  %v5398_v24 = vpop.f32.mrf.mxu3 }
 0xaed   : > { %v5449_v18 = vadd.f32 %v5393_v46, %v5176_v42  ;;  %v11816_v46 = vld [vmem:[#allocation87_spill] sm:$0xff] }
 0xaef   : > { %v5481_v35 = vmul.f32 %v11813_v6, %v5449_v18  ;;  %v7372_v6 = vld [vmem:[%s7515_s16 + $0x30] sm:$0xff] }
 0xaf1   : > { %v11083_v19 = vadd.f32 %v5481_v35, %v10749_v4  ;;  %v7373_v35 = vld [vmem:[%s7515_s16 + $0x38] sm:$0xff] }
 0xaf2   : > { %v5177_v15 = vpop.f32.mrf.mxu2 }
 0xaf3   : > { %v5178_v21 = vadd.f32 %v5177_v15, %v11814_v22  ;;  %v5400_v29 = vpop.f32.mrf.mxu3  ;;  %v11819_v22 = vld [vmem:[#allocation95_spill] sm:$0xff] }
 0xaf5   : > { %v5450_v9 = vadd.f32 %v5395_v7, %v5178_v21  ;;  %v11818_v7 = vld [vmem:[#allocation25_spill] sm:$0xff] }
 0xaf7   : > { %v11089_v48 = vadd.f32 %v5450_v9, %v11815_v44  ;;  %7115 = vmatmul.msk.bf16.gmra.mxu2 %vm1145_vm6, %v10779_v31  ;;  %v6192_v31 = vpack.c.bf16 %v7373_v35, %v7372_v6  ;;  %v11821_v9 = vld [vmem:[#allocation73_spill] sm:$0xff] }
 0xaf8   : > { %7140 = vmatmul.msk.bf16.gmra.mxu3 %vm1137_vm0, %v6191_v33  ;;  %v11825_v35 = vld [vmem:[#allocation89_spill] sm:$0xff] }
 0xafa   : > { %v5180_v4 = vpop.f32.mrf.mxu2 }
 0xafb   : > { %v5181_v63 = vadd.f32 %v5180_v4, %v11816_v46  ;;  %v5403_v16 = vpop.f32.mrf.mxu3  ;;  %v11822_v4 = vld [vmem:[#allocation24_spill] sm:$0xff] }
 0xafd   : > { %v5451_v39 = vadd.f32 %v5398_v24, %v5181_v63  ;;  %v11820_v24 = vld [vmem:[#allocation58_spill] sm:$0xff] }
 0xaff   : > { %v5483_v40 = vmul.f32 %v11817_v11, %v5451_v39 }
 0xb01   : > { %v11097_v38 = vadd.f32 %v5483_v40, %v10768_v30  ;;  %v7374_v40 = vld [vmem:[%s7515_s16 + $0x40] sm:$0xff] }
 0xb02   : > { %v5182_v14 = vpop.f32.mrf.mxu2 }
 0xb03   : > { %v5183_v42 = vadd.f32 %v5182_v14, %v11818_v7  ;;  %v5405_v18 = vpop.f32.mrf.mxu3  ;;  %v7375_v14 = vld [vmem:[%s7515_s16 + $0x48] sm:$0xff] }
 0xb05   : > { %v5452_v15 = vadd.f32 %v5400_v29, %v5183_v42  ;;  %v11823_v29 = vld [vmem:[#allocation27_spill] sm:$0xff]  ;;  %v11824_v42 = vld [vmem:[#allocation96_spill] sm:$0xff] }
 0xb07   : > { %v11103_v21 = vadd.f32 %v5452_v15, %v11819_v22  ;;  %7116 = vmatmul.msk.bf16.gmra.mxu2 %vm1145_vm6, %v10802_v3  ;;  %v6193_v3 = vpack.c.bf16 %v7375_v14, %v7374_v40  ;;  %v11829_v40 = vld [vmem:[#allocation91_spill] sm:$0xff] }
 0xb08   : > { %7141 = vmatmul.msk.bf16.gmra.mxu3 %vm1137_vm0, %v6192_v31 }
 0xb0a   : > { %v5185_v30 = vpop.f32.mrf.mxu2 }
 0xb0b   : > { %v5186_v43 = vadd.f32 %v5185_v30, %v11820_v24  ;;  %v5408_v61 = vpop.f32.mrf.mxu3  ;;  %v11826_v30 = vld [vmem:[#allocation76_spill] sm:$0xff] }
 0xb0d   : > { %v5453_v33 = vadd.f32 %v5403_v16, %v5186_v43  ;;  %v11827_v43 = vld [vmem:[#allocation59_spill] sm:$0xff] }
 0xb0f   : > { %v5485_v44 = vmul.f32 %v11821_v9, %v5453_v33 }
 0xb11   : > { %v11111_v46 = vadd.f32 %v5485_v44, %v11822_v4 }
 0xb12   : > { %v5187_v63 = vpop.f32.mrf.mxu2 }
 0xb13   : > { %v5188_v39 = vadd.f32 %v5187_v63, %v11823_v29  ;;  %v5410_v11 = vpop.f32.mrf.mxu3  ;;  %v7376_v63 = vld [vmem:[%s7515_s16 + $0x50] sm:$0xff]  ;;  %v7377_v29 = vld [vmem:[%s7515_s16 + $0x58] sm:$0xff] }
 0xb15   : > { %v5454_v7 = vadd.f32 %v5405_v18, %v5188_v39  ;;  %v11828_v18 = vld [vmem:[#allocation26_spill] sm:$0xff] }
 0xb17   : > { %v11117_v6 = vadd.f32 %v5454_v7, %v11824_v42  ;;  %7117 = vmatmul.msk.bf16.gmra.mxu2 %vm1145_vm6, %v10822_v52  ;;  %v6194_v52 = vpack.c.bf16 %v7377_v29, %v7376_v63  ;;  %v11834_v29 = vld [vmem:[#allocation60_spill] sm:$0xff] }
 0xb18   : > { %7142 = vmatmul.msk.bf16.gmra.mxu3 %vm1137_vm0, %v6193_v3  ;;  %v11830_v3 = vld [vmem:[#allocation92_spill] sm:$0xff] }
 0xb1a   : > { %v5190_v16 = vpop.f32.mrf.mxu2 }
 0xb1b   : > { %v5191_v31 = vadd.f32 %v5190_v16, %v11825_v35  ;;  %v5413_v15 = vpop.f32.mrf.mxu3  ;;  %v11831_v35 = vld [vmem:[#allocation12_spill] sm:$0xff] }
 0xb1d   : > { %v5455_v22 = vadd.f32 %v5408_v61, %v5191_v31 }
 0xb1f   : > { %v5487_v24 = vmul.f32 %v11826_v30, %v5455_v22  ;;  %v11832_v22 = vld [vmem:[#allocation30_spill] sm:$0xff] }
 0xb21   : > { %v11125_v33 = vadd.f32 %v5487_v24, %v11827_v43 }
 0xb22   : > { %v5192_v9 = vpop.f32.mrf.mxu2 }
 0xb23   : > { %v5193_v44 = vadd.f32 %v5192_v9, %v11828_v18  ;;  %v5415_v4 = vpop.f32.mrf.mxu3  ;;  %v7378_v18 = vld [vmem:[%s7515_s16 + $0x60] sm:$0xff] }
 0xb25   : > { %v5456_v39 = vadd.f32 %v5410_v11, %v5193_v44  ;;  %v11833_v11 = vld [vmem:[#allocation97_spill] sm:$0xff]  ;;  %v7379_v44 = vld [vmem:[%s7515_s16 + $0x68] sm:$0xff] }
 0xb27   : > { %v11131_v14 = vadd.f32 %v5456_v39, %v11829_v40  ;;  %7118 = vmatmul.msk.bf16.gmra.mxu2 %vm1145_vm6, %v10842_v56  ;;  %v6195_v56 = vpack.c.bf16 %v7379_v44, %v7378_v18  ;;  %v11835_v39 = vld [vmem:[#allocation28_spill] sm:$0xff]  ;;  %v7381_v18 = vld [vmem:[%s7515_s16 + $0x78] sm:$0xff] }
 0xb28   : > { %7143 = vmatmul.msk.bf16.gmra.mxu3 %vm1137_vm0, %v6194_v52 }
 0xb2a   : > { %v5195_v61 = vpop.f32.mrf.mxu2 }
 0xb2b   : > { %v5196_v7 = vadd.f32 %v5195_v61, %v11830_v3  ;;  %v5418_v42 = vpop.f32.mrf.mxu3 }
 0xb2d   : > { %v5457_v16 = vadd.f32 %v5413_v15, %v5196_v7  ;;  %v11836_v7 = vld [vmem:[#allocation83_spill] sm:$0xff] }
 0xb2f   : > { %v5489_v31 = vmul.f32 %v11831_v35, %v5457_v16  ;;  %v11837_v35 = vld [vmem:[#allocation33_spill] sm:$0xff] }
 0xb31   : > { %v11139_v30 = vadd.f32 %v5489_v31, %v11832_v22 }
 0xb32   : > { %v5197_v24 = vpop.f32.mrf.mxu2 }
 0xb33   : > { %v5198_v43 = vadd.f32 %v5197_v24, %v11833_v11  ;;  %v5420_v9 = vpop.f32.mrf.mxu3 }
 0xb35   : > { %v5458_v63 = vadd.f32 %v5415_v4, %v5198_v43  ;;  %v11838_v4 = vld [vmem:[#allocation98_spill] sm:$0xff]  ;;  %v7380_v43 = vld [vmem:[%s7515_s16 + $0x70] sm:$0xff] }
 0xb37   : > { %v11145_v52 = vadd.f32 %v5458_v63, %v11834_v29  ;;  %7119 = vmatmul.msk.bf16.gmra.mxu2 %vm1145_vm6, %v10862_v54  ;;  %v6196_v54 = vpack.c.bf16 %v7381_v18, %v7380_v43  ;;  %v11840_v29 = vld [vmem:[#allocation61_spill] sm:$0xff]  ;;  %v7382_v43 = vld [vmem:[%s7515_s16 + $0x80] sm:$0xff]  ;;  %v7383_v18 = vld [vmem:[%s7515_s16 + $0x88] sm:$0xff] }
 0xb38   : > { %7144 = vmatmul.msk.bf16.gmra.mxu3 %vm1137_vm0, %v6195_v56  ;;  %v11839_v56 = vld [vmem:[#allocation94_spill] sm:$0xff] }
 0xb3a   : > { %v5200_v15 = vpop.f32.mrf.mxu2 }
 0xb3b   : > { %v5201_v40 = vadd.f32 %v5200_v15, %v11835_v39  ;;  %v5423_v61 = vpop.f32.mrf.mxu3 }
 0xb3d   : > { %v5459_v3 = vadd.f32 %v5418_v42, %v5201_v40 }
 0xb3f   : > { %v5491_v16 = vmul.f32 %v11836_v7, %v5459_v3  ;;  %v11841_v3 = vld [vmem:[#allocation14_spill] sm:$0xff] }
 0xb41   : > { %v11153_v31 = vadd.f32 %v5491_v16, %v11837_v35  ;;  %v11842_v16 = vld [vmem:[#allocation31_spill] sm:$0xff] }
 0xb42   : > { %v5202_v22 = vpop.f32.mrf.mxu2 }
 0xb43   : > { %v5203_v24 = vadd.f32 %v5202_v22, %v11838_v4  ;;  %v5425_v11 = vpop.f32.mrf.mxu3 }
 0xb45   : > { %v5460_v44 = vadd.f32 %v5420_v9, %v5203_v24  ;;  %v11843_v9 = vld [vmem:[#allocation36_spill] sm:$0xff] }
 0xb47   : > { %v11159_v63 = vadd.f32 %v5460_v44, %v11839_v56  ;;  %7120 = vmatmul.msk.bf16.gmra.mxu2 %vm1145_vm6, %v10888_v17  ;;  %v6197_v17 = vpack.c.bf16 %v7383_v18, %v7382_v43  ;;  %v11844_v44 = vld [vmem:[#allocation99_spill] sm:$0xff]  ;;  %v7384_v18 = vld [vmem:[%s7515_s16 + $0x90] sm:$0xff] }
 0xb48   : > { %7145 = vmatmul.msk.bf16.gmra.mxu3 %vm1137_vm0, %v6196_v54 }
 0xb4a   : > { %v5205_v42 = vpop.f32.mrf.mxu2 }
 0xb4b   : > { %v5206_v15 = vadd.f32 %v5205_v42, %v11840_v29  ;;  %v5428_v39 = vpop.f32.mrf.mxu3  ;;  %v11846_v42 = vld [vmem:[#allocation62_spill] sm:$0xff] }
 0xb4d   : > { %v5461_v40 = vadd.f32 %v5423_v61, %v5206_v15 }
 0xb4f   : > { %v5493_v7 = vmul.f32 %v11841_v3, %v5461_v40  ;;  %v11847_v3 = vld [vmem:[#allocation77_spill] sm:$0xff] }
 0xb51   : > { %v11167_v35 = vadd.f32 %v5493_v7, %v11842_v16  ;;  %v11848_v16 = vld [vmem:[#allocation34_spill] sm:$0xff] }
 0xb52   : > { %v5207_v22 = vpop.f32.mrf.mxu2 }
 0xb53   : > { %v5208_v4 = vadd.f32 %v5207_v22, %v11843_v9  ;;  %v5430_v24 = vpop.f32.mrf.mxu3 }
 0xb55   : > { %v5462_v54 = vadd.f32 %v5425_v11, %v5208_v4  ;;  %v11849_v11 = vld [vmem:[#allocation39_spill] sm:$0xff] }
 0xb57   : > { %v11173_v56 = vadd.f32 %v5462_v54, %v11844_v44  ;;  %7121 = vmatmul.msk.bf16.gmra.mxu2 %vm1145_vm6, %v10906_v34  ;;  %v7385_v54 = vld [vmem:[%s7515_s16 + $0x98] sm:$0xff] }
 0xb58   : > { %7146 = vmatmul.msk.bf16.gmra.mxu3 %vm1137_vm0, %v6197_v17  ;;  %v6198_v34 = vpack.c.bf16 %v7385_v54, %v7384_v18  ;;  %v11850_v17 = vld [vmem:[#allocation100_spill] sm:$0xff]  ;;  %v11852_v18 = vld [vmem:[#allocation107_spill] sm:$0xff]  ;;  %v11213_v54 = vpop.f32.mrf.mxu1 }
 0xb59   : > { %11845 = vst [vmem:[#allocation37_spill] sm:$0xff] %v11173_v56 }
 0xb5a   : > { %v5210_v61 = vpop.f32.mrf.mxu2 }
 0xb5b   : > { %v5211_v29 = vadd.f32 %v5210_v61, %v11846_v42  ;;  %v6282_v15 = vpop.f32.mrf.mxu3 }
 0xb5d   : > { %v5463_v40 = vadd.f32 %v5428_v39, %v5211_v29  ;;  %v11192_v39 = vld [vmem:[%s11434_s14] ss:$0 sm:$0xff]  ;;  %v11851_v29 = vld [vmem:[#allocation63_spill] sm:$0xff] }
 0xb5e   : > { %v6283_v42 = vadd.f32 %v11192_v39, %v6282_v15 }
 0xb5f   : > { %v5495_v7 = vmul.f32 %v11847_v3, %v5463_v40 }
 0xb61   : > { %v11181_v22 = vadd.f32 %v5495_v7, %v11848_v16 }
 0xb62   : > { %v5212_v9 = vpop.f32.mrf.mxu2 }
 0xb63   : > { %v5213_v4 = vadd.f32 %v5212_v9, %v11849_v11  ;;  %v6284_v43 = vpop.f32.mrf.mxu3  ;;  %v7386_v9 = vld [vmem:[%s7515_s16 + $0xa0] sm:$0xff]  ;;  %v7387_v11 = vld [vmem:[%s7515_s16 + $0xa8] sm:$0xff] }
 0xb65   : > { %v5464_v44 = vadd.f32 %v5430_v24, %v5213_v4  ;;  %v6199_v4 = vpack.c.bf16 %v7387_v11, %v7386_v9  ;;  %v7388_v9 = vld [vmem:[%s7515_s16 + $0xb0] sm:$0xff]  ;;  %v7389_v11 = vld [vmem:[%s7515_s16 + $0xb8] sm:$0xff] }
 0xb67   : > { %v11187_v56 = vadd.f32 %v5464_v44, %v11850_v17  ;;  %7122 = vmatmul.msk.bf16.gmra.mxu2 %vm1145_vm6, %v10929_v58  ;;  %v11219_v17 = vpop.f32.mrf.mxu0 }
 0xb68   : > { %7147 = vmatmul.msk.bf16.gmra.mxu3 %vm1137_vm0, %v6198_v34  ;;  %v6285_v34 = vadd.f32 %v11192_v39, %v6284_v43 }
 0xb6a   : > { %v6013_v61 = vpop.f32.mrf.mxu2 }
 0xb6b   : > { %v6093_v24 = vadd.f32 %v6013_v61, %v11851_v29  ;;  %v6287_v40 = vpop.f32.mrf.mxu3 }
 0xb6d   : > { %v6157_v3 = vadd.f32 %v6093_v24, %v10921_v26 }
 0xb6f   : > { %v6362_v7 = vadd.f32 %v6283_v42, %v6157_v3  ;;  %v6288_v42 = vadd.f32 %v11192_v39, %v6287_v40  ;;  %v11227_v3 = vpop.f32.mrf.mxu1  ;;  %v6200_v40 = vpack.c.bf16 %v7389_v11, %v7388_v9 }
 0xb71   : > { %6394 = vst.msk [vmem:[%s11205_s25] sm:$0xff] %vm1145_vm6, %v6362_v7 }
 0xb72   : > { %v6015_v58 = vpop.f32.mrf.mxu2 }
 0xb73   : > { %v6094_v16 = vadd.f32 %v6015_v58, %v10918_v62  ;;  %v6289_v15 = vpop.f32.mrf.mxu3 }
 0xb75   : > { %v6126_v26 = vmul.f32 %v11852_v18, %v6094_v16 }
 0xb77   : > { %v6158_v44 = vadd.f32 %v6126_v26, %v10925_v13  ;;  %7123 = vmatmul.msk.bf16.gmra.mxu2 %vm1145_vm6, %v10952_v45  ;;  %v11231_v45 = vpop.f32.mrf.mxu0 }
 0xb78   : > { %7148 = vmatmul.msk.bf16.gmra.mxu3 %vm1137_vm0, %v6199_v4  ;;  %v11853_v4 = vld [vmem:[#allocation111_spill] sm:$0xff] }
 0xb79   : > { %v6363_v62 = vadd.f32 %v6285_v34, %v6158_v44  ;;  %v11242_v34 = vpop.f32.mrf.mxu1 }
 0xb7a   : > { %v6018_v61 = vpop.f32.mrf.mxu2 }
 0xb7b   : > { %6395 = vst.msk [vmem:[%s11205_s25 + $0x8] sm:$0xff] %vm1145_vm6, %v6363_v62  ;;  %v6095_v29 = vadd.f32 %v6018_v61, %v10931_v59  ;;  %v6292_v43 = vpop.f32.mrf.mxu3 }
 0xb7c   : > { %v6293_v44 = vadd.f32 %v11192_v39, %v6292_v43  ;;  %v11854_v43 = vld [vmem:[#allocation113_spill] sm:$0xff] }
 0xb7d   : > { %v6159_v13 = vadd.f32 %v6095_v29, %v10944_v36  ;;  %v6290_v36 = vadd.f32 %v11192_v39, %v6289_v15 }
 0xb7f   : > { %v6364_v24 = vadd.f32 %v6288_v42, %v6159_v13  ;;  %v11248_v61 = vpop.f32.mrf.mxu0 }
 0xb81   : > { %6396 = vst.msk [vmem:[%s11205_s25 + $0x10] sm:$0xff] %vm1145_vm6, %v6364_v24  ;;  %v7390_v24 = vld [vmem:[%s7515_s16 + $0xc0] sm:$0xff]  ;;  %v11256_v9 = vpop.f32.mrf.mxu1 }
 0xb82   : > { %v6020_v7 = vpop.f32.mrf.mxu2 }
 0xb83   : > { %v6096_v58 = vadd.f32 %v6020_v7, %v10941_v23  ;;  %v6294_v16 = vpop.f32.mrf.mxu3  ;;  %v7391_v7 = vld [vmem:[%s7515_s16 + $0xc8] sm:$0xff] }
 0xb85   : > { %v6128_v59 = vmul.f32 %v11853_v4, %v6096_v58  ;;  %v6201_v58 = vpack.c.bf16 %v7391_v7, %v7390_v24  ;;  %v5816_v24 = vadd.f32 %v11219_v17, %v11213_v54 }
 0xb87   : > { %v6160_v18 = vadd.f32 %v6128_v59, %v10948_v5  ;;  %7124 = vmatmul.msk.bf16.gmra.mxu2 %vm1145_vm6, %v10978_v12  ;;  %v11259_v11 = vpop.f32.mrf.mxu0 }
 0xb88   : > { %7149 = vmatmul.msk.bf16.gmra.mxu3 %vm1137_vm0, %v6200_v40 }
 0xb89   : > { %v6365_v26 = vadd.f32 %v6290_v36, %v6160_v18 }
 0xb8a   : > { %v6023_v23 = vpop.f32.mrf.mxu2 }
 0xb8b   : > { %6397 = vst.msk [vmem:[%s11205_s25 + $0x18] sm:$0xff] %vm1145_vm6, %v6365_v26  ;;  %v6097_v62 = vadd.f32 %v6023_v23, %v10957_v8  ;;  %v6297_v15 = vpop.f32.mrf.mxu3  ;;  %v11271_v26 = vpop.f32.mrf.mxu1 }
 0xb8c   : > { %v6298_v59 = vadd.f32 %v11192_v39, %v6297_v15 }
 0xb8d   : > { %v6161_v5 = vadd.f32 %v6097_v62, %v10970_v0  ;;  %v6295_v0 = vadd.f32 %v11192_v39, %v6294_v16 }
 0xb8f   : > { %v6366_v12 = vadd.f32 %v6293_v44, %v6161_v5  ;;  %v11273_v23 = vpop.f32.mrf.mxu0  ;;  %v7392_v5 = vld [vmem:[%s7515_s16 + $0xd0] sm:$0xff] }
 0xb91   : > { %6398 = vst.msk [vmem:[%s11205_s25 + $0x20] sm:$0xff] %vm1145_vm6, %v6366_v12  ;;  %v7393_v12 = vld [vmem:[%s7515_s16 + $0xd8] sm:$0xff] }
 0xb92   : > { %v6025_v42 = vpop.f32.mrf.mxu2  ;;  %v6202_v15 = vpack.c.bf16 %v7393_v12, %v7392_v5 }
 0xb93   : > { %v6098_v29 = vadd.f32 %v6025_v42, %v10967_v41  ;;  %v6299_v13 = vpop.f32.mrf.mxu3  ;;  %v11855_v42 = vld [vmem:[#allocation29_spill] sm:$0xff] }
 0xb95   : > { %v6130_v8 = vmul.f32 %v11854_v43, %v6098_v29  ;;  %v6300_v29 = vadd.f32 %v11192_v39, %v6299_v13 }
 0xb97   : > { %v6162_v40 = vadd.f32 %v6130_v8, %v10974_v50  ;;  %7125 = vmatmul.msk.bf16.gmra.mxu2 %vm1145_vm6, %v11001_v51 }
 0xb98   : > { %7150 = vmatmul.msk.bf16.gmra.mxu3 %vm1137_vm0, %v6201_v58  ;;  %v5827_v58 = vpop.f32.mrf.mxu0 }
 0xb99   : > { %v6367_v41 = vadd.f32 %v6295_v0, %v6162_v40  ;;  %v5818_v40 = vadd.f32 %v11231_v45, %v11227_v3  ;;  %v5821_v3 = vadd.f32 %v11248_v61, %v11242_v34 }
 0xb9a   : > { %v6028_v4 = vpop.f32.mrf.mxu2 }
 0xb9b   : > { %6399 = vst.msk [vmem:[%s11205_s25 + $0x28] sm:$0xff] %vm1145_vm6, %v6367_v41  ;;  %v6099_v36 = vadd.f32 %v6028_v4, %v10980_v37  ;;  %v6302_v18 = vpop.f32.mrf.mxu3 }
 0xb9c   : > { %v6303_v13 = vadd.f32 %v11192_v39, %v6302_v18  ;;  %v11856_v18 = vld [vmem:[#allocation32_spill] sm:$0xff] }
 0xb9d   : > { %v6163_v16 = vadd.f32 %v6099_v36, %v10993_v60  ;;  %v7394_v36 = vld [vmem:[%s7515_s16 + $0xe0] sm:$0xff] }
 0xb9f   : > { %v6368_v50 = vadd.f32 %v6298_v59, %v6163_v16  ;;  %v7395_v16 = vld [vmem:[%s7515_s16 + $0xe8] sm:$0xff] }
 0xba0   : > { %v5830_v59 = vpop.f32.mrf.mxu0 }
 0xba1   : > { %6400 = vst.msk [vmem:[%s11205_s25 + $0x30] sm:$0xff] %vm1145_vm6, %v6368_v50  ;;  %v6203_v50 = vpack.c.bf16 %v7395_v16, %v7394_v36  ;;  %v5905_v16 = vld [vmem:[#allocation3 + $0x112] sm:$0xff] }
 0xba2   : > { %v6030_v51 = vpop.f32.mrf.mxu2 }
 0xba3   : > { %v6100_v44 = vadd.f32 %v6030_v51, %v10990_v28  ;;  %v6304_v62 = vpop.f32.mrf.mxu3  ;;  %v5711_v28 = vpop.f32.mrf.mxu1 }
 0xba5   : > { %v6132_v37 = vmul.f32 %v11855_v42, %v6100_v44  ;;  %v6305_v44 = vadd.f32 %v11192_v39, %v6304_v62 }
 0xba7   : > { %v6164_v60 = vadd.f32 %v6132_v37, %v10997_v27  ;;  %7126 = vmatmul.msk.bf16.gmra.mxu2 %vm1145_vm6, %v11020_v49 }
 0xba8   : > { %7151 = vmatmul.msk.bf16.gmra.mxu3 %vm1137_vm0, %v6202_v15  ;;  %v5832_v37 = vpop.f32.mrf.mxu0 }
 0xba9   : > { %v6369_v7 = vadd.f32 %v6300_v29, %v6164_v60  ;;  %v5823_v29 = vadd.f32 %v11259_v11, %v11256_v9  ;;  %v5826_v11 = vadd.f32 %v11273_v23, %v11271_v26 }
 0xbaa   : > { %v6033_v43 = vpop.f32.mrf.mxu2 }
 0xbab   : > { %6401 = vst.msk [vmem:[%s11205_s25 + $0x38] sm:$0xff] %vm1145_vm6, %v6369_v7  ;;  %v6101_v8 = vadd.f32 %v6033_v43, %v5816_v24  ;;  %v6307_v27 = vpop.f32.mrf.mxu3  ;;  %v5714_v17 = vpop.f32.mrf.mxu1  ;;  %v7396_v24 = vld [vmem:[%s7515_s16 + $0xf0] sm:$0xff]  ;;  %v7397_v7 = vld [vmem:[%s7515_s16 + $0xf8] sm:$0xff] }
 0xbac   : > { %v6308_v12 = vadd.f32 %v11192_v39, %v6307_v27  ;;  %v6204_v43 = vpack.c.bf16 %v7397_v7, %v7396_v24  ;;  %v11859_v7 = vld [vmem:[#allocation71_spill] sm:$0xff] }
 0xbad   : > { %v6165_v0 = vadd.f32 %v6101_v8, %v11012_v20 }
 0xbaf   : > { %v6370_v49 = vadd.f32 %v6303_v13, %v6165_v0  ;;  %v11857_v13 = vld [vmem:[#allocation9_spill] sm:$0xff] }
 0xbb0   : > { %v5835_v9 = vpop.f32.mrf.mxu0 }
 0xbb1   : > { %6402 = vst.msk [vmem:[%s11205_s25 + $0x40] sm:$0xff] %vm1145_vm6, %v6370_v49 }
 0xbb2   : > { %v6035_v54 = vpop.f32.mrf.mxu2 }
 0xbb3   : > { %v6102_v41 = vadd.f32 %v6035_v54, %v5818_v40  ;;  %v6309_v4 = vpop.f32.mrf.mxu3  ;;  %v5716_v42 = vpop.f32.mrf.mxu1 }
 0xbb4   : > { %v6310_v0 = vadd.f32 %v11192_v39, %v6309_v4 }
 0xbb5   : > { %v6134_v51 = vmul.f32 %v11856_v18, %v6102_v41 }
 0xbb7   : > { %v6166_v20 = vadd.f32 %v6134_v51, %v11016_v1  ;;  %7127 = vmatmul.msk.bf16.gmra.mxu2 %vm1145_vm6, %v11039_v10 }
 0xbb8   : > { %7152 = vmatmul.msk.bf16.gmra.mxu3 %vm1137_vm0, %v6203_v50  ;;  %v5828_v50 = vadd.f32 %v5827_v58, %v5711_v28  ;;  %v5837_v51 = vpop.f32.mrf.mxu0 }
 0xbb9   : > { %v6371_v45 = vadd.f32 %v6305_v44, %v6166_v20 }
 0xbba   : > { %v6038_v5 = vpop.f32.mrf.mxu2 }
 0xbbb   : > { %6403 = vst.msk [vmem:[%s11205_s25 + $0x48] sm:$0xff] %vm1145_vm6, %v6371_v45  ;;  %v6103_v62 = vadd.f32 %v6038_v5, %v5821_v3  ;;  %v6312_v15 = vpop.f32.mrf.mxu3  ;;  %v5719_v27 = vpop.f32.mrf.mxu1  ;;  %v11858_v3 = vld [vmem:[#allocation38_spill] sm:$0xff] }
 0xbbc   : > { %v6313_v54 = vadd.f32 %v11192_v39, %v6312_v15 }
 0xbbd   : > { %v6167_v1 = vadd.f32 %v6103_v62, %v11031_v55 }
 0xbbf   : > { %v6372_v10 = vadd.f32 %v6308_v12, %v6167_v1  ;;  %v5831_v12 = vadd.f32 %v5830_v59, %v5714_v17 }
 0xbc1   : > { %6404 = vst.msk [vmem:[%s11205_s25 + $0x50] sm:$0xff] %vm1145_vm6, %v6372_v10 }
 0xbc2   : > { %v6040_v34 = vpop.f32.mrf.mxu2 }
 0xbc3   : > { %v6104_v61 = vadd.f32 %v6040_v34, %v5823_v29  ;;  %v6314_v60 = vpop.f32.mrf.mxu3  ;;  %v5721_v18 = vpop.f32.mrf.mxu1 }
 0xbc4   : > { %v6315_v5 = vadd.f32 %v11192_v39, %v6314_v60  ;;  %v5840_v29 = vpop.f32.mrf.mxu0  ;;  %v5833_v60 = vadd.f32 %v5832_v37, %v5716_v42 }
 0xbc5   : > { %v6136_v8 = vmul.f32 %v11857_v13, %v6104_v61 }
 0xbc7   : > { %v6168_v55 = vadd.f32 %v6136_v8, %v11035_v32  ;;  %7128 = vmatmul.msk.bf16.gmra.mxu2 %vm1145_vm6, %v11059_v57  ;;  %v5906_v57 = vld [vmem:[#allocation3 + $0x11a] sm:$0xff] }
 0xbc8   : > { %7153 = vmatmul.msk.bf16.gmra.mxu3 %vm1137_vm0, %v6204_v43  ;;  %v5922_v44 = vpack.c.bf16 %v5906_v57, %v5905_v16 }
 0xbc9   : > { %v6373_v49 = vadd.f32 %v6310_v0, %v6168_v55  ;;  %v5836_v55 = vadd.f32 %v5835_v9, %v5719_v27  ;;  %v11860_v9 = vld [vmem:[#allocation13_spill] sm:$0xff] }
 0xbca   : > { %v6043_v40 = vpop.f32.mrf.mxu2 }
 0xbcb   : > { %6405 = vst.msk [vmem:[%s11205_s25 + $0x58] sm:$0xff] %vm1145_vm6, %v6373_v49  ;;  %v6105_v41 = vadd.f32 %v6043_v40, %v5826_v11  ;;  %v6317_v4 = vpop.f32.mrf.mxu3  ;;  %v5724_v62 = vpop.f32.mrf.mxu1 }
 0xbcc   : > { %v6318_v15 = vadd.f32 %v11192_v39, %v6317_v4  ;;  %v5842_v13 = vpop.f32.mrf.mxu0 }
 0xbcd   : > { %v6169_v32 = vadd.f32 %v6105_v41, %v11049_v2 }
 0xbcf   : > { %v6374_v36 = vadd.f32 %v6313_v54, %v6169_v32  ;;  %v5838_v32 = vadd.f32 %v5837_v51, %v5721_v18 }
 0xbd1   : > { %6406 = vst.msk [vmem:[%s11205_s25 + $0x60] sm:$0xff] %vm1145_vm6, %v6374_v36 }
 0xbd2   : > { %v6045_v26 = vpop.f32.mrf.mxu2 }
 0xbd3   : > { %v6106_v23 = vadd.f32 %v6045_v26, %v5828_v50  ;;  %v6319_v20 = vpop.f32.mrf.mxu3  ;;  %v5726_v59 = vpop.f32.mrf.mxu1  ;;  %v5841_v26 = vadd.f32 %v5840_v29, %v5724_v62 }
 0xbd4   : > { %v6320_v8 = vadd.f32 %v11192_v39, %v6319_v20  ;;  %v5845_v4 = vpop.f32.mrf.mxu0 }
 0xbd5   : > { %v6138_v45 = vmul.f32 %v11858_v3, %v6106_v23 }
 0xbd7   : > { %v6170_v2 = vadd.f32 %v6138_v45, %v11055_v53  ;;  %7129 = vmatmul.msk.bf16.gmra.mxu2 %vm1145_vm6, %v5922_v44 }
 0xbd9   : > { %v6375_v28 = vadd.f32 %v6315_v5, %v6170_v2  ;;  %v5843_v2 = vadd.f32 %v5842_v13, %v5726_v59 }
 0xbda   : > { %v6048_v58 = vpop.f32.mrf.mxu2 }
 0xbdb   : > { %6407 = vst.msk [vmem:[%s11205_s25 + $0x68] sm:$0xff] %vm1145_vm6, %v6375_v28  ;;  %v6107_v1 = vadd.f32 %v6048_v58, %v5831_v12  ;;  %v6322_v10 = vpop.f32.mrf.mxu3  ;;  %v5729_v54 = vpop.f32.mrf.mxu1 }
 0xbdc   : > { %v5847_v44 = vpop.f32.mrf.mxu0 }
 0xbdd   : > { %v6171_v34 = vadd.f32 %v6107_v1, %v11069_v47  ;;  %v6323_v47 = vadd.f32 %v11192_v39, %v6322_v10 }
 0xbdf   : > { %v6376_v61 = vadd.f32 %v6318_v15, %v6171_v34  ;;  %v11861_v15 = vld [vmem:[#allocation41_spill] sm:$0xff]  ;;  %v5846_v34 = vadd.f32 %v5845_v4, %v5729_v54 }
 0xbe1   : > { %6408 = vst.msk [vmem:[%s11205_s25 + $0x70] sm:$0xff] %vm1145_vm6, %v6376_v61 }
 0xbe2   : > { %v6050_v53 = vpop.f32.mrf.mxu2 }
 0xbe3   : > { %v6108_v24 = vadd.f32 %v6050_v53, %v5833_v60  ;;  %v6324_v17 = vpop.f32.mrf.mxu3  ;;  %v5731_v23 = vpop.f32.mrf.mxu1 }
 0xbe4   : > { %v6325_v57 = vadd.f32 %v11192_v39, %v6324_v17  ;;  %v5850_v62 = vpop.f32.mrf.mxu0  ;;  %v5848_v13 = vadd.f32 %v5847_v44, %v5731_v23 }
 0xbe5   : > { %v6140_v43 = vmul.f32 %v11859_v7, %v6108_v24 }
 0xbe7   : > { %v6172_v0 = vadd.f32 %v6140_v43, %v11075_v25 }
 0xbe9   : > { %v6377_v11 = vadd.f32 %v6320_v8, %v6172_v0 }
 0xbea   : > { %v6053_v49 = vpop.f32.mrf.mxu2 }
 0xbeb   : > { %6409 = vst.msk [vmem:[%s11205_s25 + $0x78] sm:$0xff] %vm1145_vm6, %v6377_v11  ;;  %v6109_v42 = vadd.f32 %v6053_v49, %v5836_v55  ;;  %v6327_v37 = vpop.f32.mrf.mxu3  ;;  %v11862_v55 = vld [vmem:[#allocation78_spill] sm:$0xff] }
 0xbec   : > { %v6328_v18 = vadd.f32 %v11192_v39, %v6327_v37  ;;  %v5852_v7 = vpop.f32.mrf.mxu0 }
 0xbed   : > { %v6173_v40 = vadd.f32 %v6109_v42, %v11083_v19 }
 0xbef   : > { %v6378_v41 = vadd.f32 %v6323_v47, %v6173_v40 }
 0xbf1   : > { %6410 = vst.msk [vmem:[%s11205_s25 + $0x80] sm:$0xff] %vm1145_vm6, %v6378_v41 }
 0xbf2   : > { %v6055_v36 = vpop.f32.mrf.mxu2 }
 0xbf3   : > { %v6110_v25 = vadd.f32 %v6055_v36, %v5838_v32  ;;  %v6329_v27 = vpop.f32.mrf.mxu3 }
 0xbf4   : > { %v6330_v10 = vadd.f32 %v11192_v39, %v6329_v27  ;;  %v5855_v37 = vpop.f32.mrf.mxu0 }
 0xbf5   : > { %v6142_v16 = vmul.f32 %v11860_v9, %v6110_v25 }
 0xbf7   : > { %v6174_v50 = vadd.f32 %v6142_v16, %v11089_v48  ;;  %v5734_v48 = vpop.f32.mrf.mxu1 }
 0xbf8   : > { %v5851_v40 = vadd.f32 %v5850_v62, %v5734_v48 }
 0xbf9   : > { %v6379_v19 = vadd.f32 %v6325_v57, %v6174_v50  ;;  %v11863_v50 = vld [vmem:[#allocation17_spill] sm:$0xff] }
 0xbfa   : > { %v6058_v20 = vpop.f32.mrf.mxu2 }
 0xbfb   : > { %6411 = vst.msk [vmem:[%s11205_s25 + $0x88] sm:$0xff] %vm1145_vm6, %v6379_v19  ;;  %v6111_v51 = vadd.f32 %v6058_v20, %v5841_v26  ;;  %v6332_v3 = vpop.f32.mrf.mxu3 }
 0xbfc   : > { %v5857_v16 = vpop.f32.mrf.mxu0 }
 0xbfd   : > { %v6175_v45 = vadd.f32 %v6111_v51, %v11097_v38  ;;  %v6333_v38 = vadd.f32 %v11192_v39, %v6332_v3 }
 0xbff   : > { %v6380_v5 = vadd.f32 %v6328_v18, %v6175_v45  ;;  %v5736_v17 = vpop.f32.mrf.mxu1 }
 0xc00   : > { %v5853_v27 = vadd.f32 %v5852_v7, %v5736_v17 }
 0xc01   : > { %6412 = vst.msk [vmem:[%s11205_s25 + $0x90] sm:$0xff] %vm1145_vm6, %v6380_v5 }
 0xc02   : > { %v6060_v12 = vpop.f32.mrf.mxu2 }
 0xc03   : > { %v6112_v28 = vadd.f32 %v6060_v12, %v5843_v2  ;;  %v6334_v58 = vpop.f32.mrf.mxu3 }
 0xc04   : > { %v6335_v47 = vadd.f32 %v11192_v39, %v6334_v58  ;;  %v5860_v5 = vpop.f32.mrf.mxu0 }
 0xc05   : > { %v6144_v1 = vmul.f32 %v11861_v15, %v6112_v28  ;;  %v11864_v15 = vld [vmem:[#allocation85_spill] sm:$0xff] }
 0xc07   : > { %v6176_v29 = vadd.f32 %v6144_v1, %v11103_v21  ;;  %v5739_v49 = vpop.f32.mrf.mxu1 }
 0xc08   : > { %v5856_v20 = vadd.f32 %v5855_v37, %v5739_v49 }
 0xc09   : > { %v6381_v61 = vadd.f32 %v6330_v10, %v6176_v29 }
 0xc0a   : > { %v6063_v60 = vpop.f32.mrf.mxu2 }
 0xc0b   : > { %6413 = vst.msk [vmem:[%s11205_s25 + $0x98] sm:$0xff] %vm1145_vm6, %v6381_v61  ;;  %v6113_v53 = vadd.f32 %v6063_v60, %v5846_v34  ;;  %v6337_v24 = vpop.f32.mrf.mxu3 }
 0xc0c   : > { %v6338_v41 = vadd.f32 %v11192_v39, %v6337_v24  ;;  %v5862_v10 = vpop.f32.mrf.mxu0 }
 0xc0d   : > { %v6177_v59 = vadd.f32 %v6113_v53, %v11111_v46 }
 0xc0f   : > { %v6382_v43 = vadd.f32 %v6333_v38, %v6177_v59  ;;  %v5741_v9 = vpop.f32.mrf.mxu1 }
 0xc10   : > { %v5858_v48 = vadd.f32 %v5857_v16, %v5741_v9  ;;  %v11866_v16 = vld [vmem:[#allocation47_spill] sm:$0xff] }
 0xc11   : > { %6414 = vst.msk [vmem:[%s11205_s25 + $0xa0] sm:$0xff] %vm1145_vm6, %v6382_v43 }
 0xc12   : > { %v6065_v8 = vpop.f32.mrf.mxu2 }
 0xc13   : > { %v6114_v21 = vadd.f32 %v6065_v8, %v5848_v13  ;;  %v6339_v0 = vpop.f32.mrf.mxu3 }
 0xc14   : > { %v6340_v23 = vadd.f32 %v11192_v39, %v6339_v0  ;;  %v5865_v43 = vpop.f32.mrf.mxu0 }
 0xc15   : > { %v6146_v11 = vmul.f32 %v11862_v55, %v6114_v21  ;;  %v11865_v21 = vld [vmem:[#allocation80_spill] sm:$0xff] }
 0xc17   : > { %v6178_v42 = vadd.f32 %v6146_v11, %v11117_v6  ;;  %v5744_v51 = vpop.f32.mrf.mxu1 }
 0xc18   : > { %v5861_v61 = vadd.f32 %v5860_v5, %v5744_v51 }
 0xc19   : > { %v6383_v46 = vadd.f32 %v6335_v47, %v6178_v42 }
 0xc1a   : > { %v6068_v54 = vpop.f32.mrf.mxu2 }
 0xc1b   : > { %6415 = vst.msk [vmem:[%s11205_s25 + $0xa8] sm:$0xff] %vm1145_vm6, %v6383_v46  ;;  %v6115_v4 = vadd.f32 %v6068_v54, %v5851_v40  ;;  %v6342_v36 = vpop.f32.mrf.mxu3 }
 0xc1c   : > { %v6343_v3 = vadd.f32 %v11192_v39, %v6342_v36  ;;  %v5867_v37 = vpop.f32.mrf.mxu0 }
 0xc1d   : > { %v6179_v32 = vadd.f32 %v6115_v4, %v11125_v33 }
 0xc1f   : > { %v6384_v25 = vadd.f32 %v6338_v41, %v6179_v32  ;;  %v5746_v62 = vpop.f32.mrf.mxu1 }
 0xc20   : > { %v5863_v13 = vadd.f32 %v5862_v10, %v5746_v62 }
 0xc21   : > { %6416 = vst.msk [vmem:[%s11205_s25 + $0xb0] sm:$0xff] %vm1145_vm6, %v6384_v25 }
 0xc22   : > { %v6070_v6 = vpop.f32.mrf.mxu2 }
 0xc23   : > { %v6116_v57 = vadd.f32 %v6070_v6, %v5853_v27  ;;  %v6344_v44 = vpop.f32.mrf.mxu3 }
 0xc24   : > { %v6345_v29 = vadd.f32 %v11192_v39, %v6344_v44  ;;  %v5870_v9 = vpop.f32.mrf.mxu0 }
 0xc25   : > { %v6148_v26 = vmul.f32 %v11863_v50, %v6116_v57  ;;  %v11867_v50 = vld [vmem:[#allocation37_spill] sm:$0xff] }
 0xc27   : > { %v6180_v19 = vadd.f32 %v6148_v26, %v11131_v14  ;;  %v5749_v59 = vpop.f32.mrf.mxu1 }
 0xc28   : > { %v5866_v47 = vadd.f32 %v5865_v43, %v5749_v59 }
 0xc29   : > { %v6385_v33 = vadd.f32 %v6340_v23, %v6180_v19 }
 0xc2a   : > { %v6073_v18 = vpop.f32.mrf.mxu2 }
 0xc2b   : > { %6417 = vst.msk [vmem:[%s11205_s25 + $0xb8] sm:$0xff] %vm1145_vm6, %v6385_v33  ;;  %v6117_v45 = vadd.f32 %v6073_v18, %v5856_v20  ;;  %v6347_v14 = vpop.f32.mrf.mxu3 }
 0xc2d   : > { %v6181_v2 = vadd.f32 %v6117_v45, %v11139_v30  ;;  %v6348_v30 = vadd.f32 %v11192_v39, %v6347_v14 }
 0xc2f   : > { %v6386_v12 = vadd.f32 %v6343_v3, %v6181_v2  ;;  %v5751_v42 = vpop.f32.mrf.mxu1  ;;  %v5872_v3 = vpop.f32.mrf.mxu0 }
 0xc30   : > { %v5868_v36 = vadd.f32 %v5867_v37, %v5751_v42 }
 0xc31   : > { %6418 = vst.msk [vmem:[%s11205_s25 + $0xc0] sm:$0xff] %vm1145_vm6, %v6386_v12 }
 0xc32   : > { %v6075_v28 = vpop.f32.mrf.mxu2 }
 0xc33   : > { %v6118_v58 = vadd.f32 %v6075_v28, %v5858_v48  ;;  %v6349_v24 = vpop.f32.mrf.mxu3  ;;  %v11868_v28 = vld [vmem:[#allocation16_spill] sm:$0xff] }
 0xc34   : > { %v6350_v11 = vadd.f32 %v11192_v39, %v6349_v24 }
 0xc35   : > { %v6150_v1 = vmul.f32 %v11864_v15, %v6118_v58 }
 0xc37   : > { %v6182_v34 = vadd.f32 %v6150_v1, %v11145_v52  ;;  %v5754_v27 = vpop.f32.mrf.mxu1 }
 0xc38   : > { %v5871_v23 = vadd.f32 %v5870_v9, %v5754_v27 }
 0xc39   : > { %v6387_v60 = vadd.f32 %v6345_v29, %v6182_v34 }
 0xc3a   : > { %v6078_v38 = vpop.f32.mrf.mxu2 }
 0xc3b   : > { %6419 = vst.msk [vmem:[%s11205_s25 + $0xc8] sm:$0xff] %vm1145_vm6, %v6387_v60  ;;  %v6119_v53 = vadd.f32 %v6078_v38, %v5861_v61  ;;  %v6352_v55 = vpop.f32.mrf.mxu3 }
 0xc3c   : > { %v6353_v46 = vadd.f32 %v11192_v39, %v6352_v55 }
 0xc3d   : > { %v6183_v17 = vadd.f32 %v6119_v53, %v11153_v31 }
 0xc3f   : > { %v6388_v7 = vadd.f32 %v6348_v30, %v6183_v17  ;;  %v5756_v51 = vpop.f32.mrf.mxu1 }
 0xc40   : > { %v5873_v5 = vadd.f32 %v5872_v3, %v5756_v51 }
 0xc41   : > { %6420 = vst.msk [vmem:[%s11205_s25 + $0xd0] sm:$0xff] %vm1145_vm6, %v6388_v7 }
 0xc42   : > { %v6080_v8 = vpop.f32.mrf.mxu2 }
 0xc43   : > { %v6120_v52 = vadd.f32 %v6080_v8, %v5863_v13  ;;  %v6354_v32 = vpop.f32.mrf.mxu3 }
 0xc44   : > { %v6355_v57 = vadd.f32 %v11192_v39, %v6354_v32 }
 0xc45   : > { %v6152_v0 = vmul.f32 %v11865_v21, %v6120_v52 }
 0xc47   : > { %v6184_v49 = vadd.f32 %v6152_v0, %v11159_v63 }
 0xc49   : > { %v6389_v31 = vadd.f32 %v6350_v11, %v6184_v49 }
 0xc4a   : > { %v6083_v40 = vpop.f32.mrf.mxu2 }
 0xc4b   : > { %6421 = vst.msk [vmem:[%s11205_s25 + $0xd8] sm:$0xff] %vm1145_vm6, %v6389_v31  ;;  %v6121_v54 = vadd.f32 %v6083_v40, %v5866_v47 }
 0xc4d   : > { %v6185_v41 = vadd.f32 %v6121_v54, %v11167_v35  ;;  %v6357_v35 = vpop.f32.mrf.mxu3 }
 0xc4e   : > { %v6358_v20 = vadd.f32 %v11192_v39, %v6357_v35 }
 0xc4f   : > { %v6390_v4 = vadd.f32 %v6353_v46, %v6185_v41 }
 0xc51   : > { %6422 = vst.msk [vmem:[%s11205_s25 + $0xe0] sm:$0xff] %vm1145_vm6, %v6390_v4 }
 0xc52   : > { %v6085_v25 = vpop.f32.mrf.mxu2 }
 0xc53   : > { %v6122_v63 = vadd.f32 %v6085_v25, %v5868_v36 }
 0xc55   : > { %v6154_v6 = vmul.f32 %v11866_v16, %v6122_v63  ;;  %v6359_v48 = vpop.f32.mrf.mxu3 }
 0xc56   : > { %v6360_v58 = vadd.f32 %v11192_v39, %v6359_v48 }
 0xc57   : > { %v6186_v26 = vadd.f32 %v6154_v6, %v11867_v50 }
 0xc59   : > { %v6391_v19 = vadd.f32 %v6355_v57, %v6186_v26 }
 0xc5a   : > { %v6088_v44 = vpop.f32.mrf.mxu2 }
 0xc5b   : > { %6423 = vst.msk [vmem:[%s11205_s25 + $0xe8] sm:$0xff] %vm1145_vm6, %v6391_v19  ;;  %v6123_v33 = vadd.f32 %v6088_v44, %v5871_v23 }
 0xc5d   : > { %v6187_v18 = vadd.f32 %v6123_v33, %v11181_v22 }
 0xc5f   : > { %v6392_v45 = vadd.f32 %v6358_v20, %v6187_v18 }
 0xc61   : > { %6424 = vst.msk [vmem:[%s11205_s25 + $0xf0] sm:$0xff] %vm1145_vm6, %v6392_v45 }
 0xc62   : > { %v6090_v2 = vpop.f32.mrf.mxu2 }
 0xc63   : > { %v6124_v12 = vadd.f32 %v6090_v2, %v5873_v5 }
 0xc65   : > { %v6156_v14 = vmul.f32 %v11868_v28, %v6124_v12 }
 0xc67   : > { %v6188_v62 = vadd.f32 %v6156_v14, %v11187_v56 }
 0xc69   : > { %v6393_v15 = vadd.f32 %v6360_v58, %v6188_v62 }
 0xc6b   : > { %6425 = vst.msk [vmem:[%s11205_s25 + $0xf8] sm:$0xff] %vm1145_vm6, %v6393_v15 }
 0xc6c PF: > { %s25_s18 = sadd.s32 1, %s7404_s18  }
 0xc6d   : > { %p22_p4 = scmp.ge.s32.totalorder %s25_s18, 4  }
 0xc6f   :  { %24 = sbr.rel (!%p22_p4) target bundleno = 1 (0x1), region = 126 }

</bundles_post_ra>
